<compile_context>
chip_gen: v6e
topology: v6e:2x2x1
jax: 0.10.0
libtpu: 0.0.40
codegen_flags: <defaults>
</compile_context>

<pallas_src>
import jax
import jax.numpy as jnp
from jax.experimental import pallas as pl
from jax.experimental.pallas import tpu as pltpu

IN_CH, FEAT_CH, OUT_CH = 256, 512, 1024
SKIP = FEAT_CH - IN_CH  # width of out1 (= 256)


# ---------------------------------------------------------------------------
# Fused decoder kernel: 9 dense layers + folded skip concat, per row tile.
# ---------------------------------------------------------------------------
def _decoder_kernel(z_ref,
                    w1, b1, w2, b2, w3, b3, w4, b4,
                    w5a, w5b, b5,
                    w6, b6, w7, b7, w8, b8, w9, b9,
                    o_ref):
    def dense(x_bf, w_ref, b_ref):
        # bf16 operands -> MXU, f32 accumulation; bias+ReLU in f32 on the VPU,
        # then a single cast back to bf16 so the (tm, 512) inter-layer
        # activations stay half-width (less VMEM spill / vld-vst traffic).
        y = jnp.dot(x_bf, w_ref[...], preferred_element_type=jnp.float32) + b_ref[...]
        return jnp.maximum(y, 0.0).astype(jnp.bfloat16)

    z = z_ref[...]                     # (tm, 256) bf16 (streamed as bf16)
    h = dense(z, w1, b1)               # (tm, 512)
    h = dense(h, w2, b2)               # (tm, 512)
    h = dense(h, w3, b3)               # (tm, 512)
    out1 = dense(h, w4, b4)            # (tm, 256)

    # concat([out1, z]) @ W5  ==  out1 @ W5[:256] + z @ W5[256:]
    y = (jnp.dot(out1, w5a[...], preferred_element_type=jnp.float32)
         + jnp.dot(z, w5b[...], preferred_element_type=jnp.float32)
         + b5[...])
    h = jnp.maximum(y, 0.0).astype(jnp.bfloat16)    # (tm, 512)
    h = dense(h, w6, b6)               # (tm, 512)
    h = dense(h, w7, b7)               # (tm, 512)
    h = dense(h, w8, b8)               # (tm, 512)
    y9 = jnp.dot(h, w9[...], preferred_element_type=jnp.float32) + b9[...]
    o_ref[...] = y9.astype(o_ref.dtype)             # (tm, 1024), no final ReLU


# ---------------------------------------------------------------------------
# Wrapper
# ---------------------------------------------------------------------------
def _pick_tm(M):
    # Large M: 512-row tiles (best measured fraction of roofline, amortizes the
    # ~0.35 us per-grid-step overhead and MXU weight push/drain).
    # Small M: split into ~2 tiles so both v7x TensorCores get work.
    if M > 1024:
        return 512
    half = -(-M // 2)                       # cdiv(M, 2)
    return max(8, min(512, -(-half // 8) * 8))


def decoder_forward(z, params, tm=None, out_dtype=jnp.float32):
    """z: (..., 256) -> (..., 1024). Fused Pallas forward of Decoder."""
    lead = z.shape[:-1]
    # Stream the input tile in bf16 (halves input DMA); accumulation is f32.
    z2 = z.reshape(-1, IN_CH).astype(jnp.bfloat16)
    M = z2.shape[0]

    if tm is None:
        tm = _pick_tm(M)
    grid_m = pl.cdiv(M, tm)
    Mp = grid_m * tm
    if Mp != M:
        z2 = jnp.pad(z2, ((0, Mp - M), (0, 0)))  # padded rows are sliced off below

    # Fold the skip-concat into net2's first layer by splitting W5 by input rows.
    w5a = params["w5"][:SKIP].astype(jnp.bfloat16)   # multiplies out1
    w5b = params["w5"][SKIP:].astype(jnp.bfloat16)   # multiplies z

    def wb16(name):
        return params[name].astype(jnp.bfloat16)

    operands = (
        z2,
        wb16("w1"), params["b1"], wb16("w2"), params["b2"],
        wb16("w3"), params["b3"], wb16("w4"), params["b4"],
        w5a, w5b, params["b5"],
        wb16("w6"), params["b6"], wb16("w7"), params["b7"],
        wb16("w8"), params["b8"], wb16("w9"), params["b9"],
    )

    def full2d(a):
        # Whole array resident in VMEM; constant block index -> fetched once,
        # never re-DMAed across grid steps.
        return pl.BlockSpec(a.shape, lambda i: (0, 0))

    in_specs = [pl.BlockSpec((tm, IN_CH), lambda i: (i, 0))]
    in_specs += [full2d(a) for a in operands[1:]]

    # Advisory cost estimate: lets XLA overlap surrounding HBM traffic with
    # this long fused custom call.
    macs_per_row = (IN_CH * FEAT_CH + 2 * FEAT_CH * FEAT_CH + FEAT_CH * SKIP
                    + SKIP * FEAT_CH + IN_CH * FEAT_CH
                    + 3 * FEAT_CH * FEAT_CH + FEAT_CH * OUT_CH)
    weight_bytes = sum(int(a.size) * a.dtype.itemsize for a in operands[1:])
    out_itemsize = jnp.dtype(out_dtype).itemsize
    cost = pl.CostEstimate(
        flops=2 * macs_per_row * Mp,
        transcendentals=0,
        bytes_accessed=Mp * (IN_CH * 2 + OUT_CH * out_itemsize) + weight_bytes,
    )

    # grid_m == 1: "arbitrary" so a lone tile doesn't force both v7x cores to
    # each DMA the full ~4.5 MiB weight set.
    semantics = ("parallel",) if grid_m > 1 else ("arbitrary",)

    out = pl.pallas_call(
        _decoder_kernel,
        out_shape=jax.ShapeDtypeStruct((Mp, OUT_CH), out_dtype),
        grid=(grid_m,),
        in_specs=in_specs,
        out_specs=pl.BlockSpec((tm, OUT_CH), lambda i: (i, 0)),
        compiler_params=pltpu.CompilerParams(
            dimension_semantics=semantics,
            # ~9 MiB double-buffered weights + (tm,1024) output tile + bf16
            # activations fits easily; raising the limit covers v5e's 16 MiB
            # default scoped VMEM at tm=512 while staying far below v7x's
            # 64 MiB physical per TensorCore.
            vmem_limit_bytes=40 * 1024 * 1024,
        ),
        cost_estimate=cost,
    )(*operands)

    return out[:M].reshape(*lead, OUT_CH)


# ---------------------------------------------------------------------------
# Parameters (deterministic synthetic init matching the module's layer shapes).
# Layers 1..8 use weight_norm (W = g * v / ||v||_row, exact reparameterization,
# folded here); layer 9 is a plain Linear.
# ---------------------------------------------------------------------------
def init_params(key):
    dims = [
        (IN_CH, FEAT_CH), (FEAT_CH, FEAT_CH), (FEAT_CH, FEAT_CH), (FEAT_CH, SKIP),   # net1
        (FEAT_CH, FEAT_CH), (FEAT_CH, FEAT_CH), (FEAT_CH, FEAT_CH), (FEAT_CH, FEAT_CH),
        (FEAT_CH, OUT_CH),                                                            # net2
    ]
    p = {}
    keys = jax.random.split(key, 3 * len(dims))
    for i, (cin, cout) in enumerate(dims, start=1):
        kv, kg, kb = keys[3 * (i - 1): 3 * i]
        v = jax.random.normal(kv, (cout, cin), jnp.float32) * (1.0 / cin) ** 0.5
        bias = 0.01 * jax.random.normal(kb, (cout,), jnp.float32)
        if i < len(dims):  # weight-normalized layers
            g = 1.0 + 0.1 * jax.random.normal(kg, (cout,), jnp.float32)
            norm = jnp.sqrt(jnp.sum(v * v, axis=1, keepdims=True))
            w = g[:, None] * v / norm
        else:              # final plain nn.Linear
            w = v
        p[f"w{i}"] = jnp.transpose(w)          # (cin, cout) so y = x @ W
        p[f"b{i}"] = bias.reshape(1, cout)
    return p


# ---------------------------------------------------------------------------
if __name__ == "__main__":
    key = jax.random.PRNGKey(0)
    kp, kz = jax.random.split(key)

    params = init_params(kp)
    B, N = 2, 128                                   # M = 256 rows -> 2 parallel tiles
    z = jax.random.normal(kz, (B, N, IN_CH), jnp.float32)

    fwd = jax.jit(decoder_forward)                  # tm auto-picked (128 here)
    out = fwd(z, params)
    jax.block_until_ready(out)

    assert out.shape == (B, N, OUT_CH), out.shape
    assert bool(jnp.all(jnp.isfinite(out)))
    print("KERNEL_OK")
</pallas_src>

<mosaic_0001>
module attributes {stable_mosaic.version = 11 : i64} {
  func.func @_decoder_kernel(%arg0: i32, %arg1: memref<128x256xbf16, #tpu.memory_space<vmem>>, %arg2: memref<256x512xbf16, #tpu.memory_space<vmem>>, %arg3: memref<1x512xf32, #tpu.memory_space<vmem>>, %arg4: memref<512x512xbf16, #tpu.memory_space<vmem>>, %arg5: memref<1x512xf32, #tpu.memory_space<vmem>>, %arg6: memref<512x512xbf16, #tpu.memory_space<vmem>>, %arg7: memref<1x512xf32, #tpu.memory_space<vmem>>, %arg8: memref<512x256xbf16, #tpu.memory_space<vmem>>, %arg9: memref<1x256xf32, #tpu.memory_space<vmem>>, %arg10: memref<256x512xbf16, #tpu.memory_space<vmem>>, %arg11: memref<256x512xbf16, #tpu.memory_space<vmem>>, %arg12: memref<1x512xf32, #tpu.memory_space<vmem>>, %arg13: memref<512x512xbf16, #tpu.memory_space<vmem>>, %arg14: memref<1x512xf32, #tpu.memory_space<vmem>>, %arg15: memref<512x512xbf16, #tpu.memory_space<vmem>>, %arg16: memref<1x512xf32, #tpu.memory_space<vmem>>, %arg17: memref<512x512xbf16, #tpu.memory_space<vmem>>, %arg18: memref<1x512xf32, #tpu.memory_space<vmem>>, %arg19: memref<512x1024xbf16, #tpu.memory_space<vmem>>, %arg20: memref<1x1024xf32, #tpu.memory_space<vmem>>, %arg21: memref<128x1024xf32, #tpu.memory_space<vmem>>) attributes {dimension_semantics = [#tpu.dimension_semantics<parallel>], iteration_bounds = array<i64: 2>, scalar_prefetch = 0 : i64, scratch_operands = 0 : i64, tpu.core_type = #tpu.core_type<tc>, window_params = [{transform_indices = @transform_0, window_bounds = array<i64: 128, 256>}, {pipeline_mode = #tpu.pipeline_mode<synchronous>, transform_indices = @transform_1, window_bounds = array<i64: 256, 512>}, {pipeline_mode = #tpu.pipeline_mode<synchronous>, transform_indices = @transform_2, window_bounds = array<i64: 1, 512>}, {pipeline_mode = #tpu.pipeline_mode<synchronous>, transform_indices = @transform_3, window_bounds = array<i64: 512, 512>}, {pipeline_mode = #tpu.pipeline_mode<synchronous>, transform_indices = @transform_4, window_bounds = array<i64: 1, 512>}, {pipeline_mode = #tpu.pipeline_mode<synchronous>, transform_indices = @transform_5, window_bounds = array<i64: 512, 512>}, {pipeline_mode = #tpu.pipeline_mode<synchronous>, transform_indices = @transform_6, window_bounds = array<i64: 1, 512>}, {pipeline_mode = #tpu.pipeline_mode<synchronous>, transform_indices = @transform_7, window_bounds = array<i64: 512, 256>}, {pipeline_mode = #tpu.pipeline_mode<synchronous>, transform_indices = @transform_8, window_bounds = array<i64: 1, 256>}, {pipeline_mode = #tpu.pipeline_mode<synchronous>, transform_indices = @transform_9, window_bounds = array<i64: 256, 512>}, {pipeline_mode = #tpu.pipeline_mode<synchronous>, transform_indices = @transform_10, window_bounds = array<i64: 256, 512>}, {pipeline_mode = #tpu.pipeline_mode<synchronous>, transform_indices = @transform_11, window_bounds = array<i64: 1, 512>}, {pipeline_mode = #tpu.pipeline_mode<synchronous>, transform_indices = @transform_12, window_bounds = array<i64: 512, 512>}, {pipeline_mode = #tpu.pipeline_mode<synchronous>, transform_indices = @transform_13, window_bounds = array<i64: 1, 512>}, {pipeline_mode = #tpu.pipeline_mode<synchronous>, transform_indices = @transform_14, window_bounds = array<i64: 512, 512>}, {pipeline_mode = #tpu.pipeline_mode<synchronous>, transform_indices = @transform_15, window_bounds = array<i64: 1, 512>}, {pipeline_mode = #tpu.pipeline_mode<synchronous>, transform_indices = @transform_16, window_bounds = array<i64: 512, 512>}, {pipeline_mode = #tpu.pipeline_mode<synchronous>, transform_indices = @transform_17, window_bounds = array<i64: 1, 512>}, {pipeline_mode = #tpu.pipeline_mode<synchronous>, transform_indices = @transform_18, window_bounds = array<i64: 512, 1024>}, {pipeline_mode = #tpu.pipeline_mode<synchronous>, transform_indices = @transform_19, window_bounds = array<i64: 1, 1024>}, {transform_indices = @transform_20, window_bounds = array<i64: 128, 1024>}]} {
    %c0 = arith.constant 0 : index
    %c0_0 = arith.constant 0 : index
    %0 = vector.load %arg1[%c0, %c0_0] : memref<128x256xbf16, #tpu.memory_space<vmem>>, vector<128x256xbf16>
    %c0_1 = arith.constant 0 : index
    %c0_2 = arith.constant 0 : index
    %1 = vector.load %arg2[%c0_1, %c0_2] : memref<256x512xbf16, #tpu.memory_space<vmem>>, vector<256x512xbf16>
    %cst = arith.constant dense<0.000000e+00> : vector<128x512xf32>
    %2 = tpu.matmul %0, %1, %cst {dimension_numbers = #tpu.dot_dimension_numbers<[1], [0], [0], [1], [0, 0, 1, 1], [], []>} : vector<128x256xbf16>, vector<256x512xbf16>, vector<128x512xf32> -> vector<128x512xf32>
    %c0_3 = arith.constant 0 : index
    %c0_4 = arith.constant 0 : index
    %3 = vector.load %arg3[%c0_3, %c0_4] : memref<1x512xf32, #tpu.memory_space<vmem>>, vector<1x512xf32>
    %4 = vector.broadcast %3 : vector<1x512xf32> to vector<128x512xf32>
    %5 = arith.addf %2, %4 : vector<128x512xf32>
    %cst_5 = arith.constant 0.000000e+00 : f32
    %6 = vector.broadcast %cst_5 : f32 to vector<128x512xf32>
    %7 = arith.maximumf %5, %6 : vector<128x512xf32>
    %8 = arith.truncf %7 : vector<128x512xf32> to vector<128x512xbf16>
    %c0_6 = arith.constant 0 : index
    %c0_7 = arith.constant 0 : index
    %9 = vector.load %arg4[%c0_6, %c0_7] : memref<512x512xbf16, #tpu.memory_space<vmem>>, vector<512x512xbf16>
    %cst_8 = arith.constant dense<0.000000e+00> : vector<128x512xf32>
    %10 = tpu.matmul %8, %9, %cst_8 {dimension_numbers = #tpu.dot_dimension_numbers<[1], [0], [0], [1], [0, 0, 1, 1], [], []>} : vector<128x512xbf16>, vector<512x512xbf16>, vector<128x512xf32> -> vector<128x512xf32>
    %c0_9 = arith.constant 0 : index
    %c0_10 = arith.constant 0 : index
    %11 = vector.load %arg5[%c0_9, %c0_10] : memref<1x512xf32, #tpu.memory_space<vmem>>, vector<1x512xf32>
    %12 = vector.broadcast %11 : vector<1x512xf32> to vector<128x512xf32>
    %13 = arith.addf %10, %12 : vector<128x512xf32>
    %cst_11 = arith.constant 0.000000e+00 : f32
    %14 = vector.broadcast %cst_11 : f32 to vector<128x512xf32>
    %15 = arith.maximumf %13, %14 : vector<128x512xf32>
    %16 = arith.truncf %15 : vector<128x512xf32> to vector<128x512xbf16>
    %c0_12 = arith.constant 0 : index
    %c0_13 = arith.constant 0 : index
    %17 = vector.load %arg6[%c0_12, %c0_13] : memref<512x512xbf16, #tpu.memory_space<vmem>>, vector<512x512xbf16>
    %cst_14 = arith.constant dense<0.000000e+00> : vector<128x512xf32>
    %18 = tpu.matmul %16, %17, %cst_14 {dimension_numbers = #tpu.dot_dimension_numbers<[1], [0], [0], [1], [0, 0, 1, 1], [], []>} : vector<128x512xbf16>, vector<512x512xbf16>, vector<128x512xf32> -> vector<128x512xf32>
    %c0_15 = arith.constant 0 : index
    %c0_16 = arith.constant 0 : index
    %19 = vector.load %arg7[%c0_15, %c0_16] : memref<1x512xf32, #tpu.memory_space<vmem>>, vector<1x512xf32>
    %20 = vector.broadcast %19 : vector<1x512xf32> to vector<128x512xf32>
    %21 = arith.addf %18, %20 : vector<128x512xf32>
    %cst_17 = arith.constant 0.000000e+00 : f32
    %22 = vector.broadcast %cst_17 : f32 to vector<128x512xf32>
    %23 = arith.maximumf %21, %22 : vector<128x512xf32>
    %24 = arith.truncf %23 : vector<128x512xf32> to vector<128x512xbf16>
    %c0_18 = arith.constant 0 : index
    %c0_19 = arith.constant 0 : index
    %25 = vector.load %arg8[%c0_18, %c0_19] : memref<512x256xbf16, #tpu.memory_space<vmem>>, vector<512x256xbf16>
    %cst_20 = arith.constant dense<0.000000e+00> : vector<128x256xf32>
    %26 = tpu.matmul %24, %25, %cst_20 {dimension_numbers = #tpu.dot_dimension_numbers<[1], [0], [0], [1], [0, 0, 1, 1], [], []>} : vector<128x512xbf16>, vector<512x256xbf16>, vector<128x256xf32> -> vector<128x256xf32>
    %c0_21 = arith.constant 0 : index
    %c0_22 = arith.constant 0 : index
    %27 = vector.load %arg9[%c0_21, %c0_22] : memref<1x256xf32, #tpu.memory_space<vmem>>, vector<1x256xf32>
    %28 = vector.broadcast %27 : vector<1x256xf32> to vector<128x256xf32>
    %29 = arith.addf %26, %28 : vector<128x256xf32>
    %cst_23 = arith.constant 0.000000e+00 : f32
    %30 = vector.broadcast %cst_23 : f32 to vector<128x256xf32>
    %31 = arith.maximumf %29, %30 : vector<128x256xf32>
    %32 = arith.truncf %31 : vector<128x256xf32> to vector<128x256xbf16>
    %c0_24 = arith.constant 0 : index
    %c0_25 = arith.constant 0 : index
    %33 = vector.load %arg10[%c0_24, %c0_25] : memref<256x512xbf16, #tpu.memory_space<vmem>>, vector<256x512xbf16>
    %cst_26 = arith.constant dense<0.000000e+00> : vector<128x512xf32>
    %34 = tpu.matmul %32, %33, %cst_26 {dimension_numbers = #tpu.dot_dimension_numbers<[1], [0], [0], [1], [0, 0, 1, 1], [], []>} : vector<128x256xbf16>, vector<256x512xbf16>, vector<128x512xf32> -> vector<128x512xf32>
    %c0_27 = arith.constant 0 : index
    %c0_28 = arith.constant 0 : index
    %35 = vector.load %arg11[%c0_27, %c0_28] : memref<256x512xbf16, #tpu.memory_space<vmem>>, vector<256x512xbf16>
    %cst_29 = arith.constant dense<0.000000e+00> : vector<128x512xf32>
    %36 = tpu.matmul %0, %35, %cst_29 {dimension_numbers = #tpu.dot_dimension_numbers<[1], [0], [0], [1], [0, 0, 1, 1], [], []>} : vector<128x256xbf16>, vector<256x512xbf16>, vector<128x512xf32> -> vector<128x512xf32>
    %37 = arith.addf %34, %36 : vector<128x512xf32>
    %c0_30 = arith.constant 0 : index
    %c0_31 = arith.constant 0 : index
    %38 = vector.load %arg12[%c0_30, %c0_31] : memref<1x512xf32, #tpu.memory_space<vmem>>, vector<1x512xf32>
    %39 = vector.broadcast %38 : vector<1x512xf32> to vector<128x512xf32>
    %40 = arith.addf %37, %39 : vector<128x512xf32>
    %cst_32 = arith.constant 0.000000e+00 : f32
    %41 = vector.broadcast %cst_32 : f32 to vector<128x512xf32>
    %42 = arith.maximumf %40, %41 : vector<128x512xf32>
    %43 = arith.truncf %42 : vector<128x512xf32> to vector<128x512xbf16>
    %c0_33 = arith.constant 0 : index
    %c0_34 = arith.constant 0 : index
    %44 = vector.load %arg13[%c0_33, %c0_34] : memref<512x512xbf16, #tpu.memory_space<vmem>>, vector<512x512xbf16>
    %cst_35 = arith.constant dense<0.000000e+00> : vector<128x512xf32>
    %45 = tpu.matmul %43, %44, %cst_35 {dimension_numbers = #tpu.dot_dimension_numbers<[1], [0], [0], [1], [0, 0, 1, 1], [], []>} : vector<128x512xbf16>, vector<512x512xbf16>, vector<128x512xf32> -> vector<128x512xf32>
    %c0_36 = arith.constant 0 : index
    %c0_37 = arith.constant 0 : index
    %46 = vector.load %arg14[%c0_36, %c0_37] : memref<1x512xf32, #tpu.memory_space<vmem>>, vector<1x512xf32>
    %47 = vector.broadcast %46 : vector<1x512xf32> to vector<128x512xf32>
    %48 = arith.addf %45, %47 : vector<128x512xf32>
    %cst_38 = arith.constant 0.000000e+00 : f32
    %49 = vector.broadcast %cst_38 : f32 to vector<128x512xf32>
    %50 = arith.maximumf %48, %49 : vector<128x512xf32>
    %51 = arith.truncf %50 : vector<128x512xf32> to vector<128x512xbf16>
    %c0_39 = arith.constant 0 : index
    %c0_40 = arith.constant 0 : index
    %52 = vector.load %arg15[%c0_39, %c0_40] : memref<512x512xbf16, #tpu.memory_space<vmem>>, vector<512x512xbf16>
    %cst_41 = arith.constant dense<0.000000e+00> : vector<128x512xf32>
    %53 = tpu.matmul %51, %52, %cst_41 {dimension_numbers = #tpu.dot_dimension_numbers<[1], [0], [0], [1], [0, 0, 1, 1], [], []>} : vector<128x512xbf16>, vector<512x512xbf16>, vector<128x512xf32> -> vector<128x512xf32>
    %c0_42 = arith.constant 0 : index
    %c0_43 = arith.constant 0 : index
    %54 = vector.load %arg16[%c0_42, %c0_43] : memref<1x512xf32, #tpu.memory_space<vmem>>, vector<1x512xf32>
    %55 = vector.broadcast %54 : vector<1x512xf32> to vector<128x512xf32>
    %56 = arith.addf %53, %55 : vector<128x512xf32>
    %cst_44 = arith.constant 0.000000e+00 : f32
    %57 = vector.broadcast %cst_44 : f32 to vector<128x512xf32>
    %58 = arith.maximumf %56, %57 : vector<128x512xf32>
    %59 = arith.truncf %58 : vector<128x512xf32> to vector<128x512xbf16>
    %c0_45 = arith.constant 0 : index
    %c0_46 = arith.constant 0 : index
    %60 = vector.load %arg17[%c0_45, %c0_46] : memref<512x512xbf16, #tpu.memory_space<vmem>>, vector<512x512xbf16>
    %cst_47 = arith.constant dense<0.000000e+00> : vector<128x512xf32>
    %61 = tpu.matmul %59, %60, %cst_47 {dimension_numbers = #tpu.dot_dimension_numbers<[1], [0], [0], [1], [0, 0, 1, 1], [], []>} : vector<128x512xbf16>, vector<512x512xbf16>, vector<128x512xf32> -> vector<128x512xf32>
    %c0_48 = arith.constant 0 : index
    %c0_49 = arith.constant 0 : index
    %62 = vector.load %arg18[%c0_48, %c0_49] : memref<1x512xf32, #tpu.memory_space<vmem>>, vector<1x512xf32>
    %63 = vector.broadcast %62 : vector<1x512xf32> to vector<128x512xf32>
    %64 = arith.addf %61, %63 : vector<128x512xf32>
    %cst_50 = arith.constant 0.000000e+00 : f32
    %65 = vector.broadcast %cst_50 : f32 to vector<128x512xf32>
    %66 = arith.maximumf %64, %65 : vector<128x512xf32>
    %67 = arith.truncf %66 : vector<128x512xf32> to vector<128x512xbf16>
    %c0_51 = arith.constant 0 : index
    %c0_52 = arith.constant 0 : index
    %68 = vector.load %arg19[%c0_51, %c0_52] : memref<512x1024xbf16, #tpu.memory_space<vmem>>, vector<512x1024xbf16>
    %cst_53 = arith.constant dense<0.000000e+00> : vector<128x1024xf32>
    %69 = tpu.matmul %67, %68, %cst_53 {dimension_numbers = #tpu.dot_dimension_numbers<[1], [0], [0], [1], [0, 0, 1, 1], [], []>} : vector<128x512xbf16>, vector<512x1024xbf16>, vector<128x1024xf32> -> vector<128x1024xf32>
    %c0_54 = arith.constant 0 : index
    %c0_55 = arith.constant 0 : index
    %70 = vector.load %arg20[%c0_54, %c0_55] : memref<1x1024xf32, #tpu.memory_space<vmem>>, vector<1x1024xf32>
    %71 = vector.broadcast %70 : vector<1x1024xf32> to vector<128x1024xf32>
    %72 = arith.addf %69, %71 : vector<128x1024xf32>
    %c0_56 = arith.constant 0 : index
    %c0_57 = arith.constant 0 : index
    %73 = vector.load %arg21[%c0_56, %c0_57] : memref<128x1024xf32, #tpu.memory_space<vmem>>, vector<128x1024xf32>
    tpu.vector_store %arg21[%c0_56, %c0_57], %72 {strides = array<i32>} : memref<128x1024xf32, #tpu.memory_space<vmem>>, vector<128x1024xf32>,
    return
  }
  func.func @transform_0(%arg0: i32) -> (i32, i32) {
    %c0_i32 = arith.constant 0 : i32
    %c0_i32_0 = arith.constant 0 : i32
    return %arg0, %c0_i32 : i32, i32
  }
  func.func @transform_1(%arg0: i32) -> (i32, i32) {
    %c0_i32 = arith.constant 0 : i32
    %c0_i32_0 = arith.constant 0 : i32
    %c0_i32_1 = arith.constant 0 : i32
    return %c0_i32, %c0_i32_0 : i32, i32
  }
  func.func @transform_2(%arg0: i32) -> (i32, i32) {
    %c0_i32 = arith.constant 0 : i32
    %c0_i32_0 = arith.constant 0 : i32
    %c0_i32_1 = arith.constant 0 : i32
    return %c0_i32, %c0_i32_0 : i32, i32
  }
  func.func @transform_3(%arg0: i32) -> (i32, i32) {
    %c0_i32 = arith.constant 0 : i32
    %c0_i32_0 = arith.constant 0 : i32
    %c0_i32_1 = arith.constant 0 : i32
    return %c0_i32, %c0_i32_0 : i32, i32
  }
  func.func @transform_4(%arg0: i32) -> (i32, i32) {
    %c0_i32 = arith.constant 0 : i32
    %c0_i32_0 = arith.constant 0 : i32
    %c0_i32_1 = arith.constant 0 : i32
    return %c0_i32, %c0_i32_0 : i32, i32
  }
  func.func @transform_5(%arg0: i32) -> (i32, i32) {
    %c0_i32 = arith.constant 0 : i32
    %c0_i32_0 = arith.constant 0 : i32
    %c0_i32_1 = arith.constant 0 : i32
    return %c0_i32, %c0_i32_0 : i32, i32
  }
  func.func @transform_6(%arg0: i32) -> (i32, i32) {
    %c0_i32 = arith.constant 0 : i32
    %c0_i32_0 = arith.constant 0 : i32
    %c0_i32_1 = arith.constant 0 : i32
    return %c0_i32, %c0_i32_0 : i32, i32
  }
  func.func @transform_7(%arg0: i32) -> (i32, i32) {
    %c0_i32 = arith.constant 0 : i32
    %c0_i32_0 = arith.constant 0 : i32
    %c0_i32_1 = arith.constant 0 : i32
    return %c0_i32, %c0_i32_0 : i32, i32
  }
  func.func @transform_8(%arg0: i32) -> (i32, i32) {
    %c0_i32 = arith.constant 0 : i32
    %c0_i32_0 = arith.constant 0 : i32
    %c0_i32_1 = arith.constant 0 : i32
    return %c0_i32, %c0_i32_0 : i32, i32
  }
  func.func @transform_9(%arg0: i32) -> (i32, i32) {
    %c0_i32 = arith.constant 0 : i32
    %c0_i32_0 = arith.constant 0 : i32
    %c0_i32_1 = arith.constant 0 : i32
    return %c0_i32, %c0_i32_0 : i32, i32
  }
  func.func @transform_10(%arg0: i32) -> (i32, i32) {
    %c0_i32 = arith.constant 0 : i32
    %c0_i32_0 = arith.constant 0 : i32
    %c0_i32_1 = arith.constant 0 : i32
    return %c0_i32, %c0_i32_0 : i32, i32
  }
  func.func @transform_11(%arg0: i32) -> (i32, i32) {
    %c0_i32 = arith.constant 0 : i32
    %c0_i32_0 = arith.constant 0 : i32
    %c0_i32_1 = arith.constant 0 : i32
    return %c0_i32, %c0_i32_0 : i32, i32
  }
  func.func @transform_12(%arg0: i32) -> (i32, i32) {
    %c0_i32 = arith.constant 0 : i32
    %c0_i32_0 = arith.constant 0 : i32
    %c0_i32_1 = arith.constant 0 : i32
    return %c0_i32, %c0_i32_0 : i32, i32
  }
  func.func @transform_13(%arg0: i32) -> (i32, i32) {
    %c0_i32 = arith.constant 0 : i32
    %c0_i32_0 = arith.constant 0 : i32
    %c0_i32_1 = arith.constant 0 : i32
    return %c0_i32, %c0_i32_0 : i32, i32
  }
  func.func @transform_14(%arg0: i32) -> (i32, i32) {
    %c0_i32 = arith.constant 0 : i32
    %c0_i32_0 = arith.constant 0 : i32
    %c0_i32_1 = arith.constant 0 : i32
    return %c0_i32, %c0_i32_0 : i32, i32
  }
  func.func @transform_15(%arg0: i32) -> (i32, i32) {
    %c0_i32 = arith.constant 0 : i32
    %c0_i32_0 = arith.constant 0 : i32
    %c0_i32_1 = arith.constant 0 : i32
    return %c0_i32, %c0_i32_0 : i32, i32
  }
  func.func @transform_16(%arg0: i32) -> (i32, i32) {
    %c0_i32 = arith.constant 0 : i32
    %c0_i32_0 = arith.constant 0 : i32
    %c0_i32_1 = arith.constant 0 : i32
    return %c0_i32, %c0_i32_0 : i32, i32
  }
  func.func @transform_17(%arg0: i32) -> (i32, i32) {
    %c0_i32 = arith.constant 0 : i32
    %c0_i32_0 = arith.constant 0 : i32
    %c0_i32_1 = arith.constant 0 : i32
    return %c0_i32, %c0_i32_0 : i32, i32
  }
  func.func @transform_18(%arg0: i32) -> (i32, i32) {
    %c0_i32 = arith.constant 0 : i32
    %c0_i32_0 = arith.constant 0 : i32
    %c0_i32_1 = arith.constant 0 : i32
    return %c0_i32, %c0_i32_0 : i32, i32
  }
  func.func @transform_19(%arg0: i32) -> (i32, i32) {
    %c0_i32 = arith.constant 0 : i32
    %c0_i32_0 = arith.constant 0 : i32
    %c0_i32_1 = arith.constant 0 : i32
    return %c0_i32, %c0_i32_0 : i32, i32
  }
  func.func @transform_20(%arg0: i32) -> (i32, i32) {
    %c0_i32 = arith.constant 0 : i32
    %c0_i32_0 = arith.constant 0 : i32
    return %arg0, %c0_i32 : i32, i32
  }
}

</mosaic_0001>

<bundles_post_ra>
// kernel: decoder_forward.1
= control target key start
LH: loop header
LB: loop body
LE: loop exit
PB: predicated region body
PF: predicated region fallthrough
CT: control target
= control target key end

     0   :  { %s22254_s0 = inlined_call_operand.vmem [shape: bf16[256,256], index: 0, kind: input, shape index: {}]   ;;  %s22255_s1 = inlined_call_operand.vmem [shape: bf16[256,512], index: 1, kind: input, shape index: {}]   ;;  %s22256_s2 = inlined_call_operand.vmem [shape: f32[1,512], index: 2, kind: input, shape index: {}]   ;;  %s22257_s3 = inlined_call_operand.vmem [shape: bf16[512,512], index: 3, kind: input, shape index: {}]   ;;  %s22258_s4 = inlined_call_operand.vmem [shape: f32[1,512], index: 4, kind: input, shape index: {}]   ;;  %s22259_s5 = inlined_call_operand.vmem [shape: bf16[512,512], index: 5, kind: input, shape index: {}]   ;;  %s22260_s6 = inlined_call_operand.vmem [shape: f32[1,512], index: 6, kind: input, shape index: {}]   ;;  %s22261_s7 = inlined_call_operand.vmem [shape: bf16[512,256], index: 7, kind: input, shape index: {}]   ;;  %s22262_s8 = inlined_call_operand.vmem [shape: f32[1,256], index: 8, kind: input, shape index: {}]   ;;  %s22263_s9 = inlined_call_operand.vmem [shape: bf16[256,512], index: 9, kind: input, shape index: {}]   ;;  %s22264_s10 = inlined_call_operand.vmem [shape: bf16[256,512], index: 10, kind: input, shape index: {}]   ;;  %s22265_s11 = inlined_call_operand.vmem [shape: f32[1,512], index: 11, kind: input, shape index: {}]   ;;  %s22266_s12 = inlined_call_operand.vmem [shape: bf16[512,512], index: 12, kind: input, shape index: {}]   ;;  %s22267_s13 = inlined_call_operand.vmem [shape: f32[1,512], index: 13, kind: input, shape index: {}]   ;;  %s22268_s14 = inlined_call_operand.vmem [shape: bf16[512,512], index: 14, kind: input, shape index: {}]   ;;  %s22269_s15 = inlined_call_operand.vmem [shape: f32[1,512], index: 15, kind: input, shape index: {}]   ;;  %s22270_s16 = inlined_call_operand.vmem [shape: bf16[512,512], index: 16, kind: input, shape index: {}]   ;;  %s22271_s17 = inlined_call_operand.vmem [shape: f32[1,512], index: 17, kind: input, shape index: {}]   ;;  %s22272_s18 = inlined_call_operand.vmem [shape: bf16[512,1024], index: 18, kind: input, shape index: {}]   ;;  %s22273_s19 = inlined_call_operand.vmem [shape: f32[1,1024], index: 19, kind: input, shape index: {}]   ;;  %s22274_s20 = inlined_call_operand.hbm [shape: f32[256,1024], index: 20, kind: output, shape index: {}]  }
   0x1   :  { %22299 = sst [smem:[#allocation38_spill]] %s22254_s0 }
   0x2   :  { %22300 = sst [smem:[#allocation39_spill]] %s22255_s1 }
   0x3   :  { %22301 = sst [smem:[#allocation40_spill]] %s22256_s2 }
   0x4   :  { %22302 = sst [smem:[#allocation41_spill]] %s22257_s3 }
   0x5   :  { %22303 = sst [smem:[#allocation42_spill]] %s22258_s4 }
   0x6   :  { %22304 = sst [smem:[#allocation43_spill]] %s22259_s5 }
   0x7   :  { %22305 = sst [smem:[#allocation44_spill]] %s22274_s20 }
   0x8   :  { %25 = vsyncpa [#allocation3], 0 }
   0x9   :  { %27 = vsyncpa [#allocation3 + $0x1], 0  ;;  %s15687_s1 = smov 0   ;;  %s15689_s22 = smov 0  }
   0xa   :  { %s15691_s23 = smov 0   ;;  %s15693_s24 = smov 0  }
   0xb LB: > { %22306 = sst [smem:[#allocation5_spill]] %s15565_s1  ;;  %s15708_s2 = sadd.s32 4294967295, %s15577_s24   ;;  %s15577_s24 = sphi %s15693_s24, %s22381_s24   ;;  %s15573_s23 = sphi %s15691_s23, %s22383_s23   ;;  %s15569_s22 = sphi %s15689_s22, %s22385_s22   ;;  %s15565_s1 = sphi %s15687_s1, %s22384_s1  }
   0xc   : > { %22307 = sst [smem:[#allocation6_spill]] %s15573_s23  ;;  %s12907_s25 = sadd.s32 4294967294, %s15577_s24  }
   0xd   : > { %22308 = sst [smem:[#allocation7_spill]] %s15577_s24  ;;  %s15712_s3 = sadd.s32 1, %s15577_s24  }
   0xe   : > { %22309 = sst [smem:[#allocation8_spill]] %s15712_s3  ;;  %s465_s26 = sadd.s32 1, %s15573_s23 }
   0xf   : > { %s462_s27 = ssub.s32 %s15577_s24, %s15712_s3  ;;  %p475_p0 = scmp.ne.s32.totalorder %s15573_s23, %s15569_s22 }
  0x10   : > { %p463_p1 = scmp.eq.s32.totalorder %s462_s27, 0  ;;  %p476_p2 = scmp.eq.s32.totalorder %s15708_s2, 1 }
  0x11   : > { %p481_p3 = scmp.ne.s32.totalorder %s15569_s22, %s15565_s1  ;;  %p482_p4 = scmp.eq.s32.totalorder %s12907_s25, 1 }
  0x12   : > { %s15723_s28 = scalar_select %p463_p1, %s15573_s23, %s465_s26  }
  0x13   : > { %p15725_p5 = por %p476_p2, %p475_p0  ;;  %p15729_p6 = por %p482_p4, %p481_p3 }
  0x14   : > { %22310 = sst [smem:[#allocation9_spill]] %s15723_s28  ;;  %p12910_p7 = scmp.ge.s32.totalorder %s15577_s24, 1 }
  0x15   : > { %s22311_s4 = scalar_select %p15725_p5, 1, 0 }
  0x16   : > { %s22313_s29 = scalar_select %p15729_p6, 1, 0 }
  0x17   : > { %22312 = sst [smem:[#allocation10_spill]] %s22311_s4  ;;  %p567_p8 = scmp.lt.s32.totalorder %s15577_s24, 3 }
  0x18   : > { %22314 = sst [smem:[#allocation11_spill]] %s22313_s29 }
  0x19   : > { %p568_p9 = pnand %p12910_p7, %p567_p8 }
  0x1b   : > { %571 = sbr.rel (%p568_p9) target bundleno = 2541 (0x9ed), region = 100 }
  0x20   : > { %s22315_s21 = sld [smem:[#allocation39_spill]]  ;;  %s12912_s30 = sshll.u32 %s15708_s2, 4 }
  0x21   : > { %p627_p10 = scmp.lt.s32.totalorder %s12912_s30, 31  ;;  %s22316_s4 = sld [smem:[#allocation38_spill]] }
  0x22   : > { %s22317_s3 = sld [smem:[#allocation41_spill]] }
  0x23   : > { %s22387_s30 = smov (!%p627_p10, %s12912_s30), 31  ;;  %s22319_s1 = sld [smem:[#allocation40_spill]] }
  0x24   : > { %s14089_s26 = sshll.u32 %s22387_s30, 3  ;;  %s22324_s5 = sld [smem:[#allocation43_spill]] }
  0x25   : > { %s22325_s27 = sld [smem:[#allocation42_spill]] }
  0x26   : > { %v14133_v0 = vld [vmem:[%s22315_s21 + $0xe4] ss:$16 sps:$4 sm:$0xff]   ;;  %v14135_v1 = vld [vmem:[%s22315_s21 + $0xec] ss:$16 sps:$4 sm:$0xff]   ;;  %v14137_v2 = vld [vmem:[%s22315_s21 + $0xe0] ss:$16 sps:$4 sm:$0xff]  }
  0x27   : > { %1136 = vmatprep.subr.bf16.mxu0 %v14133_v0  ;;  %v14138_v3 = vld [vmem:[%s22315_s21 + $0xe8] ss:$16 sps:$4 sm:$0xff]   ;;  %1249 = vmatprep.subr.bf16.mxu1 %v14135_v1  ;;  %v14139_v4 = vld [vmem:[%s22315_s21 + $0xc4] ss:$16 sps:$4 sm:$0xff]   ;;  %v14141_v5 = vld [vmem:[%s22315_s21 + $0xcc] ss:$16 sps:$4 sm:$0xff]   ;;  %s15874_s25 = scalar_lea.vmem %s22316_s4, %s14089_s26 }
  0x28   : > { %1137 = vmatpush1.bf16.msra.mxu0 %v14137_v2  ;;  %1250 = vmatpush1.bf16.msra.mxu1 %v14138_v3  ;;  %v14143_v6 = vld [vmem:[%s22315_s21 + $0xc0] ss:$16 sps:$4 sm:$0xff]   ;;  %v14144_v7 = vld [vmem:[%s22315_s21 + $0xc8] ss:$16 sps:$4 sm:$0xff]   ;;  %v14145_v8 = vld [vmem:[%s22315_s21 + $0xa4] ss:$16 sps:$4 sm:$0xff]  }
  0x29   : > { %1138 = vmatprep.subr.bf16.mxu0 %v14139_v4  ;;  %1251 = vmatprep.subr.bf16.mxu1 %v14141_v5  ;;  %v14147_v9 = vld [vmem:[%s22315_s21 + $0xac] ss:$16 sps:$4 sm:$0xff]   ;;  %v14149_v10 = vld [vmem:[%s22315_s21 + $0xa0] ss:$16 sps:$4 sm:$0xff]   ;;  %v14150_v11 = vld [vmem:[%s22315_s21 + $0xa8] ss:$16 sps:$4 sm:$0xff]  }
  0x2a   : > { %v14151_v12 = vld [vmem:[%s22315_s21 + $0x84] ss:$16 sps:$4 sm:$0xff]   ;;  %v14153_v13 = vld [vmem:[%s22315_s21 + $0x8c] ss:$16 sps:$4 sm:$0xff]   ;;  %v14155_v14 = vld [vmem:[%s22315_s21 + $0x80] ss:$16 sps:$4 sm:$0xff]  }
  0x2b   : > { %v14156_v15 = vld [vmem:[%s22315_s21 + $0x88] ss:$16 sps:$4 sm:$0xff]   ;;  %v14157_v16 = vld [vmem:[%s22315_s21 + $0x64] ss:$16 sps:$4 sm:$0xff]   ;;  %v14159_v17 = vld [vmem:[%s22315_s21 + $0x6c] ss:$16 sps:$4 sm:$0xff]  }
  0x2c   : > { %1139 = vmatpush1.bf16.msra.mxu0 %v14143_v6  ;;  %1252 = vmatpush1.bf16.msra.mxu1 %v14144_v7  ;;  %v14161_v18 = vld [vmem:[%s22315_s21 + $0x60] ss:$16 sps:$4 sm:$0xff]   ;;  %v14162_v19 = vld [vmem:[%s22315_s21 + $0x68] ss:$16 sps:$4 sm:$0xff]   ;;  %v14163_v20 = vld [vmem:[%s22315_s21 + $0x44] ss:$16 sps:$4 sm:$0xff]  }
  0x2d   : > { %1140 = vmatprep.subr.bf16.mxu0 %v14145_v8  ;;  %1253 = vmatprep.subr.bf16.mxu1 %v14147_v9  ;;  %v14165_v21 = vld [vmem:[%s22315_s21 + $0x4c] ss:$16 sps:$4 sm:$0xff]   ;;  %v14167_v22 = vld [vmem:[%s22315_s21 + $0x40] ss:$16 sps:$4 sm:$0xff]   ;;  %v14168_v23 = vld [vmem:[%s22315_s21 + $0x48] ss:$16 sps:$4 sm:$0xff]  }
  0x2e   : > { %v14169_v24 = vld [vmem:[%s22315_s21 + $0x24] ss:$16 sps:$4 sm:$0xff]   ;;  %v14171_v25 = vld [vmem:[%s22315_s21 + $0x2c] ss:$16 sps:$4 sm:$0xff]   ;;  %v14173_v26 = vld [vmem:[%s22315_s21 + $0x20] ss:$16 sps:$4 sm:$0xff]  }
  0x2f   : > { %v14174_v27 = vld [vmem:[%s22315_s21 + $0x28] ss:$16 sps:$4 sm:$0xff]   ;;  %v14175_v28 = vld [vmem:[%s22315_s21 + $0x4] ss:$16 sps:$4 sm:$0xff]   ;;  %v14177_v29 = vld [vmem:[%s22315_s21 + $0xc] ss:$16 sps:$4 sm:$0xff]  }
  0x30   : > { %1141 = vmatpush1.bf16.msra.mxu0 %v14149_v10  ;;  %1254 = vmatpush1.bf16.msra.mxu1 %v14150_v11  ;;  %v14179_v30 = vld [vmem:[%s22315_s21] ss:$16 sps:$4 sm:$0xff]   ;;  %v14180_v31 = vld [vmem:[%s22315_s21 + $0x8] ss:$16 sps:$4 sm:$0xff]   ;;  %v14181_v32 = vld [vmem:[%s22315_s21 + $0x1e4] ss:$16 sps:$4 sm:$0xff]  }
  0x31   : > { %1142 = vmatprep.subr.bf16.mxu0 %v14151_v12  ;;  %1255 = vmatprep.subr.bf16.mxu1 %v14153_v13  ;;  %v14183_v33 = vld [vmem:[%s22315_s21 + $0x1ec] ss:$16 sps:$4 sm:$0xff]   ;;  %v14185_v34 = vld [vmem:[%s22315_s21 + $0x1e0] ss:$16 sps:$4 sm:$0xff]   ;;  %v14186_v35 = vld [vmem:[%s22315_s21 + $0x1e8] ss:$16 sps:$4 sm:$0xff]  }
  0x32   : > { %v14187_v36 = vld [vmem:[%s22315_s21 + $0x1c4] ss:$16 sps:$4 sm:$0xff]   ;;  %v14189_v37 = vld [vmem:[%s22315_s21 + $0x1cc] ss:$16 sps:$4 sm:$0xff]   ;;  %v14191_v38 = vld [vmem:[%s22315_s21 + $0x1c0] ss:$16 sps:$4 sm:$0xff]  }
  0x33   : > { %v14192_v39 = vld [vmem:[%s22315_s21 + $0x1c8] ss:$16 sps:$4 sm:$0xff]   ;;  %v14193_v40 = vld [vmem:[%s22315_s21 + $0x1a4] ss:$16 sps:$4 sm:$0xff]   ;;  %v14195_v41 = vld [vmem:[%s22315_s21 + $0x1ac] ss:$16 sps:$4 sm:$0xff]  }
  0x34   : > { %1143 = vmatpush1.bf16.msra.mxu0 %v14155_v14  ;;  %1256 = vmatpush1.bf16.msra.mxu1 %v14156_v15  ;;  %v14197_v42 = vld [vmem:[%s22315_s21 + $0x1a0] ss:$16 sps:$4 sm:$0xff]   ;;  %v14198_v43 = vld [vmem:[%s22315_s21 + $0x1a8] ss:$16 sps:$4 sm:$0xff]   ;;  %v14199_v44 = vld [vmem:[%s22315_s21 + $0x184] ss:$16 sps:$4 sm:$0xff]  }
  0x35   : > { %1144 = vmatprep.subr.bf16.mxu0 %v14157_v16  ;;  %1257 = vmatprep.subr.bf16.mxu1 %v14159_v17  ;;  %v14201_v45 = vld [vmem:[%s22315_s21 + $0x18c] ss:$16 sps:$4 sm:$0xff]   ;;  %v14203_v46 = vld [vmem:[%s22315_s21 + $0x180] ss:$16 sps:$4 sm:$0xff]   ;;  %v14204_v47 = vld [vmem:[%s22315_s21 + $0x188] ss:$16 sps:$4 sm:$0xff]  }
  0x36   : > { %v14229_v48 = vld [vmem:[%s15874_s25 + $0x4] ss:$8 sps:$4 sm:$0xff]   ;;  %v14209_v51 = vld [vmem:[%s22315_s21 + $0x160] ss:$16 sps:$4 sm:$0xff]   ;;  %v14210_v52 = vld [vmem:[%s22315_s21 + $0x168] ss:$16 sps:$4 sm:$0xff]  }
  0x37   : > { %v14205_v49 = vld [vmem:[%s22315_s21 + $0x164] ss:$16 sps:$4 sm:$0xff]   ;;  %v14207_v50 = vld [vmem:[%s22315_s21 + $0x16c] ss:$16 sps:$4 sm:$0xff]   ;;  %1168 = vmatprep.mubr.bf16.mxu0 %v14229_v48  ;;  %1281 = vmatprep.mubr.bf16.mxu1 %v14229_v48  ;;  %v14215_v55 = vld [vmem:[%s22315_s21 + $0x140] ss:$16 sps:$4 sm:$0xff]  }
  0x38   : > { %1145 = vmatpush1.bf16.msra.mxu0 %v14161_v18  ;;  %1258 = vmatpush1.bf16.msra.mxu1 %v14162_v19  ;;  %v14211_v53 = vld [vmem:[%s22315_s21 + $0x144] ss:$16 sps:$4 sm:$0xff]   ;;  %v14213_v54 = vld [vmem:[%s22315_s21 + $0x14c] ss:$16 sps:$4 sm:$0xff]   ;;  %v14216_v56 = vld [vmem:[%s22315_s21 + $0x148] ss:$16 sps:$4 sm:$0xff]  }
  0x39   : > { %1146 = vmatprep.subr.bf16.mxu0 %v14163_v20  ;;  %1259 = vmatprep.subr.bf16.mxu1 %v14165_v21  ;;  %v14217_v57 = vld [vmem:[%s22315_s21 + $0x124] ss:$16 sps:$4 sm:$0xff]   ;;  %v14219_v58 = vld [vmem:[%s22315_s21 + $0x12c] ss:$16 sps:$4 sm:$0xff]   ;;  %v14221_v59 = vld [vmem:[%s22315_s21 + $0x120] ss:$16 sps:$4 sm:$0xff]  }
  0x3a   : > { %v14222_v60 = vld [vmem:[%s22315_s21 + $0x128] ss:$16 sps:$4 sm:$0xff]   ;;  %v14223_v61 = vld [vmem:[%s22315_s21 + $0x104] ss:$16 sps:$4 sm:$0xff]   ;;  %v14225_v62 = vld [vmem:[%s22315_s21 + $0x10c] ss:$16 sps:$4 sm:$0xff]  }
  0x3b   : > { %v14227_v63 = vld [vmem:[%s22315_s21 + $0x100] ss:$16 sps:$4 sm:$0xff]   ;;  %v14228_v0 = vld [vmem:[%s22315_s21 + $0x108] ss:$16 sps:$4 sm:$0xff]   ;;  %v14255_v1 = vld [vmem:[%s22317_s3 + $0xe4] ss:$16 sps:$4 sm:$0xff]  }
  0x3c   : > { %1147 = vmatpush1.bf16.msra.mxu0 %v14167_v22  ;;  %1260 = vmatpush1.bf16.msra.mxu1 %v14168_v23  ;;  %v14258_v2 = vld [vmem:[%s22317_s3 + $0x2e4] ss:$16 sps:$4 sm:$0xff]   ;;  %v14231_v3 = vld [vmem:[%s15874_s25] ss:$8 sps:$4 sm:$0xff]   ;;  %v14234_v13 = vld [vmem:[%s15874_s25 + $0x10] ss:$8 sps:$4 sm:$0xff]  }
  0x3d   : > { %1148 = vmatprep.subr.bf16.mxu0 %v14169_v24  ;;  %1261 = vmatprep.subr.bf16.mxu1 %v14171_v25  ;;  %v14232_v4 = vld [vmem:[%s15874_s25 + $0x14] ss:$8 sps:$4 sm:$0xff]   ;;  %v14253_v5 = vld [vmem:[%s22317_s3 + $0xe0] ss:$16 sps:$4 sm:$0xff]   ;;  %v14235_v14 = vld [vmem:[%s15874_s25 + $0x24] ss:$8 sps:$4 sm:$0xff]  }
  0x3e   : > { %v14256_v6 = vld [vmem:[%s22317_s3 + $0x2e0] ss:$16 sps:$4 sm:$0xff]   ;;  %v14261_v7 = vld [vmem:[%s22317_s3 + $0xc4] ss:$16 sps:$4 sm:$0xff]   ;;  %s623_s26 = sand.u32 1, %s15569_s22   ;;  %s22377_s20 = sld [smem:[#allocation44_spill]] }
  0x3f   : > { %v14264_v8 = vld [vmem:[%s22317_s3 + $0x2c4] ss:$16 sps:$4 sm:$0xff]   ;;  %v14259_v9 = vld [vmem:[%s22317_s3 + $0xc0] ss:$16 sps:$4 sm:$0xff]   ;;  %s12911_s24 = sshll.u32 %s623_s26, 10  ;;  %s15579_s4 = smov [#allocation2]  }
  0x40   : > { %1149 = vmatpush1.bf16.msra.mxu0 %v14173_v26  ;;  %1262 = vmatpush1.bf16.msra.mxu1 %v14174_v27  ;;  %v14262_v10 = vld [vmem:[%s22317_s3 + $0x2c0] ss:$16 sps:$4 sm:$0xff]   ;;  %v14267_v11 = vld [vmem:[%s22317_s3 + $0xa4] ss:$16 sps:$4 sm:$0xff]   ;;  %s21637_s29 = scalar_lea.vmem [#allocation2], %s12911_s24  ;;  %s15521_s24 = sshll.u32 %s15579_s4, 4  ;;  %s15522_s24 = int_to_ptr.vmem [resolvable:$false] %s15521_s24 }
  0x41   : > { %1150 = vmatprep.subr.bf16.mxu0 %v14175_v28  ;;  %1263 = vmatprep.subr.bf16.mxu1 %v14177_v29  ;;  %v14270_v12 = vld [vmem:[%s22317_s3 + $0x2a4] ss:$16 sps:$4 sm:$0xff]   ;;  %v14265_v15 = vld [vmem:[%s22317_s3 + $0xa0] ss:$16 sps:$4 sm:$0xff]  }
  0x42   : > { %v14268_v16 = vld [vmem:[%s22317_s3 + $0x2a0] ss:$16 sps:$4 sm:$0xff]   ;;  %v14273_v17 = vld [vmem:[%s22317_s3 + $0x84] ss:$16 sps:$4 sm:$0xff]  }
  0x43   : > { %v14276_v18 = vld [vmem:[%s22317_s3 + $0x284] ss:$16 sps:$4 sm:$0xff]   ;;  %v14271_v19 = vld [vmem:[%s22317_s3 + $0x80] ss:$16 sps:$4 sm:$0xff]  }
  0x44   : > { %1151 = vmatpush1.bf16.msra.mxu0 %v14179_v30  ;;  %1264 = vmatpush1.bf16.msra.mxu1 %v14180_v31  ;;  %v14274_v20 = vld [vmem:[%s22317_s3 + $0x280] ss:$16 sps:$4 sm:$0xff]   ;;  %v14279_v21 = vld [vmem:[%s22317_s3 + $0x64] ss:$16 sps:$4 sm:$0xff]  }
  0x45   : > { %1152 = vmatprep.subr.bf16.mxu0 %v14181_v32  ;;  %1265 = vmatprep.subr.bf16.mxu1 %v14183_v33  ;;  %v14282_v22 = vld [vmem:[%s22317_s3 + $0x264] ss:$16 sps:$4 sm:$0xff]   ;;  %v14237_v23 = vld [vmem:[%s15874_s25 + $0x20] ss:$8 sps:$4 sm:$0xff]   ;;  %v14240_v30 = vld [vmem:[%s15874_s25 + $0x30] ss:$8 sps:$4 sm:$0xff]  }
  0x46   : > { %v14238_v24 = vld [vmem:[%s15874_s25 + $0x34] ss:$8 sps:$4 sm:$0xff]   ;;  %v14277_v25 = vld [vmem:[%s22317_s3 + $0x60] ss:$16 sps:$4 sm:$0xff]   ;;  %v14241_v32 = vld [vmem:[%s15874_s25 + $0x44] ss:$8 sps:$4 sm:$0xff]  }
  0x47   : > { %v14280_v26 = vld [vmem:[%s22317_s3 + $0x260] ss:$16 sps:$4 sm:$0xff]   ;;  %v14285_v27 = vld [vmem:[%s22317_s3 + $0x44] ss:$16 sps:$4 sm:$0xff]  }
  0x48   : > { %1153 = vmatpush2.bf16.msra.mxu0 %v14185_v34  ;;  %1266 = vmatpush2.bf16.msra.mxu1 %v14186_v35  ;;  %v14288_v28 = vld [vmem:[%s22317_s3 + $0x244] ss:$16 sps:$4 sm:$0xff]   ;;  %v14283_v29 = vld [vmem:[%s22317_s3 + $0x40] ss:$16 sps:$4 sm:$0xff]  }
  0x49   : > { %1154 = vmatprep.subr.bf16.mxu0 %v14187_v36  ;;  %1267 = vmatprep.subr.bf16.mxu1 %v14189_v37  ;;  %v14286_v31 = vld [vmem:[%s22317_s3 + $0x240] ss:$16 sps:$4 sm:$0xff]   ;;  %v14291_v33 = vld [vmem:[%s22317_s3 + $0x24] ss:$16 sps:$4 sm:$0xff]  }
  0x4a   : > { %v14294_v34 = vld [vmem:[%s22317_s3 + $0x224] ss:$16 sps:$4 sm:$0xff]   ;;  %v14289_v35 = vld [vmem:[%s22317_s3 + $0x20] ss:$16 sps:$4 sm:$0xff]  }
  0x4b   : > { %v14292_v36 = vld [vmem:[%s22317_s3 + $0x220] ss:$16 sps:$4 sm:$0xff]   ;;  %v14297_v37 = vld [vmem:[%s22317_s3 + $0x4] ss:$16 sps:$4 sm:$0xff]  }
  0x4c   : > { %1155 = vmatpush2.bf16.msra.mxu0 %v14191_v38  ;;  %1268 = vmatpush2.bf16.msra.mxu1 %v14192_v39  ;;  %v14300_v38 = vld [vmem:[%s22317_s3 + $0x204] ss:$16 sps:$4 sm:$0xff]   ;;  %v14295_v39 = vld [vmem:[%s22317_s3] ss:$16 sps:$4 sm:$0xff]  }
  0x4d   : > { %1156 = vmatprep.subr.bf16.mxu0 %v14193_v40  ;;  %1269 = vmatprep.subr.bf16.mxu1 %v14195_v41  ;;  %v14298_v40 = vld [vmem:[%s22317_s3 + $0x200] ss:$16 sps:$4 sm:$0xff]   ;;  %v14303_v41 = vld [vmem:[%s22317_s3 + $0x1e4] ss:$16 sps:$4 sm:$0xff]  }
  0x4e   : > { %v14312_v48 = vld [vmem:[%s22317_s3 + $0x3c4] ss:$16 sps:$4 sm:$0xff]  }
  0x50   : > { %1157 = vmatpush2.bf16.msra.mxu0 %v14197_v42  ;;  %1270 = vmatpush2.bf16.msra.mxu1 %v14198_v43  ;;  %v14306_v42 = vld [vmem:[%s22317_s3 + $0x3e4] ss:$16 sps:$4 sm:$0xff]   ;;  %v14243_v43 = vld [vmem:[%s15874_s25 + $0x40] ss:$8 sps:$4 sm:$0xff]  }
  0x51   : > { %1158 = vmatprep.subr.bf16.mxu0 %v14199_v44  ;;  %1271 = vmatprep.subr.bf16.mxu1 %v14201_v45  ;;  %v14244_v44 = vld [vmem:[%s15874_s25 + $0x54] ss:$8 sps:$4 sm:$0xff]   ;;  %v14301_v45 = vld [vmem:[%s22317_s3 + $0x1e0] ss:$16 sps:$4 sm:$0xff]  }
  0x54   : > { %1159 = vmatpush2.bf16.msra.mxu0 %v14203_v46  ;;  %1272 = vmatpush2.bf16.msra.mxu1 %v14204_v47  ;;  %v14304_v46 = vld [vmem:[%s22317_s3 + $0x3e0] ss:$16 sps:$4 sm:$0xff]   ;;  %v14309_v47 = vld [vmem:[%s22317_s3 + $0x1c4] ss:$16 sps:$4 sm:$0xff]  }
  0x55   : > { %1160 = vmatprep.subr.bf16.mxu0 %v14205_v49  ;;  %1273 = vmatprep.subr.bf16.mxu1 %v14207_v50  ;;  %v14307_v49 = vld [vmem:[%s22317_s3 + $0x1c0] ss:$16 sps:$4 sm:$0xff]  }
  0x56   : > { %v14310_v50 = vld [vmem:[%s22317_s3 + $0x3c0] ss:$16 sps:$4 sm:$0xff]  }
  0x58   : > { %1161 = vmatpush2.bf16.msra.mxu0 %v14209_v51  ;;  %1274 = vmatpush2.bf16.msra.mxu1 %v14210_v52  ;;  %v14315_v51 = vld [vmem:[%s22317_s3 + $0x1a4] ss:$16 sps:$4 sm:$0xff]  }
  0x59   : > { %1162 = vmatprep.subr.bf16.mxu0 %v14211_v53  ;;  %1275 = vmatprep.subr.bf16.mxu1 %v14213_v54  ;;  %v14318_v52 = vld [vmem:[%s22317_s3 + $0x3a4] ss:$16 sps:$4 sm:$0xff]   ;;  %v14246_v53 = vld [vmem:[%s15874_s25 + $0x50] ss:$8 sps:$4 sm:$0xff]  }
  0x5a   : > { %v14247_v54 = vld [vmem:[%s15874_s25 + $0x64] ss:$8 sps:$4 sm:$0xff]  }
  0x5c   : > { %1163 = vmatpush2.bf16.msra.mxu0 %v14215_v55  ;;  %1276 = vmatpush2.bf16.msra.mxu1 %v14216_v56  ;;  %v14313_v55 = vld [vmem:[%s22317_s3 + $0x1a0] ss:$16 sps:$4 sm:$0xff]  }
  0x5d   : > { %1164 = vmatprep.subr.bf16.mxu0 %v14217_v57  ;;  %1277 = vmatprep.subr.bf16.mxu1 %v14219_v58  ;;  %v14316_v56 = vld [vmem:[%s22317_s3 + $0x3a0] ss:$16 sps:$4 sm:$0xff]   ;;  %v14321_v57 = vld [vmem:[%s22317_s3 + $0x184] ss:$16 sps:$4 sm:$0xff]  }
  0x5e   : > { %v14324_v58 = vld [vmem:[%s22317_s3 + $0x384] ss:$16 sps:$4 sm:$0xff]  }
  0x60   : > { %1165 = vmatpush2.bf16.msra.mxu0 %v14221_v59  ;;  %1278 = vmatpush2.bf16.msra.mxu1 %v14222_v60  ;;  %v14319_v59 = vld [vmem:[%s22317_s3 + $0x180] ss:$16 sps:$4 sm:$0xff]  }
  0x61   : > { %1166 = vmatprep.subr.bf16.mxu0 %v14223_v61  ;;  %1279 = vmatprep.subr.bf16.mxu1 %v14225_v62  ;;  %v14322_v60 = vld [vmem:[%s22317_s3 + $0x380] ss:$16 sps:$4 sm:$0xff]   ;;  %v14327_v61 = vld [vmem:[%s22317_s3 + $0x164] ss:$16 sps:$4 sm:$0xff]  }
  0x62   : > { %v14330_v62 = vld [vmem:[%s22317_s3 + $0x364] ss:$16 sps:$4 sm:$0xff]  }
  0x64   : > { %1167 = vmatpush2.bf16.msra.mxu0 %v14227_v63  ;;  %1280 = vmatpush2.bf16.msra.mxu1 %v14228_v0  ;;  %v14249_v63 = vld [vmem:[%s15874_s25 + $0x60] ss:$8 sps:$4 sm:$0xff]   ;;  %v14250_v0 = vld [vmem:[%s15874_s25 + $0x74] ss:$8 sps:$4 sm:$0xff]  }
  0x65   : > { %2248 = vmatprep.subr.bf16.mxu0 %v14255_v1  ;;  %2361 = vmatprep.subr.bf16.mxu1 %v14258_v2  ;;  %v14325_v1 = vld [vmem:[%s22317_s3 + $0x160] ss:$16 sps:$4 sm:$0xff]  }
  0x66   : > { %v14328_v2 = vld [vmem:[%s22317_s3 + $0x360] ss:$16 sps:$4 sm:$0xff]  }
  0x67   : > { %1169 = vmatmul.mubr.bf16.vlgmr.msra.gmra.mxu0 %v14231_v3  ;;  %1282 = vmatmul.mubr.bf16.vlgmr.msra.gmra.mxu1 %v14231_v3  ;;  %v14252_v3 = vld [vmem:[%s15874_s25 + $0x70] ss:$8 sps:$4 sm:$0xff]  }
  0x68   : > { %1178 = vmatprep.mubr.bf16.mxu0 %v14232_v4  ;;  %1291 = vmatprep.mubr.bf16.mxu1 %v14232_v4  ;;  %v14333_v4 = vld [vmem:[%s22317_s3 + $0x144] ss:$16 sps:$4 sm:$0xff]  }
  0x69   : > { %2249 = vmatpush1.bf16.msra.mxu0 %v14253_v5  ;;  %2362 = vmatpush1.bf16.msra.mxu1 %v14256_v6  ;;  %v14336_v5 = vld [vmem:[%s22317_s3 + $0x344] ss:$16 sps:$4 sm:$0xff]   ;;  %v14331_v6 = vld [vmem:[%s22317_s3 + $0x140] ss:$16 sps:$4 sm:$0xff]  }
  0x6a   : > { %2250 = vmatprep.subr.bf16.mxu0 %v14261_v7  ;;  %2363 = vmatprep.subr.bf16.mxu1 %v14264_v8  ;;  %v14334_v7 = vld [vmem:[%s22317_s3 + $0x340] ss:$16 sps:$4 sm:$0xff]   ;;  %v14339_v8 = vld [vmem:[%s22317_s3 + $0x124] ss:$16 sps:$4 sm:$0xff]  }
  0x6d   : > { %2251 = vmatpush1.bf16.msra.mxu0 %v14259_v9  ;;  %2364 = vmatpush1.bf16.msra.mxu1 %v14262_v10  ;;  %v14342_v9 = vld [vmem:[%s22317_s3 + $0x324] ss:$16 sps:$4 sm:$0xff]   ;;  %v14337_v10 = vld [vmem:[%s22317_s3 + $0x120] ss:$16 sps:$4 sm:$0xff]  }
  0x6e   : > { %2252 = vmatprep.subr.bf16.mxu0 %v14267_v11  ;;  %2365 = vmatprep.subr.bf16.mxu1 %v14270_v12  ;;  %v14340_v11 = vld [vmem:[%s22317_s3 + $0x320] ss:$16 sps:$4 sm:$0xff]   ;;  %v14345_v12 = vld [vmem:[%s22317_s3 + $0x104] ss:$16 sps:$4 sm:$0xff]  }
  0x6f   : > { %1179 = vmatmul.mubr.bf16.gmra.mxu0 %v14234_v13  ;;  %1292 = vmatmul.mubr.bf16.gmra.mxu1 %v14234_v13  ;;  %v14348_v13 = vld [vmem:[%s22317_s3 + $0x304] ss:$16 sps:$4 sm:$0xff]  }
  0x70   : > { %1188 = vmatprep.mubr.bf16.mxu0 %v14235_v14  ;;  %1301 = vmatprep.mubr.bf16.mxu1 %v14235_v14  ;;  %v14343_v14 = vld [vmem:[%s22317_s3 + $0x100] ss:$16 sps:$4 sm:$0xff]  }
  0x71   : > { %2253 = vmatpush1.bf16.msra.mxu0 %v14265_v15  ;;  %2366 = vmatpush1.bf16.msra.mxu1 %v14268_v16  ;;  %v14346_v15 = vld [vmem:[%s22317_s3 + $0x300] ss:$16 sps:$4 sm:$0xff]   ;;  %v14351_v16 = vld [vmem:[%s22317_s3 + $0xec] ss:$16 sps:$4 sm:$0xff]  }
  0x72   : > { %2254 = vmatprep.subr.bf16.mxu0 %v14273_v17  ;;  %2367 = vmatprep.subr.bf16.mxu1 %v14276_v18  ;;  %v14354_v17 = vld [vmem:[%s22317_s3 + $0x2ec] ss:$16 sps:$4 sm:$0xff]   ;;  %v716_v18 = vlaneseq }
  0x75   : > { %2255 = vmatpush1.bf16.msra.mxu0 %v14271_v19  ;;  %2368 = vmatpush1.bf16.msra.mxu1 %v14274_v20  ;;  %v16147_v19 = vshrl.u32 %v716_v18, 7  ;;  %v714_v20 = vld [vmem:[%s22319_s1] sm:$0xf] }
  0x76   : > { %2256 = vmatprep.subr.bf16.mxu0 %v14279_v21  ;;  %2369 = vmatprep.subr.bf16.mxu1 %v14282_v22 }
  0x77   : > { %1189 = vmatmul.mubr.bf16.gmra.mxu0 %v14237_v23  ;;  %1302 = vmatmul.mubr.bf16.gmra.mxu1 %v14237_v23  ;;  %22318 = vst [vmem:[#allocation12_spill] sm:$0xff] %v16147_v19  ;;  %v16153_v21 = vsub.s32 1, %v16147_v19  ;;  %v16156_v22 = vsub.s32 3, %v16147_v19  ;;  %v16159_v23 = vsub.s32 0, %v16147_v19 }
  0x78   : > { %1198 = vmatprep.mubr.bf16.mxu0 %v14238_v24  ;;  %1311 = vmatprep.mubr.bf16.mxu1 %v14238_v24  ;;  %v16162_v24 = vsub.s32 2, %v16147_v19 }
  0x79   : > { %2257 = vmatpush1.bf16.msra.mxu0 %v14277_v25  ;;  %2370 = vmatpush1.bf16.msra.mxu1 %v14280_v26  ;;  %22320 = vst [vmem:[#allocation13_spill] sm:$0xff] %v16153_v21  ;;  %22321 = vst [vmem:[#allocation14_spill] sm:$0xff] %v16156_v22 }
  0x7a   : > { %2258 = vmatprep.subr.bf16.mxu0 %v14285_v27  ;;  %2371 = vmatprep.subr.bf16.mxu1 %v14288_v28  ;;  %22322 = vst [vmem:[#allocation15_spill] sm:$0xff] %v16159_v23  ;;  %22323 = vst [vmem:[#allocation16_spill] sm:$0xff] %v16162_v24  ;;  %v16165_v27 = vrot.slane %v714_v20, %v16153_v21  ;;  %v16168_v28 = vrot.slane %v714_v20, %v16156_v22 }
  0x7d   : > { %2259 = vmatpush1.bf16.msra.mxu0 %v14283_v29  ;;  %2372 = vmatpush1.bf16.msra.mxu1 %v14286_v31  ;;  %v16171_v29 = vrot.slane %v714_v20, %v16159_v23 }
  0x7e   : > { %2260 = vmatprep.subr.bf16.mxu0 %v14291_v33  ;;  %2373 = vmatprep.subr.bf16.mxu1 %v14294_v34 }
  0x7f   : > { %1199 = vmatmul.mubr.bf16.gmra.mxu0 %v14240_v30  ;;  %1312 = vmatmul.mubr.bf16.gmra.mxu1 %v14240_v30  ;;  %v16174_v30 = vrot.slane %v714_v20, %v16162_v24 }
  0x80   : > { %1208 = vmatprep.mubr.bf16.mxu0 %v14241_v32  ;;  %1321 = vmatprep.mubr.bf16.mxu1 %v14241_v32 }
  0x81   : > { %2261 = vmatpush1.bf16.msra.mxu0 %v14289_v35  ;;  %2374 = vmatpush1.bf16.msra.mxu1 %v14292_v36 }
  0x82   : > { %2262 = vmatprep.subr.bf16.mxu0 %v14297_v37  ;;  %2375 = vmatprep.subr.bf16.mxu1 %v14300_v38 }
  0x85   : > { %2263 = vmatpush1.bf16.msra.mxu0 %v14295_v39  ;;  %2376 = vmatpush1.bf16.msra.mxu1 %v14298_v40 }
  0x86   : > { %2264 = vmatprep.subr.bf16.mxu0 %v14303_v41  ;;  %2377 = vmatprep.subr.bf16.mxu1 %v14306_v42 }
  0x87   : > { %1209 = vmatmul.mubr.bf16.gmra.mxu0 %v14243_v43  ;;  %1322 = vmatmul.mubr.bf16.gmra.mxu1 %v14243_v43 }
  0x88   : > { %1218 = vmatprep.mubr.bf16.mxu0 %v14244_v44  ;;  %1331 = vmatprep.mubr.bf16.mxu1 %v14244_v44 }
  0x89   : > { %2265 = vmatpush2.bf16.msra.mxu0 %v14301_v45  ;;  %2378 = vmatpush2.bf16.msra.mxu1 %v14304_v46 }
  0x8a   : > { %2266 = vmatprep.subr.bf16.mxu0 %v14309_v47  ;;  %2379 = vmatprep.subr.bf16.mxu1 %v14312_v48 }
  0x8d   : > { %2267 = vmatpush2.bf16.msra.mxu0 %v14307_v49  ;;  %2380 = vmatpush2.bf16.msra.mxu1 %v14310_v50 }
  0x8e   : > { %2268 = vmatprep.subr.bf16.mxu0 %v14315_v51  ;;  %2381 = vmatprep.subr.bf16.mxu1 %v14318_v52 }
  0x8f   : > { %1219 = vmatmul.mubr.bf16.gmra.mxu0 %v14246_v53  ;;  %1332 = vmatmul.mubr.bf16.gmra.mxu1 %v14246_v53 }
  0x90   : > { %1228 = vmatprep.mubr.bf16.mxu0 %v14247_v54  ;;  %1341 = vmatprep.mubr.bf16.mxu1 %v14247_v54 }
  0x91   : > { %2269 = vmatpush2.bf16.msra.mxu0 %v14313_v55  ;;  %2382 = vmatpush2.bf16.msra.mxu1 %v14316_v56 }
  0x92   : > { %2270 = vmatprep.subr.bf16.mxu0 %v14321_v57  ;;  %2383 = vmatprep.subr.bf16.mxu1 %v14324_v58 }
  0x95   : > { %2271 = vmatpush2.bf16.msra.mxu0 %v14319_v59  ;;  %2384 = vmatpush2.bf16.msra.mxu1 %v14322_v60  ;;  %v14349_v59 = vld [vmem:[%s22317_s3 + $0xe8] ss:$16 sps:$4 sm:$0xff]  }
  0x96   : > { %2272 = vmatprep.subr.bf16.mxu0 %v14327_v61  ;;  %2385 = vmatprep.subr.bf16.mxu1 %v14330_v62  ;;  %v14352_v60 = vld [vmem:[%s22317_s3 + $0x2e8] ss:$16 sps:$4 sm:$0xff]  }
  0x97   : > { %1229 = vmatmul.mubr.bf16.gmra.mxu0 %v14249_v63  ;;  %1342 = vmatmul.mubr.bf16.gmra.mxu1 %v14249_v63 }
  0x98   : > { %1238 = vmatprep.mubr.bf16.mxu0 %v14250_v0  ;;  %1351 = vmatprep.mubr.bf16.mxu1 %v14250_v0 }
  0x99   : > { %2273 = vmatpush2.bf16.msra.mxu0 %v14325_v1  ;;  %2386 = vmatpush2.bf16.msra.mxu1 %v14328_v2 }
  0x9a   : > { %2274 = vmatprep.subr.bf16.mxu0 %v14333_v4  ;;  %2387 = vmatprep.subr.bf16.mxu1 %v14336_v5  ;;  %v14360_v4 = vld [vmem:[%s22317_s3 + $0x2cc] ss:$16 sps:$4 sm:$0xff]  }
  0x9d   : > { %2275 = vmatpush2.bf16.msra.mxu0 %v14331_v6  ;;  %2388 = vmatpush2.bf16.msra.mxu1 %v14334_v7 }
  0x9e   : > { %2276 = vmatprep.subr.bf16.mxu0 %v14339_v8  ;;  %2389 = vmatprep.subr.bf16.mxu1 %v14342_v9 }
  0x9f   : > { %1239 = vmatmul.mubr.bf16.gmra.mxu0 %v14252_v3  ;;  %1352 = vmatmul.mubr.bf16.gmra.mxu1 %v14252_v3  ;;  %v14357_v3 = vld [vmem:[%s22317_s3 + $0xcc] ss:$16 sps:$4 sm:$0xff]  }
  0xa1   : > { %2277 = vmatpush2.bf16.msra.mxu0 %v14337_v10  ;;  %2390 = vmatpush2.bf16.msra.mxu1 %v14340_v11 }
  0xa2   : > { %2278 = vmatprep.subr.bf16.mxu0 %v14345_v12  ;;  %2391 = vmatprep.subr.bf16.mxu1 %v14348_v13 }
  0xa5   : > { %2279 = vmatpush2.bf16.msra.mxu0 %v14343_v14  ;;  %2392 = vmatpush2.bf16.msra.mxu1 %v14346_v15  ;;  %v14355_v14 = vld [vmem:[%s22317_s3 + $0xc8] ss:$16 sps:$4 sm:$0xff]  }
  0xa6   : > { %2474 = vmatprep.subr.bf16.mxu0 %v14351_v16  ;;  %2587 = vmatprep.subr.bf16.mxu1 %v14354_v17  ;;  %v14358_v15 = vld [vmem:[%s22317_s3 + $0x2c8] ss:$16 sps:$4 sm:$0xff]  }
 0x127   : > { %v1170_v25 = vpop.f32.mrf.mxu0  ;;  %v1283_v26 = vpop.f32.mrf.mxu1 }
 0x128   : > { %v1171_v39 = vadd.f32 %v1170_v25, %v16171_v29  ;;  %v1284_v40 = vadd.f32 %v1283_v26, %v16174_v30  ;;  %v14363_v25 = vld [vmem:[%s22317_s3 + $0xac] ss:$16 sps:$4 sm:$0xff]  }
 0x129   : > { %v1172_v31 = vpop.f32.mrf.mxu0  ;;  %v1285_v32 = vpop.f32.mrf.mxu1  ;;  %v14366_v26 = vld [vmem:[%s22317_s3 + $0x2ac] ss:$16 sps:$4 sm:$0xff]  }
 0x12a   : > { %v1173_v35 = vadd.f32 %v1172_v31, %v16165_v27  ;;  %v1286_v36 = vadd.f32 %v1285_v32, %v16168_v28  ;;  %v1362_v53 = vmax.f32 %v1171_v39, 0.0  ;;  %v1364_v54 = vmax.f32 %v1284_v40, 0.0  ;;  %v14369_v39 = vld [vmem:[%s22317_s3 + $0x8c] ss:$16 sps:$4 sm:$0xff]  }
 0x12b   : > { %v1174_v33 = vpop.f32.mrf.mxu0  ;;  %v1287_v34 = vpop.f32.mrf.mxu1 }
 0x12c   : > { %v1175_v37 = vadd.f32 %v1174_v33, %v16171_v29  ;;  %v1288_v38 = vadd.f32 %v1287_v34, %v16174_v30  ;;  %v1363_v49 = vmax.f32 %v1173_v35, 0.0  ;;  %v1365_v50 = vmax.f32 %v1286_v36, 0.0  ;;  %v14361_v34 = vld [vmem:[%s22317_s3 + $0xa8] ss:$16 sps:$4 sm:$0xff]  }
 0x12d   : > { %v1176_v41 = vpop.f32.mrf.mxu0  ;;  %v1289_v42 = vpop.f32.mrf.mxu1 }
 0x12e   : > { %v1177_v43 = vadd.f32 %v1176_v41, %v16165_v27  ;;  %v1290_v44 = vadd.f32 %v1289_v42, %v16168_v28  ;;  %v1366_v45 = vmax.f32 %v1175_v37, 0.0  ;;  %v1368_v46 = vmax.f32 %v1288_v38, 0.0  ;;  %v14364_v38 = vld [vmem:[%s22317_s3 + $0x2a8] ss:$16 sps:$4 sm:$0xff]  }
 0x12f   : > { %v1180_v47 = vpop.f32.mrf.mxu0  ;;  %v1293_v48 = vpop.f32.mrf.mxu1 }
 0x130   : > { %v1367_v51 = vmax.f32 %v1177_v43, 0.0  ;;  %v1369_v52 = vmax.f32 %v1290_v44, 0.0  ;;  %v16194_v61 = vpack.c.bf16 %v1366_v45, %v1362_v53  ;;  %v16196_v62 = vpack.c.bf16 %v1368_v46, %v1364_v54  ;;  %v14372_v43 = vld [vmem:[%s22317_s3 + $0x28c] ss:$16 sps:$4 sm:$0xff]  }
 0x131   : > { %v1182_v55 = vpop.f32.mrf.mxu0  ;;  %v1295_v56 = vpop.f32.mrf.mxu1  ;;  %v1181_v63 = vadd.f32 %v1180_v47, %v16171_v29  ;;  %v1294_v10 = vadd.f32 %v1293_v48, %v16174_v30 }
 0x132   : > { %v16184_v57 = vpack.c.bf16 %v1367_v51, %v1363_v49  ;;  %v16186_v58 = vpack.c.bf16 %v1369_v52, %v1365_v50  ;;  %v1183_v0 = vadd.f32 %v1182_v55, %v16165_v27  ;;  %v1296_v7 = vadd.f32 %v1295_v56, %v16168_v28  ;;  %v14367_v52 = vld [vmem:[%s22317_s3 + $0x88] ss:$16 sps:$4 sm:$0xff]  }
 0x133   : > { %v1184_v1 = vpop.f32.mrf.mxu0  ;;  %v1297_v2 = vpop.f32.mrf.mxu1  ;;  %v1370_v16 = vmax.f32 %v1181_v63, 0.0  ;;  %v1372_v40 = vmax.f32 %v1294_v10, 0.0  ;;  %v14370_v56 = vld [vmem:[%s22317_s3 + $0x288] ss:$16 sps:$4 sm:$0xff]  }
 0x134   : > { %v1185_v5 = vadd.f32 %v1184_v1, %v16171_v29  ;;  %v1298_v6 = vadd.f32 %v1297_v2, %v16174_v30  ;;  %2280 = vmatprep.mubr.bf16.mxu0 %v16184_v57  ;;  %2393 = vmatprep.mubr.bf16.mxu1 %v16186_v58  ;;  %v1371_v17 = vmax.f32 %v1183_v0, 0.0  ;;  %v1373_v35 = vmax.f32 %v1296_v7, 0.0  ;;  %v14373_v10 = vld [vmem:[%s22317_s3 + $0x68] ss:$16 sps:$4 sm:$0xff]  }
 0x135   : > { %v1186_v8 = vpop.f32.mrf.mxu0  ;;  %v1299_v9 = vpop.f32.mrf.mxu1  ;;  %2281 = vmatmul.mubr.bf16.vlgmr.msra.gmra.mxu0 %v16194_v61  ;;  %2394 = vmatmul.mubr.bf16.vlgmr.msra.gmra.mxu1 %v16196_v62 }
 0x136   : > { %v1374_v11 = vmax.f32 %v1185_v5, 0.0  ;;  %v1187_v12 = vadd.f32 %v1186_v8, %v16165_v27  ;;  %v1300_v13 = vadd.f32 %v1299_v9, %v16168_v28  ;;  %2475 = vmatpush1.bf16.msra.mxu0 %v14349_v59  ;;  %2588 = vmatpush1.bf16.msra.mxu1 %v14352_v60  ;;  %v1376_v31 = vmax.f32 %v1298_v6, 0.0  ;;  %v14375_v59 = vld [vmem:[%s22317_s3 + $0x6c] ss:$16 sps:$4 sm:$0xff]  }
 0x137   : > { %v1190_v18 = vpop.f32.mrf.mxu0  ;;  %v1303_v20 = vpop.f32.mrf.mxu1  ;;  %2476 = vmatprep.subr.bf16.mxu0 %v14357_v3  ;;  %2589 = vmatprep.subr.bf16.mxu1 %v14360_v4  ;;  %v14378_v6 = vld [vmem:[%s22317_s3 + $0x26c] ss:$16 sps:$4 sm:$0xff]  }
 0x138   : > { %v1375_v32 = vmax.f32 %v1187_v12, 0.0  ;;  %v1377_v33 = vmax.f32 %v1300_v13, 0.0  ;;  %v16237_v41 = vpack.c.bf16 %v1374_v11, %v1370_v16  ;;  %v16248_v49 = vpack.c.bf16 %v1376_v31, %v1372_v40 }
 0x139   : > { %v1192_v36 = vpop.f32.mrf.mxu0  ;;  %v1305_v37 = vpop.f32.mrf.mxu1  ;;  %v1191_v53 = vadd.f32 %v1190_v18, %v16171_v29  ;;  %v1304_v60 = vadd.f32 %v1303_v20, %v16174_v30  ;;  %v14384_v20 = vld [vmem:[%s22317_s3 + $0x24c] ss:$16 sps:$4 sm:$0xff]  }
 0x13a   : > { %2477 = vmatpush1.bf16.msra.mxu0 %v14355_v14  ;;  %2590 = vmatpush1.bf16.msra.mxu1 %v14358_v15  ;;  %v16239_v42 = vpack.c.bf16 %v1375_v32, %v1371_v17  ;;  %v1193_v44 = vadd.f32 %v1192_v36, %v16165_v27  ;;  %v1306_v45 = vadd.f32 %v1305_v37, %v16168_v28  ;;  %v14376_v14 = vld [vmem:[%s22317_s3 + $0x268] ss:$16 sps:$4 sm:$0xff]   ;;  %v14381_v15 = vld [vmem:[%s22317_s3 + $0x4c] ss:$16 sps:$4 sm:$0xff]  }
 0x13b   : > { %v1194_v46 = vpop.f32.mrf.mxu0  ;;  %v1307_v47 = vpop.f32.mrf.mxu1  ;;  %v16246_v48 = vpack.c.bf16 %v1377_v33, %v1373_v35  ;;  %2478 = vmatprep.subr.bf16.mxu0 %v14363_v25  ;;  %2591 = vmatprep.subr.bf16.mxu1 %v14366_v26  ;;  %v1378_v11 = vmax.f32 %v1191_v53, 0.0  ;;  %v1380_v16 = vmax.f32 %v1304_v60, 0.0  ;;  %v14379_v37 = vld [vmem:[%s22317_s3 + $0x48] ss:$16 sps:$4 sm:$0xff]  }
 0x13c   : > { %v1195_v50 = vadd.f32 %v1194_v46, %v16171_v29  ;;  %v1308_v51 = vadd.f32 %v1307_v47, %v16174_v30  ;;  %2290 = vmatprep.mubr.bf16.mxu0 %v16239_v42  ;;  %v1379_v1 = vmax.f32 %v1193_v44, 0.0  ;;  %v1381_v2 = vmax.f32 %v1306_v45, 0.0  ;;  %v14387_v44 = vld [vmem:[%s22317_s3 + $0x2c] ss:$16 sps:$4 sm:$0xff]  }
 0x13d   : > { %2403 = vmatprep.mubr.bf16.mxu1 %v16246_v48  ;;  %v1196_v54 = vpop.f32.mrf.mxu0  ;;  %v1309_v55 = vpop.f32.mrf.mxu1  ;;  %2291 = vmatmul.mubr.bf16.gmra.mxu0 %v16237_v41 }
 0x13e   : > { %v1197_v63 = vadd.f32 %v1196_v54, %v16165_v27  ;;  %v1310_v0 = vadd.f32 %v1309_v55, %v16168_v28  ;;  %2404 = vmatmul.mubr.bf16.gmra.mxu1 %v16248_v49  ;;  %2479 = vmatpush1.bf16.msra.mxu0 %v14361_v34  ;;  %v1382_v3 = vmax.f32 %v1195_v50, 0.0  ;;  %v1384_v7 = vmax.f32 %v1308_v51, 0.0  ;;  %v14390_v55 = vld [vmem:[%s22317_s3 + $0x22c] ss:$16 sps:$4 sm:$0xff]  }
 0x13f   : > { %2592 = vmatpush1.bf16.msra.mxu1 %v14364_v38  ;;  %v1200_v4 = vpop.f32.mrf.mxu0  ;;  %v1313_v5 = vpop.f32.mrf.mxu1  ;;  %2480 = vmatprep.subr.bf16.mxu0 %v14369_v39 }
 0x140   : > { %v1383_v8 = vmax.f32 %v1197_v63, 0.0  ;;  %v1385_v9 = vmax.f32 %v1310_v0, 0.0  ;;  %2593 = vmatprep.subr.bf16.mxu1 %v14372_v43  ;;  %v16288_v25 = vpack.c.bf16 %v1382_v3, %v1378_v11  ;;  %v16292_v34 = vpack.c.bf16 %v1384_v7, %v1380_v16  ;;  %v14382_v43 = vld [vmem:[%s22317_s3 + $0x248] ss:$16 sps:$4 sm:$0xff]  }
 0x141   : > { %v1202_v12 = vpop.f32.mrf.mxu0  ;;  %v1315_v13 = vpop.f32.mrf.mxu1  ;;  %v1201_v38 = vadd.f32 %v1200_v4, %v16171_v29  ;;  %v1314_v45 = vadd.f32 %v1313_v5, %v16174_v30  ;;  %v14385_v63 = vld [vmem:[%s22317_s3 + $0x28] ss:$16 sps:$4 sm:$0xff]   ;;  %v14393_v4 = vld [vmem:[%s22317_s3 + $0xc] ss:$16 sps:$4 sm:$0xff]  }
 0x142   : > { %2481 = vmatpush1.bf16.msra.mxu0 %v14367_v52  ;;  %v16281_v17 = vpack.c.bf16 %v1383_v8, %v1379_v1  ;;  %v16283_v18 = vpack.c.bf16 %v1385_v9, %v1381_v2  ;;  %v1203_v26 = vadd.f32 %v1202_v12, %v16165_v27  ;;  %v1316_v31 = vadd.f32 %v1315_v13, %v16168_v28  ;;  %v14388_v3 = vld [vmem:[%s22317_s3 + $0x228] ss:$16 sps:$4 sm:$0xff]   ;;  %v14396_v8 = vld [vmem:[%s22317_s3 + $0x20c] ss:$16 sps:$4 sm:$0xff]  }
 0x143   : > { %2594 = vmatpush1.bf16.msra.mxu1 %v14370_v56  ;;  %v1204_v32 = vpop.f32.mrf.mxu0  ;;  %v1317_v33 = vpop.f32.mrf.mxu1  ;;  %2482 = vmatprep.subr.bf16.mxu0 %v14375_v59  ;;  %v1386_v0 = vmax.f32 %v1201_v38, 0.0  ;;  %v1388_v5 = vmax.f32 %v1314_v45, 0.0 }
 0x144   : > { %v1205_v35 = vadd.f32 %v1204_v32, %v16171_v29  ;;  %v1318_v36 = vadd.f32 %v1317_v33, %v16174_v30  ;;  %2300 = vmatprep.mubr.bf16.mxu0 %v16281_v17  ;;  %2413 = vmatprep.mubr.bf16.mxu1 %v16283_v18  ;;  %v1387_v50 = vmax.f32 %v1203_v26, 0.0  ;;  %v1389_v51 = vmax.f32 %v1316_v31, 0.0  ;;  %v14394_v33 = vld [vmem:[%s22317_s3 + $0x208] ss:$16 sps:$4 sm:$0xff]  }
 0x145   : > { %v1206_v39 = vpop.f32.mrf.mxu0  ;;  %v1319_v40 = vpop.f32.mrf.mxu1  ;;  %2301 = vmatmul.mubr.bf16.gmra.mxu0 %v16288_v25  ;;  %2595 = vmatprep.subr.bf16.mxu1 %v14378_v6 }
 0x146   : > { %v1207_v46 = vadd.f32 %v1206_v39, %v16165_v27  ;;  %v1320_v47 = vadd.f32 %v1319_v40, %v16168_v28  ;;  %2414 = vmatmul.mubr.bf16.gmra.mxu1 %v16292_v34  ;;  %2483 = vmatpush1.bf16.msra.mxu0 %v14373_v10  ;;  %v1390_v52 = vmax.f32 %v1205_v35, 0.0  ;;  %v1392_v56 = vmax.f32 %v1318_v36, 0.0  ;;  %v14399_v35 = vld [vmem:[%s22317_s3 + $0x1ec] ss:$16 sps:$4 sm:$0xff]  }
 0x147   : > { %2596 = vmatpush1.bf16.msra.mxu1 %v14376_v14  ;;  %v1210_v53 = vpop.f32.mrf.mxu0  ;;  %v1323_v54 = vpop.f32.mrf.mxu1  ;;  %2484 = vmatprep.subr.bf16.mxu0 %v14381_v15 }
 0x148   : > { %v1391_v59 = vmax.f32 %v1207_v46, 0.0  ;;  %v1393_v60 = vmax.f32 %v1320_v47, 0.0  ;;  %2597 = vmatprep.subr.bf16.mxu1 %v14384_v20  ;;  %v16332_v9 = vpack.c.bf16 %v1390_v52, %v1386_v0  ;;  %v16336_v14 = vpack.c.bf16 %v1392_v56, %v1388_v5  ;;  %v14391_v20 = vld [vmem:[%s22317_s3 + $0x8] ss:$16 sps:$4 sm:$0xff]   ;;  %v14402_v46 = vld [vmem:[%s22317_s3 + $0x3ec] ss:$16 sps:$4 sm:$0xff]  }
 0x149   : > { %v1212_v1 = vpop.f32.mrf.mxu0  ;;  %v1325_v2 = vpop.f32.mrf.mxu1  ;;  %v1211_v26 = vadd.f32 %v1210_v53, %v16171_v29  ;;  %v1324_v36 = vadd.f32 %v1323_v54, %v16174_v30  ;;  %v14397_v52 = vld [vmem:[%s22317_s3 + $0x1e8] ss:$16 sps:$4 sm:$0xff]  }
 0x14a   : > { %2485 = vmatpush1.bf16.msra.mxu0 %v14379_v37  ;;  %v16325_v6 = vpack.c.bf16 %v1391_v59, %v1387_v50  ;;  %v16327_v7 = vpack.c.bf16 %v1393_v60, %v1389_v51  ;;  %v1213_v10 = vadd.f32 %v1212_v1, %v16165_v27  ;;  %v1326_v11 = vadd.f32 %v1325_v2, %v16168_v28  ;;  %v14400_v56 = vld [vmem:[%s22317_s3 + $0x3e8] ss:$16 sps:$4 sm:$0xff]   ;;  %v14405_v59 = vld [vmem:[%s22317_s3 + $0x1cc] ss:$16 sps:$4 sm:$0xff]  }
 0x14b   : > { %2598 = vmatpush1.bf16.msra.mxu1 %v14382_v43  ;;  %v1214_v12 = vpop.f32.mrf.mxu0  ;;  %v1327_v13 = vpop.f32.mrf.mxu1  ;;  %2486 = vmatprep.subr.bf16.mxu0 %v14387_v44  ;;  %v1394_v53 = vmax.f32 %v1211_v26, 0.0  ;;  %v1396_v60 = vmax.f32 %v1324_v36, 0.0  ;;  %v14408_v1 = vld [vmem:[%s22317_s3 + $0x3cc] ss:$16 sps:$4 sm:$0xff]   ;;  %v14406_v26 = vld [vmem:[%s22317_s3 + $0x3c8] ss:$16 sps:$4 sm:$0xff]  }
 0x14c   : > { %v1215_v15 = vadd.f32 %v1214_v12, %v16171_v29  ;;  %v1328_v16 = vadd.f32 %v1327_v13, %v16174_v30  ;;  %2310 = vmatprep.mubr.bf16.mxu0 %v16325_v6  ;;  %2423 = vmatprep.mubr.bf16.mxu1 %v16327_v7  ;;  %v1395_v39 = vmax.f32 %v1213_v10, 0.0  ;;  %v1397_v40 = vmax.f32 %v1326_v11, 0.0  ;;  %v14403_v13 = vld [vmem:[%s22317_s3 + $0x1c8] ss:$16 sps:$4 sm:$0xff]  }
 0x14d   : > { %v1216_v31 = vpop.f32.mrf.mxu0  ;;  %v1329_v32 = vpop.f32.mrf.mxu1  ;;  %2311 = vmatmul.mubr.bf16.gmra.mxu0 %v16332_v9  ;;  %2599 = vmatprep.subr.bf16.mxu1 %v14390_v55 }
 0x14e   : > { %v1217_v37 = vadd.f32 %v1216_v31, %v16165_v27  ;;  %v1330_v38 = vadd.f32 %v1329_v32, %v16168_v28  ;;  %2424 = vmatmul.mubr.bf16.gmra.mxu1 %v16336_v14  ;;  %2487 = vmatpush1.bf16.msra.mxu0 %v14385_v63  ;;  %v1398_v43 = vmax.f32 %v1215_v15, 0.0  ;;  %v1400_v47 = vmax.f32 %v1328_v16, 0.0  ;;  %v14411_v31 = vld [vmem:[%s22317_s3 + $0x1ac] ss:$16 sps:$4 sm:$0xff]  }
 0x14f   : > { %2600 = vmatpush1.bf16.msra.mxu1 %v14388_v3  ;;  %v1220_v44 = vpop.f32.mrf.mxu0  ;;  %v1333_v45 = vpop.f32.mrf.mxu1  ;;  %2488 = vmatprep.subr.bf16.mxu0 %v14393_v4 }
 0x150   : > { %v1399_v50 = vmax.f32 %v1217_v37, 0.0  ;;  %v1401_v51 = vmax.f32 %v1330_v38, 0.0  ;;  %2601 = vmatprep.subr.bf16.mxu1 %v14396_v8  ;;  %v16376_v2 = vpack.c.bf16 %v1398_v43, %v1394_v53  ;;  %v16380_v10 = vpack.c.bf16 %v1400_v47, %v1396_v60  ;;  %v14414_v43 = vld [vmem:[%s22317_s3 + $0x3ac] ss:$16 sps:$4 sm:$0xff]   ;;  %v14409_v47 = vld [vmem:[%s22317_s3 + $0x1a8] ss:$16 sps:$4 sm:$0xff]  }
 0x151   : > { %v1222_v54 = vpop.f32.mrf.mxu0  ;;  %v1335_v55 = vpop.f32.mrf.mxu1  ;;  %v1221_v15 = vadd.f32 %v1220_v44, %v16171_v29  ;;  %v1334_v32 = vadd.f32 %v1333_v45, %v16174_v30  ;;  %v14412_v53 = vld [vmem:[%s22317_s3 + $0x3a8] ss:$16 sps:$4 sm:$0xff]   ;;  %v14420_v60 = vld [vmem:[%s22317_s3 + $0x38c] ss:$16 sps:$4 sm:$0xff]  }
 0x152   : > { %2489 = vmatpush1.bf16.msra.mxu0 %v14391_v20  ;;  %v16369_v63 = vpack.c.bf16 %v1399_v50, %v1395_v39  ;;  %v16371_v0 = vpack.c.bf16 %v1401_v51, %v1397_v40  ;;  %v1223_v3 = vadd.f32 %v1222_v54, %v16165_v27  ;;  %v1336_v4 = vadd.f32 %v1335_v55, %v16168_v28  ;;  %v14417_v54 = vld [vmem:[%s22317_s3 + $0x18c] ss:$16 sps:$4 sm:$0xff]  }
 0x153   : > { %2602 = vmatpush1.bf16.msra.mxu1 %v14394_v33  ;;  %v1224_v5 = vpop.f32.mrf.mxu0  ;;  %v1337_v8 = vpop.f32.mrf.mxu1  ;;  %2490 = vmatprep.subr.bf16.mxu0 %v14399_v35  ;;  %v1402_v50 = vmax.f32 %v1221_v15, 0.0  ;;  %v1404_v55 = vmax.f32 %v1334_v32, 0.0  ;;  %v14415_v15 = vld [vmem:[%s22317_s3 + $0x188] ss:$16 sps:$4 sm:$0xff]   ;;  %v14423_v32 = vld [vmem:[%s22317_s3 + $0x16c] ss:$16 sps:$4 sm:$0xff]  }
 0x154   : > { %v1225_v11 = vadd.f32 %v1224_v5, %v16171_v29  ;;  %v1338_v12 = vadd.f32 %v1337_v8, %v16174_v30  ;;  %2320 = vmatprep.mubr.bf16.mxu0 %v16369_v63  ;;  %2433 = vmatprep.mubr.bf16.mxu1 %v16371_v0  ;;  %v1403_v36 = vmax.f32 %v1223_v3, 0.0  ;;  %v1405_v37 = vmax.f32 %v1336_v4, 0.0 }
 0x155   : > { %v1226_v16 = vpop.f32.mrf.mxu0  ;;  %v1339_v20 = vpop.f32.mrf.mxu1  ;;  %2321 = vmatmul.mubr.bf16.gmra.mxu0 %v16376_v2  ;;  %2603 = vmatprep.subr.bf16.mxu1 %v14402_v46 }
 0x156   : > { %v1227_v33 = vadd.f32 %v1226_v16, %v16165_v27  ;;  %v1340_v35 = vadd.f32 %v1339_v20, %v16168_v28  ;;  %2434 = vmatmul.mubr.bf16.gmra.mxu1 %v16380_v10  ;;  %2491 = vmatpush2.bf16.msra.mxu0 %v14397_v52  ;;  %v1406_v38 = vmax.f32 %v1225_v11, 0.0  ;;  %v1408_v44 = vmax.f32 %v1338_v12, 0.0 }
 0x157   : > { %2604 = vmatpush2.bf16.msra.mxu1 %v14400_v56  ;;  %v1230_v39 = vpop.f32.mrf.mxu0  ;;  %v1343_v40 = vpop.f32.mrf.mxu1  ;;  %2492 = vmatprep.subr.bf16.mxu0 %v14405_v59 }
 0x158   : > { %v1407_v45 = vmax.f32 %v1227_v33, 0.0  ;;  %v1409_v46 = vmax.f32 %v1340_v35, 0.0  ;;  %2605 = vmatprep.subr.bf16.mxu1 %v14408_v1  ;;  %v16420_v1 = vpack.c.bf16 %v1406_v38, %v1402_v50  ;;  %v16424_v11 = vpack.c.bf16 %v1408_v44, %v1404_v55 }
 0x159   : > { %v1232_v51 = vpop.f32.mrf.mxu0  ;;  %v1345_v52 = vpop.f32.mrf.mxu1  ;;  %v1231_v16 = vadd.f32 %v1230_v39, %v16171_v29  ;;  %v1344_v33 = vadd.f32 %v1343_v40, %v16174_v30 }
 0x15a   : > { %2493 = vmatpush2.bf16.msra.mxu0 %v14403_v13  ;;  %v16413_v56 = vpack.c.bf16 %v1407_v45, %v1403_v36  ;;  %v16415_v59 = vpack.c.bf16 %v1409_v46, %v1405_v37  ;;  %v1233_v3 = vadd.f32 %v1232_v51, %v16165_v27  ;;  %v1346_v4 = vadd.f32 %v1345_v52, %v16168_v28  ;;  %v14426_v45 = vld [vmem:[%s22317_s3 + $0x36c] ss:$16 sps:$4 sm:$0xff]   ;;  %v14421_v51 = vld [vmem:[%s22317_s3 + $0x168] ss:$16 sps:$4 sm:$0xff]  }
 0x15b   : > { %2606 = vmatpush2.bf16.msra.mxu1 %v14406_v26  ;;  %v1234_v5 = vpop.f32.mrf.mxu0  ;;  %v1347_v8 = vpop.f32.mrf.mxu1  ;;  %2494 = vmatprep.subr.bf16.mxu0 %v14411_v31  ;;  %v14418_v31 = vld [vmem:[%s22317_s3 + $0x388] ss:$16 sps:$4 sm:$0xff]  }
 0x15c   : > { %v1235_v12 = vadd.f32 %v1234_v5, %v16171_v29  ;;  %v1348_v13 = vadd.f32 %v1347_v8, %v16174_v30  ;;  %2330 = vmatprep.mubr.bf16.mxu0 %v16413_v56  ;;  %2443 = vmatprep.mubr.bf16.mxu1 %v16415_v59  ;;  %v1411_v37 = vmax.f32 %v1233_v3, 0.0  ;;  %v1413_v38 = vmax.f32 %v1346_v4, 0.0  ;;  %v14432_v5 = vld [vmem:[%s22317_s3 + $0x34c] ss:$16 sps:$4 sm:$0xff]  }
 0x15d   : > { %v1236_v20 = vpop.f32.mrf.mxu0  ;;  %v1349_v26 = vpop.f32.mrf.mxu1  ;;  %2331 = vmatmul.mubr.bf16.gmra.mxu0 %v16420_v1  ;;  %2607 = vmatprep.subr.bf16.mxu1 %v14414_v43  ;;  %v1412_v3 = vmax.f32 %v1344_v33, 0.0 }
 0x15e   : > { %v1237_v35 = vadd.f32 %v1236_v20, %v16165_v27  ;;  %v1350_v36 = vadd.f32 %v1349_v26, %v16168_v28  ;;  %2444 = vmatmul.mubr.bf16.gmra.mxu1 %v16424_v11  ;;  %2495 = vmatpush2.bf16.msra.mxu0 %v14409_v47  ;;  %v1414_v39 = vmax.f32 %v1235_v12, 0.0  ;;  %v1416_v46 = vmax.f32 %v1348_v13, 0.0 }
 0x15f   : > { %2608 = vmatpush2.bf16.msra.mxu1 %v14412_v53  ;;  %v1240_v43 = vpop.f32.mrf.mxu0  ;;  %v1353_v44 = vpop.f32.mrf.mxu1  ;;  %2496 = vmatprep.subr.bf16.mxu0 %v14417_v54  ;;  %v1410_v47 = vmax.f32 %v1231_v16, 0.0  ;;  %v14424_v53 = vld [vmem:[%s22317_s3 + $0x368] ss:$16 sps:$4 sm:$0xff]   ;;  %v14429_v54 = vld [vmem:[%s22317_s3 + $0x14c] ss:$16 sps:$4 sm:$0xff]  }
 0x160   : > { %v1415_v40 = vmax.f32 %v1237_v35, 0.0  ;;  %v1417_v50 = vmax.f32 %v1350_v36, 0.0  ;;  %2609 = vmatprep.subr.bf16.mxu1 %v14420_v60  ;;  %v16468_v26 = vpack.c.bf16 %v1416_v46, %v1412_v3  ;;  %v14427_v35 = vld [vmem:[%s22317_s3 + $0x148] ss:$16 sps:$4 sm:$0xff]   ;;  %v1241_v36 = vadd.f32 %v1240_v43, %v16171_v29 }
 0x161   : > { %v1242_v52 = vpop.f32.mrf.mxu0  ;;  %v1355_v55 = vpop.f32.mrf.mxu1  ;;  %v16464_v8 = vpack.c.bf16 %v1414_v39, %v1410_v47  ;;  %v1354_v39 = vadd.f32 %v1353_v44, %v16174_v30 }
 0x162   : > { %2497 = vmatpush2.bf16.msra.mxu0 %v14415_v15  ;;  %v16457_v4 = vpack.c.bf16 %v1415_v40, %v1411_v37  ;;  %v16459_v60 = vpack.c.bf16 %v1417_v50, %v1413_v38  ;;  %v1243_v12 = vadd.f32 %v1242_v52, %v16165_v27  ;;  %v1356_v13 = vadd.f32 %v1355_v55, %v16168_v28  ;;  %v14435_v38 = vld [vmem:[%s22317_s3 + $0x12c] ss:$16 sps:$4 sm:$0xff]  }
 0x163   : > { %2610 = vmatpush2.bf16.msra.mxu1 %v14418_v31  ;;  %v1244_v16 = vpop.f32.mrf.mxu0  ;;  %v1357_v20 = vpop.f32.mrf.mxu1  ;;  %2498 = vmatprep.subr.bf16.mxu0 %v14423_v32  ;;  %v14430_v32 = vld [vmem:[%s22317_s3 + $0x348] ss:$16 sps:$4 sm:$0xff]   ;;  %v14438_v50 = vld [vmem:[%s22317_s3 + $0x32c] ss:$16 sps:$4 sm:$0xff]   ;;  %v1420_v44 = vmax.f32 %v1354_v39, 0.0 }
 0x164   : > { %v1245_v15 = vadd.f32 %v1244_v16, %v16171_v29  ;;  %v1358_v33 = vadd.f32 %v1357_v20, %v16174_v30  ;;  %2340 = vmatprep.mubr.bf16.mxu0 %v16457_v4  ;;  %2453 = vmatprep.mubr.bf16.mxu1 %v16459_v60  ;;  %v1419_v29 = vmax.f32 %v1243_v12, 0.0  ;;  %v1421_v43 = vmax.f32 %v1356_v13, 0.0  ;;  %v14436_v30 = vld [vmem:[%s22317_s3 + $0x328] ss:$16 sps:$4 sm:$0xff]   ;;  %v14447_v20 = vld [vmem:[%s22324_s5 + $0xe4] ss:$16 sps:$4 sm:$0xff]  }
 0x165   : > { %v1246_v31 = vpop.f32.mrf.mxu0  ;;  %v1359_v37 = vpop.f32.mrf.mxu1  ;;  %2341 = vmatmul.mubr.bf16.gmra.mxu0 %v16464_v8  ;;  %2611 = vmatprep.subr.bf16.mxu1 %v14426_v45  ;;  %v14439_v13 = vld [vmem:[%s22317_s3 + $0x108] ss:$16 sps:$4 sm:$0xff]   ;;  %v14472_v39 = vld [vmem:[%s22324_s5 + $0x1c0] ss:$16 sps:$4 sm:$0xff]  }
 0x166   : > { %v1247_v46 = vadd.f32 %v1246_v31, %v16165_v27  ;;  %v1360_v40 = vadd.f32 %v1359_v37, %v16168_v28  ;;  %2454 = vmatmul.mubr.bf16.gmra.mxu1 %v16468_v26  ;;  %2499 = vmatpush2.bf16.msra.mxu0 %v14421_v51  ;;  %v1422_v45 = vmax.f32 %v1245_v15, 0.0  ;;  %v1424_v47 = vmax.f32 %v1358_v33, 0.0  ;;  %v14433_v27 = vld [vmem:[%s22317_s3 + $0x128] ss:$16 sps:$4 sm:$0xff]   ;;  %v14445_v15 = vld [vmem:[%s22324_s5 + $0xe0] ss:$16 sps:$4 sm:$0xff]  }
 0x167   : > { %2612 = vmatpush2.bf16.msra.mxu1 %v14424_v53  ;;  %2500 = vmatprep.subr.bf16.mxu0 %v14429_v54  ;;  %v1418_v28 = vmax.f32 %v1241_v36, 0.0  ;;  %v14441_v54 = vld [vmem:[%s22317_s3 + $0x10c] ss:$16 sps:$4 sm:$0xff]   ;;  %v14442_v16 = vld [vmem:[%s22317_s3 + $0x308] ss:$16 sps:$4 sm:$0xff]  }
 0x168   : > { %v1423_v52 = vmax.f32 %v1247_v46, 0.0  ;;  %v1425_v55 = vmax.f32 %v1360_v40, 0.0  ;;  %2613 = vmatprep.subr.bf16.mxu1 %v14432_v5  ;;  %v14444_v5 = vld [vmem:[%s22317_s3 + $0x30c] ss:$16 sps:$4 sm:$0xff]   ;;  %v16510_v12 = vpack.c.bf16 %v1424_v47, %v1420_v44  ;;  %v14450_v33 = vld [vmem:[%s22324_s5 + $0xc4] ss:$16 sps:$4 sm:$0xff]  }
 0x169   : > { %v16505_v3 = vpack.c.bf16 %v1422_v45, %v1418_v28  ;;  %v14463_v36 = vld [vmem:[%s22324_s5 + $0x20] ss:$16 sps:$4 sm:$0xff]   ;;  %v14507_v37 = vld [vmem:[%s22324_s5 + $0x2a4] ss:$16 sps:$4 sm:$0xff]  }
 0x16a   : > { %2501 = vmatpush2.bf16.msra.mxu0 %v14427_v35  ;;  %v16498_v51 = vpack.c.bf16 %v1423_v52, %v1419_v29  ;;  %v16500_v53 = vpack.c.bf16 %v1425_v55, %v1421_v43  ;;  %v14456_v35 = vld [vmem:[%s22324_s5 + $0x84] ss:$16 sps:$4 sm:$0xff]   ;;  %v14466_v31 = vld [vmem:[%s22324_s5] ss:$16 sps:$4 sm:$0xff]  }
 0x16b   : > { %2614 = vmatpush2.bf16.msra.mxu1 %v14430_v32  ;;  %2502 = vmatprep.subr.bf16.mxu0 %v14435_v38  ;;  %v14471_v32 = vld [vmem:[%s22324_s5 + $0x1e4] ss:$16 sps:$4 sm:$0xff]   ;;  %v14469_v38 = vld [vmem:[%s22324_s5 + $0x1e0] ss:$16 sps:$4 sm:$0xff]  }
 0x16c   : > { %2350 = vmatprep.mubr.bf16.mxu0 %v16498_v51  ;;  %2463 = vmatprep.mubr.bf16.mxu1 %v16500_v53  ;;  %v14519_v46 = vld [vmem:[%s22324_s5 + $0x264] ss:$16 sps:$4 sm:$0xff]   ;;  %v14475_v29 = vld [vmem:[%s22324_s5 + $0x1a0] ss:$16 sps:$4 sm:$0xff]  }
 0x16d   : > { %2351 = vmatmul.mubr.bf16.gmra.mxu0 %v16505_v3  ;;  %2615 = vmatprep.subr.bf16.mxu1 %v14438_v50  ;;  %v14477_v40 = vld [vmem:[%s22324_s5 + $0x1a4] ss:$16 sps:$4 sm:$0xff]   ;;  %v14478_v43 = vld [vmem:[%s22324_s5 + $0x180] ss:$16 sps:$4 sm:$0xff]  }
 0x16e   : > { %2464 = vmatmul.mubr.bf16.gmra.mxu1 %v16510_v12  ;;  %2503 = vmatpush2.bf16.msra.mxu0 %v14433_v27  ;;  %v14531_v45 = vld [vmem:[%s22324_s5 + $0x224] ss:$16 sps:$4 sm:$0xff]   ;;  %v14481_v47 = vld [vmem:[%s22324_s5 + $0x160] ss:$16 sps:$4 sm:$0xff]  }
 0x16f   : > { %2506 = vmatprep.mubr.bf16.mxu0 %v16184_v57  ;;  %2616 = vmatpush2.bf16.msra.mxu1 %v14436_v30  ;;  %v14448_v57 = vld [vmem:[%s22324_s5 + $0xc0] ss:$16 sps:$4 sm:$0xff]   ;;  %v14483_v50 = vld [vmem:[%s22324_s5 + $0x164] ss:$16 sps:$4 sm:$0xff]  }
 0x170   : > { %2619 = vmatprep.mubr.bf16.mxu1 %v16186_v58  ;;  %2504 = vmatprep.subr.bf16.mxu0 %v14441_v54  ;;  %v14453_v58 = vld [vmem:[%s22324_s5 + $0xa4] ss:$16 sps:$4 sm:$0xff]   ;;  %v14484_v52 = vld [vmem:[%s22324_s5 + $0x140] ss:$16 sps:$4 sm:$0xff]   ;;  %v14498_v54 = vld [vmem:[%s22324_s5 + $0xec] ss:$16 sps:$4 sm:$0xff]  }
 0x171   : > { %2617 = vmatprep.subr.bf16.mxu1 %v14444_v5  ;;  %v14543_v55 = vld [vmem:[%s22324_s5 + $0x3e4] ss:$16 sps:$4 sm:$0xff]   ;;  %v14487_v28 = vld [vmem:[%s22324_s5 + $0x120] ss:$16 sps:$4 sm:$0xff]  }
 0x172   : > { %2505 = vmatpush2.bf16.msra.mxu0 %v14439_v13  ;;  %v14489_v27 = vld [vmem:[%s22324_s5 + $0x124] ss:$16 sps:$4 sm:$0xff]   ;;  %v14547_v44 = vld [vmem:[%s22324_s5 + $0x3c0] ss:$16 sps:$4 sm:$0xff]  }
 0x173   : > { %2618 = vmatpush2.bf16.msra.mxu1 %v14442_v16  ;;  %3586 = vmatprep.subr.bf16.mxu0 %v14447_v20  ;;  %v14492_v30 = vld [vmem:[%s22324_s5 + $0x104] ss:$16 sps:$4 sm:$0xff]   ;;  %v14553_v5 = vld [vmem:[%s22324_s5 + $0x3a0] ss:$16 sps:$4 sm:$0xff]  }
 0x174   : > { %v14567_v13 = vld [vmem:[%s22324_s5 + $0x364] ss:$16 sps:$4 sm:$0xff]   ;;  %v14565_v16 = vld [vmem:[%s22324_s5 + $0x360] ss:$16 sps:$4 sm:$0xff]  }
 0x175   : > { %2507 = vmatmul.mubr.bf16.vlgmr.msra.gmra.mxu0 %v16194_v61  ;;  %v14451_v61 = vld [vmem:[%s22324_s5 + $0xa0] ss:$16 sps:$4 sm:$0xff]   ;;  %v14573_v20 = vld [vmem:[%s22324_s5 + $0x344] ss:$16 sps:$4 sm:$0xff]  }
 0x176   : > { %2620 = vmatmul.mubr.bf16.vlgmr.msra.gmra.mxu1 %v16196_v62  ;;  %2516 = vmatprep.mubr.bf16.mxu0 %v16239_v42  ;;  %v14454_v62 = vld [vmem:[%s22324_s5 + $0x80] ss:$16 sps:$4 sm:$0xff]   ;;  %v14459_v42 = vld [vmem:[%s22324_s5 + $0x64] ss:$16 sps:$4 sm:$0xff]  }
 0x177   : > { %2629 = vmatprep.mubr.bf16.mxu1 %v16246_v48  ;;  %3587 = vmatpush1.bf16.msra.mxu0 %v14445_v15  ;;  %v14462_v48 = vld [vmem:[%s22324_s5 + $0x44] ss:$16 sps:$4 sm:$0xff]   ;;  %v14571_v15 = vld [vmem:[%s22324_s5 + $0x340] ss:$16 sps:$4 sm:$0xff]  }
 0x178   : > { %3588 = vmatprep.subr.bf16.mxu0 %v14450_v33  ;;  %v14579_v33 = vld [vmem:[%s22324_s5 + $0x324] ss:$16 sps:$4 sm:$0xff]  }
 0x17b   : > { %3589 = vmatpush1.bf16.msra.mxu0 %v14448_v57  ;;  %v14577_v57 = vld [vmem:[%s22324_s5 + $0x320] ss:$16 sps:$4 sm:$0xff]  }
 0x17c   : > { %3590 = vmatprep.subr.bf16.mxu0 %v14453_v58  ;;  %v14585_v58 = vld [vmem:[%s22324_s5 + $0x304] ss:$16 sps:$4 sm:$0xff]  }
 0x17d   : > { %2517 = vmatmul.mubr.bf16.gmra.mxu0 %v16237_v41  ;;  %v14457_v41 = vld [vmem:[%s22324_s5 + $0x60] ss:$16 sps:$4 sm:$0xff]  }
 0x17e   : > { %2630 = vmatmul.mubr.bf16.gmra.mxu1 %v16248_v49  ;;  %2526 = vmatprep.mubr.bf16.mxu0 %v16281_v17  ;;  %v14460_v49 = vld [vmem:[%s22324_s5 + $0x40] ss:$16 sps:$4 sm:$0xff]   ;;  %v14495_v17 = vld [vmem:[%s22324_s5 + $0x2e4] ss:$16 sps:$4 sm:$0xff]  }
 0x17f   : > { %2639 = vmatprep.mubr.bf16.mxu1 %v16283_v18  ;;  %3591 = vmatpush1.bf16.msra.mxu0 %v14451_v61  ;;  %v14465_v18 = vld [vmem:[%s22324_s5 + $0x24] ss:$16 sps:$4 sm:$0xff]   ;;  %v14583_v61 = vld [vmem:[%s22324_s5 + $0x300] ss:$16 sps:$4 sm:$0xff]  }
 0x180   : > { %3592 = vmatprep.subr.bf16.mxu0 %v14456_v35  ;;  %3699 = vmatprep.subr.bf16.mxu1 %v14495_v17  ;;  %v14591_v35 = vld [vmem:[%s22324_s5 + $0x2ec] ss:$16 sps:$4 sm:$0xff]  }
 0x183   : > { %3593 = vmatpush1.bf16.msra.mxu0 %v14454_v62  ;;  %v16755_v62 = vld [vmem:[%s22325_s27] sm:$0xf]  ;;  %s12845_s27 = sshll.u32 %s21637_s29, 4  ;;  %s22208_s27 = int_to_ptr.vmem [resolvable:$true] %s12845_s27 }
 0x184   : > { %3594 = vmatprep.subr.bf16.mxu0 %v14459_v42  ;;  %v16759_v42 = vrot.slane %v16755_v62, %v16153_v21  ;;  %s15517_s1 = scalar_lea.vmem %s22208_s27, 16384  ;;  %p15524_p0 = scmp.lt.s32.totalorder %s22208_s27, %s15522_s24 }
 0x185   : > { %2527 = vmatmul.mubr.bf16.gmra.mxu0 %v16288_v25  ;;  %v14493_v25 = vld [vmem:[%s22324_s5 + $0x2e0] ss:$16 sps:$4 sm:$0xff]   ;;  %p15518_p11 = scmp.ne.s32.totalorder %s22208_s27, %s15517_s1 }
 0x186   : > { %2640 = vmatmul.mubr.bf16.gmra.mxu1 %v16292_v34  ;;  %2536 = vmatprep.mubr.bf16.mxu0 %v16325_v6  ;;  %v14501_v34 = vld [vmem:[%s22324_s5 + $0x2c4] ss:$16 sps:$4 sm:$0xff]  }
 0x187   : > { %2649 = vmatprep.mubr.bf16.mxu1 %v16327_v7  ;;  %3595 = vmatpush1.bf16.msra.mxu0 %v14457_v41  ;;  %v14468_v6 = vld [vmem:[%s22324_s5 + $0x4] ss:$16 sps:$4 sm:$0xff]   ;;  %v14499_v7 = vld [vmem:[%s22324_s5 + $0x2c0] ss:$16 sps:$4 sm:$0xff]   ;;  %v16763_v41 = vrot.slane %v16755_v62, %v16159_v23  ;;  %p15519_p12 = pnand %p15518_p11, %p15725_p5 }
 0x188   : > { %3596 = vmatprep.subr.bf16.mxu0 %v14462_v48  ;;  %3700 = vmatpush1.bf16.msra.mxu1 %v14493_v25 }
 0x189   : > { %3701 = vmatprep.subr.bf16.mxu1 %v14501_v34  ;;  %p15520_p13 = pneg %p15519_p12 }
 0x18b   : > { %3597 = vmatpush1.bf16.msra.mxu0 %v14460_v49 }
 0x18c   : > { %3598 = vmatprep.subr.bf16.mxu0 %v14465_v18  ;;  %3702 = vmatpush1.bf16.msra.mxu1 %v14499_v7 }
 0x18d   : > { %2537 = vmatmul.mubr.bf16.gmra.mxu0 %v16332_v9  ;;  %v14505_v9 = vld [vmem:[%s22324_s5 + $0x2a0] ss:$16 sps:$4 sm:$0xff]   ;;  %3703 = vmatprep.subr.bf16.mxu1 %v14507_v37 }
 0x18e   : > { %2650 = vmatmul.mubr.bf16.gmra.mxu1 %v16336_v14  ;;  %2546 = vmatprep.mubr.bf16.mxu0 %v16369_v63  ;;  %v14513_v14 = vld [vmem:[%s22324_s5 + $0x284] ss:$16 sps:$4 sm:$0xff]  }
 0x18f   : > { %2659 = vmatprep.mubr.bf16.mxu1 %v16371_v0  ;;  %3599 = vmatpush1.bf16.msra.mxu0 %v14463_v36  ;;  %v14474_v63 = vld [vmem:[%s22324_s5 + $0x1c4] ss:$16 sps:$4 sm:$0xff]   ;;  %v14511_v0 = vld [vmem:[%s22324_s5 + $0x280] ss:$16 sps:$4 sm:$0xff]  }
 0x190   : > { %3600 = vmatprep.subr.bf16.mxu0 %v14468_v6  ;;  %3704 = vmatpush1.bf16.msra.mxu1 %v14505_v9 }
 0x191   : > { %3705 = vmatprep.subr.bf16.mxu1 %v14513_v14 }
 0x193   : > { %3601 = vmatpush1.bf16.msra.mxu0 %v14466_v31 }
 0x194   : > { %3602 = vmatprep.subr.bf16.mxu0 %v14471_v32  ;;  %3706 = vmatpush1.bf16.msra.mxu1 %v14511_v0 }
 0x195   : > { %2547 = vmatmul.mubr.bf16.gmra.mxu0 %v16376_v2  ;;  %v14517_v2 = vld [vmem:[%s22324_s5 + $0x260] ss:$16 sps:$4 sm:$0xff]   ;;  %3707 = vmatprep.subr.bf16.mxu1 %v14519_v46 }
 0x196   : > { %2660 = vmatmul.mubr.bf16.gmra.mxu1 %v16380_v10  ;;  %2556 = vmatprep.mubr.bf16.mxu0 %v16413_v56  ;;  %v14525_v10 = vld [vmem:[%s22324_s5 + $0x244] ss:$16 sps:$4 sm:$0xff]  }
 0x197   : > { %2669 = vmatprep.mubr.bf16.mxu1 %v16415_v59  ;;  %3603 = vmatpush2.bf16.msra.mxu0 %v14469_v38  ;;  %v14480_v56 = vld [vmem:[%s22324_s5 + $0x184] ss:$16 sps:$4 sm:$0xff]   ;;  %v14523_v59 = vld [vmem:[%s22324_s5 + $0x240] ss:$16 sps:$4 sm:$0xff]  }
 0x198   : > { %3604 = vmatprep.subr.bf16.mxu0 %v14474_v63  ;;  %3708 = vmatpush1.bf16.msra.mxu1 %v14517_v2 }
 0x199   : > { %3709 = vmatprep.subr.bf16.mxu1 %v14525_v10 }
 0x19b   : > { %3605 = vmatpush2.bf16.msra.mxu0 %v14472_v39 }
 0x19c   : > { %3606 = vmatprep.subr.bf16.mxu0 %v14477_v40  ;;  %3710 = vmatpush1.bf16.msra.mxu1 %v14523_v59 }
 0x19d   : > { %2557 = vmatmul.mubr.bf16.gmra.mxu0 %v16420_v1  ;;  %v14529_v1 = vld [vmem:[%s22324_s5 + $0x220] ss:$16 sps:$4 sm:$0xff]   ;;  %3711 = vmatprep.subr.bf16.mxu1 %v14531_v45 }
 0x19e   : > { %2670 = vmatmul.mubr.bf16.gmra.mxu1 %v16424_v11  ;;  %2566 = vmatprep.mubr.bf16.mxu0 %v16457_v4  ;;  %v14537_v11 = vld [vmem:[%s22324_s5 + $0x204] ss:$16 sps:$4 sm:$0xff]  }
 0x19f   : > { %2679 = vmatprep.mubr.bf16.mxu1 %v16459_v60  ;;  %3607 = vmatpush2.bf16.msra.mxu0 %v14475_v29  ;;  %v14486_v4 = vld [vmem:[%s22324_s5 + $0x144] ss:$16 sps:$4 sm:$0xff]   ;;  %v14535_v60 = vld [vmem:[%s22324_s5 + $0x200] ss:$16 sps:$4 sm:$0xff]  }
 0x1a0   : > { %3608 = vmatprep.subr.bf16.mxu0 %v14480_v56  ;;  %3712 = vmatpush1.bf16.msra.mxu1 %v14529_v1 }
 0x1a1   : > { %3713 = vmatprep.subr.bf16.mxu1 %v14537_v11  ;;  %v14496_v11 = vld [vmem:[%s22324_s5 + $0xe8] ss:$16 sps:$4 sm:$0xff]  }
 0x1a3   : > { %3609 = vmatpush2.bf16.msra.mxu0 %v14478_v43 }
 0x1a4   : > { %3610 = vmatprep.subr.bf16.mxu0 %v14483_v50  ;;  %3714 = vmatpush1.bf16.msra.mxu1 %v14535_v60 }
 0x1a5   : > { %2567 = vmatmul.mubr.bf16.gmra.mxu0 %v16464_v8  ;;  %v14541_v8 = vld [vmem:[%s22324_s5 + $0x3e0] ss:$16 sps:$4 sm:$0xff]   ;;  %3715 = vmatprep.subr.bf16.mxu1 %v14543_v55 }
 0x1a6   : > { %2680 = vmatmul.mubr.bf16.gmra.mxu1 %v16468_v26  ;;  %2576 = vmatprep.mubr.bf16.mxu0 %v16498_v51  ;;  %v14549_v26 = vld [vmem:[%s22324_s5 + $0x3c4] ss:$16 sps:$4 sm:$0xff]   ;;  %v14490_v51 = vld [vmem:[%s22324_s5 + $0x100] ss:$16 sps:$4 sm:$0xff]  }
 0x1a7   : > { %2689 = vmatprep.mubr.bf16.mxu1 %v16500_v53  ;;  %3611 = vmatpush2.bf16.msra.mxu0 %v14481_v47  ;;  %v14555_v53 = vld [vmem:[%s22324_s5 + $0x3a4] ss:$16 sps:$4 sm:$0xff]  }
 0x1a8   : > { %3612 = vmatprep.subr.bf16.mxu0 %v14486_v4  ;;  %3716 = vmatpush2.bf16.msra.mxu1 %v14541_v8 }
 0x1a9   : > { %3717 = vmatprep.subr.bf16.mxu1 %v14549_v26 }
 0x1ab   : > { %3613 = vmatpush2.bf16.msra.mxu0 %v14484_v52  ;;  %v14504_v52 = vld [vmem:[%s22324_s5 + $0xcc] ss:$16 sps:$4 sm:$0xff]  }
 0x1ac   : > { %3614 = vmatprep.subr.bf16.mxu0 %v14489_v27  ;;  %3718 = vmatpush2.bf16.msra.mxu1 %v14547_v44 }
 0x1ad   : > { %2577 = vmatmul.mubr.bf16.gmra.mxu0 %v16505_v3  ;;  %3719 = vmatprep.subr.bf16.mxu1 %v14555_v53  ;;  %v14561_v3 = vld [vmem:[%s22324_s5 + $0x384] ss:$16 sps:$4 sm:$0xff]   ;;  %v14502_v53 = vld [vmem:[%s22324_s5 + $0xc8] ss:$16 sps:$4 sm:$0xff]  }
 0x1ae   : > { %2690 = vmatmul.mubr.bf16.gmra.mxu1 %v16510_v12  ;;  %v14559_v12 = vld [vmem:[%s22324_s5 + $0x380] ss:$16 sps:$4 sm:$0xff]  }
 0x1af   : > { %3615 = vmatpush2.bf16.msra.mxu0 %v14487_v28 }
 0x1b0   : > { %3616 = vmatprep.subr.bf16.mxu0 %v14492_v30  ;;  %3720 = vmatpush2.bf16.msra.mxu1 %v14553_v5 }
 0x1b1   : > { %3721 = vmatprep.subr.bf16.mxu1 %v14561_v3  ;;  %v14510_v3 = vld [vmem:[%s22324_s5 + $0xac] ss:$16 sps:$4 sm:$0xff]  }
 0x1b3   : > { %3617 = vmatpush2.bf16.msra.mxu0 %v14490_v51 }
 0x1b4   : > { %3812 = vmatprep.subr.bf16.mxu0 %v14498_v54  ;;  %3722 = vmatpush2.bf16.msra.mxu1 %v14559_v12 }
 0x1b5   : > { %3723 = vmatprep.subr.bf16.mxu1 %v14567_v13 }
 0x1b8   : > { %3724 = vmatpush2.bf16.msra.mxu1 %v14565_v16 }
 0x1b9   : > { %3725 = vmatprep.subr.bf16.mxu1 %v14573_v20 }
 0x1bc   : > { %3726 = vmatpush2.bf16.msra.mxu1 %v14571_v15 }
 0x1bd   : > { %3727 = vmatprep.subr.bf16.mxu1 %v14579_v33 }
 0x1c0   : > { %3728 = vmatpush2.bf16.msra.mxu1 %v14577_v57 }
 0x1c1   : > { %3729 = vmatprep.subr.bf16.mxu1 %v14585_v58 }
 0x1c4   : > { %3730 = vmatpush2.bf16.msra.mxu1 %v14583_v61 }
 0x1c5   : > { %3925 = vmatprep.subr.bf16.mxu1 %v14591_v35 }
 0x1f5   : > { %v2282_v48 = vpop.f32.mrf.mxu0  ;;  %v2395_v49 = vpop.f32.mrf.mxu1 }
 0x1f6   : > { %v2283_v36 = vadd.f32 %v2282_v48, %v16763_v41  ;;  %v14508_v48 = vld [vmem:[%s22324_s5 + $0xa8] ss:$16 sps:$4 sm:$0xff]  }
 0x1f7   : > { %v2284_v17 = vpop.f32.mrf.mxu0  ;;  %v2397_v18 = vpop.f32.mrf.mxu1 }
 0x1f8   : > { %v2285_v25 = vadd.f32 %v2284_v17, %v16759_v42  ;;  %v2396_v14 = vadd.f32 %v2395_v49, %v2283_v36 }
 0x1f9   : > { %v2286_v34 = vpop.f32.mrf.mxu0  ;;  %v2399_v6 = vpop.f32.mrf.mxu1 }
 0x1fa   : > { %v2287_v7 = vadd.f32 %v2286_v34, %v16763_v41  ;;  %v2398_v32 = vadd.f32 %v2397_v18, %v2285_v25  ;;  %v2700_v59 = vmax.f32 %v2396_v14, 0.0  ;;  %v14516_v18 = vld [vmem:[%s22324_s5 + $0x8c] ss:$16 sps:$4 sm:$0xff]  }
 0x1fb   : > { %v2288_v31 = vpop.f32.mrf.mxu0  ;;  %v2401_v37 = vpop.f32.mrf.mxu1 }
 0x1fc   : > { %v2400_v9 = vadd.f32 %v2399_v6, %v2287_v7  ;;  %v2289_v38 = vadd.f32 %v2288_v31, %v16759_v42  ;;  %v2701_v2 = vmax.f32 %v2398_v32, 0.0 }
 0x1fd   : > { %v2292_v63 = vpop.f32.mrf.mxu0 }
 0x1fe   : > { %v2402_v0 = vadd.f32 %v2401_v37, %v2289_v38  ;;  %v2405_v39 = vpop.f32.mrf.mxu1  ;;  %v2704_v46 = vmax.f32 %v2400_v9, 0.0  ;;  %v2293_v43 = vadd.f32 %v2292_v63, %v16763_v41  ;;  %v14514_v9 = vld [vmem:[%s22324_s5 + $0x88] ss:$16 sps:$4 sm:$0xff]   ;;  %v14522_v63 = vld [vmem:[%s22324_s5 + $0x6c] ss:$16 sps:$4 sm:$0xff]  }
 0x1ff   : > { %v2294_v40 = vpop.f32.mrf.mxu0 }
 0x200   : > { %v2705_v29 = vmax.f32 %v2402_v0, 0.0  ;;  %v2295_v10 = vadd.f32 %v2294_v40, %v16759_v42  ;;  %v2407_v56 = vpop.f32.mrf.mxu1  ;;  %v16777_v4 = vpack.c.bf16 %v2704_v46, %v2700_v59  ;;  %v2406_v26 = vadd.f32 %v2405_v39, %v2293_v43 }
 0x201   : > { %v2296_v45 = vpop.f32.mrf.mxu0 }
 0x202   : > { %v2297_v50 = vadd.f32 %v2296_v45, %v16763_v41  ;;  %v2409_v1 = vpop.f32.mrf.mxu1  ;;  %v16772_v47 = vpack.c.bf16 %v2705_v29, %v2701_v2  ;;  %v2408_v55 = vadd.f32 %v2407_v56, %v2295_v10  ;;  %v2708_v15 = vmax.f32 %v2406_v26, 0.0  ;;  %v14520_v45 = vld [vmem:[%s22324_s5 + $0x68] ss:$16 sps:$4 sm:$0xff]  }
 0x203   : > { %v2298_v60 = vpop.f32.mrf.mxu0 }
 0x204   : > { %v2410_v27 = vadd.f32 %v2409_v1, %v2297_v50  ;;  %v2299_v8 = vadd.f32 %v2298_v60, %v16759_v42  ;;  %v2411_v28 = vpop.f32.mrf.mxu1  ;;  %3618 = vmatprep.mubr.bf16.mxu0 %v16772_v47  ;;  %v2709_v12 = vmax.f32 %v2408_v55, 0.0 }
 0x205   : > { %v2302_v30 = vpop.f32.mrf.mxu0  ;;  %3619 = vmatmul.mubr.bf16.vlgmr.msra.gmra.mxu0 %v16777_v4 }
 0x206   : > { %v2412_v44 = vadd.f32 %v2411_v28, %v2299_v8  ;;  %v2415_v51 = vpop.f32.mrf.mxu1  ;;  %3813 = vmatpush1.bf16.msra.mxu0 %v14496_v11  ;;  %v2712_v54 = vmax.f32 %v2410_v27, 0.0  ;;  %v2303_v33 = vadd.f32 %v2302_v30, %v16763_v41  ;;  %v14528_v11 = vld [vmem:[%s22324_s5 + $0x4c] ss:$16 sps:$4 sm:$0xff]  }
 0x207   : > { %v2304_v5 = vpop.f32.mrf.mxu0  ;;  %3814 = vmatprep.subr.bf16.mxu0 %v14504_v52 }
 0x208   : > { %v2713_v13 = vmax.f32 %v2412_v44, 0.0  ;;  %v2305_v16 = vadd.f32 %v2304_v5, %v16759_v42  ;;  %v2417_v20 = vpop.f32.mrf.mxu1  ;;  %v16799_v49 = vpack.c.bf16 %v2712_v54, %v2708_v15  ;;  %v2416_v7 = vadd.f32 %v2415_v51, %v2303_v33  ;;  %v14526_v44 = vld [vmem:[%s22324_s5 + $0x48] ss:$16 sps:$4 sm:$0xff]   ;;  %v14534_v54 = vld [vmem:[%s22324_s5 + $0x2c] ss:$16 sps:$4 sm:$0xff]  }
 0x209   : > { %v2306_v57 = vpop.f32.mrf.mxu0 }
 0x20a   : > { %v2307_v58 = vadd.f32 %v2306_v57, %v16763_v41  ;;  %v2419_v61 = vpop.f32.mrf.mxu1  ;;  %3815 = vmatpush1.bf16.msra.mxu0 %v14502_v53  ;;  %v16794_v35 = vpack.c.bf16 %v2713_v13, %v2709_v12  ;;  %v2418_v25 = vadd.f32 %v2417_v20, %v2305_v16  ;;  %v2716_v2 = vmax.f32 %v2416_v7, 0.0 }
 0x20b   : > { %v2308_v17 = vpop.f32.mrf.mxu0  ;;  %3816 = vmatprep.subr.bf16.mxu0 %v14510_v3 }
 0x20c   : > { %v2420_v36 = vadd.f32 %v2419_v61, %v2307_v58  ;;  %v2309_v34 = vadd.f32 %v2308_v17, %v16759_v42  ;;  %v2421_v6 = vpop.f32.mrf.mxu1  ;;  %3628 = vmatprep.mubr.bf16.mxu0 %v16794_v35  ;;  %v2717_v0 = vmax.f32 %v2418_v25, 0.0  ;;  %v14532_v61 = vld [vmem:[%s22324_s5 + $0x28] ss:$16 sps:$4 sm:$0xff]  }
 0x20d   : > { %v2312_v31 = vpop.f32.mrf.mxu0  ;;  %3629 = vmatmul.mubr.bf16.gmra.mxu0 %v16799_v49 }
 0x20e   : > { %v2422_v37 = vadd.f32 %v2421_v6, %v2309_v34  ;;  %v2425_v32 = vpop.f32.mrf.mxu1  ;;  %3817 = vmatpush1.bf16.msra.mxu0 %v14508_v48  ;;  %v2720_v38 = vmax.f32 %v2420_v36, 0.0  ;;  %v2313_v29 = vadd.f32 %v2312_v31, %v16763_v41 }
 0x20f   : > { %v2314_v14 = vpop.f32.mrf.mxu0  ;;  %3818 = vmatprep.subr.bf16.mxu0 %v14516_v18  ;;  %v14540_v18 = vld [vmem:[%s22324_s5 + $0xc] ss:$16 sps:$4 sm:$0xff]  }
 0x210   : > { %v2721_v39 = vmax.f32 %v2422_v37, 0.0  ;;  %v2315_v46 = vadd.f32 %v2314_v14, %v16759_v42  ;;  %v2427_v40 = vpop.f32.mrf.mxu1  ;;  %v16821_v50 = vpack.c.bf16 %v2720_v38, %v2716_v2  ;;  %v2426_v8 = vadd.f32 %v2425_v32, %v2313_v29 }
 0x211   : > { %v2316_v10 = vpop.f32.mrf.mxu0 }
 0x212   : > { %v2317_v56 = vadd.f32 %v2316_v10, %v16763_v41  ;;  %v2429_v59 = vpop.f32.mrf.mxu1  ;;  %3819 = vmatpush1.bf16.msra.mxu0 %v14514_v9  ;;  %v16816_v43 = vpack.c.bf16 %v2721_v39, %v2717_v0  ;;  %v2428_v60 = vadd.f32 %v2427_v40, %v2315_v46  ;;  %v2724_v16 = vmax.f32 %v2426_v8, 0.0  ;;  %v14538_v9 = vld [vmem:[%s22324_s5 + $0x8] ss:$16 sps:$4 sm:$0xff]  }
 0x213   : > { %v2318_v1 = vpop.f32.mrf.mxu0  ;;  %3820 = vmatprep.subr.bf16.mxu0 %v14522_v63  ;;  %v14546_v63 = vld [vmem:[%s22324_s5 + $0x1ec] ss:$16 sps:$4 sm:$0xff]  }
 0x214   : > { %v2430_v52 = vadd.f32 %v2429_v59, %v2317_v56  ;;  %v2319_v55 = vadd.f32 %v2318_v1, %v16759_v42  ;;  %v2431_v27 = vpop.f32.mrf.mxu1  ;;  %3638 = vmatprep.mubr.bf16.mxu0 %v16816_v43  ;;  %v2725_v5 = vmax.f32 %v2428_v60, 0.0  ;;  %v14544_v1 = vld [vmem:[%s22324_s5 + $0x1e8] ss:$16 sps:$4 sm:$0xff]  }
 0x215   : > { %v2322_v28 = vpop.f32.mrf.mxu0  ;;  %3639 = vmatmul.mubr.bf16.gmra.mxu0 %v16821_v50 }
 0x216   : > { %v2432_v26 = vadd.f32 %v2431_v27, %v2319_v55  ;;  %v2435_v30 = vpop.f32.mrf.mxu1  ;;  %3821 = vmatpush1.bf16.msra.mxu0 %v14520_v45  ;;  %v2728_v51 = vmax.f32 %v2430_v52, 0.0  ;;  %v2323_v20 = vadd.f32 %v2322_v28, %v16763_v41  ;;  %v14552_v52 = vld [vmem:[%s22324_s5 + $0x1cc] ss:$16 sps:$4 sm:$0xff]  }
 0x217   : > { %v2324_v53 = vpop.f32.mrf.mxu0  ;;  %3822 = vmatprep.subr.bf16.mxu0 %v14528_v11 }
 0x218   : > { %v2729_v3 = vmax.f32 %v2432_v26, 0.0  ;;  %v2325_v12 = vadd.f32 %v2324_v53, %v16759_v42  ;;  %v2437_v13 = vpop.f32.mrf.mxu1  ;;  %v16843_v48 = vpack.c.bf16 %v2728_v51, %v2724_v16  ;;  %v2436_v7 = vadd.f32 %v2435_v30, %v2323_v20  ;;  %v14550_v53 = vld [vmem:[%s22324_s5 + $0x1c8] ss:$16 sps:$4 sm:$0xff]  }
 0x219   : > { %v2326_v15 = vpop.f32.mrf.mxu0 }
 0x21a   : > { %v2327_v33 = vadd.f32 %v2326_v15, %v16763_v41  ;;  %v2439_v57 = vpop.f32.mrf.mxu1  ;;  %3823 = vmatpush1.bf16.msra.mxu0 %v14526_v44  ;;  %v16838_v58 = vpack.c.bf16 %v2729_v3, %v2725_v5  ;;  %v2438_v25 = vadd.f32 %v2437_v13, %v2325_v12  ;;  %v2732_v2 = vmax.f32 %v2436_v7, 0.0  ;;  %v14558_v3 = vld [vmem:[%s22324_s5 + $0x1ac] ss:$16 sps:$4 sm:$0xff]  }
 0x21b   : > { %v2328_v17 = vpop.f32.mrf.mxu0  ;;  %3824 = vmatprep.subr.bf16.mxu0 %v14534_v54 }
 0x21c   : > { %v2440_v36 = vadd.f32 %v2439_v57, %v2327_v33  ;;  %v2329_v34 = vadd.f32 %v2328_v17, %v16759_v42  ;;  %v2441_v6 = vpop.f32.mrf.mxu1  ;;  %3648 = vmatprep.mubr.bf16.mxu0 %v16838_v58  ;;  %v2733_v0 = vmax.f32 %v2438_v25, 0.0  ;;  %v14556_v25 = vld [vmem:[%s22324_s5 + $0x1a8] ss:$16 sps:$4 sm:$0xff]  }
 0x21d   : > { %v2332_v31 = vpop.f32.mrf.mxu0  ;;  %3649 = vmatmul.mubr.bf16.gmra.mxu0 %v16843_v48 }
 0x21e   : > { %v2442_v37 = vadd.f32 %v2441_v6, %v2329_v34  ;;  %v2445_v32 = vpop.f32.mrf.mxu1  ;;  %3825 = vmatpush1.bf16.msra.mxu0 %v14532_v61  ;;  %v2736_v38 = vmax.f32 %v2440_v36, 0.0  ;;  %v2333_v29 = vadd.f32 %v2332_v31, %v16763_v41  ;;  %v14564_v6 = vld [vmem:[%s22324_s5 + $0x18c] ss:$16 sps:$4 sm:$0xff]  }
 0x21f   : > { %v2334_v14 = vpop.f32.mrf.mxu0  ;;  %3826 = vmatprep.subr.bf16.mxu0 %v14540_v18 }
 0x220   : > { %v2737_v39 = vmax.f32 %v2442_v37, 0.0  ;;  %v2335_v46 = vadd.f32 %v2334_v14, %v16759_v42  ;;  %v2447_v40 = vpop.f32.mrf.mxu1  ;;  %v16865_v11 = vpack.c.bf16 %v2736_v38, %v2732_v2  ;;  %v2446_v26 = vadd.f32 %v2445_v32, %v2333_v29 }
 0x221   : > { %v2336_v10 = vpop.f32.mrf.mxu0 }
 0x222   : > { %v2337_v56 = vadd.f32 %v2336_v10, %v16763_v41  ;;  %v2449_v59 = vpop.f32.mrf.mxu1  ;;  %3827 = vmatpush1.bf16.msra.mxu0 %v14538_v9  ;;  %v16860_v45 = vpack.c.bf16 %v2737_v39, %v2733_v0  ;;  %v2448_v55 = vadd.f32 %v2447_v40, %v2335_v46  ;;  %v2740_v15 = vmax.f32 %v2446_v26, 0.0  ;;  %v14562_v0 = vld [vmem:[%s22324_s5 + $0x188] ss:$16 sps:$4 sm:$0xff]   ;;  %v14570_v40 = vld [vmem:[%s22324_s5 + $0x16c] ss:$16 sps:$4 sm:$0xff]  }
 0x223   : > { %v2338_v60 = vpop.f32.mrf.mxu0  ;;  %3828 = vmatprep.subr.bf16.mxu0 %v14546_v63 }
 0x224   : > { %v2450_v27 = vadd.f32 %v2449_v59, %v2337_v56  ;;  %v2339_v8 = vadd.f32 %v2338_v60, %v16759_v42  ;;  %v2451_v28 = vpop.f32.mrf.mxu1  ;;  %3658 = vmatprep.mubr.bf16.mxu0 %v16860_v45  ;;  %v2741_v12 = vmax.f32 %v2448_v55, 0.0 }
 0x225   : > { %v2342_v30 = vpop.f32.mrf.mxu0  ;;  %3659 = vmatmul.mubr.bf16.gmra.mxu0 %v16865_v11 }
 0x226   : > { %v2452_v44 = vadd.f32 %v2451_v28, %v2339_v8  ;;  %v2455_v51 = vpop.f32.mrf.mxu1  ;;  %3829 = vmatpush2.bf16.msra.mxu0 %v14544_v1  ;;  %v2744_v54 = vmax.f32 %v2450_v27, 0.0  ;;  %v2343_v33 = vadd.f32 %v2342_v30, %v16763_v41  ;;  %v14568_v8 = vld [vmem:[%s22324_s5 + $0x168] ss:$16 sps:$4 sm:$0xff]   ;;  %v14576_v30 = vld [vmem:[%s22324_s5 + $0x14c] ss:$16 sps:$4 sm:$0xff]  }
 0x227   : > { %v2344_v5 = vpop.f32.mrf.mxu0  ;;  %3830 = vmatprep.subr.bf16.mxu0 %v14552_v52 }
 0x228   : > { %v2745_v13 = vmax.f32 %v2452_v44, 0.0  ;;  %v2345_v16 = vadd.f32 %v2344_v5, %v16759_v42  ;;  %v2457_v20 = vpop.f32.mrf.mxu1  ;;  %v16887_v36 = vpack.c.bf16 %v2744_v54, %v2740_v15  ;;  %v2456_v9 = vadd.f32 %v2455_v51, %v2343_v33  ;;  %v14582_v33 = vld [vmem:[%s22324_s5 + $0x12c] ss:$16 sps:$4 sm:$0xff]  }
 0x229   : > { %v2346_v57 = vpop.f32.mrf.mxu0  ;;  %v16918_v54 = vrot.slane %v16755_v62, %v16156_v22 }
 0x22a   : > { %v2347_v61 = vadd.f32 %v2346_v57, %v16763_v41  ;;  %v2459_v17 = vpop.f32.mrf.mxu1  ;;  %3831 = vmatpush2.bf16.msra.mxu0 %v14550_v53  ;;  %v16882_v18 = vpack.c.bf16 %v2745_v13, %v2741_v12  ;;  %v2458_v7 = vadd.f32 %v2457_v20, %v2345_v16  ;;  %v2748_v59 = vmax.f32 %v2456_v9, 0.0 }
 0x22b   : > { %v2348_v34 = vpop.f32.mrf.mxu0  ;;  %3832 = vmatprep.subr.bf16.mxu0 %v14558_v3  ;;  %v16922_v3 = vrot.slane %v16755_v62, %v16162_v24 }
 0x22c   : > { %v2460_v31 = vadd.f32 %v2459_v17, %v2347_v61  ;;  %v2349_v37 = vadd.f32 %v2348_v34, %v16759_v42  ;;  %v2461_v32 = vpop.f32.mrf.mxu1  ;;  %3668 = vmatprep.mubr.bf16.mxu0 %v16882_v18  ;;  %v2749_v2 = vmax.f32 %v2458_v7, 0.0 }
 0x22d   : > { %v2352_v38 = vpop.f32.mrf.mxu0  ;;  %3669 = vmatmul.mubr.bf16.gmra.mxu0 %v16887_v36 }
 0x22e   : > { %v2462_v14 = vadd.f32 %v2461_v32, %v2349_v37  ;;  %v2465_v63 = vpop.f32.mrf.mxu1  ;;  %3833 = vmatpush2.bf16.msra.mxu0 %v14556_v25  ;;  %v2752_v39 = vmax.f32 %v2460_v31, 0.0  ;;  %v2353_v1 = vadd.f32 %v2352_v38, %v16763_v41  ;;  %v14580_v32 = vld [vmem:[%s22324_s5 + $0x128] ss:$16 sps:$4 sm:$0xff]  }
 0x22f   : > { %v2354_v46 = vpop.f32.mrf.mxu0  ;;  %3834 = vmatprep.subr.bf16.mxu0 %v14564_v6 }
 0x230   : > { %v2753_v29 = vmax.f32 %v2462_v14, 0.0  ;;  %v2355_v10 = vadd.f32 %v2354_v46, %v16759_v42  ;;  %v2467_v56 = vpop.f32.mrf.mxu1  ;;  %v16909_v28 = vpack.c.bf16 %v2752_v39, %v2748_v59  ;;  %v2466_v5 = vadd.f32 %v2465_v63, %v2353_v1  ;;  %v14588_v14 = vld [vmem:[%s22324_s5 + $0x10c] ss:$16 sps:$4 sm:$0xff]  }
 0x231   : > { %v2356_v60 = vpop.f32.mrf.mxu0 }
 0x232   : > { %v2357_v52 = vadd.f32 %v2356_v60, %v16763_v41  ;;  %v2469_v55 = vpop.f32.mrf.mxu1  ;;  %3835 = vmatpush2.bf16.msra.mxu0 %v14562_v0  ;;  %v16904_v27 = vpack.c.bf16 %v2753_v29, %v2749_v2  ;;  %v2468_v44 = vadd.f32 %v2467_v56, %v2355_v10  ;;  %v2756_v25 = vmax.f32 %v2466_v5, 0.0  ;;  %v14586_v56 = vld [vmem:[%s22324_s5 + $0x108] ss:$16 sps:$4 sm:$0xff]  }
 0x233   : > { %v2358_v26 = vpop.f32.mrf.mxu0  ;;  %3836 = vmatprep.subr.bf16.mxu0 %v14570_v40 }
 0x234   : > { %v2470_v51 = vadd.f32 %v2469_v55, %v2357_v52  ;;  %v2359_v41 = vadd.f32 %v2358_v26, %v16759_v42  ;;  %v2471_v53 = vpop.f32.mrf.mxu1  ;;  %3678 = vmatprep.mubr.bf16.mxu0 %v16904_v27  ;;  %v14574_v42 = vld [vmem:[%s22324_s5 + $0x148] ss:$16 sps:$4 sm:$0xff]   ;;  %v2757_v57 = vmax.f32 %v2468_v44, 0.0 }
 0x235   : > { %v2508_v12 = vpop.f32.mrf.mxu0  ;;  %3679 = vmatmul.mubr.bf16.gmra.mxu0 %v16909_v28 }
 0x236   : > { %v2472_v13 = vadd.f32 %v2471_v53, %v2359_v41  ;;  %v2621_v16 = vpop.f32.mrf.mxu1  ;;  %3837 = vmatpush2.bf16.msra.mxu0 %v14568_v8  ;;  %v2760_v20 = vmax.f32 %v2470_v51, 0.0  ;;  %v2509_v34 = vadd.f32 %v2508_v12, %v16922_v3  ;;  %v14589_v53 = vld [vmem:[%s22324_s5 + $0x2e8] ss:$16 sps:$4 sm:$0xff]  }
 0x237   : > { %v2510_v15 = vpop.f32.mrf.mxu0  ;;  %3838 = vmatprep.subr.bf16.mxu0 %v14576_v30 }
 0x238   : > { %v2761_v62 = vmax.f32 %v2472_v13, 0.0  ;;  %v2511_v61 = vadd.f32 %v2510_v15, %v16918_v54  ;;  %v2623_v17 = vpop.f32.mrf.mxu1  ;;  %v16939_v9 = vpack.c.bf16 %v2760_v20, %v2756_v25  ;;  %v2622_v40 = vadd.f32 %v2621_v16, %v2509_v34  ;;  %v14594_v13 = vld [vmem:[%s22324_s5 + $0x2cc] ss:$16 sps:$4 sm:$0xff]  }
 0x239   : > { %v2512_v6 = vpop.f32.mrf.mxu0 }
 0x23a   : > { %v2513_v7 = vadd.f32 %v2512_v6, %v16922_v3  ;;  %v2625_v31 = vpop.f32.mrf.mxu1  ;;  %3839 = vmatpush2.bf16.msra.mxu0 %v14574_v42  ;;  %v16934_v37 = vpack.c.bf16 %v2761_v62, %v2757_v57  ;;  %v2624_v63 = vadd.f32 %v2623_v17, %v2511_v61  ;;  %v2702_v26 = vmax.f32 %v2622_v40, 0.0  ;;  %v14592_v17 = vld [vmem:[%s22324_s5 + $0x2c8] ss:$16 sps:$4 sm:$0xff]   ;;  %v14597_v6 = vld [vmem:[%s22324_s5 + $0x2ac] ss:$16 sps:$4 sm:$0xff]  }
 0x23b   : > { %v2514_v38 = vpop.f32.mrf.mxu0  ;;  %3840 = vmatprep.subr.bf16.mxu0 %v14582_v33 }
 0x23c   : > { %v2626_v0 = vadd.f32 %v2625_v31, %v2513_v7  ;;  %v2515_v39 = vadd.f32 %v2514_v38, %v16918_v54  ;;  %v2627_v46 = vpop.f32.mrf.mxu1  ;;  %3688 = vmatprep.mubr.bf16.mxu0 %v16934_v37  ;;  %v2703_v60 = vmax.f32 %v2624_v63, 0.0 }
 0x23d   : > { %v2518_v2 = vpop.f32.mrf.mxu0  ;;  %3689 = vmatmul.mubr.bf16.gmra.mxu0 %v16939_v9 }
 0x23e   : > { %v2628_v29 = vadd.f32 %v2627_v46, %v2515_v39  ;;  %v2631_v10 = vpop.f32.mrf.mxu1  ;;  %3841 = vmatpush2.bf16.msra.mxu0 %v14580_v32  ;;  %3844 = vmatprep.mubr.bf16.mxu0 %v16772_v47  ;;  %v2706_v59 = vmax.f32 %v2626_v0, 0.0  ;;  %v2519_v30 = vadd.f32 %v2518_v2, %v16922_v3  ;;  %v14595_v46 = vld [vmem:[%s22324_s5 + $0x2a8] ss:$16 sps:$4 sm:$0xff]  }
 0x23f   : > { %v2520_v1 = vpop.f32.mrf.mxu0  ;;  %3842 = vmatprep.subr.bf16.mxu0 %v14588_v14 }
 0x240   : > { %v2707_v52 = vmax.f32 %v2628_v29, 0.0  ;;  %v2521_v55 = vadd.f32 %v2520_v1, %v16918_v54  ;;  %v2633_v8 = vpop.f32.mrf.mxu1  ;;  %v16959_v5 = vpack.c.bf16 %v2706_v59, %v2702_v26  ;;  %v2632_v33 = vadd.f32 %v2631_v10, %v2519_v30  ;;  %v14600_v29 = vld [vmem:[%s22324_s5 + $0x28c] ss:$16 sps:$4 sm:$0xff]   ;;  %v14598_v26 = vld [vmem:[%s22324_s5 + $0x288] ss:$16 sps:$4 sm:$0xff]  }
 0x241   : > { %v2522_v44 = vpop.f32.mrf.mxu0 }
 0x242   : > { %v2523_v51 = vadd.f32 %v2522_v44, %v16922_v3  ;;  %v2635_v41 = vpop.f32.mrf.mxu1  ;;  %3843 = vmatpush2.bf16.msra.mxu0 %v14586_v56  ;;  %v16954_v47 = vpack.c.bf16 %v2707_v52, %v2703_v60  ;;  %v2634_v16 = vadd.f32 %v2633_v8, %v2521_v55  ;;  %v2710_v38 = vmax.f32 %v2632_v33, 0.0  ;;  %v14601_v33 = vld [vmem:[%s22324_s5 + $0x268] ss:$16 sps:$4 sm:$0xff]  }
 0x243   : > { %v2524_v12 = vpop.f32.mrf.mxu0 }
 0x244   : > { %v2636_v42 = vadd.f32 %v2635_v41, %v2523_v51  ;;  %v2525_v20 = vadd.f32 %v2524_v12, %v16918_v54  ;;  %v2637_v15 = vpop.f32.mrf.mxu1  ;;  %3731 = vmatprep.mubr.bf16.mxu1 %v16954_v47  ;;  %v2711_v7 = vmax.f32 %v2634_v16, 0.0  ;;  %v14603_v51 = vld [vmem:[%s22324_s5 + $0x26c] ss:$16 sps:$4 sm:$0xff]  }
 0x245   : > { %v2528_v57 = vpop.f32.mrf.mxu0  ;;  %3732 = vmatmul.mubr.bf16.vlgmr.msra.gmra.mxu1 %v16959_v5  ;;  %3845 = vmatmul.mubr.bf16.vlgmr.msra.gmra.mxu0 %v16777_v4 }
 0x246   : > { %v2638_v62 = vadd.f32 %v2637_v15, %v2525_v20  ;;  %v2641_v61 = vpop.f32.mrf.mxu1  ;;  %3926 = vmatpush1.bf16.msra.mxu1 %v14589_v53  ;;  %3854 = vmatprep.mubr.bf16.mxu0 %v16794_v35  ;;  %v2714_v25 = vmax.f32 %v2636_v42, 0.0  ;;  %v2529_v14 = vadd.f32 %v2528_v57, %v16922_v3 }
 0x247   : > { %v2530_v34 = vpop.f32.mrf.mxu0  ;;  %3927 = vmatprep.subr.bf16.mxu1 %v14594_v13 }
 0x248   : > { %v2715_v31 = vmax.f32 %v2638_v62, 0.0  ;;  %v2531_v4 = vadd.f32 %v2530_v34, %v16918_v54  ;;  %v2643_v32 = vpop.f32.mrf.mxu1  ;;  %v16983_v40 = vpack.c.bf16 %v2714_v25, %v2710_v38  ;;  %v2642_v60 = vadd.f32 %v2641_v61, %v2529_v14  ;;  %v14606_v61 = vld [vmem:[%s22324_s5 + $0x24c] ss:$16 sps:$4 sm:$0xff]  }
 0x249   : > { %v2532_v35 = vpop.f32.mrf.mxu0 }
 0x24a   : > { %v2533_v63 = vadd.f32 %v2532_v35, %v16922_v3  ;;  %v2645_v0 = vpop.f32.mrf.mxu1  ;;  %3928 = vmatpush1.bf16.msra.mxu1 %v14592_v17  ;;  %v16978_v39 = vpack.c.bf16 %v2715_v31, %v2711_v7  ;;  %v2644_v10 = vadd.f32 %v2643_v32, %v2531_v4  ;;  %v2718_v13 = vmax.f32 %v2642_v60, 0.0  ;;  %v14639_v17 = vld [vmem:[%s22261_s7 + $0x74] ss:$8 sps:$4 sm:$0xff]   ;;  %v14637_v31 = vld [vmem:[%s22261_s7 + $0x70] ss:$8 sps:$4 sm:$0xff]  }
 0x24b   : > { %v2534_v2 = vpop.f32.mrf.mxu0  ;;  %3929 = vmatprep.subr.bf16.mxu1 %v14597_v6  ;;  %v14604_v35 = vld [vmem:[%s22324_s5 + $0x248] ss:$16 sps:$4 sm:$0xff]   ;;  %4530 = vmatprep.subr.bf16.mxu0 %v14639_v17 }
 0x24c   : > { %v2646_v56 = vadd.f32 %v2645_v0, %v2533_v63  ;;  %v2535_v59 = vadd.f32 %v2534_v2, %v16918_v54  ;;  %v2647_v1 = vpop.f32.mrf.mxu1  ;;  %3741 = vmatprep.mubr.bf16.mxu1 %v16978_v39  ;;  %v2719_v41 = vmax.f32 %v2644_v10, 0.0  ;;  %4531 = vmatpush1.bf16.msra.mxu0 %v14637_v31  ;;  %v14646_v31 = vld [vmem:[%s22261_s7 + $0x40] ss:$8 sps:$4 sm:$0xff]  }
 0x24d   : > { %v2538_v52 = vpop.f32.mrf.mxu0  ;;  %3742 = vmatmul.mubr.bf16.gmra.mxu1 %v16983_v40  ;;  %3855 = vmatmul.mubr.bf16.gmra.mxu0 %v16799_v49 }
 0x24e   : > { %v2648_v55 = vadd.f32 %v2647_v1, %v2535_v59  ;;  %v2651_v8 = vpop.f32.mrf.mxu1  ;;  %3930 = vmatpush1.bf16.msra.mxu1 %v14595_v46  ;;  %3864 = vmatprep.mubr.bf16.mxu0 %v16816_v43  ;;  %v2722_v30 = vmax.f32 %v2646_v56, 0.0  ;;  %v2539_v16 = vadd.f32 %v2538_v52, %v16922_v3  ;;  %v14609_v46 = vld [vmem:[%s22324_s5 + $0x22c] ss:$16 sps:$4 sm:$0xff]   ;;  %v14640_v56 = vld [vmem:[%s22261_s7 + $0x60] ss:$8 sps:$4 sm:$0xff]  }
 0x24f   : > { %v2540_v44 = vpop.f32.mrf.mxu0  ;;  %3931 = vmatprep.subr.bf16.mxu1 %v14600_v29 }
 0x250   : > { %v2723_v53 = vmax.f32 %v2648_v55, 0.0  ;;  %v2541_v49 = vadd.f32 %v2540_v44, %v16918_v54  ;;  %v2653_v12 = vpop.f32.mrf.mxu1  ;;  %v17007_v57 = vpack.c.bf16 %v2722_v30, %v2718_v13  ;;  %v2652_v4 = vadd.f32 %v2651_v8, %v2539_v16  ;;  %v14643_v16 = vld [vmem:[%s22261_s7 + $0x50] ss:$8 sps:$4 sm:$0xff]  }
 0x251   : > { %v2542_v43 = vpop.f32.mrf.mxu0 }
 0x252   : > { %v2543_v42 = vadd.f32 %v2542_v43, %v16922_v3  ;;  %v2655_v20 = vpop.f32.mrf.mxu1  ;;  %3932 = vmatpush1.bf16.msra.mxu1 %v14598_v26  ;;  %v17002_v15 = vpack.c.bf16 %v2723_v53, %v2719_v41  ;;  %v2654_v25 = vadd.f32 %v2653_v12, %v2541_v49  ;;  %v2726_v59 = vmax.f32 %v2652_v4, 0.0  ;;  %v14607_v26 = vld [vmem:[%s22324_s5 + $0x228] ss:$16 sps:$4 sm:$0xff]   ;;  %v14645_v41 = vld [vmem:[%s22261_s7 + $0x54] ss:$8 sps:$4 sm:$0xff]  }
 0x253   : > { %v2544_v62 = vpop.f32.mrf.mxu0  ;;  %3933 = vmatprep.subr.bf16.mxu1 %v14603_v51  ;;  %v14612_v51 = vld [vmem:[%s22324_s5 + $0x20c] ss:$16 sps:$4 sm:$0xff]  }
 0x254   : > { %v2656_v34 = vadd.f32 %v2655_v20, %v2543_v42  ;;  %v2545_v6 = vadd.f32 %v2544_v62, %v16918_v54  ;;  %v2657_v7 = vpop.f32.mrf.mxu1  ;;  %3751 = vmatprep.mubr.bf16.mxu1 %v17002_v15  ;;  %v2727_v2 = vmax.f32 %v2654_v25, 0.0  ;;  %v14610_v62 = vld [vmem:[%s22324_s5 + $0x208] ss:$16 sps:$4 sm:$0xff]   ;;  %v14615_v25 = vld [vmem:[%s22324_s5 + $0x3ec] ss:$16 sps:$4 sm:$0xff]  }
 0x255   : > { %v2548_v32 = vpop.f32.mrf.mxu0  ;;  %3752 = vmatmul.mubr.bf16.gmra.mxu1 %v17007_v57  ;;  %3865 = vmatmul.mubr.bf16.gmra.mxu0 %v16821_v50  ;;  %v14642_v50 = vld [vmem:[%s22261_s7 + $0x64] ss:$8 sps:$4 sm:$0xff]  }
 0x256   : > { %v2658_v38 = vadd.f32 %v2657_v7, %v2545_v6  ;;  %v2661_v14 = vpop.f32.mrf.mxu1  ;;  %3934 = vmatpush1.bf16.msra.mxu1 %v14601_v33  ;;  %3874 = vmatprep.mubr.bf16.mxu0 %v16838_v58  ;;  %v2730_v63 = vmax.f32 %v2656_v34, 0.0  ;;  %v2549_v1 = vadd.f32 %v2548_v32, %v16922_v3 }
 0x257   : > { %v2550_v0 = vpop.f32.mrf.mxu0  ;;  %3935 = vmatprep.subr.bf16.mxu1 %v14606_v61  ;;  %4532 = vmatprep.subr.bf16.mxu0 %v14642_v50 }
 0x258   : > { %v2731_v29 = vmax.f32 %v2658_v38, 0.0  ;;  %v2551_v58 = vadd.f32 %v2550_v0, %v16918_v54  ;;  %v2663_v10 = vpop.f32.mrf.mxu1  ;;  %v17043_v30 = vpack.c.bf16 %v2730_v63, %v2726_v59  ;;  %4533 = vmatpush1.bf16.msra.mxu0 %v14640_v56  ;;  %v2662_v43 = vadd.f32 %v2661_v14, %v2549_v1  ;;  %v14613_v0 = vld [vmem:[%s22324_s5 + $0x3e8] ss:$16 sps:$4 sm:$0xff]  }
 0x259   : > { %v2552_v60 = vpop.f32.mrf.mxu0  ;;  %4534 = vmatprep.subr.bf16.mxu0 %v14645_v41  ;;  %v14649_v1 = vld [vmem:[%s22261_s7 + $0x30] ss:$8 sps:$4 sm:$0xff]  }
 0x25a   : > { %v2553_v52 = vadd.f32 %v2552_v60, %v16922_v3  ;;  %v2665_v55 = vpop.f32.mrf.mxu1  ;;  %3936 = vmatpush1.bf16.msra.mxu1 %v14604_v35  ;;  %v17038_v8 = vpack.c.bf16 %v2731_v29, %v2727_v2  ;;  %v2664_v53 = vadd.f32 %v2663_v10, %v2551_v58  ;;  %v2734_v4 = vmax.f32 %v2662_v43, 0.0  ;;  %v14618_v2 = vld [vmem:[%s22324_s5 + $0x3cc] ss:$16 sps:$4 sm:$0xff]  }
 0x25b   : > { %v2554_v44 = vpop.f32.mrf.mxu0  ;;  %3937 = vmatprep.subr.bf16.mxu1 %v14609_v46  ;;  %v14651_v29 = vld [vmem:[%s22261_s7 + $0x34] ss:$8 sps:$4 sm:$0xff]  }
 0x25c   : > { %v2666_v49 = vadd.f32 %v2665_v55, %v2553_v52  ;;  %v2555_v12 = vadd.f32 %v2554_v44, %v16918_v54  ;;  %v2667_v13 = vpop.f32.mrf.mxu1  ;;  %3761 = vmatprep.mubr.bf16.mxu1 %v17038_v8  ;;  %v2735_v34 = vmax.f32 %v2664_v53, 0.0  ;;  %4535 = vmatpush1.bf16.msra.mxu0 %v14643_v16  ;;  %v14616_v44 = vld [vmem:[%s22324_s5 + $0x3c8] ss:$16 sps:$4 sm:$0xff]   ;;  %v14621_v53 = vld [vmem:[%s22324_s5 + $0x3ac] ss:$16 sps:$4 sm:$0xff]  }
 0x25d   : > { %v2558_v42 = vpop.f32.mrf.mxu0  ;;  %3762 = vmatmul.mubr.bf16.gmra.mxu1 %v17043_v30  ;;  %3875 = vmatmul.mubr.bf16.gmra.mxu0 %v16843_v48  ;;  %v14648_v48 = vld [vmem:[%s22261_s7 + $0x44] ss:$8 sps:$4 sm:$0xff]   ;;  %v14652_v16 = vld [vmem:[%s22261_s7 + $0x20] ss:$8 sps:$4 sm:$0xff]  }
 0x25e   : > { %v2668_v20 = vadd.f32 %v2667_v13, %v2555_v12  ;;  %v2671_v33 = vpop.f32.mrf.mxu1  ;;  %3938 = vmatpush1.bf16.msra.mxu1 %v14607_v26  ;;  %3884 = vmatprep.mubr.bf16.mxu0 %v16860_v45  ;;  %v2738_v61 = vmax.f32 %v2666_v49, 0.0  ;;  %v2559_v32 = vadd.f32 %v2558_v42, %v16922_v3 }
 0x25f   : > { %v2560_v17 = vpop.f32.mrf.mxu0  ;;  %3939 = vmatprep.subr.bf16.mxu1 %v14612_v51  ;;  %4536 = vmatprep.subr.bf16.mxu0 %v14648_v48 }
 0x260   : > { %v2739_v6 = vmax.f32 %v2668_v20, 0.0  ;;  %v2561_v45 = vadd.f32 %v2560_v17, %v16918_v54  ;;  %v2673_v7 = vpop.f32.mrf.mxu1  ;;  %v17079_v46 = vpack.c.bf16 %v2738_v61, %v2734_v4  ;;  %4537 = vmatpush1.bf16.msra.mxu0 %v14646_v31  ;;  %v2672_v60 = vadd.f32 %v2671_v33, %v2559_v32  ;;  %v14619_v17 = vld [vmem:[%s22324_s5 + $0x3a8] ss:$16 sps:$4 sm:$0xff]  }
 0x261   : > { %v2562_v38 = vpop.f32.mrf.mxu0  ;;  %4538 = vmatprep.subr.bf16.mxu0 %v14651_v29  ;;  %v14655_v32 = vld [vmem:[%s22261_s7 + $0x10] ss:$8 sps:$4 sm:$0xff]  }
 0x262   : > { %v2563_v14 = vadd.f32 %v2562_v38, %v16922_v3  ;;  %v2675_v35 = vpop.f32.mrf.mxu1  ;;  %3940 = vmatpush1.bf16.msra.mxu1 %v14610_v62  ;;  %v17074_v63 = vpack.c.bf16 %v2739_v6, %v2735_v34  ;;  %v2674_v58 = vadd.f32 %v2673_v7, %v2561_v45  ;;  %v2742_v43 = vmax.f32 %v2672_v60, 0.0  ;;  %v14624_v34 = vld [vmem:[%s22324_s5 + $0x38c] ss:$16 sps:$4 sm:$0xff]  }
 0x263   : > { %v2564_v50 = vpop.f32.mrf.mxu0  ;;  %3941 = vmatprep.subr.bf16.mxu1 %v14615_v25  ;;  %v14657_v6 = vld [vmem:[%s22261_s7 + $0x14] ss:$8 sps:$4 sm:$0xff]  }
 0x264   : > { %v2676_v10 = vadd.f32 %v2675_v35, %v2563_v14  ;;  %v2565_v56 = vadd.f32 %v2564_v50, %v16918_v54  ;;  %v2677_v59 = vpop.f32.mrf.mxu1  ;;  %3771 = vmatprep.mubr.bf16.mxu1 %v17074_v63  ;;  %v2743_v49 = vmax.f32 %v2674_v58, 0.0  ;;  %4539 = vmatpush1.bf16.msra.mxu0 %v14649_v1  ;;  %v14622_v50 = vld [vmem:[%s22324_s5 + $0x388] ss:$16 sps:$4 sm:$0xff]   ;;  %v14627_v58 = vld [vmem:[%s22324_s5 + $0x36c] ss:$16 sps:$4 sm:$0xff]  }
 0x265   : > { %v2568_v52 = vpop.f32.mrf.mxu0  ;;  %3772 = vmatmul.mubr.bf16.gmra.mxu1 %v17079_v46  ;;  %3885 = vmatmul.mubr.bf16.gmra.mxu0 %v16865_v11  ;;  %v14654_v11 = vld [vmem:[%s22261_s7 + $0x24] ss:$8 sps:$4 sm:$0xff]   ;;  %v14658_v1 = vld [vmem:[%s22261_s7] ss:$8 sps:$4 sm:$0xff]  }
 0x266   : > { %v2678_v55 = vadd.f32 %v2677_v59, %v2565_v56  ;;  %v2681_v26 = vpop.f32.mrf.mxu1  ;;  %3942 = vmatpush2.bf16.msra.mxu1 %v14613_v0  ;;  %3894 = vmatprep.mubr.bf16.mxu0 %v16882_v18  ;;  %v2746_v51 = vmax.f32 %v2676_v10, 0.0  ;;  %v2569_v42 = vadd.f32 %v2568_v52, %v16922_v3 }
 0x267   : > { %v2570_v41 = vpop.f32.mrf.mxu0  ;;  %3943 = vmatprep.subr.bf16.mxu1 %v14618_v2  ;;  %4540 = vmatprep.subr.bf16.mxu0 %v14654_v11 }
 0x268   : > { %v2747_v12 = vmax.f32 %v2678_v55, 0.0  ;;  %v2571_v18 = vadd.f32 %v2570_v41, %v16918_v54  ;;  %v2683_v13 = vpop.f32.mrf.mxu1  ;;  %v17115_v25 = vpack.c.bf16 %v2746_v51, %v2742_v43  ;;  %4541 = vmatpush1.bf16.msra.mxu0 %v14652_v16  ;;  %v2682_v38 = vadd.f32 %v2681_v26, %v2569_v42  ;;  %v14625_v41 = vld [vmem:[%s22324_s5 + $0x368] ss:$16 sps:$4 sm:$0xff]  }
 0x269   : > { %v2572_v20 = vpop.f32.mrf.mxu0  ;;  %4542 = vmatprep.subr.bf16.mxu0 %v14657_v6  ;;  %v14661_v16 = vld [vmem:[%s22261_s7 + $0xf0] ss:$8 sps:$4 sm:$0xff]  }
 0x26a   : > { %v2573_v33 = vadd.f32 %v2572_v20, %v16922_v3  ;;  %v2685_v62 = vpop.f32.mrf.mxu1  ;;  %3944 = vmatpush2.bf16.msra.mxu1 %v14616_v44  ;;  %v17110_v61 = vpack.c.bf16 %v2747_v12, %v2743_v49  ;;  %v2684_v45 = vadd.f32 %v2683_v13, %v2571_v18  ;;  %v2750_v60 = vmax.f32 %v2682_v38, 0.0  ;;  %v14630_v49 = vld [vmem:[%s22324_s5 + $0x34c] ss:$16 sps:$4 sm:$0xff]   ;;  %v14634_v38 = vld [vmem:[%s22324_s5 + $0x308] ss:$16 sps:$4 sm:$0xff]  }
 0x26b   : > { %v2574_v48 = vpop.f32.mrf.mxu0  ;;  %3945 = vmatprep.subr.bf16.mxu1 %v14621_v53 }
 0x26c   : > { %v2686_v7 = vadd.f32 %v2685_v62, %v2573_v33  ;;  %v2575_v31 = vadd.f32 %v2574_v48, %v16918_v54  ;;  %v2687_v4 = vpop.f32.mrf.mxu1  ;;  %3781 = vmatprep.mubr.bf16.mxu1 %v17110_v61  ;;  %v2751_v10 = vmax.f32 %v2684_v45, 0.0  ;;  %4543 = vmatpush1.bf16.msra.mxu0 %v14655_v32  ;;  %v14633_v62 = vld [vmem:[%s22324_s5 + $0x32c] ss:$16 sps:$4 sm:$0xff]   ;;  %v14631_v45 = vld [vmem:[%s22324_s5 + $0x328] ss:$16 sps:$4 sm:$0xff]  }
 0x26d   : > { %v2578_v14 = vpop.f32.mrf.mxu0  ;;  %3782 = vmatmul.mubr.bf16.gmra.mxu1 %v17115_v25  ;;  %3895 = vmatmul.mubr.bf16.gmra.mxu0 %v16887_v36  ;;  %v14660_v36 = vld [vmem:[%s22261_s7 + $0x4] ss:$8 sps:$4 sm:$0xff]   ;;  %v14667_v32 = vld [vmem:[%s22261_s7 + $0xd0] ss:$8 sps:$4 sm:$0xff]  }
 0x26e   : > { %v2688_v35 = vadd.f32 %v2687_v4, %v2575_v31  ;;  %v2691_v0 = vpop.f32.mrf.mxu1  ;;  %3946 = vmatpush2.bf16.msra.mxu1 %v14619_v17  ;;  %3904 = vmatprep.mubr.bf16.mxu0 %v16904_v27  ;;  %v2754_v2 = vmax.f32 %v2686_v7, 0.0  ;;  %v2579_v52 = vadd.f32 %v2578_v14, %v16922_v3  ;;  %v14666_v17 = vld [vmem:[%s22261_s7 + $0xe4] ss:$8 sps:$4 sm:$0xff]   ;;  %v14669_v4 = vld [vmem:[%s22261_s7 + $0xd4] ss:$8 sps:$4 sm:$0xff]  }
 0x26f   : > { %v2580_v29 = vpop.f32.mrf.mxu0  ;;  %3947 = vmatprep.subr.bf16.mxu1 %v14624_v34  ;;  %4544 = vmatprep.subr.bf16.mxu0 %v14660_v36  ;;  %v14636_v31 = vld [vmem:[%s22324_s5 + $0x30c] ss:$16 sps:$4 sm:$0xff]   ;;  %v14688_v36 = vld [vmem:[%s22261_s7 + $0x160] ss:$8 sps:$4 sm:$0xff]  }
 0x270   : > { %v2755_v56 = vmax.f32 %v2688_v35, 0.0  ;;  %v2581_v27 = vadd.f32 %v2580_v29, %v16918_v54  ;;  %v2693_v59 = vpop.f32.mrf.mxu1  ;;  %v17151_v53 = vpack.c.bf16 %v2754_v2, %v2750_v60  ;;  %4545 = vmatpush1.bf16.msra.mxu0 %v14658_v1  ;;  %v2692_v43 = vadd.f32 %v2691_v0, %v2579_v52  ;;  %v14672_v14 = vld [vmem:[%s22261_s7 + $0xc4] ss:$8 sps:$4 sm:$0xff]   ;;  %v14670_v35 = vld [vmem:[%s22261_s7 + $0xc0] ss:$8 sps:$4 sm:$0xff]  }
 0x271   : > { %v2582_v55 = vpop.f32.mrf.mxu0  ;;  %v14678_v0 = vld [vmem:[%s22261_s7 + $0xa4] ss:$8 sps:$4 sm:$0xff]   ;;  %v14681_v2 = vld [vmem:[%s22261_s7 + $0x94] ss:$8 sps:$4 sm:$0xff]   ;;  %v14682_v29 = vld [vmem:[%s22261_s7 + $0x80] ss:$8 sps:$4 sm:$0xff]  }
 0x272   : > { %v2583_v26 = vadd.f32 %v2582_v55, %v16922_v3  ;;  %v2695_v44 = vpop.f32.mrf.mxu1  ;;  %3948 = vmatpush2.bf16.msra.mxu1 %v14622_v50  ;;  %v17146_v51 = vpack.c.bf16 %v2755_v56, %v2751_v10  ;;  %v14663_v3 = vld [vmem:[%s22261_s7 + $0xf4] ss:$8 sps:$4 sm:$0xff]   ;;  %v2694_v12 = vadd.f32 %v2693_v59, %v2581_v27  ;;  %v2758_v34 = vmax.f32 %v2692_v43, 0.0  ;;  %v14676_v50 = vld [vmem:[%s22261_s7 + $0xa0] ss:$8 sps:$4 sm:$0xff]  }
 0x273   : > { %v2584_v11 = vpop.f32.mrf.mxu0  ;;  %3949 = vmatprep.subr.bf16.mxu1 %v14627_v58  ;;  %4546 = vmatprep.subr.bf16.mxu0 %v14663_v3  ;;  %v14687_v58 = vld [vmem:[%s22261_s7 + $0x174] ss:$8 sps:$4 sm:$0xff]   ;;  %v14694_v56 = vld [vmem:[%s22261_s7 + $0x140] ss:$8 sps:$4 sm:$0xff]   ;;  %v14714_v55 = vld [vmem:[%s22261_s7 + $0x1e4] ss:$8 sps:$4 sm:$0xff]  }
 0x274   : > { %v2696_v18 = vadd.f32 %v2695_v44, %v2583_v26  ;;  %v2585_v13 = vadd.f32 %v2584_v11, %v16918_v54  ;;  %3791 = vmatprep.mubr.bf16.mxu1 %v17146_v51  ;;  %v2697_v42 = vpop.f32.mrf.mxu1  ;;  %v14628_v54 = vld [vmem:[%s22324_s5 + $0x348] ss:$16 sps:$4 sm:$0xff]   ;;  %4547 = vmatpush2.bf16.msra.mxu0 %v14661_v16  ;;  %v14693_v10 = vld [vmem:[%s22261_s7 + $0x154] ss:$8 sps:$4 sm:$0xff]  }
 0x275   : > { %3792 = vmatmul.mubr.bf16.gmra.mxu1 %v17151_v53  ;;  %3905 = vmatmul.mubr.bf16.gmra.mxu0 %v16909_v28  ;;  %v2759_v28 = vmax.f32 %v2694_v12, 0.0  ;;  %v14699_v27 = vld [vmem:[%s22261_s7 + $0x134] ss:$8 sps:$4 sm:$0xff]   ;;  %v14700_v59 = vld [vmem:[%s22261_s7 + $0x120] ss:$8 sps:$4 sm:$0xff]  }
 0x276   : > { %v2698_v20 = vadd.f32 %v2697_v42, %v2585_v13  ;;  %3950 = vmatpush2.bf16.msra.mxu1 %v14625_v41  ;;  %3914 = vmatprep.mubr.bf16.mxu0 %v16934_v37  ;;  %v2762_v33 = vmax.f32 %v2696_v18, 0.0  ;;  %v14664_v37 = vld [vmem:[%s22261_s7 + $0xe0] ss:$8 sps:$4 sm:$0xff]   ;;  %v14705_v1 = vld [vmem:[%s22261_s7 + $0x114] ss:$8 sps:$4 sm:$0xff]  }
 0x277   : > { %3951 = vmatprep.subr.bf16.mxu1 %v14630_v49  ;;  %4548 = vmatprep.subr.bf16.mxu0 %v14666_v17  ;;  %v14706_v60 = vld [vmem:[%s22261_s7 + $0x100] ss:$8 sps:$4 sm:$0xff]   ;;  %v14711_v52 = vld [vmem:[%s22261_s7 + $0x1f4] ss:$8 sps:$4 sm:$0xff]   ;;  %v14720_v41 = vld [vmem:[%s22261_s7 + $0x1c4] ss:$8 sps:$4 sm:$0xff]  }
 0x278   : > { %v2763_v48 = vmax.f32 %v2698_v20, 0.0  ;;  %v17184_v7 = vpack.c.bf16 %v2762_v33, %v2758_v34  ;;  %4549 = vmatpush2.bf16.msra.mxu0 %v14664_v37  ;;  %v14712_v26 = vld [vmem:[%s22261_s7 + $0x1e0] ss:$8 sps:$4 sm:$0xff]   ;;  %v14717_v44 = vld [vmem:[%s22261_s7 + $0x1d4] ss:$8 sps:$4 sm:$0xff]  }
 0x279   : > { %4550 = vmatprep.subr.bf16.mxu0 %v14669_v4  ;;  %v14723_v11 = vld [vmem:[%s22261_s7 + $0x1b4] ss:$8 sps:$4 sm:$0xff]   ;;  %v14721_v49 = vld [vmem:[%s22261_s7 + $0x1b0] ss:$8 sps:$4 sm:$0xff]   ;;  %v14726_v18 = vld [vmem:[%s22261_s7 + $0x1a4] ss:$8 sps:$4 sm:$0xff]  }
 0x27a   : > { %3952 = vmatpush2.bf16.msra.mxu1 %v14628_v54  ;;  %v17179_v6 = vpack.c.bf16 %v2763_v48, %v2759_v28  ;;  %v14724_v13 = vld [vmem:[%s22261_s7 + $0x1a0] ss:$8 sps:$4 sm:$0xff]   ;;  %v14729_v42 = vld [vmem:[%s22261_s7 + $0x194] ss:$8 sps:$4 sm:$0xff]   ;;  %v14727_v20 = vld [vmem:[%s22261_s7 + $0x190] ss:$8 sps:$4 sm:$0xff]  }
 0x27b   : > { %3953 = vmatprep.subr.bf16.mxu1 %v14633_v62  ;;  %v14732_v62 = vld [vmem:[%s22261_s7 + $0x184] ss:$8 sps:$4 sm:$0xff]   ;;  %v14730_v17 = vld [vmem:[%s22261_s7 + $0x180] ss:$8 sps:$4 sm:$0xff]  }
 0x27c   : > { %3801 = vmatprep.mubr.bf16.mxu1 %v17179_v6  ;;  %4551 = vmatpush2.bf16.msra.mxu0 %v14667_v32 }
 0x27d   : > { %3802 = vmatmul.mubr.bf16.gmra.mxu1 %v17184_v7  ;;  %3915 = vmatmul.mubr.bf16.gmra.mxu0 %v16939_v9  ;;  %v14675_v9 = vld [vmem:[%s22261_s7 + $0xb4] ss:$8 sps:$4 sm:$0xff]  }
 0x27e   : > { %3954 = vmatpush2.bf16.msra.mxu1 %v14631_v45  ;;  %3957 = vmatprep.mubr.bf16.mxu1 %v16954_v47  ;;  %v14673_v47 = vld [vmem:[%s22261_s7 + $0xb0] ss:$8 sps:$4 sm:$0xff]  }
 0x27f   : > { %3955 = vmatprep.subr.bf16.mxu1 %v14636_v31  ;;  %4552 = vmatprep.subr.bf16.mxu0 %v14672_v14 }
 0x280   : > { %4553 = vmatpush2.bf16.msra.mxu0 %v14670_v35 }
 0x281   : > { %4554 = vmatprep.subr.bf16.mxu0 %v14675_v9 }
 0x282   : > { %3956 = vmatpush2.bf16.msra.mxu1 %v14634_v38 }
 0x283   : > { %4643 = vmatprep.subr.bf16.mxu1 %v14687_v58 }
 0x284   : > { %4555 = vmatpush2.bf16.msra.mxu0 %v14673_v47 }
 0x285   : > { %3958 = vmatmul.mubr.bf16.vlgmr.msra.gmra.mxu1 %v16959_v5  ;;  %4556 = vmatprep.subr.bf16.mxu0 %v14678_v0  ;;  %v14679_v5 = vld [vmem:[%s22261_s7 + $0x90] ss:$8 sps:$4 sm:$0xff]  }
 0x286   : > { %3967 = vmatprep.mubr.bf16.mxu1 %v16978_v39  ;;  %v14684_v39 = vld [vmem:[%s22261_s7 + $0x84] ss:$8 sps:$4 sm:$0xff]  }
 0x288   : > { %4557 = vmatpush2.bf16.msra.mxu0 %v14676_v50 }
 0x289   : > { %4558 = vmatprep.subr.bf16.mxu0 %v14681_v2 }
 0x28c   : > { %4559 = vmatpush2.bf16.msra.mxu0 %v14679_v5 }
 0x28d   : > { %3968 = vmatmul.mubr.bf16.gmra.mxu1 %v16983_v40  ;;  %4560 = vmatprep.subr.bf16.mxu0 %v14684_v39  ;;  %v14685_v40 = vld [vmem:[%s22261_s7 + $0x170] ss:$8 sps:$4 sm:$0xff]  }
 0x28e   : > { %3977 = vmatprep.mubr.bf16.mxu1 %v17002_v15  ;;  %4644 = vmatpush1.bf16.msra.mxu1 %v14685_v40  ;;  %v14690_v15 = vld [vmem:[%s22261_s7 + $0x164] ss:$8 sps:$4 sm:$0xff]  }
 0x28f   : > { %4645 = vmatprep.subr.bf16.mxu1 %v14690_v15 }
 0x290   : > { %4561 = vmatpush2.bf16.msra.mxu0 %v14682_v29 }
 0x292   : > { %4646 = vmatpush1.bf16.msra.mxu1 %v14688_v36 }
 0x293   : > { %4647 = vmatprep.subr.bf16.mxu1 %v14693_v10  ;;  %v17394_v10 = vld [vmem:[%s22260_s6] sm:$0xf] }
 0x295   : > { %3978 = vmatmul.mubr.bf16.gmra.mxu1 %v17007_v57  ;;  %v14691_v57 = vld [vmem:[%s22261_s7 + $0x150] ss:$8 sps:$4 sm:$0xff]  }
 0x296   : > { %3987 = vmatprep.mubr.bf16.mxu1 %v17038_v8  ;;  %4648 = vmatpush1.bf16.msra.mxu1 %v14691_v57  ;;  %v14696_v8 = vld [vmem:[%s22261_s7 + $0x144] ss:$8 sps:$4 sm:$0xff]  }
 0x297   : > { %4649 = vmatprep.subr.bf16.mxu1 %v14696_v8  ;;  %v17400_v8 = vrot.slane %v17394_v10, %v16153_v21 }
 0x29a   : > { %4650 = vmatpush1.bf16.msra.mxu1 %v14694_v56  ;;  %v17404_v56 = vrot.slane %v17394_v10, %v16159_v23 }
 0x29b   : > { %4651 = vmatprep.subr.bf16.mxu1 %v14699_v27 }
 0x29d   : > { %3988 = vmatmul.mubr.bf16.gmra.mxu1 %v17043_v30  ;;  %v14697_v30 = vld [vmem:[%s22261_s7 + $0x130] ss:$8 sps:$4 sm:$0xff]  }
 0x29e   : > { %3997 = vmatprep.mubr.bf16.mxu1 %v17074_v63  ;;  %4652 = vmatpush1.bf16.msra.mxu1 %v14697_v30  ;;  %v14702_v63 = vld [vmem:[%s22261_s7 + $0x124] ss:$8 sps:$4 sm:$0xff]  }
 0x29f   : > { %4653 = vmatprep.subr.bf16.mxu1 %v14702_v63 }
 0x2a2   : > { %4654 = vmatpush1.bf16.msra.mxu1 %v14700_v59 }
 0x2a3   : > { %4655 = vmatprep.subr.bf16.mxu1 %v14705_v1 }
 0x2a5   : > { %3998 = vmatmul.mubr.bf16.gmra.mxu1 %v17079_v46  ;;  %v14703_v46 = vld [vmem:[%s22261_s7 + $0x110] ss:$8 sps:$4 sm:$0xff]  }
 0x2a6   : > { %4007 = vmatprep.mubr.bf16.mxu1 %v17110_v61  ;;  %4656 = vmatpush1.bf16.msra.mxu1 %v14703_v46  ;;  %v14708_v61 = vld [vmem:[%s22261_s7 + $0x104] ss:$8 sps:$4 sm:$0xff]  }
 0x2a7   : > { %4657 = vmatprep.subr.bf16.mxu1 %v14708_v61 }
 0x2aa   : > { %4658 = vmatpush1.bf16.msra.mxu1 %v14706_v60 }
 0x2ab   : > { %4659 = vmatprep.subr.bf16.mxu1 %v14711_v52 }
 0x2ad   : > { %4008 = vmatmul.mubr.bf16.gmra.mxu1 %v17115_v25  ;;  %v14709_v25 = vld [vmem:[%s22261_s7 + $0x1f0] ss:$8 sps:$4 sm:$0xff]  }
 0x2ae   : > { %4017 = vmatprep.mubr.bf16.mxu1 %v17146_v51  ;;  %4660 = vmatpush2.bf16.msra.mxu1 %v14709_v25  ;;  %v14715_v51 = vld [vmem:[%s22261_s7 + $0x1d0] ss:$8 sps:$4 sm:$0xff]  }
 0x2af   : > { %4661 = vmatprep.subr.bf16.mxu1 %v14714_v55 }
 0x2b2   : > { %4662 = vmatpush2.bf16.msra.mxu1 %v14712_v26 }
 0x2b3   : > { %4663 = vmatprep.subr.bf16.mxu1 %v14717_v44 }
 0x2b5   : > { %4018 = vmatmul.mubr.bf16.gmra.mxu1 %v17151_v53  ;;  %v14718_v53 = vld [vmem:[%s22261_s7 + $0x1c0] ss:$8 sps:$4 sm:$0xff]  }
 0x2b6   : > { %4027 = vmatprep.mubr.bf16.mxu1 %v17179_v6  ;;  %4664 = vmatpush2.bf16.msra.mxu1 %v14715_v51 }
 0x2b7   : > { %4665 = vmatprep.subr.bf16.mxu1 %v14720_v41  ;;  %v14735_v41 = vld [vmem:[%s22264_s10 + $0xe4] ss:$16 sps:$4 sm:$0xff]  }
 0x2b8   : > { %5252 = vmatprep.subr.bf16.mxu0 %v14735_v41 }
 0x2ba   : > { %4666 = vmatpush2.bf16.msra.mxu1 %v14718_v53 }
 0x2bb   : > { %4667 = vmatprep.subr.bf16.mxu1 %v14723_v11  ;;  %v14738_v11 = vld [vmem:[%s22264_s10 + $0xec] ss:$16 sps:$4 sm:$0xff]  }
 0x2bd   : > { %4028 = vmatmul.mubr.bf16.gmra.mxu1 %v17184_v7 }
 0x2be   : > { %4668 = vmatpush2.bf16.msra.mxu1 %v14721_v49 }
 0x2bf   : > { %4669 = vmatprep.subr.bf16.mxu1 %v14726_v18 }
 0x2c2   : > { %4670 = vmatpush2.bf16.msra.mxu1 %v14724_v13 }
 0x2c3   : > { %4671 = vmatprep.subr.bf16.mxu1 %v14729_v42 }
 0x2c5   : > { %v3620_v3 = vpop.f32.mrf.mxu0 }
 0x2c6   : > { %4672 = vmatpush2.bf16.msra.mxu1 %v14727_v20  ;;  %v3621_v61 = vadd.f32 %v3620_v3, %v17404_v56 }
 0x2c7   : > { %v3622_v12 = vpop.f32.mrf.mxu0  ;;  %4673 = vmatprep.subr.bf16.mxu1 %v14732_v62 }
 0x2c8   : > { %v3623_v1 = vadd.f32 %v3622_v12, %v17400_v8 }
 0x2c9   : > { %v3624_v16 = vpop.f32.mrf.mxu0 }
 0x2ca   : > { %4674 = vmatpush2.bf16.msra.mxu1 %v14730_v17  ;;  %v3625_v46 = vadd.f32 %v3624_v16, %v17404_v56  ;;  %v14733_v17 = vld [vmem:[%s22264_s10 + $0xe0] ss:$16 sps:$4 sm:$0xff]  }
 0x2cb   : > { %v3626_v43 = vpop.f32.mrf.mxu0  ;;  %5365 = vmatprep.subr.bf16.mxu1 %v14738_v11 }
 0x2cc   : > { %v3627_v52 = vadd.f32 %v3626_v43, %v17400_v8 }
 0x2cd   : > { %v17337_v54 = vpop.f32.mrf.mxu0 }
 0x2cf   : > { %v3632_v33 = vpop.f32.mrf.mxu0 }
 0x2d0   : > { %v3633_v42 = vadd.f32 %v3632_v33, %v17400_v8 }
 0x2d1   : > { %v3634_v28 = vpop.f32.mrf.mxu0 }
 0x2d2   : > { %v3635_v20 = vadd.f32 %v3634_v28, %v17404_v56 }
 0x2d3   : > { %v3636_v48 = vpop.f32.mrf.mxu0 }
 0x2d5   : > { %v17345_v37 = vpop.f32.mrf.mxu0 }
 0x2d7   : > { %v17347_v34 = vpop.f32.mrf.mxu0 }
 0x2d9   : > { %v17349_v6 = vpop.f32.mrf.mxu0 }
 0x2db   : > { %v17351_v45 = vpop.f32.mrf.mxu0 }
 0x2dd   : > { %v17353_v7 = vpop.f32.mrf.mxu0 }
 0x2df   : > { %v17355_v31 = vpop.f32.mrf.mxu0 }
 0x2e1   : > { %v17357_v4 = vpop.f32.mrf.mxu0 }
 0x2e3   : > { %v17359_v32 = vpop.f32.mrf.mxu0 }
 0x2e5   : > { %v17361_v38 = vpop.f32.mrf.mxu0 }
 0x2e7   : > { %v17363_v14 = vpop.f32.mrf.mxu0 }
 0x2e9   : > { %v17365_v35 = vpop.f32.mrf.mxu0 }
 0x2eb   : > { %v17367_v9 = vpop.f32.mrf.mxu0 }
 0x2ed   : > { %v17369_v47 = vpop.f32.mrf.mxu0 }
 0x2ef   : > { %v17371_v0 = vpop.f32.mrf.mxu0 }
 0x2f1   : > { %v17373_v50 = vpop.f32.mrf.mxu0 }
 0x2f3   : > { %v17375_v2 = vpop.f32.mrf.mxu0 }
 0x2f5   : > { %v17377_v5 = vpop.f32.mrf.mxu0 }
 0x2f7   : > { %v17379_v39 = vpop.f32.mrf.mxu0 }
 0x2f9   : > { %v17381_v29 = vpop.f32.mrf.mxu0 }
 0x2fb   : > { %v17383_v58 = vpop.f32.mrf.mxu0 }
 0x2fd   : > { %v17385_v40 = vpop.f32.mrf.mxu0 }
 0x2ff   : > { %v17387_v15 = vpop.f32.mrf.mxu0 }
 0x301   : > { %v17389_v36 = vpop.f32.mrf.mxu0 }
 0x303   : > { %v17396_v57 = vpop.f32.mrf.mxu0 }
 0x305   : > { %v3733_v27 = vpop.f32.mrf.mxu1  ;;  %v17406_v30 = vpop.f32.mrf.mxu0 }
 0x306   : > { %v3734_v26 = vadd.f32 %v3733_v27, %v3621_v61  ;;  %v3631_v27 = vadd.f32 %v17337_v54, %v17404_v56  ;;  %v3637_v61 = vadd.f32 %v3636_v48, %v17400_v8  ;;  %v14739_v54 = vld [vmem:[%s22264_s10 + $0xc0] ss:$16 sps:$4 sm:$0xff]   ;;  %v14747_v48 = vld [vmem:[%s22264_s10 + $0xa4] ss:$16 sps:$4 sm:$0xff]  }
 0x307   : > { %v3735_v63 = vpop.f32.mrf.mxu1  ;;  %v17408_v59 = vpop.f32.mrf.mxu0 }
 0x308   : > { %v3736_v25 = vadd.f32 %v3735_v63, %v3623_v1  ;;  %v4038_v13 = vmax.f32 %v3734_v26, 0.0 }
 0x309   : > { %v3737_v60 = vpop.f32.mrf.mxu1  ;;  %v17414_v44 = vpop.f32.mrf.mxu0 }
 0x30a   : > { %v3738_v55 = vadd.f32 %v3737_v60, %v3625_v46  ;;  %v4039_v12 = vmax.f32 %v3736_v25, 0.0  ;;  %v14741_v46 = vld [vmem:[%s22264_s10 + $0xc4] ss:$16 sps:$4 sm:$0xff]  }
 0x30b   : > { %v3739_v51 = vpop.f32.mrf.mxu1  ;;  %v17422_v16 = vpop.f32.mrf.mxu0 }
 0x30c   : > { %v3740_v53 = vadd.f32 %v3739_v51, %v3627_v52  ;;  %v4042_v49 = vmax.f32 %v3738_v55, 0.0 }
 0x30d   : > { %v3743_v3 = vpop.f32.mrf.mxu1  ;;  %v17435_v52 = vpop.f32.mrf.mxu0 }
 0x30e   : > { %v4043_v18 = vmax.f32 %v3740_v53, 0.0  ;;  %v4102_v63 = vpack.c.bf16 %v4042_v49, %v4038_v13  ;;  %v3744_v28 = vadd.f32 %v3743_v3, %v3631_v27 }
 0x30f   : > { %v3745_v43 = vpop.f32.mrf.mxu1  ;;  %v17443_v49 = vpop.f32.mrf.mxu0 }
 0x310   : > { %v4103_v62 = vpack.c.bf16 %v4043_v18, %v4039_v12  ;;  %v3746_v60 = vadd.f32 %v3745_v43, %v3633_v42  ;;  %v4046_v11 = vmax.f32 %v3744_v28, 0.0  ;;  %v3643_v12 = vadd.f32 %v17347_v34, %v17400_v8  ;;  %v14745_v43 = vld [vmem:[%s22264_s10 + $0xa0] ss:$16 sps:$4 sm:$0xff]  }
 0x311   : > { %v3747_v1 = vpop.f32.mrf.mxu1  ;;  %v3645_v18 = vadd.f32 %v17349_v6, %v17404_v56  ;;  %v3641_v42 = vadd.f32 %v17345_v37, %v17404_v56  ;;  %v3647_v34 = vadd.f32 %v17351_v45, %v17400_v8  ;;  %v14751_v37 = vld [vmem:[%s22264_s10 + $0x80] ss:$16 sps:$4 sm:$0xff]   ;;  %v14759_v45 = vld [vmem:[%s22264_s10 + $0x64] ss:$16 sps:$4 sm:$0xff]  }
 0x312   : > { %v3748_v33 = vadd.f32 %v3747_v1, %v3635_v20  ;;  %4562 = vmatprep.mubr.bf16.mxu0 %v4103_v62  ;;  %v4047_v41 = vmax.f32 %v3746_v60, 0.0 }
 0x313   : > { %v3749_v25 = vpop.f32.mrf.mxu1  ;;  %4563 = vmatmul.mubr.bf16.vlgmr.msra.gmra.mxu0 %v4102_v63  ;;  %v17459_v63 = vpop.f32.mrf.mxu0 }
 0x314   : > { %v3750_v55 = vadd.f32 %v3749_v25, %v3637_v61  ;;  %5253 = vmatpush1.bf16.msra.mxu0 %v14733_v17  ;;  %v4050_v26 = vmax.f32 %v3748_v33, 0.0  ;;  %v14753_v17 = vld [vmem:[%s22264_s10 + $0x84] ss:$16 sps:$4 sm:$0xff]  }
 0x315   : > { %v3753_v51 = vpop.f32.mrf.mxu1  ;;  %5254 = vmatprep.subr.bf16.mxu0 %v14741_v46 }
 0x316   : > { %v4051_v53 = vmax.f32 %v3750_v55, 0.0  ;;  %v4106_v20 = vpack.c.bf16 %v4050_v26, %v4046_v11  ;;  %v3754_v1 = vadd.f32 %v3753_v51, %v3641_v42  ;;  %v17467_v55 = vpop.f32.mrf.mxu0  ;;  %v3653_v51 = vadd.f32 %v17355_v31, %v17400_v8 }
 0x317   : > { %v3755_v3 = vpop.f32.mrf.mxu1  ;;  %v3651_v11 = vadd.f32 %v17353_v7, %v17404_v56  ;;  %v3657_v31 = vadd.f32 %v17359_v32, %v17400_v8  ;;  %v14763_v7 = vld [vmem:[%s22264_s10 + $0x40] ss:$16 sps:$4 sm:$0xff]   ;;  %v14771_v32 = vld [vmem:[%s22264_s10 + $0x24] ss:$16 sps:$4 sm:$0xff]  }
 0x318   : > { %v4107_v13 = vpack.c.bf16 %v4051_v53, %v4047_v41  ;;  %5255 = vmatpush1.bf16.msra.mxu0 %v14739_v54  ;;  %v3756_v6 = vadd.f32 %v3755_v3, %v3643_v12  ;;  %v4054_v54 = vmax.f32 %v3754_v1, 0.0  ;;  %v14757_v53 = vld [vmem:[%s22264_s10 + $0x60] ss:$16 sps:$4 sm:$0xff]  }
 0x319   : > { %v3757_v62 = vpop.f32.mrf.mxu1  ;;  %5256 = vmatprep.subr.bf16.mxu0 %v14747_v48  ;;  %v3655_v48 = vadd.f32 %v17357_v4, %v17404_v56 }
 0x31a   : > { %v3758_v27 = vadd.f32 %v3757_v62, %v3645_v18  ;;  %4572 = vmatprep.mubr.bf16.mxu0 %v4107_v13  ;;  %v4055_v28 = vmax.f32 %v3756_v6, 0.0  ;;  %v14765_v18 = vld [vmem:[%s22264_s10 + $0x44] ss:$16 sps:$4 sm:$0xff]  }
 0x31b   : > { %v3759_v46 = vpop.f32.mrf.mxu1  ;;  %4573 = vmatmul.mubr.bf16.gmra.mxu0 %v4106_v20 }
 0x31c   : > { %v3760_v61 = vadd.f32 %v3759_v46, %v3647_v34  ;;  %5257 = vmatpush1.bf16.msra.mxu0 %v14745_v43  ;;  %v4058_v60 = vmax.f32 %v3758_v27, 0.0  ;;  %v17483_v43 = vpop.f32.mrf.mxu0 }
 0x31d   : > { %v3763_v33 = vpop.f32.mrf.mxu1  ;;  %5258 = vmatprep.subr.bf16.mxu0 %v14753_v17 }
 0x31e   : > { %v4059_v25 = vmax.f32 %v3760_v61, 0.0  ;;  %v4110_v3 = vpack.c.bf16 %v4058_v60, %v4054_v54  ;;  %v3764_v42 = vadd.f32 %v3763_v33, %v3651_v11  ;;  %v17491_v1 = vpop.f32.mrf.mxu0  ;;  %v3665_v60 = vadd.f32 %v17365_v35, %v17404_v56 }
 0x31f   : > { %v3765_v26 = vpop.f32.mrf.mxu1 }
 0x320   : > { %v4111_v41 = vpack.c.bf16 %v4059_v25, %v4055_v28  ;;  %5259 = vmatpush1.bf16.msra.mxu0 %v14751_v37  ;;  %v3766_v4 = vadd.f32 %v3765_v26, %v3653_v51  ;;  %v4062_v46 = vmax.f32 %v3764_v42, 0.0  ;;  %v3663_v37 = vadd.f32 %v17363_v14, %v17400_v8  ;;  %v14777_v26 = vld [vmem:[%s22264_s10 + $0x4] ss:$16 sps:$4 sm:$0xff]  }
 0x321   : > { %v3767_v12 = vpop.f32.mrf.mxu1  ;;  %5260 = vmatprep.subr.bf16.mxu0 %v14759_v45  ;;  %v14769_v45 = vld [vmem:[%s22264_s10 + $0x20] ss:$16 sps:$4 sm:$0xff]   ;;  %v3661_v28 = vadd.f32 %v17361_v38, %v17404_v56  ;;  %v3667_v14 = vadd.f32 %v17367_v9, %v17400_v8  ;;  %v14783_v9 = vld [vmem:[%s22264_s10 + $0x1e4] ss:$16 sps:$4 sm:$0xff]  }
 0x322   : > { %v3768_v13 = vadd.f32 %v3767_v12, %v3655_v48  ;;  %4582 = vmatprep.mubr.bf16.mxu0 %v4111_v41  ;;  %v4063_v6 = vmax.f32 %v3766_v4, 0.0  ;;  %v17507_v48 = vpop.f32.mrf.mxu0  ;;  %v14775_v38 = vld [vmem:[%s22264_s10] ss:$16 sps:$4 sm:$0xff]  }
 0x323   : > { %v3769_v20 = vpop.f32.mrf.mxu1  ;;  %4583 = vmatmul.mubr.bf16.gmra.mxu0 %v4110_v3 }
 0x324   : > { %v3770_v62 = vadd.f32 %v3769_v20, %v3657_v31  ;;  %5261 = vmatpush1.bf16.msra.mxu0 %v14757_v53  ;;  %v4066_v17 = vmax.f32 %v3768_v13, 0.0  ;;  %v17515_v4 = vpop.f32.mrf.mxu0  ;;  %v3673_v20 = vadd.f32 %v17371_v0, %v17400_v8  ;;  %v3677_v0 = vadd.f32 %v17375_v2, %v17400_v8  ;;  %v14795_v2 = vld [vmem:[%s22264_s10 + $0x1a4] ss:$16 sps:$4 sm:$0xff]  }
 0x325   : > { %v3773_v34 = vpop.f32.mrf.mxu1  ;;  %5262 = vmatprep.subr.bf16.mxu0 %v14765_v18 }
 0x326   : > { %v4067_v27 = vmax.f32 %v3770_v62, 0.0  ;;  %v4114_v25 = vpack.c.bf16 %v4066_v17, %v4062_v46  ;;  %v3774_v41 = vadd.f32 %v3773_v34, %v3661_v28  ;;  %v3675_v62 = vadd.f32 %v17373_v50, %v17404_v56  ;;  %v14781_v17 = vld [vmem:[%s22264_s10 + $0x1e0] ss:$16 sps:$4 sm:$0xff]  }
 0x327   : > { %v3775_v61 = vpop.f32.mrf.mxu1  ;;  %v3671_v34 = vadd.f32 %v17369_v47, %v17404_v56  ;;  %v14787_v47 = vld [vmem:[%s22264_s10 + $0x1c0] ss:$16 sps:$4 sm:$0xff]  }
 0x328   : > { %v4115_v33 = vpack.c.bf16 %v4067_v27, %v4063_v6  ;;  %5263 = vmatpush1.bf16.msra.mxu0 %v14763_v7  ;;  %v3776_v35 = vadd.f32 %v3775_v61, %v3663_v37  ;;  %v4070_v13 = vmax.f32 %v3774_v41, 0.0  ;;  %v14789_v27 = vld [vmem:[%s22264_s10 + $0x1c4] ss:$16 sps:$4 sm:$0xff]   ;;  %v17531_v61 = vpop.f32.mrf.mxu0  ;;  %v3685_v41 = vadd.f32 %v17381_v29, %v17404_v56 }
 0x329   : > { %v3777_v54 = vpop.f32.mrf.mxu1  ;;  %5264 = vmatprep.subr.bf16.mxu0 %v14771_v32 }
 0x32a   : > { %v3778_v51 = vadd.f32 %v3777_v54, %v3665_v60  ;;  %4592 = vmatprep.mubr.bf16.mxu0 %v4115_v33  ;;  %v4071_v18 = vmax.f32 %v3776_v35, 0.0 }
 0x32b   : > { %v3779_v53 = vpop.f32.mrf.mxu1  ;;  %4593 = vmatmul.mubr.bf16.gmra.mxu0 %v4114_v25 }
 0x32c   : > { %v3780_v11 = vadd.f32 %v3779_v53, %v3667_v14  ;;  %5265 = vmatpush1.bf16.msra.mxu0 %v14769_v45  ;;  %v4074_v3 = vmax.f32 %v3778_v51, 0.0  ;;  %v3683_v51 = vadd.f32 %v17379_v39, %v17400_v8  ;;  %v3687_v39 = vadd.f32 %v17383_v58, %v17400_v8  ;;  %v14807_v58 = vld [vmem:[%s22264_s10 + $0x164] ss:$16 sps:$4 sm:$0xff]  }
 0x32d   : > { %v3783_v12 = vpop.f32.mrf.mxu1  ;;  %5266 = vmatprep.subr.bf16.mxu0 %v14777_v26  ;;  %v17539_v26 = vpop.f32.mrf.mxu0 }
 0x32e   : > { %v4075_v31 = vmax.f32 %v3780_v11, 0.0  ;;  %v4118_v32 = vpack.c.bf16 %v4074_v3, %v4070_v13  ;;  %v3784_v37 = vadd.f32 %v3783_v12, %v3671_v34  ;;  %v14793_v11 = vld [vmem:[%s22264_s10 + $0x1a0] ss:$16 sps:$4 sm:$0xff]  }
 0x32f   : > { %v3785_v42 = vpop.f32.mrf.mxu1 }
 0x330   : > { %v4119_v7 = vpack.c.bf16 %v4075_v31, %v4071_v18  ;;  %5267 = vmatpush1.bf16.msra.mxu0 %v14775_v38  ;;  %v3786_v50 = vadd.f32 %v3785_v42, %v3673_v20  ;;  %v4078_v14 = vmax.f32 %v3784_v37, 0.0  ;;  %v3681_v38 = vadd.f32 %v17377_v5, %v17404_v56  ;;  %v17555_v31 = vpop.f32.mrf.mxu0  ;;  %v14799_v5 = vld [vmem:[%s22264_s10 + $0x180] ss:$16 sps:$4 sm:$0xff]  }
 0x331   : > { %v3787_v6 = vpop.f32.mrf.mxu1  ;;  %5268 = vmatprep.subr.bf16.mxu0 %v14783_v9  ;;  %v14801_v9 = vld [vmem:[%s22264_s10 + $0x184] ss:$16 sps:$4 sm:$0xff]   ;;  %v14805_v37 = vld [vmem:[%s22264_s10 + $0x160] ss:$16 sps:$4 sm:$0xff]  }
 0x332   : > { %v3788_v46 = vadd.f32 %v3787_v6, %v3675_v62  ;;  %4602 = vmatprep.mubr.bf16.mxu0 %v4119_v7  ;;  %v4079_v25 = vmax.f32 %v3786_v50, 0.0  ;;  %v3695_v50 = vadd.f32 %v17389_v36, %v17404_v56 }
 0x333   : > { %v3789_v60 = vpop.f32.mrf.mxu1  ;;  %4603 = vmatmul.mubr.bf16.gmra.mxu0 %v4118_v32  ;;  %v17563_v32 = vpop.f32.mrf.mxu0 }
 0x334   : > { %v3790_v33 = vadd.f32 %v3789_v60, %v3677_v0  ;;  %5269 = vmatpush2.bf16.msra.mxu0 %v14781_v17  ;;  %v4082_v45 = vmax.f32 %v3788_v46, 0.0  ;;  %v3693_v0 = vadd.f32 %v17387_v15, %v17400_v8  ;;  %v3691_v60 = vadd.f32 %v17385_v40, %v17404_v56 }
 0x335   : > { %v3793_v28 = vpop.f32.mrf.mxu1  ;;  %5270 = vmatprep.subr.bf16.mxu0 %v14789_v27  ;;  %v3697_v15 = vadd.f32 %v17396_v57, %v17400_v8  ;;  %v17583_v40 = vrot.slane %v17394_v10, %v16156_v22  ;;  %v17590_v57 = vrot.slane %v17394_v10, %v16162_v24 }
 0x336   : > { %v4083_v54 = vmax.f32 %v3790_v33, 0.0  ;;  %v4122_v3 = vpack.c.bf16 %v4082_v45, %v4078_v14  ;;  %v3794_v13 = vadd.f32 %v3793_v28, %v3681_v38  ;;  %v14813_v45 = vld [vmem:[%s22264_s10 + $0x144] ss:$16 sps:$4 sm:$0xff]   ;;  %v14811_v14 = vld [vmem:[%s22264_s10 + $0x140] ss:$16 sps:$4 sm:$0xff]  }
 0x337   : > { %v3795_v35 = vpop.f32.mrf.mxu1  ;;  %v3847_v10 = vadd.f32 %v17406_v30, %v17590_v57 }
 0x338   : > { %v4123_v53 = vpack.c.bf16 %v4083_v54, %v4079_v25  ;;  %5271 = vmatpush2.bf16.msra.mxu0 %v14787_v47  ;;  %v3796_v29 = vadd.f32 %v3795_v35, %v3683_v51  ;;  %v4086_v6 = vmax.f32 %v3794_v13, 0.0 }
 0x339   : > { %v3797_v12 = vpop.f32.mrf.mxu1  ;;  %5272 = vmatprep.subr.bf16.mxu0 %v14795_v2  ;;  %v17579_v2 = vpop.f32.mrf.mxu0 }
 0x33a   : > { %v3798_v18 = vadd.f32 %v3797_v12, %v3685_v41  ;;  %4612 = vmatprep.mubr.bf16.mxu0 %v4123_v53  ;;  %v4087_v17 = vmax.f32 %v3796_v29, 0.0  ;;  %v3851_v12 = vadd.f32 %v17414_v44, %v17590_v57  ;;  %v17605_v44 = vld [vmem:[%s15874_s25 + $0x4] ss:$8 sps:$4 sm:$0xff]  }
 0x33b   : > { %v3799_v42 = vpop.f32.mrf.mxu1  ;;  %4613 = vmatmul.mubr.bf16.gmra.mxu0 %v4122_v3  ;;  %v17592_v53 = vpop.f32.mrf.mxu0  ;;  %v3849_v3 = vadd.f32 %v17408_v59, %v17583_v40 }
 0x33c   : > { %v3800_v20 = vadd.f32 %v3799_v42, %v3687_v39  ;;  %5273 = vmatpush2.bf16.msra.mxu0 %v14793_v11  ;;  %v4090_v62 = vmax.f32 %v3798_v18, 0.0  ;;  %v3853_v18 = vadd.f32 %v17422_v16, %v17583_v40 }
 0x33d   : > { %v3803_v7 = vpop.f32.mrf.mxu1  ;;  %5274 = vmatprep.subr.bf16.mxu0 %v14801_v9 }
 0x33e   : > { %v4091_v34 = vmax.f32 %v3800_v20, 0.0  ;;  %v4126_v33 = vpack.c.bf16 %v4090_v62, %v4086_v6  ;;  %v3804_v25 = vadd.f32 %v3803_v7, %v3691_v60  ;;  %v17602_v20 = vpop.f32.mrf.mxu0 }
 0x33f   : > { %v3805_v27 = vpop.f32.mrf.mxu1 }
 0x340   : > { %v4127_v46 = vpack.c.bf16 %v4091_v34, %v4087_v17  ;;  %5275 = vmatpush2.bf16.msra.mxu0 %v14799_v5  ;;  %v3806_v36 = vadd.f32 %v3805_v27, %v3693_v0  ;;  %v4094_v11 = vmax.f32 %v3804_v25, 0.0  ;;  %v17608_v34 = vpop.f32.mrf.mxu0  ;;  %v3859_v27 = vadd.f32 %v17443_v49, %v17583_v40 }
 0x341   : > { %v3807_v47 = vpop.f32.mrf.mxu1  ;;  %5276 = vmatprep.subr.bf16.mxu0 %v14807_v58  ;;  %v3861_v0 = vadd.f32 %v17459_v63, %v17590_v57  ;;  %v3863_v49 = vadd.f32 %v17467_v55, %v17583_v40  ;;  %v14817_v55 = vld [vmem:[%s22264_s10 + $0x120] ss:$16 sps:$4 sm:$0xff]  }
 0x342   : > { %v3808_v28 = vadd.f32 %v3807_v47, %v3695_v50  ;;  %4622 = vmatprep.mubr.bf16.mxu0 %v4127_v46  ;;  %v4095_v51 = vmax.f32 %v3806_v36, 0.0  ;;  %v14736_v46 = vld [vmem:[%s22264_s10 + $0xe8] ss:$16 sps:$4 sm:$0xff]   ;;  %v14744_v47 = vld [vmem:[%s22264_s10 + $0xcc] ss:$16 sps:$4 sm:$0xff]   ;;  %v17624_v63 = vpop.f32.mrf.mxu0 }
 0x343   : > { %v3809_v54 = vpop.f32.mrf.mxu1  ;;  %4623 = vmatmul.mubr.bf16.gmra.mxu0 %v4126_v33 }
 0x344   : > { %v3810_v56 = vadd.f32 %v3809_v54, %v3697_v15  ;;  %5277 = vmatpush2.bf16.msra.mxu0 %v14805_v37  ;;  %v4098_v8 = vmax.f32 %v3808_v28, 0.0  ;;  %v3857_v37 = vadd.f32 %v17435_v52, %v17590_v57  ;;  %v14819_v52 = vld [vmem:[%s22264_s10 + $0x124] ss:$16 sps:$4 sm:$0xff]   ;;  %v14742_v54 = vld [vmem:[%s22264_s10 + $0xc8] ss:$16 sps:$4 sm:$0xff]  }
 0x345   : > { %v3959_v35 = vpop.f32.mrf.mxu1  ;;  %5278 = vmatprep.subr.bf16.mxu0 %v14813_v45 }
 0x346   : > { %v4099_v41 = vmax.f32 %v3810_v56, 0.0  ;;  %v4130_v39 = vpack.c.bf16 %v4098_v8, %v4094_v11  ;;  %v3960_v59 = vadd.f32 %v3959_v35, %v3847_v10  ;;  %v14750_v8 = vld [vmem:[%s22264_s10 + $0xac] ss:$16 sps:$4 sm:$0xff]  }
 0x347   : > { %v3961_v38 = vpop.f32.mrf.mxu1 }
 0x348   : > { %v4131_v9 = vpack.c.bf16 %v4099_v41, %v4095_v51  ;;  %5279 = vmatpush2.bf16.msra.mxu0 %v14811_v14  ;;  %v3962_v13 = vadd.f32 %v3961_v38, %v3849_v3  ;;  %v4040_v16 = vmax.f32 %v3960_v59, 0.0  ;;  %v17638_v41 = vpop.f32.mrf.mxu0  ;;  %v14825_v3 = vld [vmem:[%s22264_s10 + $0x104] ss:$16 sps:$4 sm:$0xff]  }
 0x349   : > { %v3963_v29 = vpop.f32.mrf.mxu1  ;;  %5280 = vmatprep.subr.bf16.mxu0 %v14819_v52 }
 0x34a   : > { %v3964_v42 = vadd.f32 %v3963_v29, %v3851_v12  ;;  %4632 = vmatprep.mubr.bf16.mxu0 %v4131_v9  ;;  %v4041_v58 = vmax.f32 %v3962_v13, 0.0  ;;  %v3869_v12 = vadd.f32 %v17491_v1, %v17583_v40  ;;  %v3871_v9 = vadd.f32 %v17507_v48, %v17590_v57  ;;  %v14823_v29 = vld [vmem:[%s22264_s10 + $0x100] ss:$16 sps:$4 sm:$0xff]   ;;  %v14756_v1 = vld [vmem:[%s22264_s10 + $0x8c] ss:$16 sps:$4 sm:$0xff]  }
 0x34b   : > { %v3965_v5 = vpop.f32.mrf.mxu1  ;;  %4633 = vmatmul.mubr.bf16.gmra.mxu0 %v4130_v39  ;;  %v14748_v39 = vld [vmem:[%s22264_s10 + $0xa8] ss:$16 sps:$4 sm:$0xff]   ;;  %v3873_v48 = vadd.f32 %v17515_v4, %v17583_v40  ;;  %v14762_v4 = vld [vmem:[%s22264_s10 + $0x6c] ss:$16 sps:$4 sm:$0xff]  }
 0x34c   : > { %v3966_v62 = vadd.f32 %v3965_v5, %v3853_v18  ;;  %5284 = vmatprep.mubr.bf16.mxu0 %v17605_v44  ;;  %v4044_v7 = vmax.f32 %v3964_v42, 0.0  ;;  %5281 = vmatpush2.bf16.msra.mxu0 %v14817_v55  ;;  %v3867_v18 = vadd.f32 %v17483_v43, %v17590_v57 }
 0x34d   : > { %v3969_v30 = vpop.f32.mrf.mxu1  ;;  %5282 = vmatprep.subr.bf16.mxu0 %v14825_v3  ;;  %v14774_v3 = vld [vmem:[%s22264_s10 + $0x2c] ss:$16 sps:$4 sm:$0xff]  }
 0x34e   : > { %v4045_v17 = vmax.f32 %v3966_v62, 0.0  ;;  %v4104_v60 = vpack.c.bf16 %v4044_v7, %v4040_v16  ;;  %v3970_v36 = vadd.f32 %v3969_v30, %v3857_v37  ;;  %v17660_v62 = vpop.f32.mrf.mxu0 }
 0x34f   : > { %v3971_v6 = vpop.f32.mrf.mxu1 }
 0x350   : > { %v4105_v50 = vpack.c.bf16 %v4045_v17, %v4041_v58  ;;  %v3972_v45 = vadd.f32 %v3971_v6, %v3859_v27  ;;  %v4048_v11 = vmax.f32 %v3970_v36, 0.0  ;;  %5283 = vmatpush2.bf16.msra.mxu0 %v14823_v29  ;;  %v14754_v58 = vld [vmem:[%s22264_s10 + $0x88] ss:$16 sps:$4 sm:$0xff]   ;;  %v14831_v36 = vld [vmem:[%s22263_s9 + $0xe4] ss:$16 sps:$4 sm:$0xff]  }
 0x351   : > { %v3973_v33 = vpop.f32.mrf.mxu1  ;;  %v17669_v6 = vld [vmem:[%s15874_s25] ss:$8 sps:$4 sm:$0xff]   ;;  %5798 = vmatprep.subr.bf16.mxu0 %v14831_v36 }
 0x352   : > { %v3974_v15 = vadd.f32 %v3973_v33, %v3861_v0  ;;  %4675 = vmatprep.mubr.bf16.mxu1 %v4105_v50  ;;  %v4049_v35 = vmax.f32 %v3972_v45, 0.0  ;;  %v17673_v50 = vld [vmem:[%s15874_s25 + $0x14] ss:$8 sps:$4 sm:$0xff]   ;;  %v3879_v33 = vadd.f32 %v17539_v26, %v17583_v40  ;;  %v14760_v45 = vld [vmem:[%s22264_s10 + $0x68] ss:$16 sps:$4 sm:$0xff]   ;;  %v3877_v26 = vadd.f32 %v17531_v61, %v17590_v57 }
 0x353   : > { %v3975_v28 = vpop.f32.mrf.mxu1  ;;  %4676 = vmatmul.mubr.bf16.vlgmr.msra.gmra.mxu1 %v4104_v60  ;;  %5285 = vmatmul.mubr.bf16.vlgmr.msra.gmra.mxu0 %v17669_v6 }
 0x354   : > { %v3976_v25 = vadd.f32 %v3975_v28, %v3863_v49  ;;  %5366 = vmatpush1.bf16.msra.mxu1 %v14736_v46  ;;  %v4052_v56 = vmax.f32 %v3974_v15, 0.0  ;;  %5294 = vmatprep.mubr.bf16.mxu0 %v17673_v50  ;;  %v17676_v46 = vpop.f32.mrf.mxu0  ;;  %v14829_v15 = vld [vmem:[%s22263_s9 + $0xe0] ss:$16 sps:$4 sm:$0xff]  }
 0x355   : > { %v3979_v14 = vpop.f32.mrf.mxu1  ;;  %5367 = vmatprep.subr.bf16.mxu1 %v14744_v47  ;;  %v3881_v47 = vadd.f32 %v17555_v31, %v17590_v57  ;;  %v14768_v31 = vld [vmem:[%s22264_s10 + $0x4c] ss:$16 sps:$4 sm:$0xff]   ;;  %5799 = vmatpush1.bf16.msra.mxu0 %v14829_v15 }
 0x356   : > { %v4053_v51 = vmax.f32 %v3976_v25, 0.0  ;;  %v4108_v13 = vpack.c.bf16 %v4052_v56, %v4048_v11  ;;  %v3980_v43 = vadd.f32 %v3979_v14, %v3867_v18  ;;  %v3883_v25 = vadd.f32 %v17563_v32, %v17583_v40  ;;  %v17698_v56 = vpop.f32.mrf.mxu0  ;;  %v14835_v32 = vld [vmem:[%s22263_s9 + $0xc0] ss:$16 sps:$4 sm:$0xff]  }
 0x357   : > { %v3981_v38 = vpop.f32.mrf.mxu1 }
 0x358   : > { %v4109_v10 = vpack.c.bf16 %v4053_v51, %v4049_v35  ;;  %5368 = vmatpush1.bf16.msra.mxu1 %v14742_v54  ;;  %v3982_v59 = vadd.f32 %v3981_v38, %v3869_v12  ;;  %v4056_v37 = vmax.f32 %v3980_v43, 0.0  ;;  %v14766_v35 = vld [vmem:[%s22264_s10 + $0x48] ss:$16 sps:$4 sm:$0xff]   ;;  %v14837_v51 = vld [vmem:[%s22263_s9 + $0xc4] ss:$16 sps:$4 sm:$0xff]   ;;  %v17720_v29 = vpop.f32.mrf.mxu0 }
 0x359   : > { %v3983_v42 = vpop.f32.mrf.mxu1  ;;  %5369 = vmatprep.subr.bf16.mxu1 %v14750_v8  ;;  %v17713_v12 = vld [vmem:[%s15874_s25 + $0x10] ss:$8 sps:$4 sm:$0xff]   ;;  %5800 = vmatprep.subr.bf16.mxu0 %v14837_v51  ;;  %v14843_v43 = vld [vmem:[%s22263_s9 + $0xa4] ss:$16 sps:$4 sm:$0xff]   ;;  %v3903_v51 = vadd.f32 %v17676_v46, %v17583_v40 }
 0x35a   : > { %v3984_v5 = vadd.f32 %v3983_v42, %v3871_v9  ;;  %4685 = vmatprep.mubr.bf16.mxu1 %v4109_v10  ;;  %v4057_v27 = vmax.f32 %v3982_v59, 0.0  ;;  %5801 = vmatpush1.bf16.msra.mxu0 %v14835_v32  ;;  %v3889_v42 = vadd.f32 %v17592_v53, %v17583_v40  ;;  %v14772_v59 = vld [vmem:[%s22264_s10 + $0x28] ss:$16 sps:$4 sm:$0xff]   ;;  %v3887_v53 = vadd.f32 %v17579_v2, %v17590_v57  ;;  %v14859_v46 = vld [vmem:[%s22263_s9 + $0x40] ss:$16 sps:$4 sm:$0xff]  }
 0x35b   : > { %v3985_v7 = vpop.f32.mrf.mxu1  ;;  %4686 = vmatmul.mubr.bf16.gmra.mxu1 %v4108_v13  ;;  %5295 = vmatmul.mubr.bf16.gmra.mxu0 %v17713_v12 }
 0x35c   : > { %v3986_v30 = vadd.f32 %v3985_v7, %v3873_v48  ;;  %5370 = vmatpush1.bf16.msra.mxu1 %v14748_v39  ;;  %v4060_v17 = vmax.f32 %v3984_v5, 0.0  ;;  %v17717_v39 = vld [vmem:[%s15874_s25 + $0x24] ss:$8 sps:$4 sm:$0xff]   ;;  %v14841_v5 = vld [vmem:[%s22263_s9 + $0xa0] ss:$16 sps:$4 sm:$0xff]   ;;  %5802 = vmatprep.subr.bf16.mxu0 %v14843_v43 }
 0x35d   : > { %v3989_v16 = vpop.f32.mrf.mxu1  ;;  %5371 = vmatprep.subr.bf16.mxu1 %v14756_v1  ;;  %5304 = vmatprep.mubr.bf16.mxu0 %v17717_v39  ;;  %v3891_v1 = vadd.f32 %v17602_v20, %v17590_v57  ;;  %v14780_v20 = vld [vmem:[%s22264_s10 + $0xc] ss:$16 sps:$4 sm:$0xff]  }
 0x35e   : > { %v4061_v0 = vmax.f32 %v3986_v30, 0.0  ;;  %v4112_v28 = vpack.c.bf16 %v4060_v17, %v4056_v37  ;;  %v3990_v14 = vadd.f32 %v3989_v16, %v3877_v26  ;;  %5803 = vmatpush1.bf16.msra.mxu0 %v14841_v5  ;;  %v14778_v37 = vld [vmem:[%s22264_s10 + $0x8] ss:$16 sps:$4 sm:$0xff]   ;;  %v17761_v26 = vld [vmem:[%s15874_s25 + $0x34] ss:$8 sps:$4 sm:$0xff]  }
 0x35f   : > { %v3991_v60 = vpop.f32.mrf.mxu1 }
 0x360   : > { %v4113_v49 = vpack.c.bf16 %v4061_v0, %v4057_v27  ;;  %5372 = vmatpush1.bf16.msra.mxu1 %v14754_v58  ;;  %v3992_v54 = vadd.f32 %v3991_v60, %v3879_v33  ;;  %v4064_v18 = vmax.f32 %v3990_v14, 0.0  ;;  %v3893_v58 = vadd.f32 %v17608_v34, %v17583_v40  ;;  %v14847_v34 = vld [vmem:[%s22263_s9 + $0x80] ss:$16 sps:$4 sm:$0xff]   ;;  %v14849_v60 = vld [vmem:[%s22263_s9 + $0x84] ss:$16 sps:$4 sm:$0xff]  }
 0x361   : > { %v3993_v52 = vpop.f32.mrf.mxu1  ;;  %5373 = vmatprep.subr.bf16.mxu1 %v14762_v4  ;;  %v17742_v4 = vpop.f32.mrf.mxu0  ;;  %5804 = vmatprep.subr.bf16.mxu0 %v14849_v60  ;;  %v14784_v14 = vld [vmem:[%s22264_s10 + $0x1e8] ss:$16 sps:$4 sm:$0xff]  }
 0x362   : > { %v3994_v55 = vadd.f32 %v3993_v52, %v3881_v47  ;;  %4695 = vmatprep.mubr.bf16.mxu1 %v4113_v49  ;;  %v4065_v9 = vmax.f32 %v3992_v54, 0.0  ;;  %v14786_v49 = vld [vmem:[%s22264_s10 + $0x1ec] ss:$16 sps:$4 sm:$0xff]   ;;  %5805 = vmatpush1.bf16.msra.mxu0 %v14847_v34  ;;  %v3901_v54 = vadd.f32 %v17660_v62, %v17590_v57 }
 0x363   : > { %v3995_v8 = vpop.f32.mrf.mxu1  ;;  %4696 = vmatmul.mubr.bf16.gmra.mxu1 %v4112_v28  ;;  %v3912_v28 = vpop.f32.mrf.mxu0  ;;  %v14792_v62 = vld [vmem:[%s22264_s10 + $0x1cc] ss:$16 sps:$4 sm:$0xff]  }
 0x364   : > { %v3996_v61 = vadd.f32 %v3995_v8, %v3883_v25  ;;  %5374 = vmatpush1.bf16.msra.mxu1 %v14760_v45  ;;  %v4068_v11 = vmax.f32 %v3994_v55, 0.0  ;;  %v17757_v45 = vld [vmem:[%s15874_s25 + $0x20] ss:$8 sps:$4 sm:$0xff]   ;;  %v3899_v25 = vadd.f32 %v17638_v41, %v17583_v40  ;;  %v3897_v41 = vadd.f32 %v17624_v63, %v17590_v57 }
 0x365   : > { %v3999_v38 = vpop.f32.mrf.mxu1  ;;  %5375 = vmatprep.subr.bf16.mxu1 %v14768_v31  ;;  %5305 = vmatmul.mubr.bf16.gmra.mxu0 %v17757_v45  ;;  %v14853_v8 = vld [vmem:[%s22263_s9 + $0x60] ss:$16 sps:$4 sm:$0xff]   ;;  %v3913_v60 = vadd.f32 %v3912_v28, %v17583_v40 }
 0x366   : > { %v4069_v10 = vmax.f32 %v3996_v61, 0.0  ;;  %v4116_v7 = vpack.c.bf16 %v4068_v11, %v4064_v18  ;;  %v4000_v27 = vadd.f32 %v3999_v38, %v3887_v53  ;;  %5314 = vmatprep.mubr.bf16.mxu0 %v17761_v26  ;;  %v14855_v61 = vld [vmem:[%s22263_s9 + $0x64] ss:$16 sps:$4 sm:$0xff]   ;;  %v14790_v18 = vld [vmem:[%s22264_s10 + $0x1c8] ss:$16 sps:$4 sm:$0xff]  }
 0x367   : > { %v4001_v13 = vpop.f32.mrf.mxu1  ;;  %5806 = vmatprep.subr.bf16.mxu0 %v14855_v61  ;;  %v17803_v53 = vld [vmem:[%s15874_s25 + $0x44] ss:$8 sps:$4 sm:$0xff]   ;;  %v14871_v28 = vld [vmem:[%s22263_s9] ss:$16 sps:$4 sm:$0xff]  }
 0x368   : > { %v4117_v48 = vpack.c.bf16 %v4069_v10, %v4065_v9  ;;  %5376 = vmatpush1.bf16.msra.mxu1 %v14766_v35  ;;  %v4002_v17 = vadd.f32 %v4001_v13, %v3889_v42  ;;  %v4072_v52 = vmax.f32 %v4000_v27, 0.0  ;;  %5807 = vmatpush1.bf16.msra.mxu0 %v14853_v8  ;;  %v14861_v13 = vld [vmem:[%s22263_s9 + $0x44] ss:$16 sps:$4 sm:$0xff]   ;;  %v14796_v27 = vld [vmem:[%s22264_s10 + $0x1a8] ss:$16 sps:$4 sm:$0xff]  }
 0x369   : > { %v4003_v30 = vpop.f32.mrf.mxu1  ;;  %5377 = vmatprep.subr.bf16.mxu1 %v14774_v3  ;;  %v17784_v3 = vpop.f32.mrf.mxu0  ;;  %5808 = vmatprep.subr.bf16.mxu0 %v14861_v13 }
 0x36a   : > { %v4004_v16 = vadd.f32 %v4003_v30, %v3891_v1  ;;  %4705 = vmatprep.mubr.bf16.mxu1 %v4117_v48  ;;  %v4073_v15 = vmax.f32 %v4002_v17, 0.0  ;;  %v14798_v48 = vld [vmem:[%s22264_s10 + $0x1ac] ss:$16 sps:$4 sm:$0xff]   ;;  %v3911_v17 = vadd.f32 %v17742_v4, %v17590_v57 }
 0x36b   : > { %v4005_v0 = vpop.f32.mrf.mxu1  ;;  %4706 = vmatmul.mubr.bf16.gmra.mxu1 %v4116_v7  ;;  %v3918_v7 = vpop.f32.mrf.mxu0  ;;  %v14804_v4 = vld [vmem:[%s22264_s10 + $0x18c] ss:$16 sps:$4 sm:$0xff]  }
 0x36c   : > { %v4006_v2 = vadd.f32 %v4005_v0, %v3893_v58  ;;  %5378 = vmatpush1.bf16.msra.mxu1 %v14772_v59  ;;  %v4076_v33 = vmax.f32 %v4004_v16, 0.0  ;;  %v17799_v59 = vld [vmem:[%s15874_s25 + $0x30] ss:$8 sps:$4 sm:$0xff]   ;;  %5809 = vmatpush1.bf16.msra.mxu0 %v14859_v46  ;;  %v3909_v58 = vadd.f32 %v17720_v29, %v17583_v40  ;;  %v3907_v29 = vadd.f32 %v17698_v56, %v17590_v57 }
 0x36d   : > { %v4009_v47 = vpop.f32.mrf.mxu1  ;;  %5379 = vmatprep.subr.bf16.mxu1 %v14780_v20  ;;  %5315 = vmatmul.mubr.bf16.gmra.mxu0 %v17799_v59  ;;  %v14865_v0 = vld [vmem:[%s22263_s9 + $0x20] ss:$16 sps:$4 sm:$0xff]  }
 0x36e   : > { %v4077_v36 = vmax.f32 %v4006_v2, 0.0  ;;  %v4120_v35 = vpack.c.bf16 %v4076_v33, %v4072_v52  ;;  %v4010_v9 = vadd.f32 %v4009_v47, %v3897_v41  ;;  %5324 = vmatprep.mubr.bf16.mxu0 %v17803_v53  ;;  %v14867_v2 = vld [vmem:[%s22263_s9 + $0x24] ss:$16 sps:$4 sm:$0xff]   ;;  %v14802_v52 = vld [vmem:[%s22264_s10 + $0x188] ss:$16 sps:$4 sm:$0xff]  }
 0x36f   : > { %v4011_v31 = vpop.f32.mrf.mxu1  ;;  %5810 = vmatprep.subr.bf16.mxu0 %v14867_v2  ;;  %v17842_v41 = vld [vmem:[%s15874_s25 + $0x54] ss:$8 sps:$4 sm:$0xff]  }
 0x370   : > { %v4121_v55 = vpack.c.bf16 %v4077_v36, %v4073_v15  ;;  %5380 = vmatpush1.bf16.msra.mxu1 %v14778_v37  ;;  %v4012_v11 = vadd.f32 %v4011_v31, %v3899_v25  ;;  %v4080_v30 = vmax.f32 %v4010_v9, 0.0  ;;  %5811 = vmatpush1.bf16.msra.mxu0 %v14865_v0  ;;  %v14873_v31 = vld [vmem:[%s22263_s9 + $0x4] ss:$16 sps:$4 sm:$0xff]   ;;  %v14808_v9 = vld [vmem:[%s22264_s10 + $0x168] ss:$16 sps:$4 sm:$0xff]  }
 0x371   : > { %v4013_v32 = vpop.f32.mrf.mxu1  ;;  %5381 = vmatprep.subr.bf16.mxu1 %v14786_v49  ;;  %v3920_v49 = vpop.f32.mrf.mxu0  ;;  %5812 = vmatprep.subr.bf16.mxu0 %v14873_v31  ;;  %v17879_v0 = vld [vmem:[%s15874_s25 + $0x64] ss:$8 sps:$4 sm:$0xff]  }
 0x372   : > { %v4014_v38 = vadd.f32 %v4013_v32, %v3901_v54  ;;  %4715 = vmatprep.mubr.bf16.mxu1 %v4121_v55  ;;  %v4081_v5 = vmax.f32 %v4012_v11, 0.0  ;;  %v14810_v55 = vld [vmem:[%s22264_s10 + $0x16c] ss:$16 sps:$4 sm:$0xff]   ;;  %v3921_v11 = vadd.f32 %v3920_v49, %v17590_v57  ;;  %v14895_v49 = vld [vmem:[%s22263_s9 + $0x180] ss:$16 sps:$4 sm:$0xff]  }
 0x373   : > { %v4015_v10 = vpop.f32.mrf.mxu1  ;;  %4716 = vmatmul.mubr.bf16.gmra.mxu1 %v4120_v35  ;;  %v3922_v35 = vpop.f32.mrf.mxu0  ;;  %v14903_v31 = vld [vmem:[%s22263_s9 + $0x164] ss:$16 sps:$4 sm:$0xff]  }
 0x374   : > { %v4016_v63 = vadd.f32 %v4015_v10, %v3903_v51  ;;  %5382 = vmatpush2.bf16.msra.mxu1 %v14784_v14  ;;  %v4084_v42 = vmax.f32 %v4014_v38, 0.0  ;;  %v17838_v14 = vld [vmem:[%s15874_s25 + $0x40] ss:$8 sps:$4 sm:$0xff]   ;;  %5813 = vmatpush1.bf16.msra.mxu0 %v14871_v28  ;;  %v3919_v51 = vadd.f32 %v3918_v7, %v17583_v40 }
 0x375   : > { %v4019_v1 = vpop.f32.mrf.mxu1  ;;  %5383 = vmatprep.subr.bf16.mxu1 %v14792_v62  ;;  %5325 = vmatmul.mubr.bf16.gmra.mxu0 %v17838_v14  ;;  %v14877_v10 = vld [vmem:[%s22263_s9 + $0x1e0] ss:$16 sps:$4 sm:$0xff]  }
 0x376   : > { %v4085_v43 = vmax.f32 %v4016_v63, 0.0  ;;  %v4124_v37 = vpack.c.bf16 %v4084_v42, %v4080_v30  ;;  %v4020_v15 = vadd.f32 %v4019_v1, %v3907_v29  ;;  %5334 = vmatprep.mubr.bf16.mxu0 %v17842_v41  ;;  %v14879_v63 = vld [vmem:[%s22263_s9 + $0x1e4] ss:$16 sps:$4 sm:$0xff]   ;;  %v14816_v42 = vld [vmem:[%s22264_s10 + $0x14c] ss:$16 sps:$4 sm:$0xff]   ;;  %v3923_v1 = vadd.f32 %v3922_v35, %v17583_v40 }
 0x377   : > { %v4021_v20 = vpop.f32.mrf.mxu1  ;;  %5814 = vmatprep.subr.bf16.mxu0 %v14879_v63  ;;  %v14883_v40 = vld [vmem:[%s22263_s9 + $0x1c0] ss:$16 sps:$4 sm:$0xff]   ;;  %v14885_v30 = vld [vmem:[%s22263_s9 + $0x1c4] ss:$16 sps:$4 sm:$0xff]   ;;  %v14852_v35 = vld [vmem:[%s22263_s9 + $0x8c] ss:$16 sps:$4 sm:$0xff]  }
 0x378   : > { %v4125_v16 = vpack.c.bf16 %v4085_v43, %v4081_v5  ;;  %5384 = vmatpush2.bf16.msra.mxu1 %v14790_v18  ;;  %v4022_v33 = vadd.f32 %v4021_v20, %v3909_v58  ;;  %v4088_v32 = vmax.f32 %v4020_v15, 0.0  ;;  %v3917_v18 = vadd.f32 %v17784_v3, %v17590_v57  ;;  %5815 = vmatpush2.bf16.msra.mxu0 %v14877_v10  ;;  %v14814_v3 = vld [vmem:[%s22264_s10 + $0x148] ss:$16 sps:$4 sm:$0xff]   ;;  %v14822_v58 = vld [vmem:[%s22264_s10 + $0x12c] ss:$16 sps:$4 sm:$0xff]  }
 0x379   : > { %v4023_v34 = vpop.f32.mrf.mxu1  ;;  %5385 = vmatprep.subr.bf16.mxu1 %v14798_v48  ;;  %5816 = vmatprep.subr.bf16.mxu0 %v14885_v30  ;;  %v14897_v15 = vld [vmem:[%s22263_s9 + $0x184] ss:$16 sps:$4 sm:$0xff]   ;;  %v14901_v28 = vld [vmem:[%s22263_s9 + $0x160] ss:$16 sps:$4 sm:$0xff]   ;;  %v14862_v10 = vld [vmem:[%s22263_s9 + $0x48] ss:$16 sps:$4 sm:$0xff]  }
 0x37a   : > { %v4024_v47 = vadd.f32 %v4023_v34, %v3911_v17  ;;  %4725 = vmatprep.mubr.bf16.mxu1 %v4125_v16  ;;  %v4089_v8 = vmax.f32 %v4022_v33, 0.0  ;;  %v17875_v17 = vld [vmem:[%s15874_s25 + $0x50] ss:$8 sps:$4 sm:$0xff]   ;;  %v14828_v33 = vld [vmem:[%s22264_s10 + $0x10c] ss:$16 sps:$4 sm:$0xff]  }
 0x37b   : > { %v4025_v36 = vpop.f32.mrf.mxu1  ;;  %4726 = vmatmul.mubr.bf16.gmra.mxu1 %v4124_v37  ;;  %v14820_v37 = vld [vmem:[%s22264_s10 + $0x128] ss:$16 sps:$4 sm:$0xff]   ;;  %v14889_v34 = vld [vmem:[%s22263_s9 + $0x1a0] ss:$16 sps:$4 sm:$0xff]   ;;  %v14870_v63 = vld [vmem:[%s22263_s9 + $0x2c] ss:$16 sps:$4 sm:$0xff]  }
 0x37c   : > { %v4026_v56 = vadd.f32 %v4025_v36, %v3913_v60  ;;  %5386 = vmatpush2.bf16.msra.mxu1 %v14796_v27  ;;  %v4092_v25 = vmax.f32 %v4024_v47, 0.0  ;;  %5817 = vmatpush2.bf16.msra.mxu0 %v14883_v40  ;;  %v14826_v47 = vld [vmem:[%s22264_s10 + $0x108] ss:$16 sps:$4 sm:$0xff]   ;;  %v14834_v36 = vld [vmem:[%s22263_s9 + $0xec] ss:$16 sps:$4 sm:$0xff]  }
 0x37d   : > { %v4029_v54 = vpop.f32.mrf.mxu1  ;;  %5387 = vmatprep.subr.bf16.mxu1 %v14804_v4  ;;  %5335 = vmatmul.mubr.bf16.gmra.mxu0 %v17875_v17  ;;  %v14891_v4 = vld [vmem:[%s22263_s9 + $0x1a4] ss:$16 sps:$4 sm:$0xff]   ;;  %v14924_v40 = vld [vmem:[%s22263_s9 + $0x10c] ss:$16 sps:$4 sm:$0xff]   ;;  %v14922_v30 = vld [vmem:[%s22263_s9 + $0x108] ss:$16 sps:$4 sm:$0xff]  }
 0x37e   : > { %v4093_v61 = vmax.f32 %v4026_v56, 0.0  ;;  %v4128_v46 = vpack.c.bf16 %v4092_v25, %v4088_v32  ;;  %v4030_v43 = vadd.f32 %v4029_v54, %v3917_v18  ;;  %5344 = vmatprep.mubr.bf16.mxu0 %v17879_v0  ;;  %5818 = vmatprep.subr.bf16.mxu0 %v14891_v4  ;;  %v17908_v56 = vld [vmem:[%s15874_s25 + $0x60] ss:$8 sps:$4 sm:$0xff]   ;;  %v14840_v25 = vld [vmem:[%s22263_s9 + $0xcc] ss:$16 sps:$4 sm:$0xff]  }
 0x37f   : > { %v4031_v62 = vpop.f32.mrf.mxu1  ;;  %v14838_v54 = vld [vmem:[%s22263_s9 + $0xc8] ss:$16 sps:$4 sm:$0xff]   ;;  %v14915_v32 = vld [vmem:[%s22263_s9 + $0x124] ss:$16 sps:$4 sm:$0xff]  }
 0x380   : > { %v4129_v38 = vpack.c.bf16 %v4093_v61, %v4089_v8  ;;  %5388 = vmatpush2.bf16.msra.mxu1 %v14802_v52  ;;  %v4032_v48 = vadd.f32 %v4031_v62, %v3919_v51  ;;  %v4096_v2 = vmax.f32 %v4030_v43, 0.0  ;;  %5819 = vmatpush2.bf16.msra.mxu0 %v14889_v34  ;;  %v17912_v52 = vld [vmem:[%s15874_s25 + $0x74] ss:$8 sps:$4 sm:$0xff]   ;;  %v17936_v8 = vld [vmem:[%s15874_s25 + $0x70] ss:$8 sps:$4 sm:$0xff]   ;;  %s14091_s25 = sshll.u32 %s15708_s2, 14 }
 0x381   : > { %v4033_v13 = vpop.f32.mrf.mxu1  ;;  %5389 = vmatprep.subr.bf16.mxu1 %v14810_v55  ;;  %5820 = vmatprep.subr.bf16.mxu0 %v14897_v15  ;;  %v14846_v55 = vld [vmem:[%s22263_s9 + $0xac] ss:$16 sps:$4 sm:$0xff]   ;;  %v14844_v61 = vld [vmem:[%s22263_s9 + $0xa8] ss:$16 sps:$4 sm:$0xff]   ;;  %v14913_v62 = vld [vmem:[%s22263_s9 + $0x120] ss:$16 sps:$4 sm:$0xff]   ;;  %s22206_s23 = scalar_lea.hbm %s22377_s20, %s14091_s25 }
 0x382   : > { %v4034_v5 = vadd.f32 %v4033_v13, %v3921_v11  ;;  %4735 = vmatprep.mubr.bf16.mxu1 %v4129_v38  ;;  %v4097_v16 = vmax.f32 %v4032_v48, 0.0  ;;  %v14850_v51 = vld [vmem:[%s22263_s9 + $0x88] ss:$16 sps:$4 sm:$0xff]   ;;  %v14858_v11 = vld [vmem:[%s22263_s9 + $0x6c] ss:$16 sps:$4 sm:$0xff]   ;;  %s22214_s2 = scalar_lea.sflag [#allocation3], %s623_s26 }
 0x383   : > { %v4035_v7 = vpop.f32.mrf.mxu1  ;;  %4736 = vmatmul.mubr.bf16.gmra.mxu1 %v4128_v46  ;;  %v14921_v38 = vld [vmem:[%s22263_s9 + $0x104] ss:$16 sps:$4 sm:$0xff]   ;;  %v14868_v18 = vld [vmem:[%s22263_s9 + $0x28] ss:$16 sps:$4 sm:$0xff]   ;;  %v14882_v46 = vld [vmem:[%s22263_s9 + $0x1ec] ss:$16 sps:$4 sm:$0xff]  }
 0x384   : > { %v4036_v57 = vadd.f32 %v4035_v7, %v3923_v1  ;;  %5390 = vmatpush2.bf16.msra.mxu1 %v14808_v9  ;;  %v4100_v20 = vmax.f32 %v4034_v5, 0.0  ;;  %5821 = vmatpush2.bf16.msra.mxu0 %v14895_v49  ;;  %v14864_v9 = vld [vmem:[%s22263_s9 + $0x4c] ss:$16 sps:$4 sm:$0xff]   ;;  %v14880_v13 = vld [vmem:[%s22263_s9 + $0x1e8] ss:$16 sps:$4 sm:$0xff]   ;;  %s15523_s25 = scalar_lea.vmem %s15522_s24, 32768 }
 0x385   : > { %5391 = vmatprep.subr.bf16.mxu1 %v14816_v42  ;;  %5345 = vmatmul.mubr.bf16.gmra.mxu0 %v17908_v56  ;;  %v14894_v42 = vld [vmem:[%s22263_s9 + $0x1ac] ss:$16 sps:$4 sm:$0xff]   ;;  %v14892_v1 = vld [vmem:[%s22263_s9 + $0x1a8] ss:$16 sps:$4 sm:$0xff]   ;;  %p15525_p1 = scmp.lt.s32.totalorder %s15523_s25, %s15517_s1 }
 0x386   : > { %v4101_v27 = vmax.f32 %v4036_v57, 0.0  ;;  %v4132_v60 = vpack.c.bf16 %v4100_v20, %v4096_v2  ;;  %5354 = vmatprep.mubr.bf16.mxu0 %v17912_v52  ;;  %5822 = vmatprep.subr.bf16.mxu0 %v14903_v31  ;;  %v14906_v48 = vld [vmem:[%s22263_s9 + $0x16c] ss:$16 sps:$4 sm:$0xff]   ;;  %v14904_v5 = vld [vmem:[%s22263_s9 + $0x168] ss:$16 sps:$4 sm:$0xff]  }
 0x387   : > { %v14912_v43 = vld [vmem:[%s22263_s9 + $0x14c] ss:$16 sps:$4 sm:$0xff]   ;;  %v14910_v7 = vld [vmem:[%s22263_s9 + $0x148] ss:$16 sps:$4 sm:$0xff]   ;;  %v14927_v2 = vld [vmem:[%s22266_s12 + $0xe4] ss:$16 sps:$4 sm:$0xff]   ;;  %p15526_p2 = por %p15525_p1, %p15524_p0 }
 0x388   : > { %v4133_v29 = vpack.c.bf16 %v4101_v27, %v4097_v16  ;;  %5392 = vmatpush2.bf16.msra.mxu1 %v14814_v3  ;;  %5823 = vmatpush2.bf16.msra.mxu0 %v14901_v28  ;;  %v14918_v57 = vld [vmem:[%s22263_s9 + $0x12c] ss:$16 sps:$4 sm:$0xff]   ;;  %v14916_v3 = vld [vmem:[%s22263_s9 + $0x128] ss:$16 sps:$4 sm:$0xff]  }
 0x389   : > { %5393 = vmatprep.subr.bf16.mxu1 %v14822_v58  ;;  %p15527_p3 = pnand %p15526_p2, %p15520_p13 }
 0x38a   : > { %4745 = vmatprep.mubr.bf16.mxu1 %v4133_v29  ;;  %v14930_v29 = vld [vmem:[%s22266_s12 + $0x2e4] ss:$16 sps:$4 sm:$0xff]  }
 0x38b   : > { %4746 = vmatmul.mubr.bf16.gmra.mxu1 %v4132_v60 }
 0x38c   : > { %5394 = vmatpush2.bf16.msra.mxu1 %v14820_v37  ;;  %5397 = vmatprep.mubr.bf16.mxu1 %v17605_v44  ;;  %v14832_v44 = vld [vmem:[%s22263_s9 + $0xe8] ss:$16 sps:$4 sm:$0xff]  }
 0x38d   : > { %5395 = vmatprep.subr.bf16.mxu1 %v14828_v33  ;;  %5355 = vmatmul.mubr.bf16.gmra.mxu0 %v17936_v8 }
 0x390   : > { %5396 = vmatpush2.bf16.msra.mxu1 %v14826_v47 }
 0x391   : > { %5911 = vmatprep.subr.bf16.mxu1 %v14834_v36 }
 0x393   : > { %5398 = vmatmul.mubr.bf16.vlgmr.msra.gmra.mxu1 %v17669_v6  ;;  %v14909_v6 = vld [vmem:[%s22263_s9 + $0x144] ss:$16 sps:$4 sm:$0xff]  }
 0x394   : > { %5912 = vmatpush1.bf16.msra.mxu1 %v14832_v44  ;;  %5407 = vmatprep.mubr.bf16.mxu1 %v17673_v50  ;;  %v14907_v50 = vld [vmem:[%s22263_s9 + $0x140] ss:$16 sps:$4 sm:$0xff]  }
 0x395   : > { %5913 = vmatprep.subr.bf16.mxu1 %v14840_v25  ;;  %5824 = vmatprep.subr.bf16.mxu0 %v14909_v6 }
 0x396   : > { %5825 = vmatpush2.bf16.msra.mxu0 %v14907_v50 }
 0x397   : > { %5826 = vmatprep.subr.bf16.mxu0 %v14915_v32 }
 0x398   : > { %5914 = vmatpush1.bf16.msra.mxu1 %v14838_v54 }
 0x399   : > { %5915 = vmatprep.subr.bf16.mxu1 %v14846_v55 }
 0x39a   : > { %5827 = vmatpush2.bf16.msra.mxu0 %v14913_v62 }
 0x39b   : > { %5408 = vmatmul.mubr.bf16.gmra.mxu1 %v17713_v12  ;;  %v14919_v12 = vld [vmem:[%s22263_s9 + $0x100] ss:$16 sps:$4 sm:$0xff]   ;;  %5828 = vmatprep.subr.bf16.mxu0 %v14921_v38 }
 0x39c   : > { %5916 = vmatpush1.bf16.msra.mxu1 %v14844_v61  ;;  %5417 = vmatprep.mubr.bf16.mxu1 %v17717_v39  ;;  %v14856_v39 = vld [vmem:[%s22263_s9 + $0x68] ss:$16 sps:$4 sm:$0xff]  }
 0x39d   : > { %5917 = vmatprep.subr.bf16.mxu1 %v14852_v35 }
 0x39e   : > { %5829 = vmatpush2.bf16.msra.mxu0 %v14919_v12 }
 0x39f   : > { %6996 = vmatprep.subr.bf16.mxu0 %v14927_v2  ;;  %v14942_v2 = vld [vmem:[%s22266_s12 + $0x2a4] ss:$16 sps:$4 sm:$0xff]  }
 0x3a0   : > { %5918 = vmatpush1.bf16.msra.mxu1 %v14850_v51 }
 0x3a1   : > { %5919 = vmatprep.subr.bf16.mxu1 %v14858_v11 }
 0x3a3   : > { %5418 = vmatmul.mubr.bf16.gmra.mxu1 %v17757_v45  ;;  %v14876_v45 = vld [vmem:[%s22263_s9 + $0xc] ss:$16 sps:$4 sm:$0xff]  }
 0x3a4   : > { %5920 = vmatpush1.bf16.msra.mxu1 %v14856_v39  ;;  %5427 = vmatprep.mubr.bf16.mxu1 %v17761_v26  ;;  %v14874_v26 = vld [vmem:[%s22263_s9 + $0x8] ss:$16 sps:$4 sm:$0xff]  }
 0x3a5   : > { %5921 = vmatprep.subr.bf16.mxu1 %v14864_v9 }
 0x3a8   : > { %5922 = vmatpush1.bf16.msra.mxu1 %v14862_v10 }
 0x3a9   : > { %5923 = vmatprep.subr.bf16.mxu1 %v14870_v63 }
 0x3ab   : > { %5428 = vmatmul.mubr.bf16.gmra.mxu1 %v17799_v59  ;;  %v14888_v59 = vld [vmem:[%s22263_s9 + $0x1cc] ss:$16 sps:$4 sm:$0xff]  }
 0x3ac   : > { %5924 = vmatpush1.bf16.msra.mxu1 %v14868_v18  ;;  %5437 = vmatprep.mubr.bf16.mxu1 %v17803_v53  ;;  %v14886_v53 = vld [vmem:[%s22263_s9 + $0x1c8] ss:$16 sps:$4 sm:$0xff]  }
 0x3ad   : > { %5925 = vmatprep.subr.bf16.mxu1 %v14876_v45 }
 0x3b0   : > { %5926 = vmatpush1.bf16.msra.mxu1 %v14874_v26 }
 0x3b1   : > { %5927 = vmatprep.subr.bf16.mxu1 %v14882_v46 }
 0x3b3   : > { %5438 = vmatmul.mubr.bf16.gmra.mxu1 %v17838_v14  ;;  %v14900_v14 = vld [vmem:[%s22263_s9 + $0x18c] ss:$16 sps:$4 sm:$0xff]  }
 0x3b4   : > { %5928 = vmatpush2.bf16.msra.mxu1 %v14880_v13  ;;  %5447 = vmatprep.mubr.bf16.mxu1 %v17842_v41  ;;  %v14898_v41 = vld [vmem:[%s22263_s9 + $0x188] ss:$16 sps:$4 sm:$0xff]  }
 0x3b5   : > { %5929 = vmatprep.subr.bf16.mxu1 %v14888_v59 }
 0x3b8   : > { %5930 = vmatpush2.bf16.msra.mxu1 %v14886_v53  ;;  %v14925_v53 = vld [vmem:[%s22266_s12 + $0xe0] ss:$16 sps:$4 sm:$0xff]  }
 0x3b9   : > { %5931 = vmatprep.subr.bf16.mxu1 %v14894_v42  ;;  %v14928_v42 = vld [vmem:[%s22266_s12 + $0x2e0] ss:$16 sps:$4 sm:$0xff]  }
 0x3bb   : > { %5448 = vmatmul.mubr.bf16.gmra.mxu1 %v17875_v17 }
 0x3bc   : > { %5932 = vmatpush2.bf16.msra.mxu1 %v14892_v1  ;;  %5457 = vmatprep.mubr.bf16.mxu1 %v17879_v0 }
 0x3bd   : > { %5933 = vmatprep.subr.bf16.mxu1 %v14900_v14 }
 0x3c0   : > { %5934 = vmatpush2.bf16.msra.mxu1 %v14898_v41 }
 0x3c1   : > { %5935 = vmatprep.subr.bf16.mxu1 %v14906_v48  ;;  %v14933_v48 = vld [vmem:[%s22266_s12 + $0xc4] ss:$16 sps:$4 sm:$0xff]  }
 0x3c3   : > { %5458 = vmatmul.mubr.bf16.gmra.mxu1 %v17908_v56 }
 0x3c4   : > { %5936 = vmatpush2.bf16.msra.mxu1 %v14904_v5  ;;  %5467 = vmatprep.mubr.bf16.mxu1 %v17912_v52  ;;  %v4198_v52 = vld [vmem:[%s22262_s8] sm:$0x3]  ;;  %v14936_v5 = vld [vmem:[%s22266_s12 + $0x2c4] ss:$16 sps:$4 sm:$0xff]  }
 0x3c5   : > { %5937 = vmatprep.subr.bf16.mxu1 %v14912_v43  ;;  %v18079_v28 = vrot.slane %v4198_v52, %v16153_v21  ;;  %v18082_v31 = vrot.slane %v4198_v52, %v16159_v23 }
 0x3c8   : > { %5938 = vmatpush2.bf16.msra.mxu1 %v14910_v7 }
 0x3c9   : > { %5939 = vmatprep.subr.bf16.mxu1 %v14918_v57 }
 0x3cb   : > { %5468 = vmatmul.mubr.bf16.gmra.mxu1 %v17936_v8 }
 0x3cc   : > { %5940 = vmatpush2.bf16.msra.mxu1 %v14916_v3 }
 0x3cd   : > { %5941 = vmatprep.subr.bf16.mxu1 %v14924_v40 }
 0x3d0   : > { %5942 = vmatpush2.bf16.msra.mxu1 %v14922_v30 }
 0x3d1   : > { %7109 = vmatprep.subr.bf16.mxu1 %v14930_v29 }
 0x3d3   : > { %v4564_v20 = vpop.f32.mrf.mxu0 }
 0x3d4   : > { %v4565_v50 = vadd.f32 %v4564_v20, %v18082_v31 }
 0x3d5   : > { %v4566_v58 = vpop.f32.mrf.mxu0 }
 0x3d6   : > { %v4567_v8 = vadd.f32 %v4566_v58, %v18079_v28  ;;  %v14931_v58 = vld [vmem:[%s22266_s12 + $0xc0] ss:$16 sps:$4 sm:$0xff]  }
 0x3d7   : > { %v4568_v17 = vpop.f32.mrf.mxu0 }
 0x3d8   : > { %v4569_v6 = vadd.f32 %v4568_v17, %v18082_v31  ;;  %v14934_v17 = vld [vmem:[%s22266_s12 + $0x2c0] ss:$16 sps:$4 sm:$0xff]  }
 0x3d9   : > { %v4570_v16 = vpop.f32.mrf.mxu0 }
 0x3da   : > { %v4571_v35 = vadd.f32 %v4570_v16, %v18079_v28 }
 0x3db   : > { %v4574_v27 = vpop.f32.mrf.mxu0 }
 0x3dc   : > { %v4575_v1 = vadd.f32 %v4574_v27, %v18082_v31 }
 0x3dd   : > { %v4576_v0 = vpop.f32.mrf.mxu0 }
 0x3de   : > { %v4577_v46 = vadd.f32 %v4576_v0, %v18079_v28  ;;  %v14939_v0 = vld [vmem:[%s22266_s12 + $0xa4] ss:$16 sps:$4 sm:$0xff]  }
 0x3df   : > { %v4578_v37 = vpop.f32.mrf.mxu0 }
 0x3e0   : > { %v4579_v13 = vadd.f32 %v4578_v37, %v18082_v31 }
 0x3e1   : > { %v4580_v34 = vpop.f32.mrf.mxu0 }
 0x3e2   : > { %v4581_v43 = vadd.f32 %v4580_v34, %v18079_v28 }
 0x3e3   : > { %v18057_v4 = vpop.f32.mrf.mxu0 }
 0x3e5   : > { %v18059_v60 = vpop.f32.mrf.mxu0 }
 0x3e7   : > { %v18061_v33 = vpop.f32.mrf.mxu0 }
 0x3e9   : > { %v18063_v47 = vpop.f32.mrf.mxu0 }
 0x3eb   : > { %v18065_v49 = vpop.f32.mrf.mxu0 }
 0x3ed   : > { %v18067_v15 = vpop.f32.mrf.mxu0 }
 0x3ef   : > { %v18069_v36 = vpop.f32.mrf.mxu0 }
 0x3f1   : > { %v18071_v56 = vpop.f32.mrf.mxu0 }
 0x3f3   : > { %v18076_v44 = vpop.f32.mrf.mxu0 }
 0x3f5   : > { %v18084_v54 = vpop.f32.mrf.mxu0 }
 0x3f7   : > { %v18090_v51 = vpop.f32.mrf.mxu0 }
 0x3f9   : > { %v18092_v18 = vpop.f32.mrf.mxu0 }
 0x3fb   : > { %v18110_v3 = vpop.f32.mrf.mxu0 }
 0x3fd   : > { %v18124_v34 = vpop.f32.mrf.mxu0 }
 0x413   : > { %v4677_v25 = vpop.f32.mrf.mxu1 }
 0x414   : > { %v4678_v11 = vadd.f32 %v4677_v25, %v4565_v50  ;;  %v14937_v50 = vld [vmem:[%s22266_s12 + $0xa0] ss:$16 sps:$4 sm:$0xff]  }
 0x415   : > { %v4679_v55 = vpop.f32.mrf.mxu1 }
 0x416   : > { %v4680_v32 = vadd.f32 %v4679_v55, %v4567_v8  ;;  %v4756_v45 = vmax.f32 %v4678_v11, 0.0  ;;  %v4587_v55 = vadd.f32 %v18059_v60, %v18079_v28  ;;  %v4589_v8 = vadd.f32 %v18061_v33, %v18082_v31  ;;  %v14945_v60 = vld [vmem:[%s22266_s12 + $0x84] ss:$16 sps:$4 sm:$0xff]  }
 0x417   : > { %v4681_v61 = vpop.f32.mrf.mxu1  ;;  %v14948_v33 = vld [vmem:[%s22266_s12 + $0x284] ss:$16 sps:$4 sm:$0xff]   ;;  %v4591_v11 = vadd.f32 %v18063_v47, %v18079_v28  ;;  %v14946_v47 = vld [vmem:[%s22266_s12 + $0x280] ss:$16 sps:$4 sm:$0xff]  }
 0x418   : > { %v4682_v62 = vadd.f32 %v4681_v61, %v4569_v6  ;;  %v4757_v10 = vmax.f32 %v4680_v32, 0.0  ;;  %v14940_v61 = vld [vmem:[%s22266_s12 + $0x2a0] ss:$16 sps:$4 sm:$0xff]  }
 0x419   : > { %v4683_v38 = vpop.f32.mrf.mxu1 }
 0x41a   : > { %v4684_v12 = vadd.f32 %v4683_v38, %v4571_v35  ;;  %v4758_v39 = vmax.f32 %v4682_v62, 0.0  ;;  %v4585_v35 = vadd.f32 %v18057_v4, %v18082_v31  ;;  %v18146_v4 = vpop.f32.mrf.mxu0 }
 0x41b   : > { %v4687_v9 = vpop.f32.mrf.mxu1 }
 0x41c   : > { %v4759_v63 = vmax.f32 %v4684_v12, 0.0  ;;  %v4788_v14 = vpack.c.bf16 %v4758_v39, %v4756_v45  ;;  %v4688_v40 = vadd.f32 %v4687_v9, %v4575_v1 }
 0x41d   : > { %v4689_v26 = vpop.f32.mrf.mxu1 }
 0x41e   : > { %v4789_v59 = vpack.c.bf16 %v4759_v63, %v4757_v10  ;;  %v4690_v7 = vadd.f32 %v4689_v26, %v4577_v46  ;;  %v4760_v52 = vmax.f32 %v4688_v40, 0.0  ;;  %v14943_v63 = vld [vmem:[%s22266_s12 + $0x80] ss:$16 sps:$4 sm:$0xff]   ;;  %v14951_v46 = vld [vmem:[%s22266_s12 + $0x64] ss:$16 sps:$4 sm:$0xff]  }
 0x41f   : > { %v4691_v41 = vpop.f32.mrf.mxu1 }
 0x420   : > { %v4692_v57 = vadd.f32 %v4691_v41, %v4579_v13  ;;  %5830 = vmatprep.mubr.bf16.mxu0 %v4789_v59  ;;  %5943 = vmatprep.mubr.bf16.mxu1 %v4789_v59  ;;  %v4761_v29 = vmax.f32 %v4690_v7, 0.0  ;;  %v14954_v13 = vld [vmem:[%s22266_s12 + $0x264] ss:$16 sps:$4 sm:$0xff]   ;;  %v4597_v41 = vadd.f32 %v18067_v15, %v18079_v28  ;;  %v14952_v7 = vld [vmem:[%s22266_s12 + $0x260] ss:$16 sps:$4 sm:$0xff]  }
 0x421   : > { %v4693_v30 = vpop.f32.mrf.mxu1  ;;  %5831 = vmatmul.mubr.bf16.vlgmr.msra.gmra.mxu0 %v4788_v14  ;;  %5944 = vmatmul.mubr.bf16.vlgmr.msra.gmra.mxu1 %v4788_v14  ;;  %v14957_v15 = vld [vmem:[%s22266_s12 + $0x44] ss:$16 sps:$4 sm:$0xff]  }
 0x422   : > { %v4694_v20 = vadd.f32 %v4693_v30, %v4581_v43  ;;  %6997 = vmatpush1.bf16.msra.mxu0 %v14925_v53  ;;  %7110 = vmatpush1.bf16.msra.mxu1 %v14928_v42  ;;  %v4762_v16 = vmax.f32 %v4692_v57, 0.0  ;;  %v18160_v42 = vpop.f32.mrf.mxu0  ;;  %v14949_v43 = vld [vmem:[%s22266_s12 + $0x60] ss:$16 sps:$4 sm:$0xff]   ;;  %v4595_v57 = vadd.f32 %v18065_v49, %v18082_v31 }
 0x423   : > { %v4697_v27 = vpop.f32.mrf.mxu1  ;;  %6998 = vmatprep.subr.bf16.mxu0 %v14933_v48  ;;  %7111 = vmatprep.subr.bf16.mxu1 %v14936_v5  ;;  %v4599_v48 = vadd.f32 %v18069_v36, %v18082_v31  ;;  %v14960_v36 = vld [vmem:[%s22266_s12 + $0x244] ss:$16 sps:$4 sm:$0xff]  }
 0x424   : > { %v4763_v37 = vmax.f32 %v4694_v20, 0.0  ;;  %v4790_v32 = vpack.c.bf16 %v4762_v16, %v4760_v52  ;;  %v4698_v39 = vadd.f32 %v4697_v27, %v4585_v35  ;;  %v4601_v20 = vadd.f32 %v18071_v56, %v18079_v28  ;;  %v18182_v49 = vpop.f32.mrf.mxu0  ;;  %v14958_v56 = vld [vmem:[%s22266_s12 + $0x240] ss:$16 sps:$4 sm:$0xff]   ;;  %v14963_v52 = vld [vmem:[%s22266_s12 + $0x24] ss:$16 sps:$4 sm:$0xff]  }
 0x425   : > { %v4699_v25 = vpop.f32.mrf.mxu1  ;;  %v4607_v35 = vadd.f32 %v18084_v54, %v18079_v28  ;;  %v14969_v54 = vld [vmem:[%s22266_s12 + $0x4] ss:$16 sps:$4 sm:$0xff]  }
 0x426   : > { %v4791_v6 = vpack.c.bf16 %v4763_v37, %v4761_v29  ;;  %6999 = vmatpush1.bf16.msra.mxu0 %v14931_v58  ;;  %7112 = vmatpush1.bf16.msra.mxu1 %v14934_v17  ;;  %v4700_v38 = vadd.f32 %v4699_v25, %v4587_v55  ;;  %v4764_v1 = vmax.f32 %v4698_v39, 0.0  ;;  %v14966_v25 = vld [vmem:[%s22266_s12 + $0x224] ss:$16 sps:$4 sm:$0xff]   ;;  %v4611_v39 = vadd.f32 %v18092_v18, %v18079_v28  ;;  %v14970_v18 = vld [vmem:[%s22266_s12 + $0x200] ss:$16 sps:$4 sm:$0xff]  }
 0x427   : > { %v4701_v62 = vpop.f32.mrf.mxu1  ;;  %7000 = vmatprep.subr.bf16.mxu0 %v14939_v0  ;;  %7113 = vmatprep.subr.bf16.mxu1 %v14942_v2  ;;  %v14955_v2 = vld [vmem:[%s22266_s12 + $0x40] ss:$16 sps:$4 sm:$0xff]  }
 0x428   : > { %v4702_v12 = vadd.f32 %v4701_v62, %v4589_v8  ;;  %5840 = vmatprep.mubr.bf16.mxu0 %v4791_v6  ;;  %5953 = vmatprep.mubr.bf16.mxu1 %v4791_v6  ;;  %v4765_v59 = vmax.f32 %v4700_v38, 0.0  ;;  %v18196_v6 = vpop.f32.mrf.mxu0 }
 0x429   : > { %v4703_v9 = vpop.f32.mrf.mxu1  ;;  %5841 = vmatmul.mubr.bf16.gmra.mxu0 %v4790_v32  ;;  %5954 = vmatmul.mubr.bf16.gmra.mxu1 %v4790_v32  ;;  %v4609_v32 = vadd.f32 %v18090_v51, %v18082_v31  ;;  %v14972_v51 = vld [vmem:[%s22266_s12 + $0x204] ss:$16 sps:$4 sm:$0xff]  }
 0x42a   : > { %v4704_v10 = vadd.f32 %v4703_v9, %v4591_v11  ;;  %7001 = vmatpush1.bf16.msra.mxu0 %v14937_v50  ;;  %7114 = vmatpush1.bf16.msra.mxu1 %v14940_v61  ;;  %v4766_v45 = vmax.f32 %v4702_v12, 0.0  ;;  %v4605_v11 = vadd.f32 %v18076_v44, %v18082_v31  ;;  %v4628_v44 = vpop.f32.mrf.mxu0 }
 0x42b   : > { %v4707_v26 = vpop.f32.mrf.mxu1  ;;  %7002 = vmatprep.subr.bf16.mxu0 %v14945_v60  ;;  %7115 = vmatprep.subr.bf16.mxu1 %v14948_v33  ;;  %v14961_v60 = vld [vmem:[%s22266_s12 + $0x20] ss:$16 sps:$4 sm:$0xff]  }
 0x42c   : > { %v4767_v53 = vmax.f32 %v4704_v10, 0.0  ;;  %v4792_v40 = vpack.c.bf16 %v4766_v45, %v4764_v1  ;;  %v4708_v16 = vadd.f32 %v4707_v26, %v4595_v57  ;;  %v14964_v33 = vld [vmem:[%s22266_s12 + $0x220] ss:$16 sps:$4 sm:$0xff]  }
 0x42d   : > { %v4709_v14 = vpop.f32.mrf.mxu1  ;;  %v14967_v26 = vld [vmem:[%s22266_s12] ss:$16 sps:$4 sm:$0xff]  }
 0x42e   : > { %v4793_v5 = vpack.c.bf16 %v4767_v53, %v4765_v59  ;;  %7003 = vmatpush1.bf16.msra.mxu0 %v14943_v63  ;;  %7116 = vmatpush1.bf16.msra.mxu1 %v14946_v47  ;;  %v4710_v58 = vadd.f32 %v4709_v14, %v4597_v41  ;;  %v4768_v50 = vmax.f32 %v4708_v16, 0.0  ;;  %v14975_v59 = vld [vmem:[%s22266_s12 + $0x1e4] ss:$16 sps:$4 sm:$0xff]   ;;  %v4630_v41 = vpop.f32.mrf.mxu0 }
 0x42f   : > { %v4711_v30 = vpop.f32.mrf.mxu1  ;;  %7004 = vmatprep.subr.bf16.mxu0 %v14951_v46  ;;  %7117 = vmatprep.subr.bf16.mxu1 %v14954_v13  ;;  %v14978_v53 = vld [vmem:[%s22266_s12 + $0x3e4] ss:$16 sps:$4 sm:$0xff]  }
 0x430   : > { %v4712_v17 = vadd.f32 %v4711_v30, %v4599_v48  ;;  %5850 = vmatprep.mubr.bf16.mxu0 %v4793_v5  ;;  %5963 = vmatprep.mubr.bf16.mxu1 %v4793_v5  ;;  %v4769_v55 = vmax.f32 %v4710_v58, 0.0  ;;  %v14976_v30 = vld [vmem:[%s22266_s12 + $0x3e0] ss:$16 sps:$4 sm:$0xff]   ;;  %v4621_v58 = vadd.f32 %v18160_v42, %v18079_v28 }
 0x431   : > { %v4713_v27 = vpop.f32.mrf.mxu1  ;;  %5851 = vmatmul.mubr.bf16.gmra.mxu0 %v4792_v40  ;;  %5964 = vmatmul.mubr.bf16.gmra.mxu1 %v4792_v40  ;;  %v14973_v40 = vld [vmem:[%s22266_s12 + $0x1e0] ss:$16 sps:$4 sm:$0xff]  }
 0x432   : > { %v4714_v0 = vadd.f32 %v4713_v27, %v4601_v20  ;;  %7005 = vmatpush1.bf16.msra.mxu0 %v14949_v43  ;;  %7118 = vmatpush1.bf16.msra.mxu1 %v14952_v7  ;;  %v4770_v29 = vmax.f32 %v4712_v17, 0.0  ;;  %v4617_v43 = vadd.f32 %v18124_v34, %v18079_v28  ;;  %v4619_v7 = vadd.f32 %v18146_v4, %v18082_v31  ;;  %v14981_v34 = vld [vmem:[%s22266_s12 + $0x1c4] ss:$16 sps:$4 sm:$0xff]   ;;  %v14982_v42 = vld [vmem:[%s22266_s12 + $0x3c0] ss:$16 sps:$4 sm:$0xff]  }
 0x433   : > { %v4717_v37 = vpop.f32.mrf.mxu1  ;;  %7006 = vmatprep.subr.bf16.mxu0 %v14957_v15  ;;  %7119 = vmatprep.subr.bf16.mxu1 %v14960_v36  ;;  %v4615_v15 = vadd.f32 %v18110_v3, %v18082_v31  ;;  %v14984_v4 = vld [vmem:[%s22266_s12 + $0x3c4] ss:$16 sps:$4 sm:$0xff]   ;;  %v18250_v3 = vpop.f32.mrf.mxu0 }
 0x434   : > { %v4771_v8 = vmax.f32 %v4714_v0, 0.0  ;;  %v4794_v38 = vpack.c.bf16 %v4770_v29, %v4768_v50  ;;  %v4718_v63 = vadd.f32 %v4717_v37, %v4605_v11  ;;  %v14988_v11 = vld [vmem:[%s22266_s12 + $0x3a0] ss:$16 sps:$4 sm:$0xff]  }
 0x435   : > { %v4719_v61 = vpop.f32.mrf.mxu1  ;;  %v4636_v50 = vpop.f32.mrf.mxu0 }
 0x436   : > { %v4795_v62 = vpack.c.bf16 %v4771_v8, %v4769_v55  ;;  %7007 = vmatpush1.bf16.msra.mxu0 %v14955_v2  ;;  %7120 = vmatpush1.bf16.msra.mxu1 %v14958_v56  ;;  %v4720_v9 = vadd.f32 %v4719_v61, %v4607_v35  ;;  %v4772_v48 = vmax.f32 %v4718_v63, 0.0  ;;  %v14979_v56 = vld [vmem:[%s22266_s12 + $0x1c0] ss:$16 sps:$4 sm:$0xff]  }
 0x437   : > { %v4721_v12 = vpop.f32.mrf.mxu1  ;;  %7008 = vmatprep.subr.bf16.mxu0 %v14963_v52  ;;  %7121 = vmatprep.subr.bf16.mxu1 %v14966_v25  ;;  %v14987_v52 = vld [vmem:[%s22266_s12 + $0x1a4] ss:$16 sps:$4 sm:$0xff]  }
 0x438   : > { %v4722_v10 = vadd.f32 %v4721_v12, %v4609_v32  ;;  %5860 = vmatprep.mubr.bf16.mxu0 %v4795_v62  ;;  %5973 = vmatprep.mubr.bf16.mxu1 %v4795_v62  ;;  %v4773_v1 = vmax.f32 %v4720_v9, 0.0  ;;  %v14990_v25 = vld [vmem:[%s22266_s12 + $0x3a4] ss:$16 sps:$4 sm:$0xff]   ;;  %v4627_v32 = vadd.f32 %v18196_v6, %v18079_v28  ;;  %v4629_v62 = vadd.f32 %v4628_v44, %v18082_v31  ;;  %v4638_v44 = vpop.f32.mrf.mxu0 }
 0x439   : > { %v4723_v47 = vpop.f32.mrf.mxu1  ;;  %5861 = vmatmul.mubr.bf16.gmra.mxu0 %v4794_v38  ;;  %5974 = vmatmul.mubr.bf16.gmra.mxu1 %v4794_v38  ;;  %v4625_v38 = vadd.f32 %v18182_v49, %v18082_v31  ;;  %v14993_v6 = vld [vmem:[%s22266_s12 + $0x184] ss:$16 sps:$4 sm:$0xff]  }
 0x43a   : > { %v4724_v45 = vadd.f32 %v4723_v47, %v4611_v39  ;;  %7009 = vmatpush1.bf16.msra.mxu0 %v14961_v60  ;;  %7122 = vmatpush1.bf16.msra.mxu1 %v14964_v33  ;;  %v4774_v46 = vmax.f32 %v4722_v10, 0.0  ;;  %v14985_v33 = vld [vmem:[%s22266_s12 + $0x1a0] ss:$16 sps:$4 sm:$0xff]   ;;  %v4631_v39 = vadd.f32 %v4630_v41, %v18079_v28 }
 0x43b   : > { %v4727_v13 = vpop.f32.mrf.mxu1  ;;  %7010 = vmatprep.subr.bf16.mxu0 %v14969_v54  ;;  %7123 = vmatprep.subr.bf16.mxu1 %v14972_v51  ;;  %v14996_v51 = vld [vmem:[%s22266_s12 + $0x384] ss:$16 sps:$4 sm:$0xff]  }
 0x43c   : > { %v4775_v14 = vmax.f32 %v4724_v45, 0.0  ;;  %v4796_v36 = vpack.c.bf16 %v4774_v46, %v4772_v48  ;;  %v4728_v27 = vadd.f32 %v4727_v13, %v4615_v15  ;;  %v14991_v45 = vld [vmem:[%s22266_s12 + $0x180] ss:$16 sps:$4 sm:$0xff]   ;;  %v14999_v13 = vld [vmem:[%s22266_s12 + $0x164] ss:$16 sps:$4 sm:$0xff]   ;;  %v4637_v48 = vadd.f32 %v4636_v50, %v18079_v28 }
 0x43d   : > { %v4729_v5 = vpop.f32.mrf.mxu1  ;;  %v15011_v50 = vld [vmem:[%s22266_s12 + $0x124] ss:$16 sps:$4 sm:$0xff]  }
 0x43e   : > { %v4797_v57 = vpack.c.bf16 %v4775_v14, %v4773_v1  ;;  %7011 = vmatpush1.bf16.msra.mxu0 %v14967_v26  ;;  %7124 = vmatpush1.bf16.msra.mxu1 %v14970_v18  ;;  %v4730_v17 = vadd.f32 %v4729_v5, %v4617_v43  ;;  %v4776_v61 = vmax.f32 %v4728_v27, 0.0  ;;  %v14994_v26 = vld [vmem:[%s22266_s12 + $0x380] ss:$16 sps:$4 sm:$0xff]   ;;  %v4640_v1 = vpop.f32.mrf.mxu0  ;;  %v4639_v5 = vadd.f32 %v4638_v44, %v18082_v31 }
 0x43f   : > { %v4731_v20 = vpop.f32.mrf.mxu1  ;;  %7012 = vmatprep.subr.bf16.mxu0 %v14975_v59  ;;  %7125 = vmatprep.subr.bf16.mxu1 %v14978_v53  ;;  %v4641_v15 = vadd.f32 %v4640_v1, %v18079_v28  ;;  %v15002_v28 = vld [vmem:[%s22266_s12 + $0x364] ss:$16 sps:$4 sm:$0xff]  }
 0x440   : > { %v4732_v16 = vadd.f32 %v4731_v20, %v4619_v7  ;;  %5870 = vmatprep.mubr.bf16.mxu0 %v4797_v57  ;;  %5983 = vmatprep.mubr.bf16.mxu1 %v4797_v57  ;;  %v4777_v55 = vmax.f32 %v4730_v17, 0.0  ;;  %v14997_v7 = vld [vmem:[%s22266_s12 + $0x160] ss:$16 sps:$4 sm:$0xff]   ;;  %v4635_v57 = vadd.f32 %v18250_v3, %v18082_v31 }
 0x441   : > { %v4733_v0 = vpop.f32.mrf.mxu1  ;;  %5871 = vmatmul.mubr.bf16.gmra.mxu0 %v4796_v36  ;;  %5984 = vmatmul.mubr.bf16.gmra.mxu1 %v4796_v36 }
 0x442   : > { %v4734_v2 = vadd.f32 %v4733_v0, %v4621_v58  ;;  %7013 = vmatpush2.bf16.msra.mxu0 %v14973_v40  ;;  %7126 = vmatpush2.bf16.msra.mxu1 %v14976_v30  ;;  %v4778_v29 = vmax.f32 %v4732_v16, 0.0 }
 0x443   : > { %v4737_v37 = vpop.f32.mrf.mxu1  ;;  %7014 = vmatprep.subr.bf16.mxu0 %v14981_v34  ;;  %7127 = vmatprep.subr.bf16.mxu1 %v14984_v4 }
 0x444   : > { %v4779_v8 = vmax.f32 %v4734_v2, 0.0  ;;  %v4798_v12 = vpack.c.bf16 %v4778_v29, %v4776_v61  ;;  %v4738_v49 = vadd.f32 %v4737_v37, %v4625_v38  ;;  %v15000_v2 = vld [vmem:[%s22266_s12 + $0x360] ss:$16 sps:$4 sm:$0xff]   ;;  %v15005_v29 = vld [vmem:[%s22266_s12 + $0x144] ss:$16 sps:$4 sm:$0xff]  }
 0x445   : > { %v4739_v35 = vpop.f32.mrf.mxu1  ;;  %v15008_v37 = vld [vmem:[%s22266_s12 + $0x344] ss:$16 sps:$4 sm:$0xff]   ;;  %v15015_v38 = vld [vmem:[%s22266_s12 + $0x100] ss:$16 sps:$4 sm:$0xff]  }
 0x446   : > { %v4799_v60 = vpack.c.bf16 %v4779_v8, %v4777_v55  ;;  %7015 = vmatpush2.bf16.msra.mxu0 %v14979_v56  ;;  %7128 = vmatpush2.bf16.msra.mxu1 %v14982_v42  ;;  %v4740_v9 = vadd.f32 %v4739_v35, %v4627_v32  ;;  %v4780_v14 = vmax.f32 %v4738_v49, 0.0  ;;  %v18305_v56 = vpop.f32.mrf.mxu0  ;;  %v15014_v61 = vld [vmem:[%s22266_s12 + $0x324] ss:$16 sps:$4 sm:$0xff]   ;;  %v15009_v35 = vld [vmem:[%s22266_s12 + $0x120] ss:$16 sps:$4 sm:$0xff]  }
 0x447   : > { %v4741_v54 = vpop.f32.mrf.mxu1  ;;  %7016 = vmatprep.subr.bf16.mxu0 %v14987_v52  ;;  %7129 = vmatprep.subr.bf16.mxu1 %v14990_v25  ;;  %v15003_v52 = vld [vmem:[%s22266_s12 + $0x140] ss:$16 sps:$4 sm:$0xff]  }
 0x448   : > { %v4742_v10 = vadd.f32 %v4741_v54, %v4629_v62  ;;  %5880 = vmatprep.mubr.bf16.mxu0 %v4799_v60  ;;  %5993 = vmatprep.mubr.bf16.mxu1 %v4799_v60  ;;  %v4781_v59 = vmax.f32 %v4740_v9, 0.0  ;;  %v15006_v25 = vld [vmem:[%s22266_s12 + $0x340] ss:$16 sps:$4 sm:$0xff]   ;;  %v18321_v55 = vpop.f32.mrf.mxu0 }
 0x449   : > { %v4743_v63 = vpop.f32.mrf.mxu1  ;;  %5881 = vmatmul.mubr.bf16.gmra.mxu0 %v4798_v12  ;;  %5994 = vmatmul.mubr.bf16.gmra.mxu1 %v4798_v12  ;;  %v15012_v32 = vld [vmem:[%s22266_s12 + $0x320] ss:$16 sps:$4 sm:$0xff]  }
 0x44a   : > { %v4744_v47 = vadd.f32 %v4743_v63, %v4631_v39  ;;  %7017 = vmatpush2.bf16.msra.mxu0 %v14985_v33  ;;  %7130 = vmatpush2.bf16.msra.mxu1 %v14988_v11  ;;  %v4782_v18 = vmax.f32 %v4742_v10, 0.0  ;;  %v18337_v62 = vpop.f32.mrf.mxu0  ;;  %v15017_v33 = vld [vmem:[%s22266_s12 + $0x104] ss:$16 sps:$4 sm:$0xff]   ;;  %v15018_v12 = vld [vmem:[%s22266_s12 + $0x300] ss:$16 sps:$4 sm:$0xff]  }
 0x44b   : > { %v4747_v46 = vpop.f32.mrf.mxu1  ;;  %7018 = vmatprep.subr.bf16.mxu0 %v14993_v6  ;;  %7131 = vmatprep.subr.bf16.mxu1 %v14996_v51  ;;  %v15020_v11 = vld [vmem:[%s22266_s12 + $0x304] ss:$16 sps:$4 sm:$0xff]   ;;  %v15023_v51 = vld [vmem:[%s22266_s12 + $0xec] ss:$16 sps:$4 sm:$0xff]  }
 0x44c   : > { %v4783_v53 = vmax.f32 %v4744_v47, 0.0  ;;  %v4800_v40 = vpack.c.bf16 %v4782_v18, %v4780_v14  ;;  %v4748_v34 = vadd.f32 %v4747_v46, %v4635_v57  ;;  %v18353_v54 = vpop.f32.mrf.mxu0  ;;  %v15026_v39 = vld [vmem:[%s22266_s12 + $0x2ec] ss:$16 sps:$4 sm:$0xff]  }
 0x44d   : > { %v4749_v41 = vpop.f32.mrf.mxu1 }
 0x44e   : > { %v4801_v43 = vpack.c.bf16 %v4783_v53, %v4781_v59  ;;  %7019 = vmatpush2.bf16.msra.mxu0 %v14991_v45  ;;  %7132 = vmatpush2.bf16.msra.mxu1 %v14994_v26  ;;  %v4750_v36 = vadd.f32 %v4749_v41, %v4637_v48  ;;  %v4784_v0 = vmax.f32 %v4748_v34, 0.0  ;;  %v18363_v9 = vpop.f32.mrf.mxu0 }
 0x44f   : > { %v4751_v30 = vpop.f32.mrf.mxu1  ;;  %7020 = vmatprep.subr.bf16.mxu0 %v14999_v13  ;;  %7133 = vmatprep.subr.bf16.mxu1 %v15002_v28 }
 0x450   : > { %v4752_v20 = vadd.f32 %v4751_v30, %v4639_v5  ;;  %5890 = vmatprep.mubr.bf16.mxu0 %v4801_v43  ;;  %6003 = vmatprep.mubr.bf16.mxu1 %v4801_v43  ;;  %v4785_v16 = vmax.f32 %v4750_v36, 0.0  ;;  %v18367_v44 = vpop.f32.mrf.mxu0 }
 0x451   : > { %v4753_v4 = vpop.f32.mrf.mxu1  ;;  %5891 = vmatmul.mubr.bf16.gmra.mxu0 %v4800_v40  ;;  %6004 = vmatmul.mubr.bf16.gmra.mxu1 %v4800_v40 }
 0x452   : > { %v4754_v58 = vadd.f32 %v4753_v4, %v4641_v15  ;;  %7021 = vmatpush2.bf16.msra.mxu0 %v14997_v7  ;;  %v4786_v17 = vmax.f32 %v4752_v20, 0.0  ;;  %7134 = vmatpush2.bf16.msra.mxu1 %v15000_v2  ;;  %v18371_v63 = vpop.f32.mrf.mxu0 }
 0x453   : > { %v18307_v42 = vpop.f32.mrf.mxu1  ;;  %7022 = vmatprep.subr.bf16.mxu0 %v15005_v29  ;;  %7135 = vmatprep.subr.bf16.mxu1 %v15008_v37 }
 0x454   : > { %v4787_v27 = vmax.f32 %v4754_v58, 0.0  ;;  %v4802_v3 = vpack.c.bf16 %v4786_v17, %v4784_v0  ;;  %v18375_v45 = vpop.f32.mrf.mxu0 }
 0x455   : > { %v18323_v8 = vpop.f32.mrf.mxu1 }
 0x456   : > { %v4803_v31 = vpack.c.bf16 %v4787_v27, %v4785_v16  ;;  %7023 = vmatpush2.bf16.msra.mxu0 %v15003_v52  ;;  %7136 = vmatpush2.bf16.msra.mxu1 %v15006_v25  ;;  %v18379_v18 = vpop.f32.mrf.mxu0 }
 0x457   : > { %v18339_v60 = vpop.f32.mrf.mxu1  ;;  %7024 = vmatprep.subr.bf16.mxu0 %v15011_v50  ;;  %7137 = vmatprep.subr.bf16.mxu1 %v15014_v61 }
 0x458   : > { %5900 = vmatprep.mubr.bf16.mxu0 %v4803_v31  ;;  %6013 = vmatprep.mubr.bf16.mxu1 %v4803_v31  ;;  %v18383_v13 = vpop.f32.mrf.mxu0 }
 0x459   : > { %5901 = vmatmul.mubr.bf16.gmra.mxu0 %v4802_v3  ;;  %6014 = vmatmul.mubr.bf16.gmra.mxu1 %v4802_v3  ;;  %v18355_v6 = vpop.f32.mrf.mxu1 }
 0x45a   : > { %7025 = vmatpush2.bf16.msra.mxu0 %v15009_v35  ;;  %7138 = vmatpush2.bf16.msra.mxu1 %v15012_v32  ;;  %v18387_v53 = vpop.f32.mrf.mxu0 }
 0x45b   : > { %7026 = vmatprep.subr.bf16.mxu0 %v15017_v33  ;;  %7139 = vmatprep.subr.bf16.mxu1 %v15020_v11  ;;  %v18365_v10 = vpop.f32.mrf.mxu1 }
 0x45c   : > { %v18391_v14 = vpop.f32.mrf.mxu0 }
 0x45d   : > { %v18369_v49 = vpop.f32.mrf.mxu1 }
 0x45e   : > { %7027 = vmatpush2.bf16.msra.mxu0 %v15015_v38  ;;  %7140 = vmatpush2.bf16.msra.mxu1 %v15018_v12  ;;  %v18395_v48 = vpop.f32.mrf.mxu0 }
 0x45f   : > { %7222 = vmatprep.subr.bf16.mxu0 %v15023_v51  ;;  %7335 = vmatprep.subr.bf16.mxu1 %v15026_v39  ;;  %v18373_v47 = vpop.f32.mrf.mxu1 }
 0x460   : > { %v18399_v43 = vpop.f32.mrf.mxu0 }
 0x461   : > { %v18377_v26 = vpop.f32.mrf.mxu1 }
 0x462   : > { %v18403_v57 = vpop.f32.mrf.mxu0 }
 0x463   : > { %v18381_v46 = vpop.f32.mrf.mxu1 }
 0x464   : > { %v18407_v30 = vpop.f32.mrf.mxu0 }
 0x465   : > { %v18385_v59 = vpop.f32.mrf.mxu1 }
 0x466   : > { %v18411_v36 = vpop.f32.mrf.mxu0 }
 0x467   : > { %v18389_v1 = vpop.f32.mrf.mxu1 }
 0x468   : > { %v18415_v34 = vpop.f32.mrf.mxu0 }
 0x469   : > { %v18393_v41 = vpop.f32.mrf.mxu1 }
 0x46a   : > { %v18419_v58 = vpop.f32.mrf.mxu0 }
 0x46b   : > { %v18397_v5 = vpop.f32.mrf.mxu1 }
 0x46c   : > { %v18423_v16 = vpop.f32.mrf.mxu0 }
 0x46d   : > { %v18401_v7 = vpop.f32.mrf.mxu1 }
 0x46e   : > { %v18427_v0 = vpop.f32.mrf.mxu0 }
 0x46f   : > { %v18405_v40 = vpop.f32.mrf.mxu1 }
 0x470   : > { %v18431_v3 = vpop.f32.mrf.mxu0 }
 0x471   : > { %v18409_v15 = vpop.f32.mrf.mxu1 }
 0x472   : > { %v18435_v2 = vpop.f32.mrf.mxu0 }
 0x473   : > { %v18413_v20 = vpop.f32.mrf.mxu1  ;;  %22327 = vst [vmem:[#allocation18_spill] sm:$0xff] %v18435_v2 }
 0x474   : > { %v18439_v37 = vpop.f32.mrf.mxu0 }
 0x475   : > { %v18417_v4 = vpop.f32.mrf.mxu1  ;;  %22329 = vst [vmem:[#allocation20_spill] sm:$0xff] %v18439_v37 }
 0x476   : > { %v18443_v25 = vpop.f32.mrf.mxu0 }
 0x477   : > { %v18421_v17 = vpop.f32.mrf.mxu1  ;;  %22331 = vst [vmem:[#allocation22_spill] sm:$0xff] %v18443_v25 }
 0x478   : > { %v18447_v61 = vpop.f32.mrf.mxu0 }
 0x479   : > { %v18425_v27 = vpop.f32.mrf.mxu1  ;;  %22333 = vst [vmem:[#allocation24_spill] sm:$0xff] %v18447_v61 }
 0x47a   : > { %v18451_v32 = vpop.f32.mrf.mxu0 }
 0x47b   : > { %v18429_v31 = vpop.f32.mrf.mxu1  ;;  %22335 = vst [vmem:[#allocation26_spill] sm:$0xff] %v18451_v32 }
 0x47c   : > { %v18455_v11 = vpop.f32.mrf.mxu0 }
 0x47d   : > { %v18433_v28 = vpop.f32.mrf.mxu1  ;;  %22337 = vst [vmem:[#allocation28_spill] sm:$0xff] %v18455_v11 }
 0x47e   : > { %22326 = vst [vmem:[#allocation17_spill] sm:$0xff] %v18433_v28  ;;  %v18459_v12 = vpop.f32.mrf.mxu0 }
 0x47f   : > { %v18437_v29 = vpop.f32.mrf.mxu1  ;;  %22339 = vst [vmem:[#allocation30_spill] sm:$0xff] %v18459_v12 }
 0x480   : > { %22328 = vst [vmem:[#allocation19_spill] sm:$0xff] %v18437_v29  ;;  %v18463_v39 = vpop.f32.mrf.mxu0 }
 0x481   : > { %v18441_v52 = vpop.f32.mrf.mxu1  ;;  %22341 = vst [vmem:[#allocation32_spill] sm:$0xff] %v18463_v39 }
 0x482   : > { %22330 = vst [vmem:[#allocation21_spill] sm:$0xff] %v18441_v52 }
 0x483   : > { %v18445_v50 = vpop.f32.mrf.mxu1 }
 0x484   : > { %22332 = vst [vmem:[#allocation23_spill] sm:$0xff] %v18445_v50  ;;  %v18467_v50 = vpop.f32.mrf.mxu0 }
 0x485   : > { %v18449_v35 = vpop.f32.mrf.mxu1  ;;  %22343 = vst [vmem:[#allocation34_spill] sm:$0xff] %v18467_v50 }
 0x486   : > { %22334 = vst [vmem:[#allocation25_spill] sm:$0xff] %v18449_v35  ;;  %v18471_v35 = vpop.f32.mrf.mxu0 }
 0x487   : > { %v18453_v33 = vpop.f32.mrf.mxu1  ;;  %22345 = vst [vmem:[#allocation36_spill] sm:$0xff] %v18471_v35 }
 0x488   : > { %22336 = vst [vmem:[#allocation27_spill] sm:$0xff] %v18453_v33 }
 0x489   : > { %v18457_v38 = vpop.f32.mrf.mxu1 }
 0x48a   : > { %22338 = vst [vmem:[#allocation29_spill] sm:$0xff] %v18457_v38  ;;  %v6024_v38 = vld [vmem:[%s22265_s11] sm:$0xf] }
 0x48b   : > { %v18461_v51 = vpop.f32.mrf.mxu1  ;;  %v18480_v39 = vrot.slane %v6024_v38, %v16159_v23  ;;  %v18484_v50 = vrot.slane %v6024_v38, %v16162_v24  ;;  %v18488_v33 = vrot.slane %v6024_v38, %v16153_v21  ;;  %v18492_v52 = vrot.slane %v6024_v38, %v16156_v22 }
 0x48c   : > { %22340 = vst [vmem:[#allocation31_spill] sm:$0xff] %v18461_v51 }
 0x48d   : > { %v18465_v19 = vpop.f32.mrf.mxu1 }
 0x48e   : > { %22342 = vst [vmem:[#allocation33_spill] sm:$0xff] %v18465_v19 }
 0x48f   : > { %v18469_v61 = vpop.f32.mrf.mxu1 }
 0x490   : > { %22344 = vst [vmem:[#allocation35_spill] sm:$0xff] %v18469_v61 }
 0x491   : > { %v18473_v32 = vpop.f32.mrf.mxu1 }
 0x492   : > { %22346 = vst [vmem:[#allocation37_spill] sm:$0xff] %v18473_v32 }
 0x4e1   : > { %v5832_v11 = vpop.f32.mrf.mxu0  ;;  %v5945_v12 = vpop.f32.mrf.mxu1 }
 0x4e2   : > { %v5833_v51 = vadd.f32 %v5832_v11, %v18305_v56  ;;  %v5946_v19 = vadd.f32 %v5945_v12, %v18307_v42 }
 0x4e3   : > { %v5834_v61 = vpop.f32.mrf.mxu0  ;;  %v5947_v35 = vpop.f32.mrf.mxu1 }
 0x4e4   : > { %v5835_v32 = vadd.f32 %v5834_v61, %v18321_v55  ;;  %v5948_v25 = vadd.f32 %v5947_v35, %v18323_v8  ;;  %v6046_v23 = vadd.f32 %v18480_v39, %v5833_v51  ;;  %v6048_v42 = vadd.f32 %v18484_v50, %v5946_v19 }
 0x4e5   : > { %v5836_v56 = vpop.f32.mrf.mxu0  ;;  %v5949_v11 = vpop.f32.mrf.mxu1 }
 0x4e6   : > { %v5837_v12 = vadd.f32 %v5836_v56, %v18337_v62  ;;  %v5950_v24 = vadd.f32 %v5949_v11, %v18339_v60  ;;  %v6047_v61 = vadd.f32 %v18488_v33, %v5835_v32  ;;  %v6049_v21 = vadd.f32 %v18492_v52, %v5948_v25 }
 0x4e7   : > { %v5838_v37 = vpop.f32.mrf.mxu0  ;;  %v5951_v55 = vpop.f32.mrf.mxu1  ;;  %v6110_v11 = vmax.f32 %v6046_v23, 0.0  ;;  %v6112_v25 = vmax.f32 %v6048_v42, 0.0 }
 0x4e8   : > { %v5839_v8 = vadd.f32 %v5838_v37, %v18353_v54  ;;  %v5952_v35 = vadd.f32 %v5951_v55, %v18355_v6  ;;  %v6050_v38 = vadd.f32 %v18480_v39, %v5837_v12  ;;  %v6052_v51 = vadd.f32 %v18484_v50, %v5950_v24 }
 0x4e9   : > { %v5842_v22 = vpop.f32.mrf.mxu0  ;;  %v5955_v19 = vpop.f32.mrf.mxu1  ;;  %v6111_v55 = vmax.f32 %v6047_v61, 0.0  ;;  %v6113_v12 = vmax.f32 %v6049_v21, 0.0 }
 0x4ea   : > { %v6051_v62 = vadd.f32 %v18488_v33, %v5839_v8  ;;  %v6053_v60 = vadd.f32 %v18492_v52, %v5952_v35  ;;  %v5843_v56 = vadd.f32 %v5842_v22, %v18363_v9  ;;  %v5956_v32 = vadd.f32 %v5955_v19, %v18365_v10 }
 0x4eb   : > { %v6114_v29 = vmax.f32 %v6050_v38, 0.0  ;;  %v6116_v54 = vmax.f32 %v6052_v51, 0.0  ;;  %v5844_v37 = vpop.f32.mrf.mxu0  ;;  %v5957_v6 = vpop.f32.mrf.mxu1 }
 0x4ec   : > { %v6115_v2 = vmax.f32 %v6051_v62, 0.0  ;;  %v6117_v24 = vmax.f32 %v6053_v60, 0.0  ;;  %v6054_v28 = vadd.f32 %v18480_v39, %v5843_v56  ;;  %v6056_v8 = vadd.f32 %v18484_v50, %v5956_v32 }
 0x4ed   : > { %v5845_v35 = vadd.f32 %v5844_v37, %v18367_v44  ;;  %v5958_v22 = vadd.f32 %v5957_v6, %v18369_v49  ;;  %v5846_v9 = vpop.f32.mrf.mxu0  ;;  %v5959_v10 = vpop.f32.mrf.mxu1  ;;  %v18512_v23 = vpack.c.bf16 %v6114_v29, %v6110_v11  ;;  %v18514_v42 = vpack.c.bf16 %v6116_v54, %v6112_v25  ;;  %v15021_v49 = vld [vmem:[%s22266_s12 + $0xe8] ss:$16 sps:$4 sm:$0xff]   ;;  %v15032_v11 = vld [vmem:[%s22266_s12 + $0x2cc] ss:$16 sps:$4 sm:$0xff]  }
 0x4ee   : > { %v5847_v38 = vadd.f32 %v5846_v9, %v18371_v63  ;;  %v5960_v21 = vadd.f32 %v5959_v10, %v18373_v47  ;;  %v18520_v60 = vpack.c.bf16 %v6115_v2, %v6111_v55  ;;  %v18522_v44 = vpack.c.bf16 %v6117_v24, %v6113_v12  ;;  %v15024_v63 = vld [vmem:[%s22266_s12 + $0x2e8] ss:$16 sps:$4 sm:$0xff]   ;;  %v15029_v2 = vld [vmem:[%s22266_s12 + $0xcc] ss:$16 sps:$4 sm:$0xff]  }
 0x4ef   : > { %v6055_v61 = vadd.f32 %v18488_v33, %v5845_v35  ;;  %v6057_v51 = vadd.f32 %v18492_v52, %v5958_v22  ;;  %v5848_v19 = vpop.f32.mrf.mxu0  ;;  %v5961_v62 = vpop.f32.mrf.mxu1  ;;  %v6118_v55 = vmax.f32 %v6054_v28, 0.0  ;;  %v6120_v12 = vmax.f32 %v6056_v8, 0.0  ;;  %v15030_v10 = vld [vmem:[%s22266_s12 + $0x2c8] ss:$16 sps:$4 sm:$0xff]  }
 0x4f0   : > { %v6058_v47 = vadd.f32 %v18480_v39, %v5847_v38  ;;  %v6060_v29 = vadd.f32 %v18484_v50, %v5960_v21  ;;  %v5849_v56 = vadd.f32 %v5848_v19, %v18375_v45  ;;  %v5962_v32 = vadd.f32 %v5961_v62, %v18377_v26  ;;  %7028 = vmatprep.mubr.bf16.mxu0 %v18520_v60  ;;  %v15027_v26 = vld [vmem:[%s22266_s12 + $0xc8] ss:$16 sps:$4 sm:$0xff]  }
 0x4f1   : > { %7141 = vmatprep.mubr.bf16.mxu1 %v18522_v44  ;;  %v5852_v25 = vpop.f32.mrf.mxu0  ;;  %v5965_v54 = vpop.f32.mrf.mxu1  ;;  %7029 = vmatmul.mubr.bf16.vlgmr.msra.gmra.mxu0 %v18512_v23  ;;  %v6119_v38 = vmax.f32 %v6055_v61, 0.0  ;;  %v6121_v21 = vmax.f32 %v6057_v51, 0.0 }
 0x4f2   : > { %v6122_v37 = vmax.f32 %v6058_v47, 0.0  ;;  %v6059_v6 = vadd.f32 %v18488_v33, %v5849_v56  ;;  %v6061_v45 = vadd.f32 %v18492_v52, %v5962_v32  ;;  %7142 = vmatmul.mubr.bf16.vlgmr.msra.gmra.mxu1 %v18514_v42  ;;  %v6124_v24 = vmax.f32 %v6060_v29, 0.0  ;;  %7223 = vmatpush1.bf16.msra.mxu0 %v15021_v49  ;;  %v15035_v29 = vld [vmem:[%s22266_s12 + $0xac] ss:$16 sps:$4 sm:$0xff]  }
 0x4f3   : > { %v5853_v35 = vadd.f32 %v5852_v25, %v18379_v18  ;;  %7336 = vmatpush1.bf16.msra.mxu1 %v15024_v63  ;;  %v5854_v22 = vpop.f32.mrf.mxu0  ;;  %v5967_v9 = vpop.f32.mrf.mxu1  ;;  %7224 = vmatprep.subr.bf16.mxu0 %v15029_v2  ;;  %v5966_v28 = vadd.f32 %v5965_v54, %v18381_v46 }
 0x4f4   : > { %v6123_v19 = vmax.f32 %v6059_v6, 0.0  ;;  %v6125_v62 = vmax.f32 %v6061_v45, 0.0  ;;  %7337 = vmatprep.subr.bf16.mxu1 %v15032_v11  ;;  %v18553_v47 = vpack.c.bf16 %v6122_v37, %v6118_v55  ;;  %v5855_v18 = vadd.f32 %v5854_v22, %v18383_v13  ;;  %v15036_v45 = vld [vmem:[%s22266_s12 + $0x2a8] ss:$16 sps:$4 sm:$0xff]  }
 0x4f5   : > { %v5968_v8 = vadd.f32 %v5967_v9, %v18385_v59  ;;  %v5856_v49 = vpop.f32.mrf.mxu0  ;;  %v5969_v63 = vpop.f32.mrf.mxu1  ;;  %v18567_v2 = vpack.c.bf16 %v6124_v24, %v6120_v12  ;;  %v6062_v46 = vadd.f32 %v18480_v39, %v5853_v35  ;;  %v6064_v9 = vadd.f32 %v18484_v50, %v5966_v28  ;;  %v15042_v28 = vld [vmem:[%s22266_s12 + $0x288] ss:$16 sps:$4 sm:$0xff]  }
 0x4f6   : > { %v5857_v61 = vadd.f32 %v5856_v49, %v18387_v53  ;;  %v5970_v51 = vadd.f32 %v5969_v63, %v18389_v1  ;;  %v18563_v56 = vpack.c.bf16 %v6123_v19, %v6119_v38  ;;  %v18565_v32 = vpack.c.bf16 %v6125_v62, %v6121_v21  ;;  %7225 = vmatpush1.bf16.msra.mxu0 %v15027_v26  ;;  %v15033_v53 = vld [vmem:[%s22266_s12 + $0xa8] ss:$16 sps:$4 sm:$0xff]   ;;  %v15038_v1 = vld [vmem:[%s22266_s12 + $0x2ac] ss:$16 sps:$4 sm:$0xff]  }
 0x4f7   : > { %v6063_v13 = vadd.f32 %v18488_v33, %v5855_v18  ;;  %7338 = vmatpush1.bf16.msra.mxu1 %v15030_v10  ;;  %v5858_v59 = vpop.f32.mrf.mxu0  ;;  %v5971_v11 = vpop.f32.mrf.mxu1  ;;  %v6065_v25 = vadd.f32 %v18492_v52, %v5968_v8  ;;  %v15041_v26 = vld [vmem:[%s22266_s12 + $0x8c] ss:$16 sps:$4 sm:$0xff]   ;;  %7226 = vmatprep.subr.bf16.mxu0 %v15035_v29  ;;  %v6126_v22 = vmax.f32 %v6062_v46, 0.0  ;;  %v15039_v62 = vld [vmem:[%s22266_s12 + $0x88] ss:$16 sps:$4 sm:$0xff]  }
 0x4f8   : > { %v6066_v54 = vadd.f32 %v18480_v39, %v5857_v61  ;;  %v5859_v37 = vadd.f32 %v5858_v59, %v18391_v14  ;;  %v5972_v6 = vadd.f32 %v5971_v11, %v18393_v41  ;;  %7038 = vmatprep.mubr.bf16.mxu0 %v18563_v56  ;;  %v6068_v55 = vadd.f32 %v18484_v50, %v5970_v51  ;;  %v15044_v14 = vld [vmem:[%s22266_s12 + $0x28c] ss:$16 sps:$4 sm:$0xff]  }
 0x4f9   : > { %7151 = vmatprep.mubr.bf16.mxu1 %v18565_v32  ;;  %v5862_v12 = vpop.f32.mrf.mxu0  ;;  %v5975_v24 = vpop.f32.mrf.mxu1  ;;  %7039 = vmatmul.mubr.bf16.gmra.mxu0 %v18553_v47  ;;  %v6127_v18 = vmax.f32 %v6063_v13, 0.0  ;;  %v6129_v8 = vmax.f32 %v6065_v25, 0.0  ;;  %v15047_v25 = vld [vmem:[%s22266_s12 + $0x6c] ss:$16 sps:$4 sm:$0xff]  }
 0x4fa   : > { %v6067_v41 = vadd.f32 %v18488_v33, %v5859_v37  ;;  %v6069_v35 = vadd.f32 %v18492_v52, %v5972_v6  ;;  %7152 = vmatmul.mubr.bf16.gmra.mxu1 %v18567_v2  ;;  %v6130_v10 = vmax.f32 %v6066_v54, 0.0  ;;  %v5863_v38 = vadd.f32 %v5862_v12, %v18395_v48  ;;  %7227 = vmatpush1.bf16.msra.mxu0 %v15033_v53  ;;  %v15050_v12 = vld [vmem:[%s22266_s12 + $0x26c] ss:$16 sps:$4 sm:$0xff]  }
 0x4fb   : > { %7339 = vmatprep.subr.bf16.mxu1 %v15038_v1  ;;  %v5864_v21 = vpop.f32.mrf.mxu0  ;;  %v5977_v19 = vpop.f32.mrf.mxu1  ;;  %7228 = vmatprep.subr.bf16.mxu0 %v15041_v26  ;;  %v6132_v29 = vmax.f32 %v6068_v55, 0.0  ;;  %v5976_v48 = vadd.f32 %v5975_v24, %v18397_v5  ;;  %v6128_v5 = vmax.f32 %v6064_v9, 0.0  ;;  %v15053_v24 = vld [vmem:[%s22266_s12 + $0x4c] ss:$16 sps:$4 sm:$0xff]  }
 0x4fc   : > { %v6131_v49 = vmax.f32 %v6067_v41, 0.0  ;;  %v6133_v63 = vmax.f32 %v6069_v35, 0.0  ;;  %7340 = vmatpush1.bf16.msra.mxu1 %v15036_v45  ;;  %v5865_v61 = vadd.f32 %v5864_v21, %v18399_v43  ;;  %v5978_v51 = vadd.f32 %v5977_v19, %v18401_v7 }
 0x4fd   : > { %v5866_v46 = vpop.f32.mrf.mxu0  ;;  %v5979_v59 = vpop.f32.mrf.mxu1  ;;  %7341 = vmatprep.subr.bf16.mxu1 %v15044_v14  ;;  %v18617_v54 = vpack.c.bf16 %v6130_v10, %v6126_v22  ;;  %v6070_v43 = vadd.f32 %v18480_v39, %v5863_v38  ;;  %v18634_v14 = vpack.c.bf16 %v6132_v29, %v6128_v5  ;;  %v6072_v41 = vadd.f32 %v18484_v50, %v5976_v48  ;;  %v15048_v22 = vld [vmem:[%s22266_s12 + $0x268] ss:$16 sps:$4 sm:$0xff]   ;;  %v15056_v38 = vld [vmem:[%s22266_s12 + $0x24c] ss:$16 sps:$4 sm:$0xff]  }
 0x4fe   : > { %v5867_v13 = vadd.f32 %v5866_v46, %v18403_v57  ;;  %v5980_v11 = vadd.f32 %v5979_v59, %v18405_v40  ;;  %v18610_v53 = vpack.c.bf16 %v6131_v49, %v6127_v18  ;;  %v18612_v1 = vpack.c.bf16 %v6133_v63, %v6129_v8  ;;  %7229 = vmatpush1.bf16.msra.mxu0 %v15039_v62  ;;  %v15045_v40 = vld [vmem:[%s22266_s12 + $0x68] ss:$16 sps:$4 sm:$0xff]  }
 0x4ff   : > { %v6071_v7 = vadd.f32 %v18488_v33, %v5865_v61  ;;  %v5868_v37 = vpop.f32.mrf.mxu0  ;;  %v5981_v57 = vpop.f32.mrf.mxu1  ;;  %v6073_v6 = vadd.f32 %v18492_v52, %v5978_v51  ;;  %7230 = vmatprep.subr.bf16.mxu0 %v15047_v25  ;;  %v6134_v21 = vmax.f32 %v6070_v43, 0.0  ;;  %v15051_v49 = vld [vmem:[%s22266_s12 + $0x48] ss:$16 sps:$4 sm:$0xff]   ;;  %v6136_v61 = vmax.f32 %v6072_v41, 0.0 }
 0x500   : > { %v6074_v45 = vadd.f32 %v18480_v39, %v5867_v13  ;;  %7342 = vmatpush1.bf16.msra.mxu1 %v15042_v28  ;;  %v5869_v26 = vadd.f32 %v5868_v37, %v18407_v30  ;;  %v5982_v55 = vadd.f32 %v5981_v57, %v18409_v15  ;;  %v6076_v35 = vadd.f32 %v18484_v50, %v5980_v11  ;;  %v15054_v11 = vld [vmem:[%s22266_s12 + $0x248] ss:$16 sps:$4 sm:$0xff]  }
 0x501   : > { %7048 = vmatprep.mubr.bf16.mxu0 %v18610_v53  ;;  %7161 = vmatprep.mubr.bf16.mxu1 %v18612_v1  ;;  %v5872_v30 = vpop.f32.mrf.mxu0  ;;  %v5985_v15 = vpop.f32.mrf.mxu1  ;;  %v6135_v63 = vmax.f32 %v6071_v7, 0.0  ;;  %v6137_v28 = vmax.f32 %v6073_v6, 0.0  ;;  %v15057_v6 = vld [vmem:[%s22266_s12 + $0x28] ss:$16 sps:$4 sm:$0xff]  }
 0x502   : > { %v6075_v9 = vadd.f32 %v18488_v33, %v5869_v26  ;;  %v6077_v10 = vadd.f32 %v18492_v52, %v5982_v55  ;;  %7049 = vmatmul.mubr.bf16.gmra.mxu0 %v18617_v54  ;;  %v6138_v19 = vmax.f32 %v6074_v45, 0.0  ;;  %v5873_v62 = vadd.f32 %v5872_v30, %v18411_v36  ;;  %7162 = vmatmul.mubr.bf16.gmra.mxu1 %v18634_v14 }
 0x503   : > { %7231 = vmatpush1.bf16.msra.mxu0 %v15045_v40  ;;  %v5874_v18 = vpop.f32.mrf.mxu0  ;;  %v5987_v8 = vpop.f32.mrf.mxu1  ;;  %7343 = vmatprep.subr.bf16.mxu1 %v15050_v12  ;;  %v6140_v51 = vmax.f32 %v6076_v35, 0.0  ;;  %v5986_v57 = vadd.f32 %v5985_v15, %v18413_v20  ;;  %v15062_v20 = vld [vmem:[%s22266_s12 + $0x22c] ss:$16 sps:$4 sm:$0xff]  }
 0x504   : > { %v6139_v29 = vmax.f32 %v6075_v9, 0.0  ;;  %v6141_v48 = vmax.f32 %v6077_v10, 0.0  ;;  %7232 = vmatprep.subr.bf16.mxu0 %v15053_v24  ;;  %7344 = vmatpush1.bf16.msra.mxu1 %v15048_v22  ;;  %v5875_v36 = vadd.f32 %v5874_v18, %v18415_v34  ;;  %v5988_v46 = vadd.f32 %v5987_v8, %v18417_v4  ;;  %v15059_v34 = vld [vmem:[%s22266_s12 + $0x2c] ss:$16 sps:$4 sm:$0xff]   ;;  %v15063_v8 = vld [vmem:[%s22266_s12 + $0x8] ss:$16 sps:$4 sm:$0xff]  }
 0x505   : > { %v5876_v59 = vpop.f32.mrf.mxu0  ;;  %v5989_v13 = vpop.f32.mrf.mxu1  ;;  %7345 = vmatprep.subr.bf16.mxu1 %v15056_v38  ;;  %v18668_v4 = vpack.c.bf16 %v6138_v19, %v6134_v21  ;;  %v6078_v37 = vadd.f32 %v18480_v39, %v5873_v62  ;;  %v15065_v24 = vld [vmem:[%s22266_s12 + $0xc] ss:$16 sps:$4 sm:$0xff]   ;;  %v18687_v41 = vpack.c.bf16 %v6140_v51, %v6136_v61  ;;  %v6080_v38 = vadd.f32 %v18484_v50, %v5986_v57 }
 0x506   : > { %v5877_v25 = vadd.f32 %v5876_v59, %v18419_v58  ;;  %v5990_v5 = vadd.f32 %v5989_v13, %v18421_v17  ;;  %v18661_v43 = vpack.c.bf16 %v6139_v29, %v6135_v63  ;;  %v18663_v7 = vpack.c.bf16 %v6141_v48, %v6137_v28  ;;  %v15068_v9 = vld [vmem:[%s22266_s12 + $0x20c] ss:$16 sps:$4 sm:$0xff]   ;;  %v15066_v13 = vld [vmem:[%s22266_s12 + $0x208] ss:$16 sps:$4 sm:$0xff]  }
 0x507   : > { %v6079_v40 = vadd.f32 %v18488_v33, %v5875_v36  ;;  %7233 = vmatpush1.bf16.msra.mxu0 %v15051_v49  ;;  %v5878_v58 = vpop.f32.mrf.mxu0  ;;  %v5991_v17 = vpop.f32.mrf.mxu1  ;;  %v6081_v45 = vadd.f32 %v18492_v52, %v5988_v46  ;;  %v6142_v10 = vmax.f32 %v6078_v37, 0.0  ;;  %v22347_v51 = vld [vmem:[#allocation17_spill] sm:$0xff] }
 0x508   : > { %v6082_v26 = vadd.f32 %v18480_v39, %v5877_v25  ;;  %v5879_v55 = vadd.f32 %v5878_v58, %v18423_v16  ;;  %v5992_v12 = vadd.f32 %v5991_v17, %v18425_v27  ;;  %7058 = vmatprep.mubr.bf16.mxu0 %v18661_v43  ;;  %v6084_v35 = vadd.f32 %v18484_v50, %v5990_v5  ;;  %v15060_v27 = vld [vmem:[%s22266_s12 + $0x228] ss:$16 sps:$4 sm:$0xff]  }
 0x509   : > { %7346 = vmatpush1.bf16.msra.mxu1 %v15054_v11  ;;  %7171 = vmatprep.mubr.bf16.mxu1 %v18663_v7  ;;  %v5882_v16 = vpop.f32.mrf.mxu0  ;;  %v5995_v30 = vpop.f32.mrf.mxu1  ;;  %v6143_v49 = vmax.f32 %v6079_v40, 0.0  ;;  %v6145_v63 = vmax.f32 %v6081_v45, 0.0  ;;  %v22348_v11 = vld [vmem:[#allocation18_spill] sm:$0xff]  ;;  %v22349_v5 = vld [vmem:[#allocation19_spill] sm:$0xff] }
 0x50a   : > { %v6083_v15 = vadd.f32 %v18488_v33, %v5879_v55  ;;  %v6085_v22 = vadd.f32 %v18492_v52, %v5992_v12  ;;  %7234 = vmatprep.subr.bf16.mxu0 %v15059_v34  ;;  %7059 = vmatmul.mubr.bf16.gmra.mxu0 %v18668_v4  ;;  %v6146_v21 = vmax.f32 %v6082_v26, 0.0  ;;  %v5883_v19 = vadd.f32 %v5882_v16, %v18427_v0  ;;  %v15069_v26 = vld [vmem:[%s22266_s12 + $0x1e8] ss:$16 sps:$4 sm:$0xff]  }
 0x50b   : > { %7172 = vmatmul.mubr.bf16.gmra.mxu1 %v18687_v41  ;;  %7235 = vmatpush1.bf16.msra.mxu0 %v15057_v6  ;;  %v5884_v62 = vpop.f32.mrf.mxu0  ;;  %v5997_v18 = vpop.f32.mrf.mxu1  ;;  %v6148_v48 = vmax.f32 %v6084_v35, 0.0  ;;  %v5996_v61 = vadd.f32 %v5995_v30, %v18429_v31  ;;  %v15071_v31 = vld [vmem:[%s22266_s12 + $0x1ec] ss:$16 sps:$4 sm:$0xff]  }
 0x50c   : > { %v6147_v28 = vmax.f32 %v6083_v15, 0.0  ;;  %v6149_v29 = vmax.f32 %v6085_v22, 0.0  ;;  %7347 = vmatprep.subr.bf16.mxu1 %v15062_v20  ;;  %7236 = vmatprep.subr.bf16.mxu0 %v15065_v24  ;;  %v5885_v0 = vadd.f32 %v5884_v62, %v18431_v3  ;;  %v5998_v36 = vadd.f32 %v5997_v18, %v22347_v51  ;;  %v22350_v20 = vld [vmem:[#allocation20_spill] sm:$0xff]  ;;  %v22351_v35 = vld [vmem:[#allocation21_spill] sm:$0xff] }
 0x50d   : > { %7348 = vmatpush1.bf16.msra.mxu1 %v15060_v27  ;;  %v5886_v46 = vpop.f32.mrf.mxu0  ;;  %v5999_v59 = vpop.f32.mrf.mxu1  ;;  %v6144_v3 = vmax.f32 %v6080_v38, 0.0  ;;  %v18721_v40 = vpack.c.bf16 %v6146_v21, %v6142_v10  ;;  %v6086_v58 = vadd.f32 %v18480_v39, %v5883_v19  ;;  %v15074_v30 = vld [vmem:[%s22266_s12 + $0x3ec] ss:$16 sps:$4 sm:$0xff]   ;;  %v6088_v22 = vadd.f32 %v18484_v50, %v5996_v61  ;;  %v15072_v21 = vld [vmem:[%s22266_s12 + $0x3e8] ss:$16 sps:$4 sm:$0xff]  }
 0x50e   : > { %v5887_v25 = vadd.f32 %v5886_v46, %v22348_v11  ;;  %v6000_v34 = vadd.f32 %v5999_v59, %v22349_v5  ;;  %7349 = vmatprep.subr.bf16.mxu1 %v15068_v9  ;;  %v18714_v37 = vpack.c.bf16 %v6147_v28, %v6143_v49  ;;  %v18716_v57 = vpack.c.bf16 %v6149_v29, %v6145_v63  ;;  %v15077_v27 = vld [vmem:[%s22266_s12 + $0x1cc] ss:$16 sps:$4 sm:$0xff]   ;;  %v22352_v63 = vld [vmem:[#allocation22_spill] sm:$0xff]  ;;  %v15075_v61 = vld [vmem:[%s22266_s12 + $0x1c8] ss:$16 sps:$4 sm:$0xff]  }
 0x50f   : > { %v6087_v17 = vadd.f32 %v18488_v33, %v5885_v0  ;;  %7237 = vmatpush1.bf16.msra.mxu0 %v15063_v8  ;;  %v5888_v6 = vpop.f32.mrf.mxu0  ;;  %v6001_v45 = vpop.f32.mrf.mxu1  ;;  %v6089_v55 = vadd.f32 %v18492_v52, %v5998_v36  ;;  %v18739_v15 = vpack.c.bf16 %v6148_v48, %v6144_v3  ;;  %v15080_v18 = vld [vmem:[%s22266_s12 + $0x3cc] ss:$16 sps:$4 sm:$0xff]   ;;  %v6150_v8 = vmax.f32 %v6086_v58, 0.0  ;;  %v22353_v11 = vld [vmem:[#allocation24_spill] sm:$0xff]  ;;  %v15078_v58 = vld [vmem:[%s22266_s12 + $0x3c8] ss:$16 sps:$4 sm:$0xff]  }
 0x510   : > { %v6090_v12 = vadd.f32 %v18480_v39, %v5887_v25  ;;  %v5889_v24 = vadd.f32 %v5888_v6, %v22350_v20  ;;  %v6002_v16 = vadd.f32 %v6001_v45, %v22351_v35  ;;  %7068 = vmatprep.mubr.bf16.mxu0 %v18714_v37  ;;  %v6092_v9 = vadd.f32 %v18484_v50, %v6000_v34  ;;  %v22354_v5 = vld [vmem:[#allocation25_spill] sm:$0xff]  ;;  %v22355_v6 = vld [vmem:[#allocation26_spill] sm:$0xff]  ;;  %v22356_v45 = vld [vmem:[#allocation27_spill] sm:$0xff] }
 0x511   : > { %7350 = vmatpush1.bf16.msra.mxu1 %v15066_v13  ;;  %7181 = vmatprep.mubr.bf16.mxu1 %v18716_v57  ;;  %v5892_v10 = vpop.f32.mrf.mxu0  ;;  %v6005_v38 = vpop.f32.mrf.mxu1  ;;  %v6151_v0 = vmax.f32 %v6087_v17, 0.0  ;;  %v6153_v51 = vmax.f32 %v6089_v55, 0.0  ;;  %v6152_v59 = vmax.f32 %v6088_v22, 0.0  ;;  %v15083_v20 = vld [vmem:[%s22266_s12 + $0x1ac] ss:$16 sps:$4 sm:$0xff]  }
 0x512   : > { %v6091_v19 = vadd.f32 %v18488_v33, %v5889_v24  ;;  %v6093_v62 = vadd.f32 %v18492_v52, %v6002_v16  ;;  %7238 = vmatprep.subr.bf16.mxu0 %v15071_v31  ;;  %7069 = vmatmul.mubr.bf16.gmra.mxu0 %v18721_v40  ;;  %v6154_v49 = vmax.f32 %v6090_v12, 0.0  ;;  %v5893_v28 = vadd.f32 %v5892_v10, %v22352_v63  ;;  %v22357_v16 = vld [vmem:[#allocation23_spill] sm:$0xff] }
 0x513   : > { %7182 = vmatmul.mubr.bf16.gmra.mxu1 %v18739_v15  ;;  %7239 = vmatpush2.bf16.msra.mxu0 %v15069_v26  ;;  %v5894_v29 = vpop.f32.mrf.mxu0  ;;  %v6007_v48 = vpop.f32.mrf.mxu1  ;;  %v6156_v13 = vmax.f32 %v6092_v9, 0.0  ;;  %v15081_v10 = vld [vmem:[%s22266_s12 + $0x1a8] ss:$16 sps:$4 sm:$0xff]   ;;  %v15089_v63 = vld [vmem:[%s22266_s12 + $0x18c] ss:$16 sps:$4 sm:$0xff]  }
 0x514   : > { %v6155_v36 = vmax.f32 %v6091_v19, 0.0  ;;  %v6157_v46 = vmax.f32 %v6093_v62, 0.0  ;;  %7351 = vmatprep.subr.bf16.mxu1 %v15074_v30  ;;  %7240 = vmatprep.subr.bf16.mxu0 %v15077_v27  ;;  %v5895_v25 = vadd.f32 %v5894_v29, %v22353_v11  ;;  %v6008_v34 = vadd.f32 %v6007_v48, %v22354_v5  ;;  %v22358_v62 = vld [vmem:[#allocation28_spill] sm:$0xff] }
 0x515   : > { %7352 = vmatpush2.bf16.msra.mxu1 %v15072_v21  ;;  %v5896_v31 = vpop.f32.mrf.mxu0  ;;  %v6009_v3 = vpop.f32.mrf.mxu1  ;;  %v18772_v24 = vpack.c.bf16 %v6154_v49, %v6150_v8  ;;  %v6094_v35 = vadd.f32 %v18480_v39, %v5893_v28  ;;  %v6006_v30 = vadd.f32 %v6005_v38, %v22357_v16  ;;  %v22359_v8 = vld [vmem:[#allocation29_spill] sm:$0xff]  ;;  %v18791_v28 = vpack.c.bf16 %v6156_v13, %v6152_v59 }
 0x516   : > { %v5897_v17 = vadd.f32 %v5896_v31, %v22355_v6  ;;  %v6010_v26 = vadd.f32 %v6009_v3, %v22356_v45  ;;  %7353 = vmatprep.subr.bf16.mxu1 %v15080_v18  ;;  %v18765_v55 = vpack.c.bf16 %v6155_v36, %v6151_v0  ;;  %v18767_v12 = vpack.c.bf16 %v6157_v46, %v6153_v51  ;;  %v15086_v38 = vld [vmem:[%s22266_s12 + $0x3ac] ss:$16 sps:$4 sm:$0xff]   ;;  %v15084_v0 = vld [vmem:[%s22266_s12 + $0x3a8] ss:$16 sps:$4 sm:$0xff]   ;;  %v22360_v45 = vld [vmem:[#allocation30_spill] sm:$0xff] }
 0x517   : > { %v6095_v27 = vadd.f32 %v18488_v33, %v5895_v25  ;;  %7241 = vmatpush2.bf16.msra.mxu0 %v15075_v61  ;;  %v5898_v22 = vpop.f32.mrf.mxu0  ;;  %v6011_v9 = vpop.f32.mrf.mxu1  ;;  %v6097_v21 = vadd.f32 %v18492_v52, %v6008_v34  ;;  %v15092_v46 = vld [vmem:[%s22266_s12 + $0x38c] ss:$16 sps:$4 sm:$0xff]   ;;  %v6158_v59 = vmax.f32 %v6094_v35, 0.0  ;;  %v6096_v13 = vadd.f32 %v18484_v50, %v6006_v30  ;;  %v15087_v34 = vld [vmem:[%s22266_s12 + $0x188] ss:$16 sps:$4 sm:$0xff]  }
 0x518   : > { %v6098_v19 = vadd.f32 %v18480_v39, %v5897_v17  ;;  %v5899_v18 = vadd.f32 %v5898_v22, %v22358_v62  ;;  %v6012_v49 = vadd.f32 %v6011_v9, %v22359_v8  ;;  %7078 = vmatprep.mubr.bf16.mxu0 %v18765_v55  ;;  %v6100_v29 = vadd.f32 %v18484_v50, %v6010_v26  ;;  %v22362_v16 = vld [vmem:[#allocation33_spill] sm:$0xff] }
 0x519   : > { %7354 = vmatpush2.bf16.msra.mxu1 %v15078_v58  ;;  %7191 = vmatprep.mubr.bf16.mxu1 %v18767_v12  ;;  %v5902_v48 = vpop.f32.mrf.mxu0  ;;  %v6015_v61 = vpop.f32.mrf.mxu1  ;;  %v6159_v31 = vmax.f32 %v6095_v27, 0.0  ;;  %v6161_v3 = vmax.f32 %v6097_v21, 0.0  ;;  %v22363_v27 = vld [vmem:[#allocation34_spill] sm:$0xff] }
 0x51a   : > { %v6099_v51 = vadd.f32 %v18488_v33, %v5899_v18  ;;  %v6101_v36 = vadd.f32 %v18492_v52, %v6012_v49  ;;  %7242 = vmatprep.subr.bf16.mxu0 %v15083_v20  ;;  %7079 = vmatmul.mubr.bf16.gmra.mxu0 %v18772_v24  ;;  %v6162_v11 = vmax.f32 %v6098_v19, 0.0  ;;  %v6164_v17 = vmax.f32 %v6100_v29, 0.0  ;;  %v22361_v20 = vld [vmem:[#allocation32_spill] sm:$0xff]  ;;  %v22364_v19 = vld [vmem:[#allocation35_spill] sm:$0xff] }
 0x51b   : > { %7192 = vmatmul.mubr.bf16.gmra.mxu1 %v18791_v28  ;;  %7243 = vmatpush2.bf16.msra.mxu0 %v15081_v10  ;;  %v5904_v25 = vpop.f32.mrf.mxu0  ;;  %v6017_v5 = vpop.f32.mrf.mxu1  ;;  %v5903_v26 = vadd.f32 %v5902_v48, %v22360_v45  ;;  %v15090_v10 = vld [vmem:[%s22266_s12 + $0x388] ss:$16 sps:$4 sm:$0xff]   ;;  %v15095_v49 = vld [vmem:[%s22266_s12 + $0x16c] ss:$16 sps:$4 sm:$0xff]  }
 0x51c   : > { %v6163_v58 = vmax.f32 %v6099_v51, 0.0  ;;  %v6165_v6 = vmax.f32 %v6101_v36, 0.0  ;;  %7355 = vmatprep.subr.bf16.mxu1 %v15086_v38  ;;  %7244 = vmatprep.subr.bf16.mxu0 %v15089_v63  ;;  %v5905_v35 = vadd.f32 %v5904_v25, %v22361_v20  ;;  %v6018_v30 = vadd.f32 %v6017_v5, %v22362_v16  ;;  %v22365_v29 = vld [vmem:[#allocation31_spill] sm:$0xff] }
 0x51d   : > { %7356 = vmatpush2.bf16.msra.mxu1 %v15084_v0  ;;  %v5906_v22 = vpop.f32.mrf.mxu0  ;;  %v6019_v9 = vpop.f32.mrf.mxu1  ;;  %v6160_v38 = vmax.f32 %v6096_v13, 0.0  ;;  %v18824_v63 = vpack.c.bf16 %v6162_v11, %v6158_v59  ;;  %v6016_v48 = vadd.f32 %v6015_v61, %v22365_v29  ;;  %v22367_v13 = vld [vmem:[#allocation37_spill] sm:$0xff]  ;;  %v6102_v45 = vadd.f32 %v18480_v39, %v5903_v26 }
 0x51e   : > { %v5907_v21 = vadd.f32 %v5906_v22, %v22363_v27  ;;  %v6020_v62 = vadd.f32 %v6019_v9, %v22364_v19  ;;  %7357 = vmatprep.subr.bf16.mxu1 %v15092_v46  ;;  %v18817_v18 = vpack.c.bf16 %v6163_v58, %v6159_v31  ;;  %v18819_v8 = vpack.c.bf16 %v6165_v6, %v6161_v3  ;;  %v15093_v46 = vld [vmem:[%s22266_s12 + $0x168] ss:$16 sps:$4 sm:$0xff]   ;;  %v22366_v31 = vld [vmem:[#allocation36_spill] sm:$0xff]  ;;  %v15098_v61 = vld [vmem:[%s22266_s12 + $0x36c] ss:$16 sps:$4 sm:$0xff]  }
 0x51f   : > { %v6103_v0 = vadd.f32 %v18488_v33, %v5905_v35  ;;  %7245 = vmatpush2.bf16.msra.mxu0 %v15087_v34  ;;  %v5908_v51 = vpop.f32.mrf.mxu0  ;;  %v6021_v36 = vpop.f32.mrf.mxu1  ;;  %v6105_v25 = vadd.f32 %v18492_v52, %v6018_v30  ;;  %v15101_v11 = vld [vmem:[%s22266_s12 + $0x14c] ss:$16 sps:$4 sm:$0xff]   ;;  %v18842_v34 = vpack.c.bf16 %v6164_v17, %v6160_v38  ;;  %v15096_v6 = vld [vmem:[%s22266_s12 + $0x368] ss:$16 sps:$4 sm:$0xff]   ;;  %v6104_v16 = vadd.f32 %v18484_v50, %v6016_v48 }
 0x520   : > { %v6106_v5 = vadd.f32 %v18480_v39, %v5907_v21  ;;  %v5909_v3 = vadd.f32 %v5908_v51, %v22366_v31  ;;  %v6022_v59 = vadd.f32 %v6021_v36, %v22367_v13  ;;  %7088 = vmatprep.mubr.bf16.mxu0 %v18817_v18  ;;  %v6108_v58 = vadd.f32 %v18484_v50, %v6020_v62  ;;  %v15104_v17 = vld [vmem:[%s22266_s12 + $0x34c] ss:$16 sps:$4 sm:$0xff]   ;;  %v15099_v39 = vld [vmem:[%s22266_s12 + $0x148] ss:$16 sps:$4 sm:$0xff]   ;;  %v15117_v31 = vld [vmem:[%s22268_s14 + $0xe0] ss:$16 sps:$4 sm:$0xff]  }
 0x521   : > { %7358 = vmatpush2.bf16.msra.mxu1 %v15090_v10  ;;  %7201 = vmatprep.mubr.bf16.mxu1 %v18819_v8  ;;  %v6167_v30 = vmax.f32 %v6103_v0, 0.0  ;;  %v15102_v50 = vld [vmem:[%s22266_s12 + $0x348] ss:$16 sps:$4 sm:$0xff]   ;;  %v15107_v10 = vld [vmem:[%s22266_s12 + $0x12c] ss:$16 sps:$4 sm:$0xff]   ;;  %v6166_v27 = vmax.f32 %v6102_v45, 0.0 }
 0x522   : > { %v6107_v20 = vadd.f32 %v18488_v33, %v5909_v3  ;;  %v6109_v35 = vadd.f32 %v18492_v52, %v6022_v59  ;;  %7246 = vmatprep.subr.bf16.mxu0 %v15095_v49  ;;  %7089 = vmatmul.mubr.bf16.gmra.mxu0 %v18824_v63  ;;  %v6169_v33 = vmax.f32 %v6105_v25, 0.0  ;;  %v6170_v26 = vmax.f32 %v6106_v5, 0.0  ;;  %v15110_v62 = vld [vmem:[%s22266_s12 + $0x32c] ss:$16 sps:$4 sm:$0xff]   ;;  %v15105_v38 = vld [vmem:[%s22266_s12 + $0x128] ss:$16 sps:$4 sm:$0xff]  }
 0x523   : > { %7202 = vmatmul.mubr.bf16.gmra.mxu1 %v18842_v34  ;;  %7247 = vmatpush2.bf16.msra.mxu0 %v15093_v46  ;;  %v6172_v9 = vmax.f32 %v6108_v58, 0.0  ;;  %v6168_v49 = vmax.f32 %v6104_v16, 0.0  ;;  %v15108_v0 = vld [vmem:[%s22266_s12 + $0x328] ss:$16 sps:$4 sm:$0xff]   ;;  %v15113_v51 = vld [vmem:[%s22266_s12 + $0x10c] ss:$16 sps:$4 sm:$0xff]  }
 0x524   : > { %v6171_v52 = vmax.f32 %v6107_v20, 0.0  ;;  %v6173_v22 = vmax.f32 %v6109_v35, 0.0  ;;  %7359 = vmatprep.subr.bf16.mxu1 %v15098_v61  ;;  %7248 = vmatprep.subr.bf16.mxu0 %v15101_v11  ;;  %v18877_v29 = vpack.c.bf16 %v6170_v26, %v6166_v27  ;;  %v15116_v36 = vld [vmem:[%s22266_s12 + $0x30c] ss:$16 sps:$4 sm:$0xff]   ;;  %v15111_v46 = vld [vmem:[%s22266_s12 + $0x108] ss:$16 sps:$4 sm:$0xff]  }
 0x525   : > { %7360 = vmatpush2.bf16.msra.mxu1 %v15096_v6  ;;  %v18881_v48 = vpack.c.bf16 %v6172_v9, %v6168_v49  ;;  %v15119_v25 = vld [vmem:[%s22268_s14 + $0xe4] ss:$16 sps:$4 sm:$0xff]   ;;  %v15114_v5 = vld [vmem:[%s22266_s12 + $0x308] ss:$16 sps:$4 sm:$0xff]   ;;  %v15165_v13 = vld [vmem:[%s22268_s14 + $0x2e0] ss:$16 sps:$4 sm:$0xff]  }
 0x526   : > { %7361 = vmatprep.subr.bf16.mxu1 %v15104_v17  ;;  %v18867_v21 = vpack.c.bf16 %v6171_v52, %v6167_v30  ;;  %v18869_v19 = vpack.c.bf16 %v6173_v22, %v6169_v33  ;;  %v15125_v3 = vld [vmem:[%s22268_s14 + $0xa4] ss:$16 sps:$4 sm:$0xff]   ;;  %v15135_v59 = vld [vmem:[%s22268_s14 + $0x20] ss:$16 sps:$4 sm:$0xff]  }
 0x527   : > { %7249 = vmatpush2.bf16.msra.mxu0 %v15099_v39  ;;  %v15179_v61 = vld [vmem:[%s22268_s14 + $0x2a4] ss:$16 sps:$4 sm:$0xff]   ;;  %v15138_v11 = vld [vmem:[%s22268_s14] ss:$16 sps:$4 sm:$0xff]  }
 0x528   : > { %7098 = vmatprep.mubr.bf16.mxu0 %v18867_v21  ;;  %7211 = vmatprep.mubr.bf16.mxu1 %v18869_v19  ;;  %v15177_v58 = vld [vmem:[%s22268_s14 + $0x2a0] ss:$16 sps:$4 sm:$0xff]   ;;  %v15191_v45 = vld [vmem:[%s22268_s14 + $0x264] ss:$16 sps:$4 sm:$0xff]  }
 0x529   : > { %7362 = vmatpush2.bf16.msra.mxu1 %v15102_v50  ;;  %7250 = vmatprep.subr.bf16.mxu0 %v15107_v10  ;;  %v15141_v6 = vld [vmem:[%s22268_s14 + $0x1e0] ss:$16 sps:$4 sm:$0xff]   ;;  %v15203_v16 = vld [vmem:[%s22268_s14 + $0x224] ss:$16 sps:$4 sm:$0xff]  }
 0x52a   : > { %7099 = vmatmul.mubr.bf16.gmra.mxu0 %v18877_v29  ;;  %7363 = vmatprep.subr.bf16.mxu1 %v15110_v62  ;;  %v15144_v20 = vld [vmem:[%s22268_s14 + $0x1c0] ss:$16 sps:$4 sm:$0xff]   ;;  %v15215_v26 = vld [vmem:[%s22268_s14 + $0x3e4] ss:$16 sps:$4 sm:$0xff]   ;;  %v15170_v62 = vld [vmem:[%s22268_s14 + $0xec] ss:$16 sps:$4 sm:$0xff]  }
 0x52b   : > { %7212 = vmatmul.mubr.bf16.gmra.mxu1 %v18881_v48  ;;  %7251 = vmatpush2.bf16.msra.mxu0 %v15105_v38  ;;  %v15189_v35 = vld [vmem:[%s22268_s14 + $0x260] ss:$16 sps:$4 sm:$0xff]   ;;  %v15221_v9 = vld [vmem:[%s22268_s14 + $0x3c4] ss:$16 sps:$4 sm:$0xff]  }
 0x52c   : > { %7254 = vmatprep.mubr.bf16.mxu0 %v18520_v60  ;;  %7367 = vmatprep.mubr.bf16.mxu1 %v18522_v44  ;;  %v15122_v60 = vld [vmem:[%s22268_s14 + $0xc4] ss:$16 sps:$4 sm:$0xff]   ;;  %v15120_v44 = vld [vmem:[%s22268_s14 + $0xc0] ss:$16 sps:$4 sm:$0xff]  }
 0x52d   : > { %7364 = vmatpush2.bf16.msra.mxu1 %v15108_v0  ;;  %7252 = vmatprep.subr.bf16.mxu0 %v15113_v51  ;;  %v15147_v17 = vld [vmem:[%s22268_s14 + $0x1a0] ss:$16 sps:$4 sm:$0xff]   ;;  %v15164_v10 = vld [vmem:[%s22268_s14 + $0x104] ss:$16 sps:$4 sm:$0xff]  }
 0x52e   : > { %7365 = vmatprep.subr.bf16.mxu1 %v15116_v36  ;;  %v15150_v30 = vld [vmem:[%s22268_s14 + $0x180] ss:$16 sps:$4 sm:$0xff]   ;;  %v15227_v27 = vld [vmem:[%s22268_s14 + $0x3a4] ss:$16 sps:$4 sm:$0xff]  }
 0x52f   : > { %7253 = vmatpush2.bf16.msra.mxu0 %v15111_v46  ;;  %v15201_v39 = vld [vmem:[%s22268_s14 + $0x220] ss:$16 sps:$4 sm:$0xff]   ;;  %v15233_v49 = vld [vmem:[%s22268_s14 + $0x384] ss:$16 sps:$4 sm:$0xff]  }
 0x530   : > { %8334 = vmatprep.subr.bf16.mxu0 %v15119_v25  ;;  %v15153_v33 = vld [vmem:[%s22268_s14 + $0x160] ss:$16 sps:$4 sm:$0xff]   ;;  %v15245_v0 = vld [vmem:[%s22268_s14 + $0x344] ss:$16 sps:$4 sm:$0xff]  }
 0x531   : > { %7366 = vmatpush2.bf16.msra.mxu1 %v15114_v5  ;;  %v15156_v52 = vld [vmem:[%s22268_s14 + $0x140] ss:$16 sps:$4 sm:$0xff]   ;;  %v15251_v36 = vld [vmem:[%s22268_s14 + $0x324] ss:$16 sps:$4 sm:$0xff]  }
 0x532   : > { %7255 = vmatmul.mubr.bf16.vlgmr.msra.gmra.mxu0 %v18512_v23  ;;  %v15123_v23 = vld [vmem:[%s22268_s14 + $0xa0] ss:$16 sps:$4 sm:$0xff]   ;;  %v15257_v25 = vld [vmem:[%s22268_s14 + $0x304] ss:$16 sps:$4 sm:$0xff]  }
 0x533   : > { %7264 = vmatprep.mubr.bf16.mxu0 %v18563_v56  ;;  %8335 = vmatpush1.bf16.msra.mxu0 %v15117_v31  ;;  %v15128_v56 = vld [vmem:[%s22268_s14 + $0x84] ss:$16 sps:$4 sm:$0xff]   ;;  %v15213_v22 = vld [vmem:[%s22268_s14 + $0x3e0] ss:$16 sps:$4 sm:$0xff]   ;;  %v15263_v31 = vld [vmem:[%s22268_s14 + $0x2ec] ss:$16 sps:$4 sm:$0xff]  }
 0x534   : > { %7368 = vmatmul.mubr.bf16.vlgmr.msra.gmra.mxu1 %v18514_v42  ;;  %8336 = vmatprep.subr.bf16.mxu0 %v15122_v60  ;;  %v15126_v42 = vld [vmem:[%s22268_s14 + $0x80] ss:$16 sps:$4 sm:$0xff]  }
 0x535   : > { %7377 = vmatprep.mubr.bf16.mxu1 %v18565_v32  ;;  %v15131_v32 = vld [vmem:[%s22268_s14 + $0x64] ss:$16 sps:$4 sm:$0xff]   ;;  %v15159_v50 = vld [vmem:[%s22268_s14 + $0x120] ss:$16 sps:$4 sm:$0xff]  }
 0x536   : > { %v15231_v38 = vld [vmem:[%s22268_s14 + $0x380] ss:$16 sps:$4 sm:$0xff]  }
 0x537   : > { %8337 = vmatpush1.bf16.msra.mxu0 %v15120_v44  ;;  %v15243_v51 = vld [vmem:[%s22268_s14 + $0x340] ss:$16 sps:$4 sm:$0xff]   ;;  %v22368_v44 = vld [vmem:[#allocation13_spill] sm:$0xff] }
 0x538   : > { %8338 = vmatprep.subr.bf16.mxu0 %v15125_v3  ;;  %v15249_v46 = vld [vmem:[%s22268_s14 + $0x320] ss:$16 sps:$4 sm:$0xff]  }
 0x539   : > { %v15255_v5 = vld [vmem:[%s22268_s14 + $0x300] ss:$16 sps:$4 sm:$0xff]  }
 0x53a   : > { %7265 = vmatmul.mubr.bf16.gmra.mxu0 %v18553_v47  ;;  %v15129_v47 = vld [vmem:[%s22268_s14 + $0x60] ss:$16 sps:$4 sm:$0xff]  }
 0x53b   : > { %7274 = vmatprep.mubr.bf16.mxu0 %v18610_v53  ;;  %8339 = vmatpush1.bf16.msra.mxu0 %v15123_v23  ;;  %v15134_v53 = vld [vmem:[%s22268_s14 + $0x44] ss:$16 sps:$4 sm:$0xff]   ;;  %v19133_v60 = vld [vmem:[%s22267_s13] sm:$0xf]  ;;  %v22369_v23 = vld [vmem:[#allocation15_spill] sm:$0xff] }
 0x53c   : > { %7378 = vmatmul.mubr.bf16.gmra.mxu1 %v18567_v2  ;;  %8340 = vmatprep.subr.bf16.mxu0 %v15128_v56  ;;  %v15167_v2 = vld [vmem:[%s22268_s14 + $0x2e4] ss:$16 sps:$4 sm:$0xff]   ;;  %v19137_v3 = vrot.slane %v19133_v60, %v22368_v44  ;;  %v19141_v56 = vrot.slane %v19133_v60, %v22369_v23 }
 0x53d   : > { %7387 = vmatprep.mubr.bf16.mxu1 %v18612_v1  ;;  %v15132_v1 = vld [vmem:[%s22268_s14 + $0x40] ss:$16 sps:$4 sm:$0xff]   ;;  %8447 = vmatprep.subr.bf16.mxu1 %v15167_v2 }
 0x53e   : > { %8448 = vmatpush1.bf16.msra.mxu1 %v15165_v13 }
 0x53f   : > { %8341 = vmatpush1.bf16.msra.mxu0 %v15126_v42 }
 0x540   : > { %8342 = vmatprep.subr.bf16.mxu0 %v15131_v32 }
 0x542   : > { %7275 = vmatmul.mubr.bf16.gmra.mxu0 %v18617_v54  ;;  %v15137_v54 = vld [vmem:[%s22268_s14 + $0x24] ss:$16 sps:$4 sm:$0xff]  }
 0x543   : > { %7284 = vmatprep.mubr.bf16.mxu0 %v18661_v43  ;;  %8343 = vmatpush1.bf16.msra.mxu0 %v15129_v47  ;;  %v15173_v43 = vld [vmem:[%s22268_s14 + $0x2c4] ss:$16 sps:$4 sm:$0xff]  }
 0x544   : > { %7388 = vmatmul.mubr.bf16.gmra.mxu1 %v18634_v14  ;;  %8344 = vmatprep.subr.bf16.mxu0 %v15134_v53  ;;  %v15171_v14 = vld [vmem:[%s22268_s14 + $0x2c0] ss:$16 sps:$4 sm:$0xff]  }
 0x545   : > { %7397 = vmatprep.mubr.bf16.mxu1 %v18663_v7  ;;  %v15140_v7 = vld [vmem:[%s22268_s14 + $0x4] ss:$16 sps:$4 sm:$0xff]   ;;  %8449 = vmatprep.subr.bf16.mxu1 %v15173_v43 }
 0x546   : > { %8450 = vmatpush1.bf16.msra.mxu1 %v15171_v14 }
 0x547   : > { %8345 = vmatpush1.bf16.msra.mxu0 %v15132_v1  ;;  %8451 = vmatprep.subr.bf16.mxu1 %v15179_v61 }
 0x548   : > { %8346 = vmatprep.subr.bf16.mxu0 %v15137_v54 }
 0x54a   : > { %7285 = vmatmul.mubr.bf16.gmra.mxu0 %v18668_v4  ;;  %v15143_v4 = vld [vmem:[%s22268_s14 + $0x1e4] ss:$16 sps:$4 sm:$0xff]   ;;  %8452 = vmatpush1.bf16.msra.mxu1 %v15177_v58 }
 0x54b   : > { %7294 = vmatprep.mubr.bf16.mxu0 %v18714_v37  ;;  %8347 = vmatpush1.bf16.msra.mxu0 %v15135_v59  ;;  %v15185_v37 = vld [vmem:[%s22268_s14 + $0x284] ss:$16 sps:$4 sm:$0xff]  }
 0x54c   : > { %7398 = vmatmul.mubr.bf16.gmra.mxu1 %v18687_v41  ;;  %8348 = vmatprep.subr.bf16.mxu0 %v15140_v7  ;;  %v15183_v41 = vld [vmem:[%s22268_s14 + $0x280] ss:$16 sps:$4 sm:$0xff]  }
 0x54d   : > { %7407 = vmatprep.mubr.bf16.mxu1 %v18716_v57  ;;  %v15146_v57 = vld [vmem:[%s22268_s14 + $0x1c4] ss:$16 sps:$4 sm:$0xff]   ;;  %8453 = vmatprep.subr.bf16.mxu1 %v15185_v37 }
 0x54e   : > { %8454 = vmatpush1.bf16.msra.mxu1 %v15183_v41 }
 0x54f   : > { %8349 = vmatpush1.bf16.msra.mxu0 %v15138_v11  ;;  %8455 = vmatprep.subr.bf16.mxu1 %v15191_v45 }
 0x550   : > { %8350 = vmatprep.subr.bf16.mxu0 %v15143_v4 }
 0x552   : > { %7295 = vmatmul.mubr.bf16.gmra.mxu0 %v18721_v40  ;;  %v15149_v40 = vld [vmem:[%s22268_s14 + $0x1a4] ss:$16 sps:$4 sm:$0xff]   ;;  %8456 = vmatpush1.bf16.msra.mxu1 %v15189_v35 }
 0x553   : > { %7304 = vmatprep.mubr.bf16.mxu0 %v18765_v55  ;;  %8351 = vmatpush2.bf16.msra.mxu0 %v15141_v6  ;;  %v15197_v55 = vld [vmem:[%s22268_s14 + $0x244] ss:$16 sps:$4 sm:$0xff]  }
 0x554   : > { %7408 = vmatmul.mubr.bf16.gmra.mxu1 %v18739_v15  ;;  %8352 = vmatprep.subr.bf16.mxu0 %v15146_v57  ;;  %v15195_v15 = vld [vmem:[%s22268_s14 + $0x240] ss:$16 sps:$4 sm:$0xff]  }
 0x555   : > { %7417 = vmatprep.mubr.bf16.mxu1 %v18767_v12  ;;  %v15152_v12 = vld [vmem:[%s22268_s14 + $0x184] ss:$16 sps:$4 sm:$0xff]   ;;  %8457 = vmatprep.subr.bf16.mxu1 %v15197_v55 }
 0x556   : > { %8458 = vmatpush1.bf16.msra.mxu1 %v15195_v15 }
 0x557   : > { %8353 = vmatpush2.bf16.msra.mxu0 %v15144_v20  ;;  %8459 = vmatprep.subr.bf16.mxu1 %v15203_v16 }
 0x558   : > { %8354 = vmatprep.subr.bf16.mxu0 %v15149_v40 }
 0x55a   : > { %7305 = vmatmul.mubr.bf16.gmra.mxu0 %v18772_v24  ;;  %v15155_v24 = vld [vmem:[%s22268_s14 + $0x164] ss:$16 sps:$4 sm:$0xff]   ;;  %8460 = vmatpush1.bf16.msra.mxu1 %v15201_v39  ;;  %v15168_v39 = vld [vmem:[%s22268_s14 + $0xe8] ss:$16 sps:$4 sm:$0xff]  }
 0x55b   : > { %7314 = vmatprep.mubr.bf16.mxu0 %v18817_v18  ;;  %8355 = vmatpush2.bf16.msra.mxu0 %v15147_v17  ;;  %v15209_v18 = vld [vmem:[%s22268_s14 + $0x204] ss:$16 sps:$4 sm:$0xff]  }
 0x55c   : > { %7418 = vmatmul.mubr.bf16.gmra.mxu1 %v18791_v28  ;;  %8356 = vmatprep.subr.bf16.mxu0 %v15152_v12  ;;  %v15207_v28 = vld [vmem:[%s22268_s14 + $0x200] ss:$16 sps:$4 sm:$0xff]  }
 0x55d   : > { %7427 = vmatprep.mubr.bf16.mxu1 %v18819_v8  ;;  %v15158_v8 = vld [vmem:[%s22268_s14 + $0x144] ss:$16 sps:$4 sm:$0xff]   ;;  %8461 = vmatprep.subr.bf16.mxu1 %v15209_v18 }
 0x55e   : > { %8462 = vmatpush1.bf16.msra.mxu1 %v15207_v28  ;;  %v15176_v28 = vld [vmem:[%s22268_s14 + $0xcc] ss:$16 sps:$4 sm:$0xff]  }
 0x55f   : > { %8357 = vmatpush2.bf16.msra.mxu0 %v15150_v30  ;;  %8463 = vmatprep.subr.bf16.mxu1 %v15215_v26 }
 0x560   : > { %8358 = vmatprep.subr.bf16.mxu0 %v15155_v24 }
 0x562   : > { %7315 = vmatmul.mubr.bf16.gmra.mxu0 %v18824_v63  ;;  %v15161_v63 = vld [vmem:[%s22268_s14 + $0x124] ss:$16 sps:$4 sm:$0xff]   ;;  %8464 = vmatpush2.bf16.msra.mxu1 %v15213_v22 }
 0x563   : > { %7324 = vmatprep.mubr.bf16.mxu0 %v18867_v21  ;;  %8359 = vmatpush2.bf16.msra.mxu0 %v15153_v33  ;;  %v15162_v21 = vld [vmem:[%s22268_s14 + $0x100] ss:$16 sps:$4 sm:$0xff]  }
 0x564   : > { %7428 = vmatmul.mubr.bf16.gmra.mxu1 %v18842_v34  ;;  %8360 = vmatprep.subr.bf16.mxu0 %v15158_v8  ;;  %v15219_v34 = vld [vmem:[%s22268_s14 + $0x3c0] ss:$16 sps:$4 sm:$0xff]  }
 0x565   : > { %7437 = vmatprep.mubr.bf16.mxu1 %v18869_v19  ;;  %8465 = vmatprep.subr.bf16.mxu1 %v15221_v9  ;;  %v15225_v19 = vld [vmem:[%s22268_s14 + $0x3a0] ss:$16 sps:$4 sm:$0xff]  }
 0x566   : > { %8466 = vmatpush2.bf16.msra.mxu1 %v15219_v34  ;;  %v15174_v34 = vld [vmem:[%s22268_s14 + $0xc8] ss:$16 sps:$4 sm:$0xff]  }
 0x567   : > { %8361 = vmatpush2.bf16.msra.mxu0 %v15156_v52  ;;  %8467 = vmatprep.subr.bf16.mxu1 %v15227_v27 }
 0x568   : > { %8362 = vmatprep.subr.bf16.mxu0 %v15161_v63 }
 0x56a   : > { %7325 = vmatmul.mubr.bf16.gmra.mxu0 %v18877_v29  ;;  %8468 = vmatpush2.bf16.msra.mxu1 %v15225_v19  ;;  %v15239_v29 = vld [vmem:[%s22268_s14 + $0x364] ss:$16 sps:$4 sm:$0xff]  }
 0x56b   : > { %8363 = vmatpush2.bf16.msra.mxu0 %v15159_v50  ;;  %8469 = vmatprep.subr.bf16.mxu1 %v15233_v49 }
 0x56c   : > { %7438 = vmatmul.mubr.bf16.gmra.mxu1 %v18881_v48  ;;  %8364 = vmatprep.subr.bf16.mxu0 %v15164_v10  ;;  %v15237_v48 = vld [vmem:[%s22268_s14 + $0x360] ss:$16 sps:$4 sm:$0xff]  }
 0x56e   : > { %8470 = vmatpush2.bf16.msra.mxu1 %v15231_v38 }
 0x56f   : > { %8365 = vmatpush2.bf16.msra.mxu0 %v15162_v21  ;;  %8471 = vmatprep.subr.bf16.mxu1 %v15239_v29  ;;  %v15182_v21 = vld [vmem:[%s22268_s14 + $0xac] ss:$16 sps:$4 sm:$0xff]  }
 0x570   : > { %8560 = vmatprep.subr.bf16.mxu0 %v15170_v62 }
 0x572   : > { %8472 = vmatpush2.bf16.msra.mxu1 %v15237_v48 }
 0x573   : > { %8473 = vmatprep.subr.bf16.mxu1 %v15245_v0 }
 0x576   : > { %8474 = vmatpush2.bf16.msra.mxu1 %v15243_v51 }
 0x577   : > { %8475 = vmatprep.subr.bf16.mxu1 %v15251_v36 }
 0x57a   : > { %8476 = vmatpush2.bf16.msra.mxu1 %v15249_v46 }
 0x57b   : > { %8477 = vmatprep.subr.bf16.mxu1 %v15257_v25  ;;  %v15180_v25 = vld [vmem:[%s22268_s14 + $0xa8] ss:$16 sps:$4 sm:$0xff]  }
 0x57e   : > { %8478 = vmatpush2.bf16.msra.mxu1 %v15255_v5 }
 0x57f   : > { %8673 = vmatprep.subr.bf16.mxu1 %v15263_v31 }
 0x5b1   : > { %v7030_v42 = vpop.f32.mrf.mxu0 }
 0x5b2   : > { %v7143_v32 = vpop.f32.mrf.mxu1  ;;  %v7031_v1 = vadd.f32 %v7030_v42, %v19141_v56  ;;  %v15188_v42 = vld [vmem:[%s22268_s14 + $0x8c] ss:$16 sps:$4 sm:$0xff]  }
 0x5b3   : > { %v7032_v47 = vpop.f32.mrf.mxu0 }
 0x5b4   : > { %v7145_v53 = vpop.f32.mrf.mxu1  ;;  %v7033_v2 = vadd.f32 %v7032_v47, %v19137_v3  ;;  %v7144_v58 = vadd.f32 %v7143_v32, %v7031_v1 }
 0x5b5   : > { %v7034_v13 = vpop.f32.mrf.mxu0 }
 0x5b6   : > { %v7147_v54 = vpop.f32.mrf.mxu1  ;;  %v7035_v43 = vadd.f32 %v7034_v13, %v19141_v56  ;;  %v7146_v7 = vadd.f32 %v7145_v53, %v7033_v2  ;;  %v7448_v55 = vmax.f32 %v7144_v58, 0.0 }
 0x5b7   : > { %v7036_v59 = vpop.f32.mrf.mxu0 }
 0x5b8   : > { %v7149_v14 = vpop.f32.mrf.mxu1  ;;  %v7148_v61 = vadd.f32 %v7147_v54, %v7035_v43  ;;  %v7037_v11 = vadd.f32 %v7036_v59, %v19137_v3  ;;  %v7449_v20 = vmax.f32 %v7146_v7, 0.0  ;;  %v15186_v59 = vld [vmem:[%s22268_s14 + $0x88] ss:$16 sps:$4 sm:$0xff]  }
 0x5b9   : > { %v7040_v4 = vpop.f32.mrf.mxu0 }
 0x5ba   : > { %v7153_v37 = vpop.f32.mrf.mxu1  ;;  %v7150_v6 = vadd.f32 %v7149_v14, %v7037_v11  ;;  %v7452_v41 = vmax.f32 %v7148_v61, 0.0  ;;  %v7041_v17 = vadd.f32 %v7040_v4, %v19141_v56  ;;  %v15194_v61 = vld [vmem:[%s22268_s14 + $0x6c] ss:$16 sps:$4 sm:$0xff]  }
 0x5bb   : > { %v7042_v57 = vpop.f32.mrf.mxu0 }
 0x5bc   : > { %v7155_v45 = vpop.f32.mrf.mxu1  ;;  %v7453_v35 = vmax.f32 %v7150_v6, 0.0  ;;  %v7043_v40 = vadd.f32 %v7042_v57, %v19137_v3  ;;  %v19155_v24 = vpack.c.bf16 %v7452_v41, %v7448_v55  ;;  %v7154_v22 = vadd.f32 %v7153_v37, %v7041_v17 }
 0x5bd   : > { %v7044_v15 = vpop.f32.mrf.mxu0 }
 0x5be   : > { %v7157_v12 = vpop.f32.mrf.mxu1  ;;  %v7045_v16 = vadd.f32 %v7044_v15, %v19141_v56  ;;  %v19150_v30 = vpack.c.bf16 %v7453_v35, %v7449_v20  ;;  %v7156_v8 = vadd.f32 %v7155_v45, %v7043_v40  ;;  %v7456_v29 = vmax.f32 %v7154_v22, 0.0  ;;  %v15192_v40 = vld [vmem:[%s22268_s14 + $0x68] ss:$16 sps:$4 sm:$0xff]   ;;  %v15200_v15 = vld [vmem:[%s22268_s14 + $0x4c] ss:$16 sps:$4 sm:$0xff]  }
 0x5bf   : > { %v7046_v18 = vpop.f32.mrf.mxu0 }
 0x5c0   : > { %v7159_v33 = vpop.f32.mrf.mxu1  ;;  %v7158_v26 = vadd.f32 %v7157_v12, %v7045_v16  ;;  %v7047_v52 = vadd.f32 %v7046_v18, %v19137_v3  ;;  %8366 = vmatprep.mubr.bf16.mxu0 %v19150_v30  ;;  %v7457_v19 = vmax.f32 %v7156_v8, 0.0 }
 0x5c1   : > { %8367 = vmatmul.mubr.bf16.vlgmr.msra.gmra.mxu0 %v19155_v24 }
 0x5c2   : > { %v7050_v63 = vpop.f32.mrf.mxu0  ;;  %v7160_v9 = vadd.f32 %v7159_v33, %v7047_v52  ;;  %v7163_v50 = vpop.f32.mrf.mxu1  ;;  %8561 = vmatpush1.bf16.msra.mxu0 %v15168_v39  ;;  %v7460_v10 = vmax.f32 %v7158_v26, 0.0  ;;  %v15198_v52 = vld [vmem:[%s22268_s14 + $0x48] ss:$16 sps:$4 sm:$0xff]  }
 0x5c3   : > { %8562 = vmatprep.subr.bf16.mxu0 %v15176_v28  ;;  %v7051_v48 = vadd.f32 %v7050_v63, %v19141_v56 }
 0x5c4   : > { %v7052_v27 = vpop.f32.mrf.mxu0  ;;  %v7461_v62 = vmax.f32 %v7160_v9, 0.0  ;;  %v7165_v38 = vpop.f32.mrf.mxu1  ;;  %v19177_v5 = vpack.c.bf16 %v7460_v10, %v7456_v29  ;;  %v15206_v9 = vld [vmem:[%s22268_s14 + $0x2c] ss:$16 sps:$4 sm:$0xff]  }
 0x5c5   : > { %v7053_v49 = vadd.f32 %v7052_v27, %v19137_v3  ;;  %v7164_v1 = vadd.f32 %v7163_v50, %v7051_v48  ;;  %v15204_v48 = vld [vmem:[%s22268_s14 + $0x28] ss:$16 sps:$4 sm:$0xff]  }
 0x5c6   : > { %v7054_v0 = vpop.f32.mrf.mxu0  ;;  %v7167_v36 = vpop.f32.mrf.mxu1  ;;  %8563 = vmatpush1.bf16.msra.mxu0 %v15174_v34  ;;  %v19172_v46 = vpack.c.bf16 %v7461_v62, %v7457_v19 }
 0x5c7   : > { %v7055_v51 = vadd.f32 %v7054_v0, %v19141_v56  ;;  %8564 = vmatprep.subr.bf16.mxu0 %v15182_v21  ;;  %v7166_v32 = vadd.f32 %v7165_v38, %v7053_v49  ;;  %v7464_v6 = vmax.f32 %v7164_v1, 0.0 }
 0x5c8   : > { %v7056_v31 = vpop.f32.mrf.mxu0  ;;  %v7169_v2 = vpop.f32.mrf.mxu1  ;;  %8376 = vmatprep.mubr.bf16.mxu0 %v19172_v46 }
 0x5c9   : > { %v7168_v47 = vadd.f32 %v7167_v36, %v7055_v51  ;;  %v7057_v53 = vadd.f32 %v7056_v31, %v19137_v3  ;;  %8377 = vmatmul.mubr.bf16.gmra.mxu0 %v19177_v5  ;;  %v7465_v11 = vmax.f32 %v7166_v32, 0.0  ;;  %v15212_v36 = vld [vmem:[%s22268_s14 + $0xc] ss:$16 sps:$4 sm:$0xff]  }
 0x5ca   : > { %v7060_v13 = vpop.f32.mrf.mxu0  ;;  %8565 = vmatpush1.bf16.msra.mxu0 %v15180_v25 }
 0x5cb   : > { %v7170_v54 = vadd.f32 %v7169_v2, %v7057_v53  ;;  %v7173_v43 = vpop.f32.mrf.mxu1  ;;  %v7468_v14 = vmax.f32 %v7168_v47, 0.0  ;;  %8566 = vmatprep.subr.bf16.mxu0 %v15188_v42  ;;  %v7061_v41 = vadd.f32 %v7060_v13, %v19141_v56  ;;  %v15210_v13 = vld [vmem:[%s22268_s14 + $0x8] ss:$16 sps:$4 sm:$0xff]  }
 0x5cc   : > { %v7062_v7 = vpop.f32.mrf.mxu0 }
 0x5cd   : > { %v7469_v58 = vmax.f32 %v7170_v54, 0.0  ;;  %v7063_v4 = vadd.f32 %v7062_v7, %v19137_v3  ;;  %v7175_v37 = vpop.f32.mrf.mxu1  ;;  %v19199_v55 = vpack.c.bf16 %v7468_v14, %v7464_v6  ;;  %v7174_v33 = vadd.f32 %v7173_v43, %v7061_v41 }
 0x5ce   : > { %v7064_v57 = vpop.f32.mrf.mxu0  ;;  %8567 = vmatpush1.bf16.msra.mxu0 %v15186_v59  ;;  %v15218_v59 = vld [vmem:[%s22268_s14 + $0x1ec] ss:$16 sps:$4 sm:$0xff]  }
 0x5cf   : > { %v7065_v45 = vadd.f32 %v7064_v57, %v19141_v56  ;;  %v7177_v20 = vpop.f32.mrf.mxu1  ;;  %v19194_v35 = vpack.c.bf16 %v7469_v58, %v7465_v11  ;;  %8568 = vmatprep.subr.bf16.mxu0 %v15194_v61  ;;  %v7176_v12 = vadd.f32 %v7175_v37, %v7063_v4  ;;  %v7472_v21 = vmax.f32 %v7174_v33, 0.0 }
 0x5d0   : > { %v7066_v17 = vpop.f32.mrf.mxu0 }
 0x5d1   : > { %v7178_v16 = vadd.f32 %v7177_v20, %v7065_v45  ;;  %v7067_v39 = vadd.f32 %v7066_v17, %v19137_v3  ;;  %v7179_v18 = vpop.f32.mrf.mxu1  ;;  %8386 = vmatprep.mubr.bf16.mxu0 %v19194_v35  ;;  %v7473_v50 = vmax.f32 %v7176_v12, 0.0  ;;  %v15216_v45 = vld [vmem:[%s22268_s14 + $0x1e8] ss:$16 sps:$4 sm:$0xff]   ;;  %v15224_v17 = vld [vmem:[%s22268_s14 + $0x1cc] ss:$16 sps:$4 sm:$0xff]  }
 0x5d2   : > { %v7070_v28 = vpop.f32.mrf.mxu0  ;;  %8387 = vmatmul.mubr.bf16.gmra.mxu0 %v19199_v55 }
 0x5d3   : > { %v7180_v8 = vadd.f32 %v7179_v18, %v7067_v39  ;;  %v7183_v26 = vpop.f32.mrf.mxu1  ;;  %8569 = vmatpush1.bf16.msra.mxu0 %v15192_v40  ;;  %v7476_v22 = vmax.f32 %v7178_v16, 0.0  ;;  %v7071_v19 = vadd.f32 %v7070_v28, %v19141_v56 }
 0x5d4   : > { %v7072_v63 = vpop.f32.mrf.mxu0  ;;  %8570 = vmatprep.subr.bf16.mxu0 %v15200_v15 }
 0x5d5   : > { %v7477_v34 = vmax.f32 %v7180_v8, 0.0  ;;  %v7073_v10 = vadd.f32 %v7072_v63, %v19137_v3  ;;  %v7185_v27 = vpop.f32.mrf.mxu1  ;;  %v19221_v0 = vpack.c.bf16 %v7476_v22, %v7472_v21  ;;  %v7184_v47 = vadd.f32 %v7183_v26, %v7071_v19  ;;  %v15222_v26 = vld [vmem:[%s22268_s14 + $0x1c8] ss:$16 sps:$4 sm:$0xff]   ;;  %v15230_v63 = vld [vmem:[%s22268_s14 + $0x1ac] ss:$16 sps:$4 sm:$0xff]  }
 0x5d6   : > { %v7074_v62 = vpop.f32.mrf.mxu0 }
 0x5d7   : > { %v7075_v49 = vadd.f32 %v7074_v62, %v19141_v56  ;;  %v7187_v38 = vpop.f32.mrf.mxu1  ;;  %8571 = vmatpush1.bf16.msra.mxu0 %v15198_v52  ;;  %v19216_v29 = vpack.c.bf16 %v7477_v34, %v7473_v50  ;;  %v7186_v25 = vadd.f32 %v7185_v27, %v7073_v10  ;;  %v7480_v58 = vmax.f32 %v7184_v47, 0.0 }
 0x5d8   : > { %v7076_v51 = vpop.f32.mrf.mxu0  ;;  %8572 = vmatprep.subr.bf16.mxu0 %v15206_v9 }
 0x5d9   : > { %v7188_v31 = vadd.f32 %v7187_v38, %v7075_v49  ;;  %v7077_v42 = vadd.f32 %v7076_v51, %v19137_v3  ;;  %v7189_v32 = vpop.f32.mrf.mxu1  ;;  %8396 = vmatprep.mubr.bf16.mxu0 %v19216_v29  ;;  %v7481_v14 = vmax.f32 %v7186_v25, 0.0  ;;  %v15236_v25 = vld [vmem:[%s22268_s14 + $0x18c] ss:$16 sps:$4 sm:$0xff]  }
 0x5da   : > { %v7080_v53 = vpop.f32.mrf.mxu0  ;;  %8397 = vmatmul.mubr.bf16.gmra.mxu0 %v19221_v0 }
 0x5db   : > { %v7190_v2 = vadd.f32 %v7189_v32, %v7077_v42  ;;  %v7193_v1 = vpop.f32.mrf.mxu1  ;;  %8573 = vmatpush1.bf16.msra.mxu0 %v15204_v48  ;;  %v7484_v54 = vmax.f32 %v7188_v31, 0.0  ;;  %v7081_v4 = vadd.f32 %v7080_v53, %v19141_v56  ;;  %v15228_v48 = vld [vmem:[%s22268_s14 + $0x1a8] ss:$16 sps:$4 sm:$0xff]  }
 0x5dc   : > { %v7082_v43 = vpop.f32.mrf.mxu0  ;;  %8574 = vmatprep.subr.bf16.mxu0 %v15212_v36 }
 0x5dd   : > { %v7485_v7 = vmax.f32 %v7190_v2, 0.0  ;;  %v7083_v61 = vadd.f32 %v7082_v43, %v19137_v3  ;;  %v7195_v11 = vpop.f32.mrf.mxu1  ;;  %v19243_v20 = vpack.c.bf16 %v7484_v54, %v7480_v58  ;;  %v7194_v18 = vadd.f32 %v7193_v1, %v7081_v4  ;;  %v15234_v54 = vld [vmem:[%s22268_s14 + $0x188] ss:$16 sps:$4 sm:$0xff]  }
 0x5de   : > { %v7084_v37 = vpop.f32.mrf.mxu0 }
 0x5df   : > { %v7085_v6 = vadd.f32 %v7084_v37, %v19141_v56  ;;  %v7197_v41 = vpop.f32.mrf.mxu1  ;;  %8575 = vmatpush1.bf16.msra.mxu0 %v15210_v13  ;;  %v19238_v57 = vpack.c.bf16 %v7485_v7, %v7481_v14  ;;  %v7196_v15 = vadd.f32 %v7195_v11, %v7083_v61  ;;  %v7488_v27 = vmax.f32 %v7194_v18, 0.0  ;;  %v15242_v14 = vld [vmem:[%s22268_s14 + $0x16c] ss:$16 sps:$4 sm:$0xff]  }
 0x5e0   : > { %v7086_v40 = vpop.f32.mrf.mxu0  ;;  %8576 = vmatprep.subr.bf16.mxu0 %v15218_v59 }
 0x5e1   : > { %v7198_v12 = vadd.f32 %v7197_v41, %v7085_v6  ;;  %v7087_v16 = vadd.f32 %v7086_v40, %v19137_v3  ;;  %v7199_v39 = vpop.f32.mrf.mxu1  ;;  %8406 = vmatprep.mubr.bf16.mxu0 %v19238_v57  ;;  %v7489_v9 = vmax.f32 %v7196_v15, 0.0 }
 0x5e2   : > { %v7090_v33 = vpop.f32.mrf.mxu0  ;;  %8407 = vmatmul.mubr.bf16.gmra.mxu0 %v19243_v20 }
 0x5e3   : > { %v7200_v28 = vadd.f32 %v7199_v39, %v7087_v16  ;;  %v7203_v8 = vpop.f32.mrf.mxu1  ;;  %8577 = vmatpush2.bf16.msra.mxu0 %v15216_v45  ;;  %v7492_v52 = vmax.f32 %v7198_v12, 0.0  ;;  %v7091_v21 = vadd.f32 %v7090_v33, %v19141_v56  ;;  %v15248_v16 = vld [vmem:[%s22268_s14 + $0x14c] ss:$16 sps:$4 sm:$0xff]  }
 0x5e4   : > { %v7092_v22 = vpop.f32.mrf.mxu0  ;;  %8578 = vmatprep.subr.bf16.mxu0 %v15224_v17  ;;  %v15240_v17 = vld [vmem:[%s22268_s14 + $0x168] ss:$16 sps:$4 sm:$0xff]  }
 0x5e5   : > { %v7493_v50 = vmax.f32 %v7200_v28, 0.0  ;;  %v7093_v34 = vadd.f32 %v7092_v22, %v19137_v3  ;;  %v7205_v10 = vpop.f32.mrf.mxu1  ;;  %v19265_v51 = vpack.c.bf16 %v7492_v52, %v7488_v27  ;;  %v7204_v53 = vadd.f32 %v7203_v8, %v7091_v21  ;;  %v22370_v28 = vld [vmem:[#allocation14_spill] sm:$0xff]  ;;  %v22371_v52 = vld [vmem:[#allocation16_spill] sm:$0xff]  ;;  %v15254_v27 = vld [vmem:[%s22268_s14 + $0x12c] ss:$16 sps:$4 sm:$0xff]  }
 0x5e6   : > { %v7094_v19 = vpop.f32.mrf.mxu0  ;;  %v19296_v8 = vrot.slane %v19133_v60, %v22370_v28  ;;  %v19300_v22 = vrot.slane %v19133_v60, %v22371_v52 }
 0x5e7   : > { %v7095_v62 = vadd.f32 %v7094_v19, %v19141_v56  ;;  %v7207_v49 = vpop.f32.mrf.mxu1  ;;  %8579 = vmatpush2.bf16.msra.mxu0 %v15222_v26  ;;  %v19260_v38 = vpack.c.bf16 %v7493_v50, %v7489_v9  ;;  %v7206_v31 = vadd.f32 %v7205_v10, %v7093_v34  ;;  %v7496_v4 = vmax.f32 %v7204_v53, 0.0 }
 0x5e8   : > { %v7096_v36 = vpop.f32.mrf.mxu0  ;;  %8580 = vmatprep.subr.bf16.mxu0 %v15230_v63 }
 0x5e9   : > { %v7208_v42 = vadd.f32 %v7207_v49, %v7095_v62  ;;  %v7097_v32 = vadd.f32 %v7096_v36, %v19137_v3  ;;  %v7209_v47 = vpop.f32.mrf.mxu1  ;;  %8416 = vmatprep.mubr.bf16.mxu0 %v19260_v38  ;;  %v7497_v7 = vmax.f32 %v7206_v31, 0.0 }
 0x5ea   : > { %v7100_v2 = vpop.f32.mrf.mxu0  ;;  %8417 = vmatmul.mubr.bf16.gmra.mxu0 %v19265_v51 }
 0x5eb   : > { %v7210_v1 = vadd.f32 %v7209_v47, %v7097_v32  ;;  %v7213_v13 = vpop.f32.mrf.mxu1  ;;  %8581 = vmatpush2.bf16.msra.mxu0 %v15228_v48  ;;  %v7500_v43 = vmax.f32 %v7208_v42, 0.0  ;;  %v7101_v37 = vadd.f32 %v7100_v2, %v19141_v56  ;;  %v15252_v42 = vld [vmem:[%s22268_s14 + $0x128] ss:$16 sps:$4 sm:$0xff]   ;;  %v15260_v2 = vld [vmem:[%s22268_s14 + $0x10c] ss:$16 sps:$4 sm:$0xff]  }
 0x5ec   : > { %v7102_v59 = vpop.f32.mrf.mxu0  ;;  %8582 = vmatprep.subr.bf16.mxu0 %v15236_v25 }
 0x5ed   : > { %v7501_v61 = vmax.f32 %v7210_v1, 0.0  ;;  %v7103_v11 = vadd.f32 %v7102_v59, %v19137_v3  ;;  %v7215_v58 = vpop.f32.mrf.mxu1  ;;  %v19287_v15 = vpack.c.bf16 %v7500_v43, %v7496_v4  ;;  %v7214_v26 = vadd.f32 %v7213_v13, %v7101_v37 }
 0x5ee   : > { %v7104_v6 = vpop.f32.mrf.mxu0 }
 0x5ef   : > { %v7105_v41 = vadd.f32 %v7104_v6, %v19141_v56  ;;  %v7217_v45 = vpop.f32.mrf.mxu1  ;;  %8583 = vmatpush2.bf16.msra.mxu0 %v15234_v54  ;;  %v19282_v40 = vpack.c.bf16 %v7501_v61, %v7497_v7  ;;  %v7216_v39 = vadd.f32 %v7215_v58, %v7103_v11  ;;  %v7504_v62 = vmax.f32 %v7214_v26, 0.0  ;;  %v15258_v61 = vld [vmem:[%s22268_s14 + $0x108] ss:$16 sps:$4 sm:$0xff]  }
 0x5f0   : > { %v7106_v12 = vpop.f32.mrf.mxu0  ;;  %8584 = vmatprep.subr.bf16.mxu0 %v15242_v14 }
 0x5f1   : > { %v7218_v18 = vadd.f32 %v7217_v45, %v7105_v41  ;;  %v7107_v56 = vadd.f32 %v7106_v12, %v19137_v3  ;;  %v7219_v33 = vpop.f32.mrf.mxu1  ;;  %8426 = vmatprep.mubr.bf16.mxu0 %v19282_v40  ;;  %v15246_v3 = vld [vmem:[%s22268_s14 + $0x148] ss:$16 sps:$4 sm:$0xff]   ;;  %v7505_v21 = vmax.f32 %v7216_v39, 0.0 }
 0x5f2   : > { %v7256_v63 = vpop.f32.mrf.mxu0  ;;  %8427 = vmatmul.mubr.bf16.gmra.mxu0 %v19287_v15 }
 0x5f3   : > { %v7220_v9 = vadd.f32 %v7219_v33, %v7107_v56  ;;  %8585 = vmatpush2.bf16.msra.mxu0 %v15240_v17  ;;  %v7508_v50 = vmax.f32 %v7218_v18, 0.0  ;;  %v7257_v49 = vadd.f32 %v7256_v63, %v19300_v22  ;;  %v15261_v18 = vld [vmem:[%s22268_s14 + $0x2e8] ss:$16 sps:$4 sm:$0xff]   ;;  %v15266_v63 = vld [vmem:[%s22268_s14 + $0x2cc] ss:$16 sps:$4 sm:$0xff]  }
 0x5f4   : > { %v7369_v34 = vpop.f32.mrf.mxu1  ;;  %v7258_v10 = vpop.f32.mrf.mxu0  ;;  %8586 = vmatprep.subr.bf16.mxu0 %v15248_v16 }
 0x5f5   : > { %v7509_v60 = vmax.f32 %v7220_v9, 0.0  ;;  %v7259_v19 = vadd.f32 %v7258_v10, %v19296_v8  ;;  %v19317_v32 = vpack.c.bf16 %v7508_v50, %v7504_v62  ;;  %v7370_v43 = vadd.f32 %v7369_v34, %v7257_v49 }
 0x5f6   : > { %v7371_v48 = vpop.f32.mrf.mxu1  ;;  %v7260_v36 = vpop.f32.mrf.mxu0 }
 0x5f7   : > { %v7261_v25 = vadd.f32 %v7260_v36, %v19300_v22  ;;  %8587 = vmatpush2.bf16.msra.mxu0 %v15246_v3  ;;  %v19312_v31 = vpack.c.bf16 %v7509_v60, %v7505_v21  ;;  %v7372_v1 = vadd.f32 %v7371_v48, %v7259_v19  ;;  %v7450_v45 = vmax.f32 %v7370_v43, 0.0  ;;  %v15264_v60 = vld [vmem:[%s22268_s14 + $0x2c8] ss:$16 sps:$4 sm:$0xff]   ;;  %v15269_v48 = vld [vmem:[%s22268_s14 + $0x2ac] ss:$16 sps:$4 sm:$0xff]  }
 0x5f8   : > { %v7373_v47 = vpop.f32.mrf.mxu1  ;;  %v7262_v53 = vpop.f32.mrf.mxu0  ;;  %8588 = vmatprep.subr.bf16.mxu0 %v15254_v27 }
 0x5f9   : > { %v7374_v13 = vadd.f32 %v7373_v47, %v7261_v25  ;;  %v7263_v54 = vadd.f32 %v7262_v53, %v19296_v8  ;;  %8436 = vmatprep.mubr.bf16.mxu0 %v19312_v31  ;;  %v7451_v37 = vmax.f32 %v7372_v1, 0.0 }
 0x5fa   : > { %v7375_v59 = vpop.f32.mrf.mxu1  ;;  %v7266_v14 = vpop.f32.mrf.mxu0  ;;  %8437 = vmatmul.mubr.bf16.gmra.mxu0 %v19317_v32 }
 0x5fb   : > { %v7376_v7 = vadd.f32 %v7375_v59, %v7263_v54  ;;  %8589 = vmatpush2.bf16.msra.mxu0 %v15252_v42  ;;  %8592 = vmatprep.mubr.bf16.mxu0 %v19150_v30  ;;  %v7454_v11 = vmax.f32 %v7374_v13, 0.0  ;;  %v7267_v17 = vadd.f32 %v7266_v14, %v19300_v22  ;;  %v15267_v13 = vld [vmem:[%s22268_s14 + $0x2a8] ss:$16 sps:$4 sm:$0xff]   ;;  %v15272_v14 = vld [vmem:[%s22268_s14 + $0x28c] ss:$16 sps:$4 sm:$0xff]  }
 0x5fc   : > { %v7379_v58 = vpop.f32.mrf.mxu1  ;;  %v7268_v4 = vpop.f32.mrf.mxu0  ;;  %8590 = vmatprep.subr.bf16.mxu0 %v15260_v2 }
 0x5fd   : > { %v7455_v6 = vmax.f32 %v7376_v7, 0.0  ;;  %v7269_v41 = vadd.f32 %v7268_v4, %v19296_v8  ;;  %v19337_v56 = vpack.c.bf16 %v7454_v11, %v7450_v45  ;;  %v7380_v34 = vadd.f32 %v7379_v58, %v7267_v17 }
 0x5fe   : > { %v7381_v12 = vpop.f32.mrf.mxu1  ;;  %v7270_v16 = vpop.f32.mrf.mxu0 }
 0x5ff   : > { %v7271_v39 = vadd.f32 %v7270_v16, %v19300_v22  ;;  %8591 = vmatpush2.bf16.msra.mxu0 %v15258_v61  ;;  %v19332_v30 = vpack.c.bf16 %v7455_v6, %v7451_v37  ;;  %v7382_v9 = vadd.f32 %v7381_v12, %v7269_v41  ;;  %v7458_v42 = vmax.f32 %v7380_v34, 0.0  ;;  %v15270_v41 = vld [vmem:[%s22268_s14 + $0x288] ss:$16 sps:$4 sm:$0xff]   ;;  %v15275_v16 = vld [vmem:[%s22268_s14 + $0x26c] ss:$16 sps:$4 sm:$0xff]  }
 0x600   : > { %v7383_v33 = vpop.f32.mrf.mxu1  ;;  %v7272_v26 = vpop.f32.mrf.mxu0 }
 0x601   : > { %v7384_v3 = vadd.f32 %v7383_v33, %v7271_v39  ;;  %v7273_v50 = vadd.f32 %v7272_v26, %v19296_v8  ;;  %8479 = vmatprep.mubr.bf16.mxu1 %v19332_v30  ;;  %v7459_v36 = vmax.f32 %v7382_v9, 0.0 }
 0x602   : > { %v7385_v10 = vpop.f32.mrf.mxu1  ;;  %v7276_v27 = vpop.f32.mrf.mxu0  ;;  %8480 = vmatmul.mubr.bf16.vlgmr.msra.gmra.mxu1 %v19337_v56  ;;  %8593 = vmatmul.mubr.bf16.vlgmr.msra.gmra.mxu0 %v19155_v24 }
 0x603   : > { %v7386_v21 = vadd.f32 %v7385_v10, %v7273_v50  ;;  %8674 = vmatpush1.bf16.msra.mxu1 %v15261_v18  ;;  %8602 = vmatprep.mubr.bf16.mxu0 %v19172_v46  ;;  %v7462_v19 = vmax.f32 %v7384_v3, 0.0  ;;  %v7277_v47 = vadd.f32 %v7276_v27, %v19300_v22  ;;  %v15273_v50 = vld [vmem:[%s22268_s14 + $0x268] ss:$16 sps:$4 sm:$0xff]  }
 0x604   : > { %v7389_v62 = vpop.f32.mrf.mxu1  ;;  %v7278_v49 = vpop.f32.mrf.mxu0  ;;  %8675 = vmatprep.subr.bf16.mxu1 %v15266_v63 }
 0x605   : > { %v7463_v25 = vmax.f32 %v7386_v21, 0.0  ;;  %v7279_v24 = vadd.f32 %v7278_v49, %v19296_v8  ;;  %v19361_v54 = vpack.c.bf16 %v7462_v19, %v7458_v42  ;;  %v7390_v58 = vadd.f32 %v7389_v62, %v7277_v47  ;;  %v15278_v21 = vld [vmem:[%s22268_s14 + $0x24c] ss:$16 sps:$4 sm:$0xff]   ;;  %v15276_v47 = vld [vmem:[%s22268_s14 + $0x248] ss:$16 sps:$4 sm:$0xff]  }
 0x606   : > { %v7391_v46 = vpop.f32.mrf.mxu1  ;;  %v7280_v53 = vpop.f32.mrf.mxu0 }
 0x607   : > { %v7281_v2 = vadd.f32 %v7280_v53, %v19300_v22  ;;  %8676 = vmatpush1.bf16.msra.mxu1 %v15264_v60  ;;  %v19356_v1 = vpack.c.bf16 %v7463_v25, %v7459_v36  ;;  %v7392_v7 = vadd.f32 %v7391_v46, %v7279_v24  ;;  %v7466_v33 = vmax.f32 %v7390_v58, 0.0  ;;  %v15311_v60 = vld [vmem:[%s22270_s16 + $0xe4] ss:$16 sps:$4 sm:$0xff]  }
 0x608   : > { %v7393_v43 = vpop.f32.mrf.mxu1  ;;  %v7282_v59 = vpop.f32.mrf.mxu0  ;;  %8677 = vmatprep.subr.bf16.mxu1 %v15269_v48  ;;  %v15309_v48 = vld [vmem:[%s22270_s16 + $0xe0] ss:$16 sps:$4 sm:$0xff]   ;;  %9672 = vmatprep.subr.bf16.mxu0 %v15311_v60  ;;  %v15287_v60 = vld [vmem:[%s22268_s14 + $0x3ec] ss:$16 sps:$4 sm:$0xff]  }
 0x609   : > { %v7394_v61 = vadd.f32 %v7393_v43, %v7281_v2  ;;  %v7283_v11 = vadd.f32 %v7282_v59, %v19296_v8  ;;  %8489 = vmatprep.mubr.bf16.mxu1 %v19356_v1  ;;  %v7467_v39 = vmax.f32 %v7392_v7, 0.0  ;;  %9673 = vmatpush1.bf16.msra.mxu0 %v15309_v48 }
 0x60a   : > { %v7395_v4 = vpop.f32.mrf.mxu1  ;;  %v7286_v37 = vpop.f32.mrf.mxu0  ;;  %8490 = vmatmul.mubr.bf16.gmra.mxu1 %v19361_v54  ;;  %8603 = vmatmul.mubr.bf16.gmra.mxu0 %v19177_v5 }
 0x60b   : > { %v7396_v6 = vadd.f32 %v7395_v4, %v7283_v11  ;;  %8678 = vmatpush1.bf16.msra.mxu1 %v15267_v13  ;;  %8612 = vmatprep.mubr.bf16.mxu0 %v19194_v35  ;;  %v7470_v45 = vmax.f32 %v7394_v61, 0.0  ;;  %v7287_v26 = vadd.f32 %v7286_v37, %v19300_v22  ;;  %v15281_v13 = vld [vmem:[%s22268_s14 + $0x22c] ss:$16 sps:$4 sm:$0xff]  }
 0x60c   : > { %v7399_v17 = vpop.f32.mrf.mxu1  ;;  %v7288_v12 = vpop.f32.mrf.mxu0  ;;  %8679 = vmatprep.subr.bf16.mxu1 %v15272_v14  ;;  %v15312_v14 = vld [vmem:[%s22270_s16 + $0xc0] ss:$16 sps:$4 sm:$0xff]  }
 0x60d   : > { %v7471_v18 = vmax.f32 %v7396_v6, 0.0  ;;  %v7289_v5 = vadd.f32 %v7288_v12, %v19296_v8  ;;  %v19385_v34 = vpack.c.bf16 %v7470_v45, %v7466_v33  ;;  %v7400_v36 = vadd.f32 %v7399_v17, %v7287_v26  ;;  %v15279_v6 = vld [vmem:[%s22268_s14 + $0x228] ss:$16 sps:$4 sm:$0xff]   ;;  %v15284_v12 = vld [vmem:[%s22268_s14 + $0x20c] ss:$16 sps:$4 sm:$0xff]  }
 0x60e   : > { %v7401_v35 = vpop.f32.mrf.mxu1  ;;  %v7290_v63 = vpop.f32.mrf.mxu0  ;;  %v15315_v33 = vld [vmem:[%s22270_s16 + $0xa0] ss:$16 sps:$4 sm:$0xff]  }
 0x60f   : > { %v7291_v9 = vadd.f32 %v7290_v63, %v19300_v22  ;;  %8680 = vmatpush1.bf16.msra.mxu1 %v15270_v41  ;;  %v19380_v3 = vpack.c.bf16 %v7471_v18, %v7467_v39  ;;  %v7402_v19 = vadd.f32 %v7401_v35, %v7289_v5  ;;  %v7474_v7 = vmax.f32 %v7400_v36, 0.0 }
 0x610   : > { %v7403_v10 = vpop.f32.mrf.mxu1  ;;  %v7292_v27 = vpop.f32.mrf.mxu0  ;;  %8681 = vmatprep.subr.bf16.mxu1 %v15275_v16  ;;  %v15317_v16 = vld [vmem:[%s22270_s16 + $0xa4] ss:$16 sps:$4 sm:$0xff]  }
 0x611   : > { %v7404_v62 = vadd.f32 %v7403_v10, %v7291_v9  ;;  %v7293_v49 = vadd.f32 %v7292_v27, %v19296_v8  ;;  %8499 = vmatprep.mubr.bf16.mxu1 %v19380_v3  ;;  %v7475_v43 = vmax.f32 %v7402_v19, 0.0 }
 0x612   : > { %v7405_v25 = vpop.f32.mrf.mxu1  ;;  %v7296_v24 = vpop.f32.mrf.mxu0  ;;  %8500 = vmatmul.mubr.bf16.gmra.mxu1 %v19385_v34  ;;  %8613 = vmatmul.mubr.bf16.gmra.mxu0 %v19199_v55  ;;  %v15314_v55 = vld [vmem:[%s22270_s16 + $0xc4] ss:$16 sps:$4 sm:$0xff]  }
 0x613   : > { %v7406_v42 = vadd.f32 %v7405_v25, %v7293_v49  ;;  %8682 = vmatpush1.bf16.msra.mxu1 %v15273_v50  ;;  %8622 = vmatprep.mubr.bf16.mxu0 %v19216_v29  ;;  %v7478_v46 = vmax.f32 %v7404_v62, 0.0  ;;  %v7297_v61 = vadd.f32 %v7296_v24, %v19300_v22  ;;  %v15282_v50 = vld [vmem:[%s22268_s14 + $0x208] ss:$16 sps:$4 sm:$0xff]   ;;  %v15318_v49 = vld [vmem:[%s22270_s16 + $0x80] ss:$16 sps:$4 sm:$0xff]  }
 0x614   : > { %v7409_v53 = vpop.f32.mrf.mxu1  ;;  %v7298_v2 = vpop.f32.mrf.mxu0  ;;  %8683 = vmatprep.subr.bf16.mxu1 %v15278_v21  ;;  %9674 = vmatprep.subr.bf16.mxu0 %v15314_v55  ;;  %v15290_v55 = vld [vmem:[%s22268_s14 + $0x3cc] ss:$16 sps:$4 sm:$0xff]  }
 0x615   : > { %v7479_v59 = vmax.f32 %v7406_v42, 0.0  ;;  %v7299_v29 = vadd.f32 %v7298_v2, %v19296_v8  ;;  %v19421_v41 = vpack.c.bf16 %v7478_v46, %v7474_v7  ;;  %9675 = vmatpush1.bf16.msra.mxu0 %v15312_v14  ;;  %v7410_v26 = vadd.f32 %v7409_v53, %v7297_v61  ;;  %v15285_v46 = vld [vmem:[%s22268_s14 + $0x3e8] ss:$16 sps:$4 sm:$0xff]   ;;  %v15321_v7 = vld [vmem:[%s22270_s16 + $0x60] ss:$16 sps:$4 sm:$0xff]  }
 0x616   : > { %v7411_v11 = vpop.f32.mrf.mxu1  ;;  %v7300_v58 = vpop.f32.mrf.mxu0  ;;  %9676 = vmatprep.subr.bf16.mxu0 %v15317_v16  ;;  %v15293_v16 = vld [vmem:[%s22268_s14 + $0x3ac] ss:$16 sps:$4 sm:$0xff]  }
 0x617   : > { %v7301_v4 = vadd.f32 %v7300_v58, %v19300_v22  ;;  %8684 = vmatpush1.bf16.msra.mxu1 %v15276_v47  ;;  %v19416_v37 = vpack.c.bf16 %v7479_v59, %v7475_v43  ;;  %v7412_v39 = vadd.f32 %v7411_v11, %v7299_v29  ;;  %v7482_v48 = vmax.f32 %v7410_v26, 0.0  ;;  %v15323_v43 = vld [vmem:[%s22270_s16 + $0x64] ss:$16 sps:$4 sm:$0xff]  }
 0x618   : > { %v7413_v45 = vpop.f32.mrf.mxu1  ;;  %v7302_v17 = vpop.f32.mrf.mxu0  ;;  %8685 = vmatprep.subr.bf16.mxu1 %v15281_v13 }
 0x619   : > { %v7414_v18 = vadd.f32 %v7413_v45, %v7301_v4  ;;  %v7303_v5 = vadd.f32 %v7302_v17, %v19296_v8  ;;  %8509 = vmatprep.mubr.bf16.mxu1 %v19416_v37  ;;  %v7483_v19 = vmax.f32 %v7412_v39, 0.0  ;;  %9677 = vmatpush1.bf16.msra.mxu0 %v15315_v33 }
 0x61a   : > { %v7415_v35 = vpop.f32.mrf.mxu1  ;;  %v7306_v63 = vpop.f32.mrf.mxu0  ;;  %8510 = vmatmul.mubr.bf16.gmra.mxu1 %v19421_v41  ;;  %8623 = vmatmul.mubr.bf16.gmra.mxu0 %v19221_v0  ;;  %v15320_v0 = vld [vmem:[%s22270_s16 + $0x84] ss:$16 sps:$4 sm:$0xff]  }
 0x61b   : > { %v7416_v9 = vadd.f32 %v7415_v35, %v7303_v5  ;;  %8686 = vmatpush1.bf16.msra.mxu1 %v15279_v6  ;;  %8632 = vmatprep.mubr.bf16.mxu0 %v19238_v57  ;;  %v7486_v10 = vmax.f32 %v7414_v18, 0.0  ;;  %v7307_v36 = vadd.f32 %v7306_v63, %v19300_v22  ;;  %v15288_v6 = vld [vmem:[%s22268_s14 + $0x3c8] ss:$16 sps:$4 sm:$0xff]   ;;  %v15324_v5 = vld [vmem:[%s22270_s16 + $0x40] ss:$16 sps:$4 sm:$0xff]  }
 0x61c   : > { %v7419_v27 = vpop.f32.mrf.mxu1  ;;  %v7308_v21 = vpop.f32.mrf.mxu0  ;;  %8687 = vmatprep.subr.bf16.mxu1 %v15284_v12  ;;  %9678 = vmatprep.subr.bf16.mxu0 %v15320_v0  ;;  %v15296_v0 = vld [vmem:[%s22268_s14 + $0x38c] ss:$16 sps:$4 sm:$0xff]  }
 0x61d   : > { %v7487_v62 = vmax.f32 %v7416_v9, 0.0  ;;  %v7309_v57 = vadd.f32 %v7308_v21, %v19296_v8  ;;  %v19457_v53 = vpack.c.bf16 %v7486_v10, %v7482_v48  ;;  %9679 = vmatpush1.bf16.msra.mxu0 %v15318_v49  ;;  %v7420_v61 = vadd.f32 %v7419_v27, %v7307_v36  ;;  %v15291_v10 = vld [vmem:[%s22268_s14 + $0x3a8] ss:$16 sps:$4 sm:$0xff]   ;;  %v15327_v48 = vld [vmem:[%s22270_s16 + $0x20] ss:$16 sps:$4 sm:$0xff]  }
 0x61e   : > { %v7421_v25 = vpop.f32.mrf.mxu1  ;;  %v7310_v24 = vpop.f32.mrf.mxu0  ;;  %9680 = vmatprep.subr.bf16.mxu0 %v15323_v43  ;;  %v15299_v43 = vld [vmem:[%s22268_s14 + $0x36c] ss:$16 sps:$4 sm:$0xff]  }
 0x61f   : > { %v7311_v42 = vadd.f32 %v7310_v24, %v19300_v22  ;;  %8688 = vmatpush1.bf16.msra.mxu1 %v15282_v50  ;;  %v19452_v47 = vpack.c.bf16 %v7487_v62, %v7483_v19  ;;  %v7422_v59 = vadd.f32 %v7421_v25, %v7309_v57  ;;  %v7490_v33 = vmax.f32 %v7420_v61, 0.0  ;;  %v15329_v19 = vld [vmem:[%s22270_s16 + $0x24] ss:$16 sps:$4 sm:$0xff]  }
 0x620   : > { %v7423_v2 = vpop.f32.mrf.mxu1  ;;  %v7312_v13 = vpop.f32.mrf.mxu0  ;;  %8689 = vmatprep.subr.bf16.mxu1 %v15287_v60 }
 0x621   : > { %v7424_v29 = vadd.f32 %v7423_v2, %v7311_v42  ;;  %v7313_v14 = vadd.f32 %v7312_v13, %v19296_v8  ;;  %8519 = vmatprep.mubr.bf16.mxu1 %v19452_v47  ;;  %v7491_v39 = vmax.f32 %v7422_v59, 0.0  ;;  %9681 = vmatpush1.bf16.msra.mxu0 %v15321_v7 }
 0x622   : > { %v7425_v11 = vpop.f32.mrf.mxu1  ;;  %v7316_v58 = vpop.f32.mrf.mxu0  ;;  %8520 = vmatmul.mubr.bf16.gmra.mxu1 %v19457_v53  ;;  %8633 = vmatmul.mubr.bf16.gmra.mxu0 %v19243_v20  ;;  %v15326_v20 = vld [vmem:[%s22270_s16 + $0x44] ss:$16 sps:$4 sm:$0xff]  }
 0x623   : > { %v7426_v4 = vadd.f32 %v7425_v11, %v7313_v14  ;;  %8690 = vmatpush2.bf16.msra.mxu1 %v15285_v46  ;;  %8642 = vmatprep.mubr.bf16.mxu0 %v19260_v38  ;;  %v7494_v45 = vmax.f32 %v7424_v29, 0.0  ;;  %v7317_v26 = vadd.f32 %v7316_v58, %v19300_v22  ;;  %v15294_v46 = vld [vmem:[%s22268_s14 + $0x388] ss:$16 sps:$4 sm:$0xff]   ;;  %v15330_v14 = vld [vmem:[%s22270_s16] ss:$16 sps:$4 sm:$0xff]  }
 0x624   : > { %v7429_v17 = vpop.f32.mrf.mxu1  ;;  %v7318_v12 = vpop.f32.mrf.mxu0  ;;  %8691 = vmatprep.subr.bf16.mxu1 %v15290_v55  ;;  %9682 = vmatprep.subr.bf16.mxu0 %v15326_v20  ;;  %v15302_v20 = vld [vmem:[%s22268_s14 + $0x34c] ss:$16 sps:$4 sm:$0xff]  }
 0x625   : > { %v7495_v18 = vmax.f32 %v7426_v4, 0.0  ;;  %v7319_v38 = vadd.f32 %v7318_v12, %v19296_v8  ;;  %v19493_v27 = vpack.c.bf16 %v7494_v45, %v7490_v33  ;;  %9683 = vmatpush1.bf16.msra.mxu0 %v15324_v5  ;;  %v7430_v36 = vadd.f32 %v7429_v17, %v7317_v26  ;;  %v15297_v45 = vld [vmem:[%s22268_s14 + $0x368] ss:$16 sps:$4 sm:$0xff]   ;;  %v15333_v5 = vld [vmem:[%s22270_s16 + $0x1e0] ss:$16 sps:$4 sm:$0xff]  }
 0x626   : > { %v7431_v35 = vpop.f32.mrf.mxu1  ;;  %v7320_v63 = vpop.f32.mrf.mxu0  ;;  %9684 = vmatprep.subr.bf16.mxu0 %v15329_v19  ;;  %v15303_v19 = vld [vmem:[%s22268_s14 + $0x328] ss:$16 sps:$4 sm:$0xff]  }
 0x627   : > { %v7321_v9 = vadd.f32 %v7320_v63, %v19300_v22  ;;  %8692 = vmatpush2.bf16.msra.mxu1 %v15288_v6  ;;  %v19488_v50 = vpack.c.bf16 %v7495_v18, %v7491_v39  ;;  %v7432_v62 = vadd.f32 %v7431_v35, %v7319_v38  ;;  %v7498_v7 = vmax.f32 %v7430_v36, 0.0  ;;  %v15306_v36 = vld [vmem:[%s22268_s14 + $0x308] ss:$16 sps:$4 sm:$0xff]  }
 0x628   : > { %v7433_v21 = vpop.f32.mrf.mxu1  ;;  %v7322_v60 = vpop.f32.mrf.mxu0  ;;  %8693 = vmatprep.subr.bf16.mxu1 %v15293_v16 }
 0x629   : > { %v7434_v57 = vadd.f32 %v7433_v21, %v7321_v9  ;;  %v7323_v49 = vadd.f32 %v7322_v60, %v19296_v8  ;;  %8529 = vmatprep.mubr.bf16.mxu1 %v19488_v50  ;;  %v7499_v59 = vmax.f32 %v7432_v62, 0.0  ;;  %9685 = vmatpush1.bf16.msra.mxu0 %v15327_v48  ;;  %v15305_v9 = vld [vmem:[%s22268_s14 + $0x32c] ss:$16 sps:$4 sm:$0xff]   ;;  %v15339_v48 = vld [vmem:[%s22270_s16 + $0x1a0] ss:$16 sps:$4 sm:$0xff]  }
 0x62a   : > { %v7435_v25 = vpop.f32.mrf.mxu1  ;;  %v7326_v24 = vpop.f32.mrf.mxu0  ;;  %8530 = vmatmul.mubr.bf16.gmra.mxu1 %v19493_v27  ;;  %8643 = vmatmul.mubr.bf16.gmra.mxu0 %v19265_v51  ;;  %v15332_v51 = vld [vmem:[%s22270_s16 + $0x4] ss:$16 sps:$4 sm:$0xff]  }
 0x62b   : > { %v7436_v42 = vadd.f32 %v7435_v25, %v7323_v49  ;;  %8694 = vmatpush2.bf16.msra.mxu1 %v15291_v10  ;;  %8652 = vmatprep.mubr.bf16.mxu0 %v19282_v40  ;;  %v7502_v2 = vmax.f32 %v7434_v57, 0.0  ;;  %v7327_v61 = vadd.f32 %v7326_v24, %v19300_v22  ;;  %v15338_v10 = vld [vmem:[%s22270_s16 + $0x1c4] ss:$16 sps:$4 sm:$0xff]   ;;  %v15308_v57 = vld [vmem:[%s22268_s14 + $0x30c] ss:$16 sps:$4 sm:$0xff]  }
 0x62c   : > { %v7439_v13 = vpop.f32.mrf.mxu1  ;;  %v7328_v55 = vpop.f32.mrf.mxu0  ;;  %8695 = vmatprep.subr.bf16.mxu1 %v15296_v0  ;;  %9686 = vmatprep.subr.bf16.mxu0 %v15332_v51  ;;  %v15341_v49 = vld [vmem:[%s22270_s16 + $0x1a4] ss:$16 sps:$4 sm:$0xff]   ;;  %v15342_v24 = vld [vmem:[%s22270_s16 + $0x180] ss:$16 sps:$4 sm:$0xff]  }
 0x62d   : > { %v7503_v29 = vmax.f32 %v7436_v42, 0.0  ;;  %v7329_v40 = vadd.f32 %v7328_v55, %v19296_v8  ;;  %v19529_v17 = vpack.c.bf16 %v7502_v2, %v7498_v7  ;;  %9687 = vmatpush1.bf16.msra.mxu0 %v15330_v14  ;;  %v7440_v33 = vadd.f32 %v7439_v13, %v7327_v61  ;;  %v15344_v25 = vld [vmem:[%s22270_s16 + $0x184] ss:$16 sps:$4 sm:$0xff]   ;;  %v15354_v13 = vld [vmem:[%s22270_s16 + $0x100] ss:$16 sps:$4 sm:$0xff]  }
 0x62e   : > { %v7441_v11 = vpop.f32.mrf.mxu1  ;;  %v7330_v58 = vpop.f32.mrf.mxu0  ;;  %v15350_v42 = vld [vmem:[%s22270_s16 + $0x144] ss:$16 sps:$4 sm:$0xff]   ;;  %v15363_v51 = vld [vmem:[%s22270_s16 + $0x2c0] ss:$16 sps:$4 sm:$0xff]  }
 0x62f   : > { %v7331_v4 = vadd.f32 %v7330_v58, %v19300_v22  ;;  %8696 = vmatpush2.bf16.msra.mxu1 %v15294_v46  ;;  %v19524_v6 = vpack.c.bf16 %v7503_v29, %v7499_v59  ;;  %v15335_v22 = vld [vmem:[%s22270_s16 + $0x1e4] ss:$16 sps:$4 sm:$0xff]   ;;  %v7442_v39 = vadd.f32 %v7441_v11, %v7329_v40  ;;  %v7506_v60 = vmax.f32 %v7440_v33, 0.0  ;;  %v15348_v46 = vld [vmem:[%s22270_s16 + $0x140] ss:$16 sps:$4 sm:$0xff]  }
 0x630   : > { %v7443_v12 = vpop.f32.mrf.mxu1  ;;  %v7332_v16 = vpop.f32.mrf.mxu0  ;;  %8697 = vmatprep.subr.bf16.mxu1 %v15299_v43  ;;  %9688 = vmatprep.subr.bf16.mxu0 %v15335_v22  ;;  %v15353_v2 = vld [vmem:[%s22270_s16 + $0x124] ss:$16 sps:$4 sm:$0xff]   ;;  %v15375_v29 = vld [vmem:[%s22270_s16 + $0x280] ss:$16 sps:$4 sm:$0xff]  }
 0x631   : > { %v7444_v18 = vadd.f32 %v7443_v12, %v7331_v4  ;;  %v7333_v38 = vadd.f32 %v7332_v16, %v19296_v8  ;;  %8539 = vmatprep.mubr.bf16.mxu1 %v19524_v6  ;;  %v15300_v8 = vld [vmem:[%s22268_s14 + $0x348] ss:$16 sps:$4 sm:$0xff]   ;;  %9689 = vmatpush2.bf16.msra.mxu0 %v15333_v5  ;;  %v15359_v55 = vld [vmem:[%s22270_s16 + $0x2e4] ss:$16 sps:$4 sm:$0xff]   ;;  %v15387_v14 = vld [vmem:[%s22270_s16 + $0x240] ss:$16 sps:$4 sm:$0xff]  }
 0x632   : > { %v7445_v26 = vpop.f32.mrf.mxu1  ;;  %8540 = vmatmul.mubr.bf16.gmra.mxu1 %v19529_v17  ;;  %8653 = vmatmul.mubr.bf16.gmra.mxu0 %v19287_v15  ;;  %v7507_v15 = vmax.f32 %v7442_v39, 0.0  ;;  %v15365_v43 = vld [vmem:[%s22270_s16 + $0x2c4] ss:$16 sps:$4 sm:$0xff]   ;;  %v15399_v61 = vld [vmem:[%s22270_s16 + $0x200] ss:$16 sps:$4 sm:$0xff]  }
 0x633   : > { %v7446_v35 = vadd.f32 %v7445_v26, %v7333_v38  ;;  %8698 = vmatpush2.bf16.msra.mxu1 %v15297_v45  ;;  %8662 = vmatprep.mubr.bf16.mxu0 %v19312_v31  ;;  %v7510_v63 = vmax.f32 %v7444_v18, 0.0  ;;  %v15336_v31 = vld [vmem:[%s22270_s16 + $0x1c0] ss:$16 sps:$4 sm:$0xff]   ;;  %v15371_v59 = vld [vmem:[%s22270_s16 + $0x2a4] ss:$16 sps:$4 sm:$0xff]  }
 0x634   : > { %8699 = vmatprep.subr.bf16.mxu1 %v15302_v20  ;;  %9690 = vmatprep.subr.bf16.mxu0 %v15338_v10  ;;  %v15383_v40 = vld [vmem:[%s22270_s16 + $0x264] ss:$16 sps:$4 sm:$0xff]   ;;  %v15411_v4 = vld [vmem:[%s22270_s16 + $0x3c0] ss:$16 sps:$4 sm:$0xff]  }
 0x635   : > { %v7511_v21 = vmax.f32 %v7446_v35, 0.0  ;;  %v19562_v62 = vpack.c.bf16 %v7510_v63, %v7506_v60  ;;  %9691 = vmatpush2.bf16.msra.mxu0 %v15336_v31  ;;  %v15395_v7 = vld [vmem:[%s22270_s16 + $0x224] ss:$16 sps:$4 sm:$0xff]   ;;  %v15417_v45 = vld [vmem:[%s22270_s16 + $0x3a0] ss:$16 sps:$4 sm:$0xff]  }
 0x636   : > { %9692 = vmatprep.subr.bf16.mxu0 %v15341_v49  ;;  %v15407_v11 = vld [vmem:[%s22270_s16 + $0x3e4] ss:$16 sps:$4 sm:$0xff]   ;;  %v15423_v12 = vld [vmem:[%s22270_s16 + $0x380] ss:$16 sps:$4 sm:$0xff]   ;;  %v15455_v31 = vld [vmem:[%s22270_s16 + $0x2ec] ss:$16 sps:$4 sm:$0xff]  }
 0x637   : > { %8700 = vmatpush2.bf16.msra.mxu1 %v15300_v8  ;;  %v19557_v0 = vpack.c.bf16 %v7511_v21, %v7507_v15  ;;  %v15413_v58 = vld [vmem:[%s22270_s16 + $0x3c4] ss:$16 sps:$4 sm:$0xff]   ;;  %v15429_v20 = vld [vmem:[%s22270_s16 + $0x360] ss:$16 sps:$4 sm:$0xff]  }
 0x638   : > { %8701 = vmatprep.subr.bf16.mxu1 %v15305_v9  ;;  %v15431_v16 = vld [vmem:[%s22270_s16 + $0x364] ss:$16 sps:$4 sm:$0xff]   ;;  %v15435_v38 = vld [vmem:[%s22270_s16 + $0x340] ss:$16 sps:$4 sm:$0xff]  }
 0x639   : > { %8549 = vmatprep.mubr.bf16.mxu1 %v19557_v0  ;;  %9693 = vmatpush2.bf16.msra.mxu0 %v15339_v48  ;;  %v15437_v18 = vld [vmem:[%s22270_s16 + $0x344] ss:$16 sps:$4 sm:$0xff]   ;;  %v15441_v35 = vld [vmem:[%s22270_s16 + $0x320] ss:$16 sps:$4 sm:$0xff]  }
 0x63a   : > { %8550 = vmatmul.mubr.bf16.gmra.mxu1 %v19562_v62  ;;  %8663 = vmatmul.mubr.bf16.gmra.mxu0 %v19317_v32  ;;  %v15347_v32 = vld [vmem:[%s22270_s16 + $0x164] ss:$16 sps:$4 sm:$0xff]   ;;  %v15447_v10 = vld [vmem:[%s22270_s16 + $0x300] ss:$16 sps:$4 sm:$0xff]  }
 0x63b   : > { %8702 = vmatpush2.bf16.msra.mxu1 %v15303_v19  ;;  %8705 = vmatprep.mubr.bf16.mxu1 %v19332_v30  ;;  %v15345_v30 = vld [vmem:[%s22270_s16 + $0x160] ss:$16 sps:$4 sm:$0xff]   ;;  %v15443_v26 = vld [vmem:[%s22270_s16 + $0x324] ss:$16 sps:$4 sm:$0xff]  }
 0x63c   : > { %8703 = vmatprep.subr.bf16.mxu1 %v15308_v57  ;;  %9694 = vmatprep.subr.bf16.mxu0 %v15344_v25  ;;  %v15449_v9 = vld [vmem:[%s22270_s16 + $0x304] ss:$16 sps:$4 sm:$0xff]  }
 0x63d   : > { %9695 = vmatpush2.bf16.msra.mxu0 %v15342_v24 }
 0x63e   : > { %9696 = vmatprep.subr.bf16.mxu0 %v15347_v32 }
 0x63f   : > { %8704 = vmatpush2.bf16.msra.mxu1 %v15306_v36 }
 0x640   : > { %9785 = vmatprep.subr.bf16.mxu1 %v15359_v55 }
 0x641   : > { %9697 = vmatpush2.bf16.msra.mxu0 %v15345_v30 }
 0x642   : > { %8706 = vmatmul.mubr.bf16.vlgmr.msra.gmra.mxu1 %v19337_v56  ;;  %9698 = vmatprep.subr.bf16.mxu0 %v15350_v42  ;;  %v15351_v56 = vld [vmem:[%s22270_s16 + $0x120] ss:$16 sps:$4 sm:$0xff]  }
 0x643   : > { %8715 = vmatprep.mubr.bf16.mxu1 %v19356_v1  ;;  %v15356_v1 = vld [vmem:[%s22270_s16 + $0x104] ss:$16 sps:$4 sm:$0xff]  }
 0x645   : > { %9699 = vmatpush2.bf16.msra.mxu0 %v15348_v46 }
 0x646   : > { %9700 = vmatprep.subr.bf16.mxu0 %v15353_v2 }
 0x649   : > { %9701 = vmatpush2.bf16.msra.mxu0 %v15351_v56 }
 0x64a   : > { %8716 = vmatmul.mubr.bf16.gmra.mxu1 %v19361_v54  ;;  %9702 = vmatprep.subr.bf16.mxu0 %v15356_v1  ;;  %v15362_v54 = vld [vmem:[%s22270_s16 + $0xec] ss:$16 sps:$4 sm:$0xff]  }
 0x64b   : > { %8725 = vmatprep.mubr.bf16.mxu1 %v19380_v3  ;;  %v15357_v3 = vld [vmem:[%s22270_s16 + $0x2e0] ss:$16 sps:$4 sm:$0xff]  }
 0x64c   : > { %9786 = vmatpush1.bf16.msra.mxu1 %v15357_v3 }
 0x64d   : > { %9703 = vmatpush2.bf16.msra.mxu0 %v15354_v13  ;;  %9787 = vmatprep.subr.bf16.mxu1 %v15365_v43 }
 0x64e   : > { %9898 = vmatprep.subr.bf16.mxu0 %v15362_v54 }
 0x650   : > { %9788 = vmatpush1.bf16.msra.mxu1 %v15363_v51 }
 0x651   : > { %9789 = vmatprep.subr.bf16.mxu1 %v15371_v59  ;;  %v19778_v59 = vld [vmem:[%s22269_s15] sm:$0xf] }
 0x652   : > { %8726 = vmatmul.mubr.bf16.gmra.mxu1 %v19385_v34  ;;  %v15369_v34 = vld [vmem:[%s22270_s16 + $0x2a0] ss:$16 sps:$4 sm:$0xff]  }
 0x653   : > { %8735 = vmatprep.mubr.bf16.mxu1 %v19416_v37  ;;  %v15377_v37 = vld [vmem:[%s22270_s16 + $0x284] ss:$16 sps:$4 sm:$0xff]  }
 0x654   : > { %9790 = vmatpush1.bf16.msra.mxu1 %v15369_v34 }
 0x655   : > { %9791 = vmatprep.subr.bf16.mxu1 %v15377_v37  ;;  %v19784_v37 = vrot.slane %v19778_v59, %v22368_v44 }
 0x658   : > { %9792 = vmatpush1.bf16.msra.mxu1 %v15375_v29  ;;  %v19788_v29 = vrot.slane %v19778_v59, %v22369_v23 }
 0x659   : > { %9793 = vmatprep.subr.bf16.mxu1 %v15383_v40 }
 0x65a   : > { %8736 = vmatmul.mubr.bf16.gmra.mxu1 %v19421_v41  ;;  %v15381_v41 = vld [vmem:[%s22270_s16 + $0x260] ss:$16 sps:$4 sm:$0xff]  }
 0x65b   : > { %8745 = vmatprep.mubr.bf16.mxu1 %v19452_v47  ;;  %v15389_v47 = vld [vmem:[%s22270_s16 + $0x244] ss:$16 sps:$4 sm:$0xff]  }
 0x65c   : > { %9794 = vmatpush1.bf16.msra.mxu1 %v15381_v41 }
 0x65d   : > { %9795 = vmatprep.subr.bf16.mxu1 %v15389_v47 }
 0x660   : > { %9796 = vmatpush1.bf16.msra.mxu1 %v15387_v14 }
 0x661   : > { %9797 = vmatprep.subr.bf16.mxu1 %v15395_v7 }
 0x662   : > { %8746 = vmatmul.mubr.bf16.gmra.mxu1 %v19457_v53  ;;  %v15393_v53 = vld [vmem:[%s22270_s16 + $0x220] ss:$16 sps:$4 sm:$0xff]  }
 0x663   : > { %8755 = vmatprep.mubr.bf16.mxu1 %v19488_v50  ;;  %v15401_v50 = vld [vmem:[%s22270_s16 + $0x204] ss:$16 sps:$4 sm:$0xff]  }
 0x664   : > { %9798 = vmatpush1.bf16.msra.mxu1 %v15393_v53 }
 0x665   : > { %9799 = vmatprep.subr.bf16.mxu1 %v15401_v50 }
 0x668   : > { %9800 = vmatpush1.bf16.msra.mxu1 %v15399_v61 }
 0x669   : > { %9801 = vmatprep.subr.bf16.mxu1 %v15407_v11 }
 0x66a   : > { %8756 = vmatmul.mubr.bf16.gmra.mxu1 %v19493_v27  ;;  %v15405_v27 = vld [vmem:[%s22270_s16 + $0x3e0] ss:$16 sps:$4 sm:$0xff]  }
 0x66b   : > { %8765 = vmatprep.mubr.bf16.mxu1 %v19524_v6  ;;  %v15419_v6 = vld [vmem:[%s22270_s16 + $0x3a4] ss:$16 sps:$4 sm:$0xff]  }
 0x66c   : > { %9802 = vmatpush2.bf16.msra.mxu1 %v15405_v27 }
 0x66d   : > { %9803 = vmatprep.subr.bf16.mxu1 %v15413_v58 }
 0x670   : > { %9804 = vmatpush2.bf16.msra.mxu1 %v15411_v4 }
 0x671   : > { %9805 = vmatprep.subr.bf16.mxu1 %v15419_v6 }
 0x672   : > { %8766 = vmatmul.mubr.bf16.gmra.mxu1 %v19529_v17  ;;  %v15425_v17 = vld [vmem:[%s22270_s16 + $0x384] ss:$16 sps:$4 sm:$0xff]  }
 0x673   : > { %8775 = vmatprep.mubr.bf16.mxu1 %v19557_v0 }
 0x674   : > { %9806 = vmatpush2.bf16.msra.mxu1 %v15417_v45 }
 0x675   : > { %9807 = vmatprep.subr.bf16.mxu1 %v15425_v17 }
 0x678   : > { %9808 = vmatpush2.bf16.msra.mxu1 %v15423_v12 }
 0x679   : > { %9809 = vmatprep.subr.bf16.mxu1 %v15431_v16 }
 0x67a   : > { %8776 = vmatmul.mubr.bf16.gmra.mxu1 %v19562_v62 }
 0x67c   : > { %9810 = vmatpush2.bf16.msra.mxu1 %v15429_v20 }
 0x67d   : > { %9811 = vmatprep.subr.bf16.mxu1 %v15437_v18 }
 0x680   : > { %9812 = vmatpush2.bf16.msra.mxu1 %v15435_v38 }
 0x681   : > { %v8368_v22 = vpop.f32.mrf.mxu0  ;;  %9813 = vmatprep.subr.bf16.mxu1 %v15443_v26 }
 0x682   : > { %v8369_v50 = vadd.f32 %v8368_v22, %v19788_v29 }
 0x683   : > { %v8370_v39 = vpop.f32.mrf.mxu0 }
 0x684   : > { %9814 = vmatpush2.bf16.msra.mxu1 %v15441_v35  ;;  %v8371_v7 = vadd.f32 %v8370_v39, %v19784_v37  ;;  %v15360_v35 = vld [vmem:[%s22270_s16 + $0xe8] ss:$16 sps:$4 sm:$0xff]  }
 0x685   : > { %v8372_v5 = vpop.f32.mrf.mxu0  ;;  %9815 = vmatprep.subr.bf16.mxu1 %v15449_v9 }
 0x686   : > { %v8373_v53 = vadd.f32 %v8372_v5, %v19788_v29 }
 0x687   : > { %v8374_v33 = vpop.f32.mrf.mxu0 }
 0x688   : > { %9816 = vmatpush2.bf16.msra.mxu1 %v15447_v10  ;;  %v8375_v11 = vadd.f32 %v8374_v33, %v19784_v37 }
 0x689   : > { %v19718_v8 = vpop.f32.mrf.mxu0  ;;  %10011 = vmatprep.subr.bf16.mxu1 %v15455_v31 }
 0x68a   : > { %v8379_v9 = vadd.f32 %v19718_v8, %v19788_v29 }
 0x68b   : > { %v8380_v63 = vpop.f32.mrf.mxu0 }
 0x68c   : > { %v8381_v22 = vadd.f32 %v8380_v63, %v19784_v37 }
 0x68d   : > { %v8382_v15 = vpop.f32.mrf.mxu0 }
 0x68e   : > { %v8383_v26 = vadd.f32 %v8382_v15, %v19788_v29 }
 0x68f   : > { %v8384_v21 = vpop.f32.mrf.mxu0 }
 0x690   : > { %v8385_v63 = vadd.f32 %v8384_v21, %v19784_v37  ;;  %v15374_v21 = vld [vmem:[%s22270_s16 + $0xac] ss:$16 sps:$4 sm:$0xff]  }
 0x692   : > { %v19729_v60 = vpop.f32.mrf.mxu0 }
 0x694   : > { %v19731_v0 = vpop.f32.mrf.mxu0 }
 0x696   : > { %v19733_v19 = vpop.f32.mrf.mxu0 }
 0x698   : > { %v19735_v62 = vpop.f32.mrf.mxu0 }
 0x69a   : > { %v19737_v57 = vpop.f32.mrf.mxu0 }
 0x69c   : > { %v19739_v49 = vpop.f32.mrf.mxu0 }
 0x69e   : > { %v19741_v48 = vpop.f32.mrf.mxu0 }
 0x6a0   : > { %v19743_v36 = vpop.f32.mrf.mxu0 }
 0x6a2   : > { %v19745_v25 = vpop.f32.mrf.mxu0 }
 0x6a4   : > { %v19747_v24 = vpop.f32.mrf.mxu0 }
 0x6a6   : > { %v19749_v32 = vpop.f32.mrf.mxu0 }
 0x6a8   : > { %v19751_v30 = vpop.f32.mrf.mxu0 }
 0x6aa   : > { %v19753_v42 = vpop.f32.mrf.mxu0 }
 0x6ac   : > { %v19755_v46 = vpop.f32.mrf.mxu0 }
 0x6ae   : > { %v19757_v2 = vpop.f32.mrf.mxu0 }
 0x6b0   : > { %v19759_v56 = vpop.f32.mrf.mxu0 }
 0x6b2   : > { %v19761_v1 = vpop.f32.mrf.mxu0 }
 0x6b4   : > { %v19763_v13 = vpop.f32.mrf.mxu0 }
 0x6b6   : > { %v19765_v55 = vpop.f32.mrf.mxu0 }
 0x6b8   : > { %v19767_v54 = vpop.f32.mrf.mxu0 }
 0x6ba   : > { %v19769_v3 = vpop.f32.mrf.mxu0 }
 0x6bc   : > { %v19771_v43 = vpop.f32.mrf.mxu0 }
 0x6be   : > { %v19773_v51 = vpop.f32.mrf.mxu0 }
 0x6c0   : > { %v19780_v34 = vpop.f32.mrf.mxu0 }
 0x6c2   : > { %v8481_v40 = vpop.f32.mrf.mxu1  ;;  %v19790_v41 = vpop.f32.mrf.mxu0 }
 0x6c3   : > { %v8482_v6 = vadd.f32 %v8481_v40, %v8369_v50  ;;  %v15368_v40 = vld [vmem:[%s22270_s16 + $0xcc] ss:$16 sps:$4 sm:$0xff]  }
 0x6c4   : > { %v8483_v47 = vpop.f32.mrf.mxu1  ;;  %v19792_v14 = vpop.f32.mrf.mxu0 }
 0x6c5   : > { %v8484_v27 = vadd.f32 %v8483_v47, %v8371_v7  ;;  %v8786_v39 = vmax.f32 %v8482_v6, 0.0 }
 0x6c6   : > { %v8485_v61 = vpop.f32.mrf.mxu1  ;;  %v19798_v4 = vpop.f32.mrf.mxu0 }
 0x6c7   : > { %v8486_v58 = vadd.f32 %v8485_v61, %v8373_v53  ;;  %v8787_v20 = vmax.f32 %v8484_v27, 0.0  ;;  %v15366_v61 = vld [vmem:[%s22270_s16 + $0xc8] ss:$16 sps:$4 sm:$0xff]  }
 0x6c8   : > { %v8487_v45 = vpop.f32.mrf.mxu1  ;;  %v19800_v38 = vpop.f32.mrf.mxu0 }
 0x6c9   : > { %v8488_v17 = vadd.f32 %v8487_v45, %v8375_v11  ;;  %v8790_v12 = vmax.f32 %v8486_v58, 0.0 }
 0x6ca   : > { %v8491_v16 = vpop.f32.mrf.mxu1  ;;  %v19817_v47 = vpop.f32.mrf.mxu0 }
 0x6cb   : > { %v8791_v18 = vmax.f32 %v8488_v17, 0.0  ;;  %v19811_v10 = vpack.c.bf16 %v8790_v12, %v8786_v39  ;;  %v8492_v53 = vadd.f32 %v8491_v16, %v8379_v9  ;;  %v8391_v16 = vadd.f32 %v19731_v0, %v19784_v37  ;;  %v15372_v39 = vld [vmem:[%s22270_s16 + $0xa8] ss:$16 sps:$4 sm:$0xff]   ;;  %v15380_v0 = vld [vmem:[%s22270_s16 + $0x8c] ss:$16 sps:$4 sm:$0xff]  }
 0x6cc   : > { %v8493_v5 = vpop.f32.mrf.mxu1  ;;  %v19827_v6 = vpop.f32.mrf.mxu0 }
 0x6cd   : > { %v19804_v33 = vpack.c.bf16 %v8791_v18, %v8787_v20  ;;  %v8494_v15 = vadd.f32 %v8493_v5, %v8381_v22  ;;  %v8794_v17 = vmax.f32 %v8492_v53, 0.0  ;;  %v8393_v20 = vadd.f32 %v19733_v19, %v19788_v29 }
 0x6ce   : > { %v8495_v31 = vpop.f32.mrf.mxu1  ;;  %v8389_v5 = vadd.f32 %v19729_v60, %v19788_v29  ;;  %v8395_v19 = vadd.f32 %v19735_v62, %v19784_v37  ;;  %v15386_v62 = vld [vmem:[%s22270_s16 + $0x6c] ss:$16 sps:$4 sm:$0xff]  }
 0x6cf   : > { %v8496_v7 = vadd.f32 %v8495_v31, %v8383_v26  ;;  %9704 = vmatprep.mubr.bf16.mxu0 %v19804_v33  ;;  %v8795_v58 = vmax.f32 %v8494_v15, 0.0  ;;  %v15378_v15 = vld [vmem:[%s22270_s16 + $0x88] ss:$16 sps:$4 sm:$0xff]  }
 0x6d0   : > { %v8497_v50 = vpop.f32.mrf.mxu1  ;;  %9705 = vmatmul.mubr.bf16.vlgmr.msra.gmra.mxu0 %v19811_v10 }
 0x6d1   : > { %v8498_v8 = vadd.f32 %v8497_v50, %v8385_v63  ;;  %9899 = vmatpush1.bf16.msra.mxu0 %v15360_v35  ;;  %v8798_v11 = vmax.f32 %v8496_v7, 0.0  ;;  %v19847_v35 = vpop.f32.mrf.mxu0 }
 0x6d2   : > { %v8501_v27 = vpop.f32.mrf.mxu1  ;;  %9900 = vmatprep.subr.bf16.mxu0 %v15368_v40 }
 0x6d3   : > { %v8799_v45 = vmax.f32 %v8498_v8, 0.0  ;;  %v19840_v22 = vpack.c.bf16 %v8798_v11, %v8794_v17  ;;  %v8502_v40 = vadd.f32 %v8501_v27, %v8389_v5  ;;  %v19857_v50 = vpop.f32.mrf.mxu0  ;;  %v15384_v17 = vld [vmem:[%s22270_s16 + $0x68] ss:$16 sps:$4 sm:$0xff]  }
 0x6d4   : > { %v8503_v12 = vpop.f32.mrf.mxu1 }
 0x6d5   : > { %9901 = vmatpush1.bf16.msra.mxu0 %v15366_v61  ;;  %v19833_v18 = vpack.c.bf16 %v8799_v45, %v8795_v58  ;;  %v8504_v9 = vadd.f32 %v8503_v12, %v8391_v16  ;;  %v8802_v11 = vmax.f32 %v8502_v40, 0.0  ;;  %v8403_v58 = vadd.f32 %v19741_v48, %v19788_v29 }
 0x6d6   : > { %v8505_v26 = vpop.f32.mrf.mxu1  ;;  %9902 = vmatprep.subr.bf16.mxu0 %v15374_v21  ;;  %v8401_v21 = vadd.f32 %v19739_v49, %v19784_v37  ;;  %v8399_v12 = vadd.f32 %v19737_v57, %v19788_v29  ;;  %v15392_v49 = vld [vmem:[%s22270_s16 + $0x4c] ss:$16 sps:$4 sm:$0xff]   ;;  %v8405_v48 = vadd.f32 %v19743_v36, %v19784_v37 }
 0x6d7   : > { %v8506_v31 = vadd.f32 %v8505_v26, %v8393_v20  ;;  %9714 = vmatprep.mubr.bf16.mxu0 %v19833_v18  ;;  %v8803_v8 = vmax.f32 %v8504_v9, 0.0  ;;  %v15390_v9 = vld [vmem:[%s22270_s16 + $0x48] ss:$16 sps:$4 sm:$0xff]   ;;  %v15398_v36 = vld [vmem:[%s22270_s16 + $0x2c] ss:$16 sps:$4 sm:$0xff]  }
 0x6d8   : > { %v8507_v63 = vpop.f32.mrf.mxu1  ;;  %9715 = vmatmul.mubr.bf16.gmra.mxu0 %v19840_v22 }
 0x6d9   : > { %v8508_v60 = vadd.f32 %v8507_v63, %v8395_v19  ;;  %9903 = vmatpush1.bf16.msra.mxu0 %v15372_v39  ;;  %v8806_v7 = vmax.f32 %v8506_v31, 0.0  ;;  %v19877_v39 = vpop.f32.mrf.mxu0 }
 0x6da   : > { %v8511_v53 = vpop.f32.mrf.mxu1  ;;  %9904 = vmatprep.subr.bf16.mxu0 %v15380_v0 }
 0x6db   : > { %v8807_v61 = vmax.f32 %v8508_v60, 0.0  ;;  %v19870_v16 = vpack.c.bf16 %v8806_v7, %v8802_v11  ;;  %v8512_v0 = vadd.f32 %v8511_v53, %v8399_v12  ;;  %v19887_v63 = vpop.f32.mrf.mxu0  ;;  %v15396_v11 = vld [vmem:[%s22270_s16 + $0x28] ss:$16 sps:$4 sm:$0xff]  }
 0x6dc   : > { %v8513_v27 = vpop.f32.mrf.mxu1 }
 0x6dd   : > { %9905 = vmatpush1.bf16.msra.mxu0 %v15378_v15  ;;  %v19863_v45 = vpack.c.bf16 %v8807_v61, %v8803_v8  ;;  %v8514_v5 = vadd.f32 %v8513_v27, %v8401_v21  ;;  %v8810_v7 = vmax.f32 %v8512_v0, 0.0  ;;  %v8413_v8 = vadd.f32 %v19749_v32, %v19788_v29 }
 0x6de   : > { %v8515_v20 = vpop.f32.mrf.mxu1  ;;  %9906 = vmatprep.subr.bf16.mxu0 %v15386_v62  ;;  %v8411_v62 = vadd.f32 %v19747_v24, %v19784_v37  ;;  %v8409_v27 = vadd.f32 %v19745_v25, %v19788_v29  ;;  %v15404_v24 = vld [vmem:[%s22270_s16 + $0xc] ss:$16 sps:$4 sm:$0xff]   ;;  %v8415_v32 = vadd.f32 %v19751_v30, %v19784_v37 }
 0x6df   : > { %v8516_v26 = vadd.f32 %v8515_v20, %v8403_v58  ;;  %9724 = vmatprep.mubr.bf16.mxu0 %v19863_v45  ;;  %v8811_v60 = vmax.f32 %v8514_v5, 0.0  ;;  %v15402_v5 = vld [vmem:[%s22270_s16 + $0x8] ss:$16 sps:$4 sm:$0xff]   ;;  %v15410_v30 = vld [vmem:[%s22270_s16 + $0x1ec] ss:$16 sps:$4 sm:$0xff]  }
 0x6e0   : > { %v8517_v19 = vpop.f32.mrf.mxu1  ;;  %9725 = vmatmul.mubr.bf16.gmra.mxu0 %v19870_v16 }
 0x6e1   : > { %v8518_v57 = vadd.f32 %v8517_v19, %v8405_v48  ;;  %9907 = vmatpush1.bf16.msra.mxu0 %v15384_v17  ;;  %v8814_v31 = vmax.f32 %v8516_v26, 0.0  ;;  %v19907_v17 = vpop.f32.mrf.mxu0 }
 0x6e2   : > { %v8521_v40 = vpop.f32.mrf.mxu1  ;;  %9908 = vmatprep.subr.bf16.mxu0 %v15392_v49 }
 0x6e3   : > { %v8815_v15 = vmax.f32 %v8518_v57, 0.0  ;;  %v19900_v21 = vpack.c.bf16 %v8814_v31, %v8810_v7  ;;  %v8522_v49 = vadd.f32 %v8521_v40, %v8409_v27  ;;  %v19917_v19 = vpop.f32.mrf.mxu0  ;;  %v15408_v7 = vld [vmem:[%s22270_s16 + $0x1e8] ss:$16 sps:$4 sm:$0xff]  }
 0x6e4   : > { %v8523_v53 = vpop.f32.mrf.mxu1 }
 0x6e5   : > { %9909 = vmatpush1.bf16.msra.mxu0 %v15390_v9  ;;  %v19893_v61 = vpack.c.bf16 %v8815_v15, %v8811_v60  ;;  %v8524_v12 = vadd.f32 %v8523_v53, %v8411_v62  ;;  %v8818_v31 = vmax.f32 %v8522_v49, 0.0  ;;  %v8423_v60 = vadd.f32 %v19757_v2, %v19788_v29 }
 0x6e6   : > { %v8525_v58 = vpop.f32.mrf.mxu1  ;;  %9910 = vmatprep.subr.bf16.mxu0 %v15398_v36  ;;  %v8421_v36 = vadd.f32 %v19755_v46, %v19784_v37  ;;  %v8419_v53 = vadd.f32 %v19753_v42, %v19788_v29  ;;  %v15416_v46 = vld [vmem:[%s22270_s16 + $0x1cc] ss:$16 sps:$4 sm:$0xff]   ;;  %v8425_v2 = vadd.f32 %v19759_v56, %v19784_v37 }
 0x6e7   : > { %v8526_v20 = vadd.f32 %v8525_v58, %v8413_v8  ;;  %9734 = vmatprep.mubr.bf16.mxu0 %v19893_v61  ;;  %v8819_v57 = vmax.f32 %v8524_v12, 0.0  ;;  %v15414_v12 = vld [vmem:[%s22270_s16 + $0x1c8] ss:$16 sps:$4 sm:$0xff]   ;;  %v15422_v56 = vld [vmem:[%s22270_s16 + $0x1ac] ss:$16 sps:$4 sm:$0xff]  }
 0x6e8   : > { %v8527_v48 = vpop.f32.mrf.mxu1  ;;  %9735 = vmatmul.mubr.bf16.gmra.mxu0 %v19900_v21 }
 0x6e9   : > { %v8528_v25 = vadd.f32 %v8527_v48, %v8415_v32  ;;  %9911 = vmatpush1.bf16.msra.mxu0 %v15396_v11  ;;  %v8822_v26 = vmax.f32 %v8526_v20, 0.0  ;;  %v19937_v11 = vpop.f32.mrf.mxu0 }
 0x6ea   : > { %v8531_v0 = vpop.f32.mrf.mxu1  ;;  %9912 = vmatprep.subr.bf16.mxu0 %v15404_v24 }
 0x6eb   : > { %v8823_v9 = vmax.f32 %v8528_v25, 0.0  ;;  %v19930_v62 = vpack.c.bf16 %v8822_v26, %v8818_v31  ;;  %v8532_v24 = vadd.f32 %v8531_v0, %v8419_v53  ;;  %v19947_v48 = vpop.f32.mrf.mxu0  ;;  %v15420_v31 = vld [vmem:[%s22270_s16 + $0x1a8] ss:$16 sps:$4 sm:$0xff]  }
 0x6ec   : > { %v8533_v40 = vpop.f32.mrf.mxu1 }
 0x6ed   : > { %9913 = vmatpush1.bf16.msra.mxu0 %v15402_v5  ;;  %v19923_v15 = vpack.c.bf16 %v8823_v9, %v8819_v57  ;;  %v8534_v27 = vadd.f32 %v8533_v40, %v8421_v36  ;;  %v8826_v26 = vmax.f32 %v8532_v24, 0.0  ;;  %v8433_v57 = vadd.f32 %v19765_v55, %v19788_v29 }
 0x6ee   : > { %v8535_v8 = vpop.f32.mrf.mxu1  ;;  %9914 = vmatprep.subr.bf16.mxu0 %v15410_v30  ;;  %v8431_v30 = vadd.f32 %v19763_v13, %v19784_v37  ;;  %v8429_v40 = vadd.f32 %v19761_v1, %v19788_v29  ;;  %v15428_v13 = vld [vmem:[%s22270_s16 + $0x18c] ss:$16 sps:$4 sm:$0xff]   ;;  %v8435_v55 = vadd.f32 %v19767_v54, %v19784_v37 }
 0x6ef   : > { %v8536_v58 = vadd.f32 %v8535_v8, %v8423_v60  ;;  %9744 = vmatprep.mubr.bf16.mxu0 %v19923_v15  ;;  %v8827_v25 = vmax.f32 %v8534_v27, 0.0  ;;  %v15426_v27 = vld [vmem:[%s22270_s16 + $0x188] ss:$16 sps:$4 sm:$0xff]   ;;  %v15434_v54 = vld [vmem:[%s22270_s16 + $0x16c] ss:$16 sps:$4 sm:$0xff]  }
 0x6f0   : > { %v8537_v32 = vpop.f32.mrf.mxu1  ;;  %9745 = vmatmul.mubr.bf16.gmra.mxu0 %v19930_v62 }
 0x6f1   : > { %v8538_v42 = vadd.f32 %v8537_v32, %v8425_v2  ;;  %9915 = vmatpush2.bf16.msra.mxu0 %v15408_v7  ;;  %v8830_v20 = vmax.f32 %v8536_v58, 0.0  ;;  %v19967_v7 = vpop.f32.mrf.mxu0 }
 0x6f2   : > { %v8541_v49 = vpop.f32.mrf.mxu1  ;;  %9916 = vmatprep.subr.bf16.mxu0 %v15416_v46 }
 0x6f3   : > { %v8831_v5 = vmax.f32 %v8538_v42, 0.0  ;;  %v19960_v36 = vpack.c.bf16 %v8830_v20, %v8826_v26  ;;  %v8542_v46 = vadd.f32 %v8541_v49, %v8429_v40  ;;  %v19977_v32 = vpop.f32.mrf.mxu0  ;;  %v15432_v26 = vld [vmem:[%s22270_s16 + $0x168] ss:$16 sps:$4 sm:$0xff]  }
 0x6f4   : > { %v8543_v0 = vpop.f32.mrf.mxu1 }
 0x6f5   : > { %9917 = vmatpush2.bf16.msra.mxu0 %v15414_v12  ;;  %v19953_v9 = vpack.c.bf16 %v8831_v5, %v8827_v25  ;;  %v8544_v53 = vadd.f32 %v8543_v0, %v8431_v30  ;;  %v8834_v20 = vmax.f32 %v8542_v46, 0.0  ;;  %v8443_v25 = vadd.f32 %v19773_v51, %v19788_v29  ;;  %v15446_v46 = vld [vmem:[%s22270_s16 + $0x12c] ss:$16 sps:$4 sm:$0xff]  }
 0x6f6   : > { %v8545_v60 = vpop.f32.mrf.mxu1  ;;  %9918 = vmatprep.subr.bf16.mxu0 %v15422_v56  ;;  %v8441_v56 = vadd.f32 %v19771_v43, %v19784_v37  ;;  %v8439_v0 = vadd.f32 %v19769_v3, %v19788_v29  ;;  %v15440_v43 = vld [vmem:[%s22270_s16 + $0x14c] ss:$16 sps:$4 sm:$0xff]   ;;  %v8445_v51 = vadd.f32 %v19780_v34, %v19784_v37  ;;  %v20003_v3 = vrot.slane %v19778_v59, %v22370_v28  ;;  %v15438_v34 = vld [vmem:[%s22270_s16 + $0x148] ss:$16 sps:$4 sm:$0xff]  }
 0x6f7   : > { %v8546_v8 = vadd.f32 %v8545_v60, %v8433_v57  ;;  %9754 = vmatprep.mubr.bf16.mxu0 %v19953_v9  ;;  %v8835_v42 = vmax.f32 %v8544_v53, 0.0  ;;  %v20010_v37 = vrot.slane %v19778_v59, %v22371_v52 }
 0x6f8   : > { %v8547_v2 = vpop.f32.mrf.mxu1  ;;  %9755 = vmatmul.mubr.bf16.gmra.mxu0 %v19960_v36 }
 0x6f9   : > { %v8548_v1 = vadd.f32 %v8547_v2, %v8435_v55  ;;  %9919 = vmatpush2.bf16.msra.mxu0 %v15420_v31  ;;  %v8838_v58 = vmax.f32 %v8546_v8, 0.0  ;;  %v19997_v31 = vpop.f32.mrf.mxu0  ;;  %v8599_v59 = vadd.f32 %v19798_v4, %v20010_v37  ;;  %v8601_v4 = vadd.f32 %v19800_v38, %v20003_v3 }
 0x6fa   : > { %v8551_v24 = vpop.f32.mrf.mxu1  ;;  %9920 = vmatprep.subr.bf16.mxu0 %v15428_v13 }
 0x6fb   : > { %v8839_v12 = vmax.f32 %v8548_v1, 0.0  ;;  %v19990_v30 = vpack.c.bf16 %v8838_v58, %v8834_v20  ;;  %v8552_v13 = vadd.f32 %v8551_v24, %v8439_v0  ;;  %v20015_v2 = vpop.f32.mrf.mxu0  ;;  %v8595_v20 = vadd.f32 %v19790_v41, %v20010_v37 }
 0x6fc   : > { %v8553_v49 = vpop.f32.mrf.mxu1 }
 0x6fd   : > { %9921 = vmatpush2.bf16.msra.mxu0 %v15426_v27  ;;  %v19983_v5 = vpack.c.bf16 %v8839_v12, %v8835_v42  ;;  %v8554_v40 = vadd.f32 %v8553_v49, %v8441_v56  ;;  %v8842_v58 = vmax.f32 %v8552_v13, 0.0  ;;  %v15444_v12 = vld [vmem:[%s22270_s16 + $0x128] ss:$16 sps:$4 sm:$0xff]  }
 0x6fe   : > { %v8555_v57 = vpop.f32.mrf.mxu1  ;;  %9922 = vmatprep.subr.bf16.mxu0 %v15434_v54  ;;  %v8597_v54 = vadd.f32 %v19792_v14, %v20003_v3  ;;  %v15452_v14 = vld [vmem:[%s22270_s16 + $0x10c] ss:$16 sps:$4 sm:$0xff]  }
 0x6ff   : > { %v8556_v60 = vadd.f32 %v8555_v57, %v8443_v25  ;;  %9764 = vmatprep.mubr.bf16.mxu0 %v19983_v5  ;;  %v8843_v1 = vmax.f32 %v8554_v40, 0.0  ;;  %v20035_v25 = vpop.f32.mrf.mxu0 }
 0x700   : > { %v8557_v55 = vpop.f32.mrf.mxu1  ;;  %9765 = vmatmul.mubr.bf16.gmra.mxu0 %v19990_v30 }
 0x701   : > { %v8558_v29 = vadd.f32 %v8557_v55, %v8445_v51  ;;  %9923 = vmatpush2.bf16.msra.mxu0 %v15432_v26  ;;  %v8846_v53 = vmax.f32 %v8556_v60, 0.0  ;;  %v15450_v51 = vld [vmem:[%s22270_s16 + $0x108] ss:$16 sps:$4 sm:$0xff]   ;;  %v20043_v60 = vpop.f32.mrf.mxu0 }
 0x702   : > { %v8707_v8 = vpop.f32.mrf.mxu1  ;;  %9924 = vmatprep.subr.bf16.mxu0 %v15440_v43 }
 0x703   : > { %v8847_v27 = vmax.f32 %v8558_v29, 0.0  ;;  %v20028_v49 = vpack.c.bf16 %v8846_v53, %v8842_v58  ;;  %v8708_v57 = vadd.f32 %v8707_v8, %v8595_v20  ;;  %v8607_v53 = vadd.f32 %v19827_v6, %v20003_v3  ;;  %v15458_v6 = vld [vmem:[%s22270_s16 + $0x2cc] ss:$16 sps:$4 sm:$0xff]  }
 0x704   : > { %v8709_v24 = vpop.f32.mrf.mxu1  ;;  %v8609_v8 = vadd.f32 %v19847_v35, %v20010_v37  ;;  %v8611_v35 = vadd.f32 %v19857_v50, %v20003_v3  ;;  %v15456_v50 = vld [vmem:[%s22270_s16 + $0x2c8] ss:$16 sps:$4 sm:$0xff]  }
 0x705   : > { %9925 = vmatpush2.bf16.msra.mxu0 %v15438_v34  ;;  %v20021_v42 = vpack.c.bf16 %v8847_v27, %v8843_v1  ;;  %v8710_v26 = vadd.f32 %v8709_v24, %v8597_v54  ;;  %v8788_v29 = vmax.f32 %v8708_v57, 0.0  ;;  %v8605_v1 = vadd.f32 %v19817_v47, %v20010_v37  ;;  %v20063_v24 = vpop.f32.mrf.mxu0 }
 0x706   : > { %v8711_v56 = vpop.f32.mrf.mxu1  ;;  %9926 = vmatprep.subr.bf16.mxu0 %v15446_v46  ;;  %v15453_v46 = vld [vmem:[%s22270_s16 + $0x2e8] ss:$16 sps:$4 sm:$0xff]  }
 0x707   : > { %v8712_v0 = vadd.f32 %v8711_v56, %v8599_v59  ;;  %9774 = vmatprep.mubr.bf16.mxu0 %v20021_v42  ;;  %v8789_v13 = vmax.f32 %v8710_v26, 0.0  ;;  %v20075_v26 = vpop.f32.mrf.mxu0 }
 0x708   : > { %v8713_v43 = vpop.f32.mrf.mxu1  ;;  %9775 = vmatmul.mubr.bf16.gmra.mxu0 %v20028_v49 }
 0x709   : > { %v8714_v41 = vadd.f32 %v8713_v43, %v8601_v4  ;;  %9927 = vmatpush2.bf16.msra.mxu0 %v15444_v12  ;;  %9930 = vmatprep.mubr.bf16.mxu0 %v19804_v33  ;;  %v8792_v40 = vmax.f32 %v8712_v0, 0.0  ;;  %v15461_v4 = vld [vmem:[%s22270_s16 + $0x2ac] ss:$16 sps:$4 sm:$0xff]  }
 0x70a   : > { %v8717_v38 = vpop.f32.mrf.mxu1  ;;  %9928 = vmatprep.subr.bf16.mxu0 %v15452_v14 }
 0x70b   : > { %v8793_v55 = vmax.f32 %v8714_v41, 0.0  ;;  %v20056_v27 = vpack.c.bf16 %v8792_v40, %v8788_v29  ;;  %v8718_v12 = vadd.f32 %v8717_v38, %v8605_v1  ;;  %v8619_v41 = vadd.f32 %v19907_v17, %v20010_v37  ;;  %v15459_v40 = vld [vmem:[%s22270_s16 + $0x2a8] ss:$16 sps:$4 sm:$0xff]   ;;  %v20095_v29 = vpop.f32.mrf.mxu0 }
 0x70c   : > { %v8719_v34 = vpop.f32.mrf.mxu1  ;;  %v8615_v38 = vadd.f32 %v19877_v39, %v20010_v37  ;;  %v8621_v17 = vadd.f32 %v19917_v19, %v20003_v3  ;;  %v15462_v19 = vld [vmem:[%s22270_s16 + $0x288] ss:$16 sps:$4 sm:$0xff]  }
 0x70d   : > { %9929 = vmatpush2.bf16.msra.mxu0 %v15450_v51  ;;  %v20049_v33 = vpack.c.bf16 %v8793_v55, %v8789_v13  ;;  %v8720_v54 = vadd.f32 %v8719_v34, %v8607_v53 }
 0x70e   : > { %v8721_v58 = vpop.f32.mrf.mxu1 }
 0x70f   : > { %v8722_v59 = vadd.f32 %v8721_v58, %v8609_v8  ;;  %9817 = vmatprep.mubr.bf16.mxu1 %v20049_v33  ;;  %v8797_v0 = vmax.f32 %v8720_v54, 0.0 }
 0x710   : > { %v8723_v20 = vpop.f32.mrf.mxu1  ;;  %9818 = vmatmul.mubr.bf16.vlgmr.msra.gmra.mxu1 %v20056_v27  ;;  %9931 = vmatmul.mubr.bf16.vlgmr.msra.gmra.mxu0 %v19811_v10  ;;  %v8796_v10 = vmax.f32 %v8718_v12, 0.0 }
 0x711   : > { %v8724_v47 = vadd.f32 %v8723_v20, %v8611_v35  ;;  %10012 = vmatpush1.bf16.msra.mxu1 %v15453_v46  ;;  %9940 = vmatprep.mubr.bf16.mxu0 %v19833_v18  ;;  %v8800_v56 = vmax.f32 %v8722_v59, 0.0  ;;  %v8617_v18 = vadd.f32 %v19887_v63, %v20003_v3  ;;  %v15464_v63 = vld [vmem:[%s22270_s16 + $0x28c] ss:$16 sps:$4 sm:$0xff]   ;;  %v20107_v35 = vpop.f32.mrf.mxu0  ;;  %v8629_v20 = vadd.f32 %v19967_v7, %v20010_v37 }
 0x712   : > { %v8727_v14 = vpop.f32.mrf.mxu1  ;;  %10013 = vmatprep.subr.bf16.mxu1 %v15458_v6  ;;  %v15467_v6 = vld [vmem:[%s22270_s16 + $0x26c] ss:$16 sps:$4 sm:$0xff]  }
 0x713   : > { %v8801_v57 = vmax.f32 %v8724_v47, 0.0  ;;  %v20088_v13 = vpack.c.bf16 %v8800_v56, %v8796_v10  ;;  %v8728_v8 = vadd.f32 %v8727_v14, %v8615_v38  ;;  %v10276_v56 = vld [vmem:[%s22272_s18 + $0x1c0] sm:$0xff]  ;;  %v8631_v10 = vadd.f32 %v19977_v32, %v20003_v3  ;;  %v15468_v32 = vld [vmem:[%s22270_s16 + $0x248] ss:$16 sps:$4 sm:$0xff]  }
 0x714   : > { %v8729_v43 = vpop.f32.mrf.mxu1  ;;  %v10280_v14 = vld [vmem:[%s22272_s18 + $0x1e0] sm:$0xff] }
 0x715   : > { %10014 = vmatpush1.bf16.msra.mxu1 %v15456_v50  ;;  %v20081_v51 = vpack.c.bf16 %v8801_v57, %v8797_v0  ;;  %v8730_v34 = vadd.f32 %v8729_v43, %v8617_v18  ;;  %v15465_v50 = vld [vmem:[%s22270_s16 + $0x268] ss:$16 sps:$4 sm:$0xff]   ;;  %v15470_v0 = vld [vmem:[%s22270_s16 + $0x24c] ss:$16 sps:$4 sm:$0xff]   ;;  %v13884_v57 = vcombine.high %v10276_v56, %v10280_v14  ;;  %v20133_v43 = vpop.f32.mrf.mxu0 }
 0x716   : > { %v8731_v55 = vpop.f32.mrf.mxu1  ;;  %10015 = vmatprep.subr.bf16.mxu1 %v15461_v4 }
 0x717   : > { %v8732_v53 = vadd.f32 %v8731_v55, %v8619_v41  ;;  %9827 = vmatprep.mubr.bf16.mxu1 %v20081_v51  ;;  %v8805_v54 = vmax.f32 %v8730_v34, 0.0  ;;  %11798 = vmatprep.subr.bf16.mxu0 %v13884_v57 }
 0x718   : > { %v8733_v46 = vpop.f32.mrf.mxu1  ;;  %9828 = vmatmul.mubr.bf16.gmra.mxu1 %v20088_v13  ;;  %9941 = vmatmul.mubr.bf16.gmra.mxu0 %v19840_v22  ;;  %v8804_v22 = vmax.f32 %v8728_v8, 0.0  ;;  %v20151_v8 = vpop.f32.mrf.mxu0 }
 0x719   : > { %v8734_v39 = vadd.f32 %v8733_v46, %v8621_v17  ;;  %10016 = vmatpush1.bf16.msra.mxu1 %v15459_v40  ;;  %9950 = vmatprep.mubr.bf16.mxu0 %v19863_v45  ;;  %v8808_v1 = vmax.f32 %v8732_v53, 0.0  ;;  %v8627_v45 = vadd.f32 %v19947_v48, %v20003_v3  ;;  %v8625_v48 = vadd.f32 %v19937_v11, %v20010_v37  ;;  %v10272_v17 = vld [vmem:[%s22272_s18 + $0x1a0] sm:$0xff] }
 0x71a   : > { %v8737_v58 = vpop.f32.mrf.mxu1  ;;  %10017 = vmatprep.subr.bf16.mxu1 %v15464_v63  ;;  %v13883_v40 = vcombine.low %v10276_v56, %v10280_v14  ;;  %v10268_v63 = vld [vmem:[%s22272_s18 + $0x180] sm:$0xff]  ;;  %v15476_v56 = vld [vmem:[%s22270_s16 + $0x20c] ss:$16 sps:$4 sm:$0xff]  }
 0x71b   : > { %v8809_v59 = vmax.f32 %v8734_v39, 0.0  ;;  %v20126_v4 = vpack.c.bf16 %v8808_v1, %v8804_v22  ;;  %v8738_v11 = vadd.f32 %v8737_v58, %v8625_v48  ;;  %v15471_v22 = vld [vmem:[%s22270_s16 + $0x228] ss:$16 sps:$4 sm:$0xff]   ;;  %v20177_v48 = vpop.f32.mrf.mxu0 }
 0x71c   : > { %v8739_v12 = vpop.f32.mrf.mxu1  ;;  %11799 = vmatpush1.bf16.msra.mxu0 %v13883_v40  ;;  %v10256_v40 = vld [vmem:[%s22272_s18 + $0x120] sm:$0xff] }
 0x71d   : > { %10018 = vmatpush1.bf16.msra.mxu1 %v15462_v19  ;;  %v20113_v47 = vpack.c.bf16 %v8809_v59, %v8805_v54  ;;  %v8740_v18 = vadd.f32 %v8739_v12, %v8627_v45  ;;  %v13875_v19 = vcombine.low %v10268_v63, %v10272_v17  ;;  %v8812_v1 = vmax.f32 %v8738_v11, 0.0  ;;  %v10260_v12 = vld [vmem:[%s22272_s18 + $0x140] sm:$0xff] }
 0x71e   : > { %v8741_v7 = vpop.f32.mrf.mxu1  ;;  %10019 = vmatprep.subr.bf16.mxu1 %v15467_v6  ;;  %v8637_v6 = vadd.f32 %v20015_v2, %v20003_v3  ;;  %v8639_v54 = vadd.f32 %v20035_v25, %v20010_v37  ;;  %v10264_v45 = vld [vmem:[%s22272_s18 + $0x160] sm:$0xff]  ;;  %v8635_v2 = vadd.f32 %v19997_v31, %v20010_v37  ;;  %v8641_v25 = vadd.f32 %v20043_v60, %v20003_v3 }
 0x71f   : > { %v8742_v41 = vadd.f32 %v8741_v7, %v8629_v20  ;;  %9837 = vmatprep.mubr.bf16.mxu1 %v20113_v47  ;;  %v8813_v46 = vmax.f32 %v8740_v18, 0.0  ;;  %v13868_v14 = vcombine.high %v10260_v12, %v10264_v45  ;;  %v13867_v31 = vcombine.low %v10260_v12, %v10264_v45  ;;  %v15474_v18 = vld [vmem:[%s22270_s16 + $0x208] ss:$16 sps:$4 sm:$0xff]  }
 0x720   : > { %v8743_v38 = vpop.f32.mrf.mxu1  ;;  %9838 = vmatmul.mubr.bf16.gmra.mxu1 %v20126_v4  ;;  %9951 = vmatmul.mubr.bf16.gmra.mxu0 %v19870_v16  ;;  %v15473_v16 = vld [vmem:[%s22270_s16 + $0x22c] ss:$16 sps:$4 sm:$0xff]  }
 0x721   : > { %v8744_v55 = vadd.f32 %v8743_v38, %v8631_v10  ;;  %10020 = vmatpush1.bf16.msra.mxu1 %v15465_v50  ;;  %9960 = vmatprep.mubr.bf16.mxu0 %v19893_v61  ;;  %v8816_v34 = vmax.f32 %v8742_v41, 0.0  ;;  %v13876_v61 = vcombine.high %v10268_v63, %v10272_v17  ;;  %v10252_v41 = vld [vmem:[%s22272_s18 + $0x100] sm:$0xff] }
 0x722   : > { %v8747_v53 = vpop.f32.mrf.mxu1  ;;  %10021 = vmatprep.subr.bf16.mxu1 %v15470_v0  ;;  %v13859_v17 = vcombine.low %v10252_v41, %v10256_v40 }
 0x723   : > { %v8817_v39 = vmax.f32 %v8744_v55, 0.0  ;;  %11800 = vmatprep.subr.bf16.mxu0 %v13876_v61  ;;  %v20172_v20 = vpack.c.bf16 %v8816_v34, %v8812_v1  ;;  %v8748_v57 = vadd.f32 %v8747_v53, %v8635_v2  ;;  %v8660_v55 = vpop.f32.mrf.mxu0  ;;  %v8649_v61 = vadd.f32 %v20095_v29, %v20010_v37  ;;  %v10248_v1 = vld [vmem:[%s22272_s18 + $0xe0] sm:$0xff] }
 0x724   : > { %v8749_v58 = vpop.f32.mrf.mxu1  ;;  %11801 = vmatpush1.bf16.msra.mxu0 %v13875_v19  ;;  %v10244_v19 = vld [vmem:[%s22272_s18 + $0xc0] sm:$0xff]  ;;  %v8651_v29 = vadd.f32 %v20107_v35, %v20003_v3 }
 0x725   : > { %10022 = vmatpush1.bf16.msra.mxu1 %v15468_v32  ;;  %v20157_v59 = vpack.c.bf16 %v8817_v39, %v8813_v46  ;;  %v8750_v7 = vadd.f32 %v8749_v58, %v8637_v6  ;;  %11802 = vmatprep.subr.bf16.mxu0 %v13868_v14  ;;  %v8820_v34 = vmax.f32 %v8748_v57, 0.0  ;;  %v15477_v39 = vld [vmem:[%s22270_s16 + $0x3e8] ss:$16 sps:$4 sm:$0xff]   ;;  %v20219_v12 = vpop.f32.mrf.mxu0  ;;  %v10236_v14 = vld [vmem:[%s22272_s18 + $0x80] sm:$0xff] }
 0x726   : > { %v8751_v50 = vpop.f32.mrf.mxu1  ;;  %10023 = vmatprep.subr.bf16.mxu1 %v15473_v16  ;;  %v8647_v16 = vadd.f32 %v20075_v26, %v20003_v3  ;;  %v8645_v26 = vadd.f32 %v20063_v24, %v20010_v37  ;;  %v13851_v24 = vcombine.low %v10244_v19, %v10248_v1 }
 0x727   : > { %v8752_v0 = vadd.f32 %v8751_v50, %v8639_v54  ;;  %9847 = vmatprep.mubr.bf16.mxu1 %v20157_v59  ;;  %v8821_v32 = vmax.f32 %v8750_v7, 0.0  ;;  %v15482_v54 = vld [vmem:[%s22270_s16 + $0x3cc] ss:$16 sps:$4 sm:$0xff]   ;;  %v10240_v7 = vld [vmem:[%s22272_s18 + $0xa0] sm:$0xff]  ;;  %v8666_v57 = vpop.f32.mrf.mxu0 }
 0x728   : > { %v8753_v10 = vpop.f32.mrf.mxu1  ;;  %9848 = vmatmul.mubr.bf16.gmra.mxu1 %v20172_v20  ;;  %9961 = vmatmul.mubr.bf16.gmra.mxu0 %v19900_v21  ;;  %v15479_v21 = vld [vmem:[%s22270_s16 + $0x3ec] ss:$16 sps:$4 sm:$0xff]  }
 0x729   : > { %v8754_v60 = vadd.f32 %v8753_v10, %v8641_v25  ;;  %10024 = vmatpush1.bf16.msra.mxu1 %v15471_v22  ;;  %9970 = vmatprep.mubr.bf16.mxu0 %v19923_v15  ;;  %v8824_v11 = vmax.f32 %v8752_v0, 0.0  ;;  %v13860_v15 = vcombine.high %v10252_v41, %v10256_v40  ;;  %v13852_v22 = vcombine.high %v10244_v19, %v10248_v1 }
 0x72a   : > { %v8757_v38 = vpop.f32.mrf.mxu1  ;;  %10025 = vmatprep.subr.bf16.mxu1 %v15476_v56  ;;  %11803 = vmatpush1.bf16.msra.mxu0 %v13867_v31  ;;  %v15480_v56 = vld [vmem:[%s22270_s16 + $0x3c8] ss:$16 sps:$4 sm:$0xff]  }
 0x72b   : > { %v8825_v63 = vmax.f32 %v8754_v60, 0.0  ;;  %11804 = vmatprep.subr.bf16.mxu0 %v13860_v15  ;;  %v20214_v58 = vpack.c.bf16 %v8824_v11, %v8820_v34  ;;  %v8758_v25 = vadd.f32 %v8757_v38, %v8645_v26  ;;  %v8657_v11 = vadd.f32 %v20151_v8, %v20003_v3  ;;  %v15483_v15 = vld [vmem:[%s22270_s16 + $0x3a8] ss:$16 sps:$4 sm:$0xff]  }
 0x72c   : > { %v8759_v53 = vpop.f32.mrf.mxu1  ;;  %v8659_v38 = vadd.f32 %v20177_v48, %v20010_v37  ;;  %v8655_v8 = vadd.f32 %v20133_v43, %v20010_v37  ;;  %v8661_v48 = vadd.f32 %v8660_v55, %v20003_v3 }
 0x72d   : > { %10026 = vmatpush1.bf16.msra.mxu1 %v15474_v18  ;;  %v20199_v46 = vpack.c.bf16 %v8825_v63, %v8821_v32  ;;  %v8760_v45 = vadd.f32 %v8759_v53, %v8647_v16  ;;  %v13843_v18 = vcombine.low %v10236_v14, %v10240_v7  ;;  %v8828_v41 = vmax.f32 %v8758_v25, 0.0  ;;  %v10228_v32 = vld [vmem:[%s22272_s18 + $0x40] sm:$0xff]  ;;  %v15488_v53 = vld [vmem:[%s22270_s16 + $0x38c] ss:$16 sps:$4 sm:$0xff]  }
 0x72e   : > { %v8761_v6 = vpop.f32.mrf.mxu1  ;;  %10027 = vmatprep.subr.bf16.mxu1 %v15479_v21  ;;  %11805 = vmatpush1.bf16.msra.mxu0 %v13859_v17  ;;  %v10232_v63 = vld [vmem:[%s22272_s18 + $0x60] sm:$0xff] }
 0x72f   : > { %v8762_v2 = vadd.f32 %v8761_v6, %v8649_v61  ;;  %9857 = vmatprep.mubr.bf16.mxu1 %v20199_v46  ;;  %11806 = vmatprep.subr.bf16.mxu0 %v13852_v22  ;;  %v8829_v10 = vmax.f32 %v8760_v45, 0.0  ;;  %v13836_v16 = vcombine.high %v10228_v32, %v10232_v63  ;;  %v8668_v61 = vpop.f32.mrf.mxu0  ;;  %v13835_v1 = vcombine.low %v10228_v32, %v10232_v63  ;;  %v10220_v6 = vld [vmem:[%s22272_s18] sm:$0xff] }
 0x730   : > { %v8763_v50 = vpop.f32.mrf.mxu1  ;;  %9858 = vmatmul.mubr.bf16.gmra.mxu1 %v20214_v58  ;;  %9971 = vmatmul.mubr.bf16.gmra.mxu0 %v19930_v62  ;;  %v15485_v62 = vld [vmem:[%s22270_s16 + $0x3ac] ss:$16 sps:$4 sm:$0xff]  }
 0x731   : > { %v8764_v35 = vadd.f32 %v8763_v50, %v8651_v29  ;;  %10028 = vmatpush2.bf16.msra.mxu1 %v15477_v39  ;;  %9980 = vmatprep.mubr.bf16.mxu0 %v19953_v9  ;;  %v8832_v0 = vmax.f32 %v8762_v2, 0.0  ;;  %v13844_v9 = vcombine.high %v10236_v14, %v10240_v7  ;;  %v15486_v29 = vld [vmem:[%s22270_s16 + $0x388] ss:$16 sps:$4 sm:$0xff]   ;;  %v8670_v2 = vpop.f32.mrf.mxu0  ;;  %v8667_v14 = vadd.f32 %v8666_v57, %v20003_v3 }
 0x732   : > { %v8767_v31 = vpop.f32.mrf.mxu1  ;;  %10029 = vmatprep.subr.bf16.mxu1 %v15482_v54  ;;  %11807 = vmatpush1.bf16.msra.mxu0 %v13851_v24  ;;  %v10224_v54 = vld [vmem:[%s22272_s18 + $0x20] sm:$0xff]  ;;  %v8669_v7 = vadd.f32 %v8668_v61, %v20010_v37  ;;  %v8665_v57 = vadd.f32 %v20219_v12, %v20010_v37  ;;  %v15492_v37 = vld [vmem:[%s22270_s16 + $0x348] ss:$16 sps:$4 sm:$0xff]  }
 0x733   : > { %v8833_v60 = vmax.f32 %v8764_v35, 0.0  ;;  %11808 = vmatprep.subr.bf16.mxu0 %v13844_v9  ;;  %v20255_v17 = vpack.c.bf16 %v8832_v0, %v8828_v41  ;;  %v8768_v26 = vadd.f32 %v8767_v31, %v8655_v8  ;;  %v13827_v50 = vcombine.low %v10220_v6, %v10224_v54  ;;  %v15489_v31 = vld [vmem:[%s22270_s16 + $0x368] ss:$16 sps:$4 sm:$0xff]   ;;  %v10344_v9 = vld [vmem:[%s22272_s18 + $0x3e0] sm:$0xff]  ;;  %v15494_v41 = vld [vmem:[%s22270_s16 + $0x34c] ss:$16 sps:$4 sm:$0xff]  }
 0x734   : > { %v8769_v40 = vpop.f32.mrf.mxu1  ;;  %v10332_v12 = vld [vmem:[%s22272_s18 + $0x380] sm:$0xff] }
 0x735   : > { %10030 = vmatpush2.bf16.msra.mxu1 %v15480_v56  ;;  %v20241_v21 = vpack.c.bf16 %v8833_v60, %v8829_v10  ;;  %v8770_v39 = vadd.f32 %v8769_v40, %v8657_v11  ;;  %v8836_v35 = vmax.f32 %v8768_v26, 0.0  ;;  %v8671_v10 = vadd.f32 %v8670_v2, %v20003_v3  ;;  %v10336_v8 = vld [vmem:[%s22272_s18 + $0x3a0] sm:$0xff] }
 0x736   : > { %v8771_v34 = vpop.f32.mrf.mxu1  ;;  %10031 = vmatprep.subr.bf16.mxu1 %v15485_v62  ;;  %11809 = vmatpush1.bf16.msra.mxu0 %v13843_v18  ;;  %v10340_v62 = vld [vmem:[%s22272_s18 + $0x3c0] sm:$0xff] }
 0x737   : > { %v8772_v19 = vadd.f32 %v8771_v34, %v8659_v38  ;;  %9867 = vmatprep.mubr.bf16.mxu1 %v20241_v21  ;;  %11810 = vmatprep.subr.bf16.mxu0 %v13836_v16  ;;  %v8837_v24 = vmax.f32 %v8770_v39, 0.0  ;;  %v13948_v40 = vcombine.high %v10340_v62, %v10344_v9  ;;  %v13939_v16 = vcombine.low %v10332_v12, %v10336_v8  ;;  %v10328_v26 = vld [vmem:[%s22272_s18 + $0x360] sm:$0xff] }
 0x738   : > { %v8773_v43 = vpop.f32.mrf.mxu1  ;;  %9868 = vmatmul.mubr.bf16.gmra.mxu1 %v20255_v17  ;;  %9981 = vmatmul.mubr.bf16.gmra.mxu0 %v19960_v36  ;;  %v15491_v36 = vld [vmem:[%s22270_s16 + $0x36c] ss:$16 sps:$4 sm:$0xff]  }
 0x739   : > { %v8774_v55 = vadd.f32 %v8773_v43, %v8661_v48  ;;  %10032 = vmatpush2.bf16.msra.mxu1 %v15483_v15  ;;  %9990 = vmatprep.mubr.bf16.mxu0 %v19983_v5  ;;  %v8840_v22 = vmax.f32 %v8772_v19, 0.0  ;;  %v13828_v5 = vcombine.high %v10220_v6, %v10224_v54  ;;  %v13947_v15 = vcombine.low %v10340_v62, %v10344_v9  ;;  %v15495_v19 = vld [vmem:[%s22270_s16 + $0x328] ss:$16 sps:$4 sm:$0xff]   ;;  %v10288_v62 = vld [vmem:[%s22272_s18 + $0x220] sm:$0xff] }
 0x73a   : > { %v8777_v45 = vpop.f32.mrf.mxu1  ;;  %10033 = vmatprep.subr.bf16.mxu1 %v15488_v53  ;;  %11811 = vmatpush1.bf16.msra.mxu0 %v13835_v1  ;;  %v10324_v1 = vld [vmem:[%s22272_s18 + $0x340] sm:$0xff]  ;;  %v15498_v54 = vld [vmem:[%s22270_s16 + $0x308] ss:$16 sps:$4 sm:$0xff]  }
 0x73b   : > { %v8841_v25 = vmax.f32 %v8774_v55, 0.0  ;;  %11812 = vmatprep.subr.bf16.mxu0 %v13828_v5  ;;  %v20292_v60 = vpack.c.bf16 %v8840_v22, %v8836_v35  ;;  %v8778_v32 = vadd.f32 %v8777_v45, %v8665_v57  ;;  %v15500_v55 = vld [vmem:[%s22270_s16 + $0x30c] ss:$16 sps:$4 sm:$0xff]   ;;  %v13931_v6 = vcombine.low %v10324_v1, %v10328_v26  ;;  %v10316_v22 = vld [vmem:[%s22272_s18 + $0x300] sm:$0xff] }
 0x73c   : > { %v8779_v56 = vpop.f32.mrf.mxu1  ;;  %v10320_v45 = vld [vmem:[%s22272_s18 + $0x320] sm:$0xff] }
 0x73d   : > { %10034 = vmatpush2.bf16.msra.mxu1 %v15486_v29  ;;  %v20278_v0 = vpack.c.bf16 %v8841_v25, %v8837_v24  ;;  %v8780_v11 = vadd.f32 %v8779_v56, %v8667_v14  ;;  %v8844_v61 = vmax.f32 %v8778_v32, 0.0  ;;  %v13932_v29 = vcombine.high %v10324_v1, %v10328_v26  ;;  %v10312_v5 = vld [vmem:[%s22272_s18 + $0x2e0] sm:$0xff] }
 0x73e   : > { %v8781_v18 = vpop.f32.mrf.mxu1  ;;  %10035 = vmatprep.subr.bf16.mxu1 %v15491_v36  ;;  %11813 = vmatpush1.bf16.msra.mxu0 %v13827_v50  ;;  %v13924_v36 = vcombine.high %v10316_v22, %v10320_v45  ;;  %v10300_v25 = vld [vmem:[%s22272_s18 + $0x280] sm:$0xff] }
 0x73f   : > { %v8782_v38 = vadd.f32 %v8781_v18, %v8669_v7  ;;  %9877 = vmatprep.mubr.bf16.mxu1 %v20278_v0  ;;  %11814 = vmatprep.subr.bf16.mxu0 %v13948_v40  ;;  %v8845_v34 = vmax.f32 %v8780_v11, 0.0  ;;  %v10304_v50 = vld [vmem:[%s22272_s18 + $0x2a0] sm:$0xff] }
 0x740   : > { %v8783_v63 = vpop.f32.mrf.mxu1  ;;  %9878 = vmatmul.mubr.bf16.gmra.mxu1 %v20292_v60  ;;  %9991 = vmatmul.mubr.bf16.gmra.mxu0 %v19990_v30  ;;  %v15497_v30 = vld [vmem:[%s22270_s16 + $0x32c] ss:$16 sps:$4 sm:$0xff]   ;;  %v13908_v35 = vcombine.high %v10300_v25, %v10304_v50  ;;  %v13907_v56 = vcombine.low %v10300_v25, %v10304_v50  ;;  %v10292_v14 = vld [vmem:[%s22272_s18 + $0x240] sm:$0xff] }
 0x741   : > { %v8784_v3 = vadd.f32 %v8783_v63, %v8671_v10  ;;  %10036 = vmatpush2.bf16.msra.mxu1 %v15489_v31  ;;  %10000 = vmatprep.mubr.bf16.mxu0 %v20021_v42  ;;  %v8848_v48 = vmax.f32 %v8782_v38, 0.0  ;;  %v13940_v42 = vcombine.high %v10332_v12, %v10336_v8  ;;  %v10284_v31 = vld [vmem:[%s22272_s18 + $0x200] sm:$0xff] }
 0x742   : > { %10037 = vmatprep.subr.bf16.mxu1 %v15494_v41  ;;  %11815 = vmatpush2.bf16.msra.mxu0 %v13947_v15  ;;  %v13892_v9 = vcombine.high %v10284_v31, %v10288_v62  ;;  %v13891_v57 = vcombine.low %v10284_v31, %v10288_v62  ;;  %v10404_v10 = vld [vmem:[%s22272_s18 + $0x5c0] sm:$0xff]  ;;  %v20384_v41 = vld [vmem:[%s22272_s18 + $0x1e8] sm:$0xff] }
 0x743   : > { %v8849_v53 = vmax.f32 %v8784_v3, 0.0  ;;  %11816 = vmatprep.subr.bf16.mxu0 %v13940_v42  ;;  %v20324_v43 = vpack.c.bf16 %v8848_v48, %v8844_v61  ;;  %v10396_v15 = vld [vmem:[%s22272_s18 + $0x580] sm:$0xff] }
 0x744   : > { %v10400_v32 = vld [vmem:[%s22272_s18 + $0x5a0] sm:$0xff] }
 0x745   : > { %10038 = vmatpush2.bf16.msra.mxu1 %v15492_v37  ;;  %v20313_v39 = vpack.c.bf16 %v8849_v53, %v8845_v34  ;;  %v14004_v63 = vcombine.high %v10396_v15, %v10400_v32  ;;  %v14003_v3 = vcombine.low %v10396_v15, %v10400_v32  ;;  %v10380_v8 = vld [vmem:[%s22272_s18 + $0x500] sm:$0xff] }
 0x746   : > { %10039 = vmatprep.subr.bf16.mxu1 %v15497_v30  ;;  %11817 = vmatpush2.bf16.msra.mxu0 %v13939_v16  ;;  %v10384_v48 = vld [vmem:[%s22272_s18 + $0x520] sm:$0xff] }
 0x747   : > { %9887 = vmatprep.mubr.bf16.mxu1 %v20313_v39  ;;  %11818 = vmatprep.subr.bf16.mxu0 %v13932_v29  ;;  %v13988_v30 = vcombine.high %v10380_v8, %v10384_v48  ;;  %v13987_v42 = vcombine.low %v10380_v8, %v10384_v48  ;;  %v10364_v16 = vld [vmem:[%s22272_s18 + $0x480] sm:$0xff] }
 0x748   : > { %9888 = vmatmul.mubr.bf16.gmra.mxu1 %v20324_v43  ;;  %10001 = vmatmul.mubr.bf16.gmra.mxu0 %v20028_v49  ;;  %v13923_v49 = vcombine.low %v10316_v22, %v10320_v45  ;;  %v10368_v61 = vld [vmem:[%s22272_s18 + $0x4a0] sm:$0xff] }
 0x749   : > { %10040 = vmatpush2.bf16.msra.mxu1 %v15495_v19  ;;  %10043 = vmatprep.mubr.bf16.mxu1 %v20049_v33  ;;  %v10308_v33 = vld [vmem:[%s22272_s18 + $0x2c0] sm:$0xff]  ;;  %v13972_v19 = vcombine.high %v10364_v16, %v10368_v61  ;;  %v13971_v1 = vcombine.low %v10364_v16, %v10368_v61 }
 0x74a   : > { %10041 = vmatprep.subr.bf16.mxu1 %v15500_v55  ;;  %11819 = vmatpush2.bf16.msra.mxu0 %v13931_v6  ;;  %v13916_v2 = vcombine.high %v10308_v33, %v10312_v5  ;;  %v13915_v24 = vcombine.low %v10308_v33, %v10312_v5  ;;  %v10348_v29 = vld [vmem:[%s22272_s18 + $0x400] sm:$0xff] }
 0x74b   : > { %11820 = vmatprep.subr.bf16.mxu0 %v13924_v36  ;;  %v10352_v6 = vld [vmem:[%s22272_s18 + $0x420] sm:$0xff] }
 0x74c   : > { %v13955_v22 = vcombine.low %v10348_v29, %v10352_v6  ;;  %v10464_v33 = vld [vmem:[%s22272_s18 + $0x7a0] sm:$0xff] }
 0x74d   : > { %10042 = vmatpush2.bf16.msra.mxu1 %v15498_v54  ;;  %v13956_v54 = vcombine.high %v10348_v29, %v10352_v6  ;;  %v10444_v50 = vld [vmem:[%s22272_s18 + $0x700] sm:$0xff] }
 0x74e   : > { %11821 = vmatpush2.bf16.msra.mxu0 %v13923_v49  ;;  %v10460_v49 = vld [vmem:[%s22272_s18 + $0x780] sm:$0xff] }
 0x74f   : > { %11822 = vmatprep.subr.bf16.mxu0 %v13916_v2  ;;  %v14068_v5 = vcombine.high %v10460_v49, %v10464_v33  ;;  %v14067_v2 = vcombine.low %v10460_v49, %v10464_v33  ;;  %v10428_v62 = vld [vmem:[%s22272_s18 + $0x680] sm:$0xff] }
 0x750   : > { %10044 = vmatmul.mubr.bf16.vlgmr.msra.gmra.mxu1 %v20056_v27  ;;  %v10296_v27 = vld [vmem:[%s22272_s18 + $0x260] sm:$0xff] }
 0x751   : > { %10053 = vmatprep.mubr.bf16.mxu1 %v20081_v51  ;;  %v13900_v51 = vcombine.high %v10292_v14, %v10296_v27  ;;  %v13899_v7 = vcombine.low %v10292_v14, %v10296_v27  ;;  %v10436_v27 = vld [vmem:[%s22272_s18 + $0x6c0] sm:$0xff] }
 0x752   : > { %11823 = vmatpush2.bf16.msra.mxu0 %v13915_v24 }
 0x753   : > { %11824 = vmatprep.subr.bf16.mxu0 %v13908_v35  ;;  %v10448_v35 = vld [vmem:[%s22272_s18 + $0x720] sm:$0xff] }
 0x754   : > { %v14051_v14 = vcombine.low %v10444_v50, %v10448_v35 }
 0x756   : > { %11825 = vmatpush2.bf16.msra.mxu0 %v13907_v56  ;;  %v14052_v56 = vcombine.high %v10444_v50, %v10448_v35 }
 0x757   : > { %11826 = vmatprep.subr.bf16.mxu0 %v13900_v51 }
 0x758   : > { %10054 = vmatmul.mubr.bf16.gmra.mxu1 %v20088_v13  ;;  %v10408_v13 = vld [vmem:[%s22272_s18 + $0x5e0] sm:$0xff] }
 0x759   : > { %10063 = vmatprep.mubr.bf16.mxu1 %v20113_v47  ;;  %v20379_v47 = vld [vmem:[%s22272_s18 + $0x1c8] sm:$0xff]  ;;  %v14012_v18 = vcombine.high %v10404_v10, %v10408_v13  ;;  %v14011_v40 = vcombine.low %v10404_v10, %v10408_v13 }
 0x75a   : > { %11827 = vmatpush2.bf16.msra.mxu0 %v13899_v7  ;;  %v13885_v11 = vcombine.low %v20379_v47, %v20384_v41  ;;  %v13886_v38 = vcombine.high %v20379_v47, %v20384_v41 }
 0x75b   : > { %11828 = vmatprep.subr.bf16.mxu0 %v13892_v9  ;;  %11911 = vmatprep.subr.bf16.mxu1 %v14012_v18  ;;  %v10432_v9 = vld [vmem:[%s22272_s18 + $0x6a0] sm:$0xff] }
 0x75c   : > { %11912 = vmatpush1.bf16.msra.mxu1 %v14011_v40  ;;  %v14036_v10 = vcombine.high %v10428_v62, %v10432_v9  ;;  %v14035_v13 = vcombine.low %v10428_v62, %v10432_v9  ;;  %v10420_v40 = vld [vmem:[%s22272_s18 + $0x640] sm:$0xff] }
 0x75d   : > { %11913 = vmatprep.subr.bf16.mxu1 %v14004_v63 }
 0x75e   : > { %11829 = vmatpush2.bf16.msra.mxu0 %v13891_v57 }
 0x75f   : > { %12024 = vmatprep.subr.bf16.mxu0 %v13886_v38  ;;  %v10424_v38 = vld [vmem:[%s22272_s18 + $0x660] sm:$0xff] }
 0x760   : > { %10064 = vmatmul.mubr.bf16.gmra.mxu1 %v20126_v4  ;;  %v10388_v4 = vld [vmem:[%s22272_s18 + $0x540] sm:$0xff]  ;;  %v14028_v32 = vcombine.high %v10420_v40, %v10424_v38  ;;  %v14027_v63 = vcombine.low %v10420_v40, %v10424_v38 }
 0x761   : > { %10073 = vmatprep.mubr.bf16.mxu1 %v20157_v59  ;;  %11914 = vmatpush1.bf16.msra.mxu1 %v14003_v3  ;;  %v10392_v59 = vld [vmem:[%s22272_s18 + $0x560] sm:$0xff] }
 0x762   : > { %v13996_v37 = vcombine.high %v10388_v4, %v10392_v59  ;;  %v13995_v12 = vcombine.low %v10388_v4, %v10392_v59  ;;  %v10412_v4 = vld [vmem:[%s22272_s18 + $0x600] sm:$0xff] }
 0x763   : > { %v10416_v59 = vld [vmem:[%s22272_s18 + $0x620] sm:$0xff] }
 0x764   : > { %11915 = vmatprep.subr.bf16.mxu1 %v13996_v37  ;;  %v14019_v8 = vcombine.low %v10412_v4, %v10416_v59 }
 0x765   : > { %11916 = vmatpush1.bf16.msra.mxu1 %v13995_v12  ;;  %v14020_v12 = vcombine.high %v10412_v4, %v10416_v59 }
 0x766   : > { %11917 = vmatprep.subr.bf16.mxu1 %v13988_v30  ;;  %v20500_v30 = vld [vmem:[%s22272_s18 + $0x5c8] sm:$0xff] }
 0x768   : > { %10074 = vmatmul.mubr.bf16.gmra.mxu1 %v20172_v20  ;;  %v10372_v20 = vld [vmem:[%s22272_s18 + $0x4c0] sm:$0xff] }
 0x769   : > { %10083 = vmatprep.mubr.bf16.mxu1 %v20199_v46  ;;  %11918 = vmatpush1.bf16.msra.mxu1 %v13987_v42  ;;  %v10376_v46 = vld [vmem:[%s22272_s18 + $0x4e0] sm:$0xff]  ;;  %v20505_v42 = vld [vmem:[%s22272_s18 + $0x5e8] sm:$0xff] }
 0x76a   : > { %v13980_v34 = vcombine.high %v10372_v20, %v10376_v46  ;;  %v13979_v53 = vcombine.low %v10372_v20, %v10376_v46  ;;  %v14014_v46 = vcombine.high %v20500_v30, %v20505_v42 }
 0x76c   : > { %11919 = vmatprep.subr.bf16.mxu1 %v13980_v34 }
 0x76d   : > { %11920 = vmatpush1.bf16.msra.mxu1 %v13979_v53 }
 0x76e   : > { %11921 = vmatprep.subr.bf16.mxu1 %v13972_v19 }
 0x770   : > { %10084 = vmatmul.mubr.bf16.gmra.mxu1 %v20214_v58  ;;  %v10356_v58 = vld [vmem:[%s22272_s18 + $0x440] sm:$0xff] }
 0x771   : > { %10093 = vmatprep.mubr.bf16.mxu1 %v20241_v21  ;;  %11922 = vmatpush1.bf16.msra.mxu1 %v13971_v1  ;;  %v10360_v21 = vld [vmem:[%s22272_s18 + $0x460] sm:$0xff] }
 0x772   : > { %v13964_v26 = vcombine.high %v10356_v58, %v10360_v21  ;;  %v13963_v55 = vcombine.low %v10356_v58, %v10360_v21 }
 0x774   : > { %11923 = vmatprep.subr.bf16.mxu1 %v13964_v26 }
 0x775   : > { %11924 = vmatpush1.bf16.msra.mxu1 %v13963_v55 }
 0x776   : > { %11925 = vmatprep.subr.bf16.mxu1 %v13956_v54 }
 0x778   : > { %10094 = vmatmul.mubr.bf16.gmra.mxu1 %v20255_v17  ;;  %v10468_v17 = vld [vmem:[%s22272_s18 + $0x7c0] sm:$0xff] }
 0x779   : > { %10103 = vmatprep.mubr.bf16.mxu1 %v20278_v0  ;;  %11926 = vmatpush1.bf16.msra.mxu1 %v13955_v22  ;;  %v10472_v0 = vld [vmem:[%s22272_s18 + $0x7e0] sm:$0xff] }
 0x77a   : > { %v14076_v45 = vcombine.high %v10468_v17, %v10472_v0  ;;  %v14075_v36 = vcombine.low %v10468_v17, %v10472_v0 }
 0x77c   : > { %11927 = vmatprep.subr.bf16.mxu1 %v14076_v45 }
 0x77d   : > { %11928 = vmatpush2.bf16.msra.mxu1 %v14075_v36 }
 0x77e   : > { %11929 = vmatprep.subr.bf16.mxu1 %v14068_v5 }
 0x780   : > { %10104 = vmatmul.mubr.bf16.gmra.mxu1 %v20292_v60  ;;  %v10452_v60 = vld [vmem:[%s22272_s18 + $0x740] sm:$0xff] }
 0x781   : > { %10113 = vmatprep.mubr.bf16.mxu1 %v20313_v39  ;;  %11930 = vmatpush2.bf16.msra.mxu1 %v14067_v2  ;;  %v10456_v39 = vld [vmem:[%s22272_s18 + $0x760] sm:$0xff] }
 0x782   : > { %v14060_v24 = vcombine.high %v10452_v60, %v10456_v39  ;;  %v14059_v25 = vcombine.low %v10452_v60, %v10456_v39 }
 0x784   : > { %11931 = vmatprep.subr.bf16.mxu1 %v14060_v24  ;;  %v20560_v24 = vld [vmem:[%s22271_s17] sm:$0xf] }
 0x785   : > { %11932 = vmatpush2.bf16.msra.mxu1 %v14059_v25  ;;  %v20566_v50 = vrot.slane %v20560_v24, %v22368_v44  ;;  %v20570_v35 = vrot.slane %v20560_v24, %v22369_v23 }
 0x786   : > { %11933 = vmatprep.subr.bf16.mxu1 %v14052_v56 }
 0x788   : > { %10114 = vmatmul.mubr.bf16.gmra.mxu1 %v20324_v43  ;;  %v10440_v43 = vld [vmem:[%s22272_s18 + $0x6e0] sm:$0xff] }
 0x789   : > { %11934 = vmatpush2.bf16.msra.mxu1 %v14051_v14  ;;  %v14044_v51 = vcombine.high %v10436_v27, %v10440_v43  ;;  %v14043_v7 = vcombine.low %v10436_v27, %v10440_v43 }
 0x78b   : > { %11935 = vmatprep.subr.bf16.mxu1 %v14044_v51 }
 0x78d   : > { %11936 = vmatpush2.bf16.msra.mxu1 %v14043_v7 }
 0x78e   : > { %11937 = vmatprep.subr.bf16.mxu1 %v14036_v10 }
 0x790   : > { %v20473_v31 = vpop.f32.mrf.mxu0 }
 0x791   : > { %11938 = vmatpush2.bf16.msra.mxu1 %v14035_v13  ;;  %v9707_v62 = vadd.f32 %v20473_v31, %v20570_v35  ;;  %v10273_v31 = vld [vmem:[%s22272_s18 + $0x1a8] sm:$0xff] }
 0x792   : > { %v9708_v57 = vpop.f32.mrf.mxu0  ;;  %11939 = vmatprep.subr.bf16.mxu1 %v14028_v32 }
 0x793   : > { %v9709_v51 = vadd.f32 %v9708_v57, %v20566_v50  ;;  %v10269_v57 = vld [vmem:[%s22272_s18 + $0x188] sm:$0xff] }
 0x794   : > { %v9710_v18 = vpop.f32.mrf.mxu0 }
 0x795   : > { %11940 = vmatpush2.bf16.msra.mxu1 %v14027_v63  ;;  %v9711_v7 = vadd.f32 %v9710_v18, %v20570_v35 }
 0x796   : > { %v9712_v15 = vpop.f32.mrf.mxu0  ;;  %11941 = vmatprep.subr.bf16.mxu1 %v14020_v12 }
 0x797   : > { %v9713_v10 = vadd.f32 %v9712_v15, %v20566_v50 }
 0x798   : > { %v20487_v3 = vpop.f32.mrf.mxu0 }
 0x799   : > { %11942 = vmatpush2.bf16.msra.mxu1 %v14019_v8 }
 0x79a   : > { %v20495_v37 = vpop.f32.mrf.mxu0  ;;  %12137 = vmatprep.subr.bf16.mxu1 %v14014_v46 }
 0x79c   : > { %v9720_v48 = vpop.f32.mrf.mxu0 }
 0x79e   : > { %v9722_v20 = vpop.f32.mrf.mxu0 }
 0x7a0   : > { %v20511_v53 = vpop.f32.mrf.mxu0 }
 0x7a2   : > { %v20513_v16 = vpop.f32.mrf.mxu0 }
 0x7a3   : > { %v9729_v41 = vadd.f32 %v20513_v16, %v20566_v50 }
 0x7a4   : > { %v20515_v61 = vpop.f32.mrf.mxu0 }
 0x7a6   : > { %v20517_v19 = vpop.f32.mrf.mxu0 }
 0x7a8   : > { %v20519_v1 = vpop.f32.mrf.mxu0 }
 0x7aa   : > { %v20521_v58 = vpop.f32.mrf.mxu0 }
 0x7ac   : > { %v20523_v21 = vpop.f32.mrf.mxu0 }
 0x7ae   : > { %v20525_v26 = vpop.f32.mrf.mxu0 }
 0x7b0   : > { %v20527_v55 = vpop.f32.mrf.mxu0 }
 0x7b2   : > { %v20529_v29 = vpop.f32.mrf.mxu0 }
 0x7b4   : > { %v20531_v6 = vpop.f32.mrf.mxu0 }
 0x7b6   : > { %v20533_v54 = vpop.f32.mrf.mxu0 }
 0x7b8   : > { %v20535_v22 = vpop.f32.mrf.mxu0 }
 0x7ba   : > { %v20537_v17 = vpop.f32.mrf.mxu0 }
 0x7bc   : > { %v20539_v0 = vpop.f32.mrf.mxu0 }
 0x7be   : > { %v20541_v45 = vpop.f32.mrf.mxu0 }
 0x7c0   : > { %v20543_v36 = vpop.f32.mrf.mxu0 }
 0x7c2   : > { %v20545_v49 = vpop.f32.mrf.mxu0 }
 0x7c4   : > { %v20547_v33 = vpop.f32.mrf.mxu0 }
 0x7c6   : > { %v20549_v5 = vpop.f32.mrf.mxu0 }
 0x7c8   : > { %v20551_v2 = vpop.f32.mrf.mxu0 }
 0x7ca   : > { %v20553_v60 = vpop.f32.mrf.mxu0 }
 0x7cc   : > { %v20555_v39 = vpop.f32.mrf.mxu0 }
 0x7ce   : > { %v20562_v25 = vpop.f32.mrf.mxu0 }
 0x7d0   : > { %v9819_v56 = vpop.f32.mrf.mxu1  ;;  %v20572_v14 = vpop.f32.mrf.mxu0 }
 0x7d1   : > { %v9820_v38 = vadd.f32 %v9819_v56, %v9707_v62  ;;  %v9717_v62 = vadd.f32 %v20487_v3, %v20570_v35 }
 0x7d2   : > { %v9821_v27 = vpop.f32.mrf.mxu1  ;;  %v20574_v43 = vpop.f32.mrf.mxu0 }
 0x7d3   : > { %v9822_v13 = vadd.f32 %v9821_v27, %v9709_v51  ;;  %v10124_v18 = vmax.f32 %v9820_v38, 0.0  ;;  %v9719_v27 = vadd.f32 %v20495_v37, %v20566_v50  ;;  %v9721_v51 = vadd.f32 %v9720_v48, %v20570_v35  ;;  %v10261_v37 = vld [vmem:[%s22272_s18 + $0x148] sm:$0xff] }
 0x7d4   : > { %v9823_v9 = vpop.f32.mrf.mxu1  ;;  %v20581_v32 = vpop.f32.mrf.mxu0  ;;  %v10265_v48 = vld [vmem:[%s22272_s18 + $0x168] sm:$0xff] }
 0x7d5   : > { %v9824_v40 = vadd.f32 %v9823_v9, %v9711_v7  ;;  %v10125_v8 = vmax.f32 %v9822_v13, 0.0  ;;  %v13878_v13 = vcombine.high %v10269_v57, %v10273_v31 }
 0x7d6   : > { %v9825_v63 = vpop.f32.mrf.mxu1  ;;  %v20589_v15 = vpop.f32.mrf.mxu0 }
 0x7d7   : > { %v9826_v4 = vadd.f32 %v9825_v63, %v9713_v10  ;;  %v10128_v59 = vmax.f32 %v9824_v40, 0.0  ;;  %v9723_v40 = vadd.f32 %v9722_v20, %v20566_v50  ;;  %v13877_v20 = vcombine.low %v10269_v57, %v10273_v31 }
 0x7d8   : > { %v9829_v12 = vpop.f32.mrf.mxu1  ;;  %v20608_v3 = vpop.f32.mrf.mxu0  ;;  %v13869_v31 = vcombine.low %v10261_v37, %v10265_v48 }
 0x7d9   : > { %v10129_v46 = vmax.f32 %v9826_v4, 0.0  ;;  %v20598_v9 = vpack.c.bf16 %v10128_v59, %v10124_v18  ;;  %v9830_v4 = vadd.f32 %v9829_v12, %v9717_v62  ;;  %v10253_v12 = vld [vmem:[%s22272_s18 + $0x108] sm:$0xff] }
 0x7da   : > { %v9831_v56 = vpop.f32.mrf.mxu1  ;;  %v10257_v62 = vld [vmem:[%s22272_s18 + $0x128] sm:$0xff] }
 0x7db   : > { %v20594_v7 = vpack.c.bf16 %v10129_v46, %v10125_v8  ;;  %v9832_v38 = vadd.f32 %v9831_v56, %v9719_v27  ;;  %v13870_v56 = vcombine.high %v10261_v37, %v10265_v48 }
 0x7dc   : > { %v9833_v10 = vpop.f32.mrf.mxu1 }
 0x7dd   : > { %v9834_v63 = vadd.f32 %v9833_v10, %v9721_v51  ;;  %11830 = vmatprep.mubr.bf16.mxu0 %v20594_v7  ;;  %v10133_v27 = vmax.f32 %v9832_v38, 0.0  ;;  %v10132_v10 = vmax.f32 %v9830_v4, 0.0  ;;  %v13862_v4 = vcombine.high %v10253_v12, %v10257_v62 }
 0x7de   : > { %v9835_v59 = vpop.f32.mrf.mxu1  ;;  %11831 = vmatmul.mubr.bf16.vlgmr.msra.gmra.mxu0 %v20598_v9 }
 0x7df   : > { %v9836_v8 = vadd.f32 %v9835_v59, %v9723_v40  ;;  %12025 = vmatpush1.bf16.msra.mxu0 %v13885_v11  ;;  %v10136_v46 = vmax.f32 %v9834_v63, 0.0  ;;  %v20620_v40 = vpop.f32.mrf.mxu0  ;;  %v9731_v11 = vadd.f32 %v20515_v61, %v20570_v35  ;;  %v9733_v59 = vadd.f32 %v20517_v19, %v20566_v50  ;;  %v10245_v61 = vld [vmem:[%s22272_s18 + $0xc8] sm:$0xff] }
 0x7e0   : > { %v9839_v18 = vpop.f32.mrf.mxu1  ;;  %12026 = vmatprep.subr.bf16.mxu0 %v13878_v13  ;;  %v9727_v13 = vadd.f32 %v20511_v53, %v20570_v35  ;;  %v10249_v53 = vld [vmem:[%s22272_s18 + $0xe8] sm:$0xff]  ;;  %v13861_v19 = vcombine.low %v10253_v12, %v10257_v62  ;;  %v9739_v12 = vadd.f32 %v20521_v58, %v20566_v50  ;;  %v9741_v62 = vadd.f32 %v20523_v21, %v20570_v35 }
 0x7e1   : > { %v10137_v51 = vmax.f32 %v9836_v8, 0.0  ;;  %v20630_v38 = vpack.c.bf16 %v10136_v46, %v10132_v10  ;;  %v20641_v37 = vpop.f32.mrf.mxu0  ;;  %v10229_v21 = vld [vmem:[%s22272_s18 + $0x48] sm:$0xff] }
 0x7e2   : > { %v9841_v47 = vpop.f32.mrf.mxu1  ;;  %v9840_v48 = vadd.f32 %v9839_v18, %v9727_v13  ;;  %v10241_v18 = vld [vmem:[%s22272_s18 + $0xa8] sm:$0xff] }
 0x7e3   : > { %v20626_v57 = vpack.c.bf16 %v10137_v51, %v10133_v27  ;;  %12027 = vmatpush1.bf16.msra.mxu0 %v13877_v20  ;;  %v9842_v8 = vadd.f32 %v9841_v47, %v9729_v41  ;;  %v13854_v51 = vcombine.high %v10245_v61, %v10249_v53  ;;  %v10237_v41 = vld [vmem:[%s22272_s18 + $0x88] sm:$0xff] }
 0x7e4   : > { %v9843_v63 = vpop.f32.mrf.mxu1  ;;  %12028 = vmatprep.subr.bf16.mxu0 %v13870_v56  ;;  %v10140_v13 = vmax.f32 %v9840_v48, 0.0  ;;  %v9743_v48 = vadd.f32 %v20525_v26, %v20566_v50  ;;  %v13845_v26 = vcombine.low %v10237_v41, %v10241_v18 }
 0x7e5   : > { %v9844_v16 = vadd.f32 %v9843_v63, %v9731_v11  ;;  %11840 = vmatprep.mubr.bf16.mxu0 %v20626_v57  ;;  %v10141_v10 = vmax.f32 %v9842_v8, 0.0  ;;  %v20650_v11 = vpop.f32.mrf.mxu0 }
 0x7e6   : > { %v9845_v20 = vpop.f32.mrf.mxu1  ;;  %11841 = vmatmul.mubr.bf16.gmra.mxu0 %v20630_v38 }
 0x7e7   : > { %v9846_v46 = vadd.f32 %v9845_v20, %v9733_v59  ;;  %12029 = vmatpush1.bf16.msra.mxu0 %v13869_v31  ;;  %v10144_v56 = vmax.f32 %v9844_v16, 0.0  ;;  %v9737_v59 = vadd.f32 %v20519_v1, %v20570_v35  ;;  %v13846_v20 = vcombine.high %v10237_v41, %v10241_v18  ;;  %v10233_v1 = vld [vmem:[%s22272_s18 + $0x68] sm:$0xff] }
 0x7e8   : > { %v9849_v27 = vpop.f32.mrf.mxu1  ;;  %12030 = vmatprep.subr.bf16.mxu0 %v13862_v4  ;;  %v13853_v4 = vcombine.low %v10245_v61, %v10249_v53  ;;  %v20671_v61 = vpop.f32.mrf.mxu0  ;;  %v9749_v41 = vadd.f32 %v20529_v29, %v20566_v50  ;;  %v9751_v18 = vadd.f32 %v20531_v6, %v20570_v35  ;;  %v10341_v6 = vld [vmem:[%s22272_s18 + $0x3c8] sm:$0xff] }
 0x7e9   : > { %v10145_v47 = vmax.f32 %v9846_v46, 0.0  ;;  %v20660_v8 = vpack.c.bf16 %v10144_v56, %v10140_v13  ;;  %v9850_v53 = vadd.f32 %v9849_v27, %v9737_v59  ;;  %v10225_v27 = vld [vmem:[%s22272_s18 + $0x28] sm:$0xff] }
 0x7ea   : > { %v9851_v63 = vpop.f32.mrf.mxu1 }
 0x7eb   : > { %v20656_v31 = vpack.c.bf16 %v10145_v47, %v10141_v10  ;;  %12031 = vmatpush1.bf16.msra.mxu0 %v13861_v19  ;;  %v9852_v46 = vadd.f32 %v9851_v63, %v9739_v12  ;;  %v13838_v47 = vcombine.high %v10229_v21, %v10233_v1  ;;  %v10221_v12 = vld [vmem:[%s22272_s18 + $0x8] sm:$0xff]  ;;  %v10148_v59 = vmax.f32 %v9850_v53, 0.0 }
 0x7ec   : > { %v9853_v16 = vpop.f32.mrf.mxu1  ;;  %12032 = vmatprep.subr.bf16.mxu0 %v13854_v51  ;;  %v9753_v53 = vadd.f32 %v20533_v54, %v20566_v50  ;;  %v13829_v54 = vcombine.low %v10221_v12, %v10225_v27 }
 0x7ed   : > { %v9854_v58 = vadd.f32 %v9853_v16, %v9741_v62  ;;  %11850 = vmatprep.mubr.bf16.mxu0 %v20656_v31  ;;  %v10149_v13 = vmax.f32 %v9852_v46, 0.0  ;;  %v20680_v62 = vpop.f32.mrf.mxu0 }
 0x7ee   : > { %v9855_v19 = vpop.f32.mrf.mxu1  ;;  %11851 = vmatmul.mubr.bf16.gmra.mxu0 %v20660_v8 }
 0x7ef   : > { %v9856_v56 = vadd.f32 %v9855_v19, %v9743_v48  ;;  %12033 = vmatpush1.bf16.msra.mxu0 %v13853_v4  ;;  %v10152_v51 = vmax.f32 %v9854_v58, 0.0  ;;  %v9747_v48 = vadd.f32 %v20527_v55, %v20570_v35  ;;  %v13830_v19 = vcombine.high %v10221_v12, %v10225_v27  ;;  %v10345_v55 = vld [vmem:[%s22272_s18 + $0x3e8] sm:$0xff] }
 0x7f0   : > { %v9859_v10 = vpop.f32.mrf.mxu1  ;;  %12034 = vmatprep.subr.bf16.mxu0 %v13846_v20  ;;  %v13837_v20 = vcombine.low %v10229_v21, %v10233_v1  ;;  %v20701_v21 = vpop.f32.mrf.mxu0  ;;  %v9759_v12 = vadd.f32 %v20537_v17, %v20566_v50  ;;  %v9761_v27 = vadd.f32 %v20539_v0, %v20570_v35  ;;  %v10325_v0 = vld [vmem:[%s22272_s18 + $0x348] sm:$0xff] }
 0x7f1   : > { %v10153_v63 = vmax.f32 %v9856_v56, 0.0  ;;  %v20690_v46 = vpack.c.bf16 %v10152_v51, %v10148_v59  ;;  %v9860_v1 = vadd.f32 %v9859_v10, %v9747_v48  ;;  %v10337_v10 = vld [vmem:[%s22272_s18 + $0x3a8] sm:$0xff] }
 0x7f2   : > { %v9861_v16 = vpop.f32.mrf.mxu1 }
 0x7f3   : > { %v20686_v4 = vpack.c.bf16 %v10153_v63, %v10149_v13  ;;  %12035 = vmatpush1.bf16.msra.mxu0 %v13845_v26  ;;  %v9862_v56 = vadd.f32 %v9861_v16, %v9749_v41  ;;  %v13950_v63 = vcombine.high %v10341_v6, %v10345_v55  ;;  %v10333_v41 = vld [vmem:[%s22272_s18 + $0x388] sm:$0xff]  ;;  %v10156_v48 = vmax.f32 %v9860_v1, 0.0 }
 0x7f4   : > { %v9863_v58 = vpop.f32.mrf.mxu1  ;;  %12036 = vmatprep.subr.bf16.mxu0 %v13838_v47  ;;  %v9763_v1 = vadd.f32 %v20541_v45, %v20566_v50  ;;  %v13941_v45 = vcombine.low %v10333_v41, %v10337_v10 }
 0x7f5   : > { %v9864_v29 = vadd.f32 %v9863_v58, %v9751_v18  ;;  %11860 = vmatprep.mubr.bf16.mxu0 %v20686_v4  ;;  %v10157_v59 = vmax.f32 %v9862_v56, 0.0  ;;  %v20710_v18 = vpop.f32.mrf.mxu0 }
 0x7f6   : > { %v9865_v26 = vpop.f32.mrf.mxu1  ;;  %11861 = vmatmul.mubr.bf16.gmra.mxu0 %v20690_v46 }
 0x7f7   : > { %v9866_v51 = vadd.f32 %v9865_v26, %v9753_v53  ;;  %12037 = vmatpush1.bf16.msra.mxu0 %v13837_v20  ;;  %v10160_v47 = vmax.f32 %v9864_v29, 0.0  ;;  %v9757_v53 = vadd.f32 %v20535_v22, %v20570_v35  ;;  %v13942_v26 = vcombine.high %v10333_v41, %v10337_v10  ;;  %v10329_v22 = vld [vmem:[%s22272_s18 + $0x368] sm:$0xff] }
 0x7f8   : > { %v9869_v13 = vpop.f32.mrf.mxu1  ;;  %12038 = vmatprep.subr.bf16.mxu0 %v13830_v19  ;;  %v13949_v19 = vcombine.low %v10341_v6, %v10345_v55  ;;  %v20731_v6 = vpop.f32.mrf.mxu0  ;;  %v9769_v41 = vadd.f32 %v20545_v49, %v20566_v50  ;;  %v9771_v10 = vadd.f32 %v20547_v33, %v20570_v35  ;;  %v10309_v33 = vld [vmem:[%s22272_s18 + $0x2c8] sm:$0xff] }
 0x7f9   : > { %v10161_v16 = vmax.f32 %v9866_v51, 0.0  ;;  %v20720_v56 = vpack.c.bf16 %v10160_v47, %v10156_v48  ;;  %v9870_v55 = vadd.f32 %v9869_v13, %v9757_v53  ;;  %v10321_v13 = vld [vmem:[%s22272_s18 + $0x328] sm:$0xff] }
 0x7fa   : > { %v9871_v58 = vpop.f32.mrf.mxu1 }
 0x7fb   : > { %v20716_v20 = vpack.c.bf16 %v10161_v16, %v10157_v59  ;;  %12039 = vmatpush1.bf16.msra.mxu0 %v13829_v54  ;;  %v9872_v51 = vadd.f32 %v9871_v58, %v9759_v12  ;;  %v13934_v16 = vcombine.high %v10325_v0, %v10329_v22  ;;  %v10317_v12 = vld [vmem:[%s22272_s18 + $0x308] sm:$0xff]  ;;  %v10164_v53 = vmax.f32 %v9870_v55, 0.0 }
 0x7fc   : > { %v9873_v29 = vpop.f32.mrf.mxu1  ;;  %12040 = vmatprep.subr.bf16.mxu0 %v13950_v63  ;;  %v9773_v55 = vadd.f32 %v20549_v5, %v20566_v50  ;;  %v13925_v5 = vcombine.low %v10317_v12, %v10321_v13 }
 0x7fd   : > { %v9874_v17 = vadd.f32 %v9873_v29, %v9761_v27  ;;  %11870 = vmatprep.mubr.bf16.mxu0 %v20716_v20  ;;  %v10165_v48 = vmax.f32 %v9872_v51, 0.0  ;;  %v20740_v27 = vpop.f32.mrf.mxu0 }
 0x7fe   : > { %v9875_v54 = vpop.f32.mrf.mxu1  ;;  %11871 = vmatmul.mubr.bf16.gmra.mxu0 %v20720_v56 }
 0x7ff   : > { %v9876_v47 = vadd.f32 %v9875_v54, %v9763_v1  ;;  %12041 = vmatpush2.bf16.msra.mxu0 %v13949_v19  ;;  %v10168_v63 = vmax.f32 %v9874_v17, 0.0  ;;  %v9767_v1 = vadd.f32 %v20543_v36, %v20570_v35  ;;  %v13926_v54 = vcombine.high %v10317_v12, %v10321_v13  ;;  %v10313_v36 = vld [vmem:[%s22272_s18 + $0x2e8] sm:$0xff] }
 0x800   : > { %v9879_v59 = vpop.f32.mrf.mxu1  ;;  %12042 = vmatprep.subr.bf16.mxu0 %v13942_v26  ;;  %v13933_v26 = vcombine.low %v10325_v0, %v10329_v22  ;;  %v20761_v0 = vpop.f32.mrf.mxu0  ;;  %v9779_v12 = vadd.f32 %v20553_v60, %v20566_v50  ;;  %v9781_v13 = vadd.f32 %v20555_v39, %v20570_v35  ;;  %v10293_v39 = vld [vmem:[%s22272_s18 + $0x248] sm:$0xff] }
 0x801   : > { %v10169_v58 = vmax.f32 %v9876_v47, 0.0  ;;  %v20750_v51 = vpack.c.bf16 %v10168_v63, %v10164_v53  ;;  %v9880_v22 = vadd.f32 %v9879_v59, %v9767_v1  ;;  %v10305_v59 = vld [vmem:[%s22272_s18 + $0x2a8] sm:$0xff] }
 0x802   : > { %v9881_v29 = vpop.f32.mrf.mxu1 }
 0x803   : > { %v20746_v19 = vpack.c.bf16 %v10169_v58, %v10165_v48  ;;  %12043 = vmatpush2.bf16.msra.mxu0 %v13941_v45  ;;  %v9882_v47 = vadd.f32 %v9881_v29, %v9769_v41  ;;  %v13918_v58 = vcombine.high %v10309_v33, %v10313_v36  ;;  %v10301_v41 = vld [vmem:[%s22272_s18 + $0x288] sm:$0xff]  ;;  %v10172_v1 = vmax.f32 %v9880_v22, 0.0 }
 0x804   : > { %v9883_v17 = vpop.f32.mrf.mxu1  ;;  %12044 = vmatprep.subr.bf16.mxu0 %v13934_v16  ;;  %v9783_v22 = vadd.f32 %v20562_v25, %v20566_v50  ;;  %v20796_v25 = vrot.slane %v20560_v24, %v22370_v28 }
 0x805   : > { %v9884_v49 = vadd.f32 %v9883_v17, %v9771_v10  ;;  %11880 = vmatprep.mubr.bf16.mxu0 %v20746_v19  ;;  %v10173_v53 = vmax.f32 %v9882_v47, 0.0  ;;  %v20770_v10 = vpop.f32.mrf.mxu0 }
 0x806   : > { %v9885_v45 = vpop.f32.mrf.mxu1  ;;  %11881 = vmatmul.mubr.bf16.gmra.mxu0 %v20750_v51 }
 0x807   : > { %v9886_v63 = vadd.f32 %v9885_v45, %v9773_v55  ;;  %12045 = vmatpush2.bf16.msra.mxu0 %v13933_v26  ;;  %v10176_v16 = vmax.f32 %v9884_v49, 0.0  ;;  %v9777_v55 = vadd.f32 %v20551_v2, %v20570_v35  ;;  %v13910_v45 = vcombine.high %v10301_v41, %v10305_v59  ;;  %v10297_v2 = vld [vmem:[%s22272_s18 + $0x268] sm:$0xff]  ;;  %v20791_v35 = vpop.f32.mrf.mxu0 }
 0x808   : > { %v9889_v48 = vpop.f32.mrf.mxu1  ;;  %12046 = vmatprep.subr.bf16.mxu0 %v13926_v54  ;;  %v13917_v54 = vcombine.low %v10309_v33, %v10313_v36 }
 0x809   : > { %v10177_v29 = vmax.f32 %v9886_v63, 0.0  ;;  %v20780_v47 = vpack.c.bf16 %v10176_v16, %v10172_v1  ;;  %v9890_v33 = vadd.f32 %v9889_v48, %v9777_v55  ;;  %v20800_v16 = vrot.slane %v20560_v24, %v22371_v52 }
 0x80a   : > { %v9891_v17 = vpop.f32.mrf.mxu1  ;;  %v9935_v24 = vadd.f32 %v20574_v43, %v20796_v25 }
 0x80b   : > { %v20776_v26 = vpack.c.bf16 %v10177_v29, %v10173_v53  ;;  %12047 = vmatpush2.bf16.msra.mxu0 %v13925_v5  ;;  %v9892_v63 = vadd.f32 %v9891_v17, %v9779_v12  ;;  %v13909_v5 = vcombine.low %v10301_v41, %v10305_v59  ;;  %v13902_v29 = vcombine.high %v10293_v39, %v10297_v2  ;;  %v10285_v17 = vld [vmem:[%s22272_s18 + $0x208] sm:$0xff] }
 0x80c   : > { %v9893_v49 = vpop.f32.mrf.mxu1  ;;  %12048 = vmatprep.subr.bf16.mxu0 %v13918_v58  ;;  %v10289_v12 = vld [vmem:[%s22272_s18 + $0x228] sm:$0xff]  ;;  %v10180_v41 = vmax.f32 %v9890_v33, 0.0  ;;  %v9939_v33 = vadd.f32 %v20589_v15, %v20796_v25 }
 0x80d   : > { %v9894_v60 = vadd.f32 %v9893_v49, %v9781_v13  ;;  %11890 = vmatprep.mubr.bf16.mxu0 %v20776_v26  ;;  %v10181_v1 = vmax.f32 %v9892_v63, 0.0  ;;  %v20808_v13 = vpop.f32.mrf.mxu0  ;;  %v13901_v49 = vcombine.low %v10293_v39, %v10297_v2  ;;  %v13893_v15 = vcombine.low %v10285_v17, %v10289_v12 }
 0x80e   : > { %v9895_v36 = vpop.f32.mrf.mxu1  ;;  %11891 = vmatmul.mubr.bf16.gmra.mxu0 %v20780_v47 }
 0x80f   : > { %v9896_v50 = vadd.f32 %v9895_v36, %v9783_v22  ;;  %12049 = vmatpush2.bf16.msra.mxu0 %v13917_v54  ;;  %v10184_v58 = vmax.f32 %v9894_v60, 0.0  ;;  %v9937_v54 = vadd.f32 %v20581_v32, %v20800_v16  ;;  %v13894_v60 = vcombine.high %v10285_v17, %v10289_v12  ;;  %v10278_v32 = vld [vmem:[%s22272_s18 + $0x1d0] sm:$0xff]  ;;  %v20829_v39 = vpop.f32.mrf.mxu0 }
 0x810   : > { %v10045_v53 = vpop.f32.mrf.mxu1  ;;  %12050 = vmatprep.subr.bf16.mxu0 %v13910_v45  ;;  %v9933_v45 = vadd.f32 %v20572_v14, %v20800_v16  ;;  %v10282_v14 = vld [vmem:[%s22272_s18 + $0x1f0] sm:$0xff] }
 0x811   : > { %v10185_v48 = vmax.f32 %v9896_v50, 0.0  ;;  %v20818_v22 = vpack.c.bf16 %v10184_v58, %v10180_v41  ;;  %v10270_v17 = vld [vmem:[%s22272_s18 + $0x190] sm:$0xff] }
 0x812   : > { %v10047_v59 = vpop.f32.mrf.mxu1  ;;  %v10046_v2 = vadd.f32 %v10045_v53, %v9933_v45  ;;  %v10401_v53 = vld [vmem:[%s22272_s18 + $0x5a8] sm:$0xff]  ;;  %v10274_v12 = vld [vmem:[%s22272_s18 + $0x1b0] sm:$0xff]  ;;  %v9945_v45 = vadd.f32 %v20620_v40, %v20796_v25 }
 0x813   : > { %v20814_v55 = vpack.c.bf16 %v10185_v48, %v10181_v1  ;;  %12051 = vmatpush2.bf16.msra.mxu0 %v13909_v5  ;;  %v10048_v36 = vadd.f32 %v10047_v59, %v9935_v24  ;;  %v13888_v1 = vcombine.high %v10278_v32, %v10282_v14  ;;  %v10397_v59 = vld [vmem:[%s22272_s18 + $0x588] sm:$0xff]  ;;  %v20839_v24 = vpop.f32.mrf.mxu0 }
 0x814   : > { %v10049_v63 = vpop.f32.mrf.mxu1  ;;  %12052 = vmatprep.subr.bf16.mxu0 %v13902_v29 }
 0x815   : > { %v10050_v43 = vadd.f32 %v10049_v63, %v9937_v54  ;;  %11900 = vmatprep.mubr.bf16.mxu0 %v20814_v55  ;;  %v10127_v48 = vmax.f32 %v10048_v36, 0.0  ;;  %v10126_v54 = vmax.f32 %v10046_v2, 0.0  ;;  %v9947_v63 = vadd.f32 %v20641_v37, %v20800_v16 }
 0x816   : > { %v10051_v50 = vpop.f32.mrf.mxu1  ;;  %11901 = vmatmul.mubr.bf16.gmra.mxu0 %v20818_v22  ;;  %v13887_v2 = vcombine.low %v10278_v32, %v10282_v14  ;;  %v13880_v37 = vcombine.high %v10270_v17, %v10274_v12 }
 0x817   : > { %v10052_v5 = vadd.f32 %v10051_v50, %v9939_v33  ;;  %12053 = vmatpush2.bf16.msra.mxu0 %v13901_v49  ;;  %12056 = vmatprep.mubr.bf16.mxu0 %v20594_v7  ;;  %v10130_v58 = vmax.f32 %v10050_v43, 0.0  ;;  %v9943_v33 = vadd.f32 %v20608_v3, %v20800_v16  ;;  %v14006_v50 = vcombine.high %v10397_v59, %v10401_v53  ;;  %v10393_v3 = vld [vmem:[%s22272_s18 + $0x568] sm:$0xff] }
 0x818   : > { %v10055_v29 = vpop.f32.mrf.mxu1  ;;  %12054 = vmatprep.subr.bf16.mxu0 %v13894_v60 }
 0x819   : > { %v10131_v41 = vmax.f32 %v10052_v5, 0.0  ;;  %v20855_v36 = vpack.c.bf16 %v10130_v58, %v10126_v54  ;;  %v9949_v5 = vadd.f32 %v20650_v11, %v20796_v25  ;;  %v20866_v58 = vpop.f32.mrf.mxu0  ;;  %v10056_v32 = vadd.f32 %v10055_v29, %v9943_v33  ;;  %v10262_v11 = vld [vmem:[%s22272_s18 + $0x150] sm:$0xff]  ;;  %v20883_v33 = vld [vmem:[%s22272_s18 + $0x508] sm:$0xff] }
 0x81a   : > { %v10057_v49 = vpop.f32.mrf.mxu1  ;;  %v14005_v29 = vcombine.low %v10397_v59, %v10401_v53  ;;  %v10254_v53 = vld [vmem:[%s22272_s18 + $0x110] sm:$0xff] }
 0x81b   : > { %v20851_v60 = vpack.c.bf16 %v10131_v41, %v10127_v48  ;;  %12055 = vmatpush2.bf16.msra.mxu0 %v13893_v15  ;;  %v10058_v34 = vadd.f32 %v10057_v49, %v9945_v45  ;;  %v10389_v15 = vld [vmem:[%s22272_s18 + $0x548] sm:$0xff]  ;;  %v22372_v41 = vcombine.low %v20500_v30, %v20505_v42  ;;  %v13879_v45 = vcombine.low %v10270_v17, %v10274_v12  ;;  %v10258_v17 = vld [vmem:[%s22272_s18 + $0x130] sm:$0xff]  ;;  %v20896_v12 = vpop.f32.mrf.mxu0 }
 0x81c   : > { %v10059_v43 = vpop.f32.mrf.mxu1  ;;  %12250 = vmatprep.subr.bf16.mxu0 %v13888_v1  ;;  %v10266_v1 = vld [vmem:[%s22272_s18 + $0x170] sm:$0xff] }
 0x81d   : > { %v10060_v40 = vadd.f32 %v10059_v43, %v9947_v63  ;;  %11943 = vmatprep.mubr.bf16.mxu1 %v20851_v60  ;;  %v13998_v63 = vcombine.high %v10389_v15, %v10393_v3  ;;  %v20888_v43 = vld [vmem:[%s22272_s18 + $0x528] sm:$0xff]  ;;  %v10135_v30 = vmax.f32 %v10058_v34, 0.0  ;;  %v13872_v59 = vcombine.high %v10262_v11, %v10266_v1 }
 0x81e   : > { %v10061_v14 = vpop.f32.mrf.mxu1  ;;  %11944 = vmatmul.mubr.bf16.vlgmr.msra.gmra.mxu1 %v20855_v36  ;;  %12057 = vmatmul.mubr.bf16.vlgmr.msra.gmra.mxu0 %v20598_v9  ;;  %v9955_v34 = vadd.f32 %v20680_v62, %v20796_v25  ;;  %v9959_v62 = vadd.f32 %v20710_v18, %v20796_v25  ;;  %v10246_v18 = vld [vmem:[%s22272_s18 + $0xd0] sm:$0xff] }
 0x81f   : > { %v10062_v48 = vadd.f32 %v10061_v14, %v9949_v5  ;;  %12138 = vmatpush1.bf16.msra.mxu1 %v22372_v41  ;;  %12066 = vmatprep.mubr.bf16.mxu0 %v20626_v57  ;;  %v10138_v54 = vmax.f32 %v10060_v40, 0.0  ;;  %v13997_v5 = vcombine.low %v10389_v15, %v10393_v3  ;;  %v13871_v40 = vcombine.low %v10262_v11, %v10266_v1  ;;  %v10373_v11 = vld [vmem:[%s22272_s18 + $0x4c8] sm:$0xff]  ;;  %v20919_v1 = vpop.f32.mrf.mxu0 }
 0x820   : > { %12251 = vmatpush1.bf16.msra.mxu0 %v13887_v2  ;;  %v10065_v49 = vpop.f32.mrf.mxu1  ;;  %12139 = vmatprep.subr.bf16.mxu1 %v14006_v50  ;;  %v10134_v2 = vmax.f32 %v10056_v32, 0.0  ;;  %v9953_v41 = vadd.f32 %v20671_v61, %v20800_v16  ;;  %v13864_v3 = vcombine.high %v10254_v53, %v10258_v17  ;;  %v10377_v61 = vld [vmem:[%s22272_s18 + $0x4e8] sm:$0xff] }
 0x821   : > { %v10139_v42 = vmax.f32 %v10062_v48, 0.0  ;;  %12252 = vmatprep.subr.bf16.mxu0 %v13880_v37  ;;  %v9957_v37 = vadd.f32 %v20701_v21, %v20800_v16  ;;  %v13990_v48 = vcombine.high %v20883_v33, %v20888_v43 }
 0x822   : > { %v10067_v50 = vpop.f32.mrf.mxu1  ;;  %v20908_v28 = vpack.c.bf16 %v10138_v54, %v10134_v2  ;;  %v13982_v2 = vcombine.high %v10373_v11, %v10377_v61 }
 0x823   : > { %v20902_v14 = vpack.c.bf16 %v10139_v42, %v10135_v30  ;;  %12140 = vmatpush1.bf16.msra.mxu1 %v14005_v29  ;;  %v10068_v32 = vadd.f32 %v10067_v50, %v9955_v34  ;;  %v10066_v29 = vadd.f32 %v10065_v49, %v9953_v41  ;;  %v13989_v49 = vcombine.low %v20883_v33, %v20888_v43  ;;  %v20935_v50 = vld [vmem:[%s22272_s18 + $0x488] sm:$0xff]  ;;  %v10238_v43 = vld [vmem:[%s22272_s18 + $0x90] sm:$0xff] }
 0x824   : > { %12253 = vmatpush1.bf16.msra.mxu0 %v13879_v45  ;;  %v10069_v15 = vpop.f32.mrf.mxu1  ;;  %12141 = vmatprep.subr.bf16.mxu1 %v13998_v63  ;;  %v10250_v45 = vld [vmem:[%s22272_s18 + $0xf0] sm:$0xff]  ;;  %v13981_v41 = vcombine.low %v10373_v11, %v10377_v61 }
 0x825   : > { %v10070_v21 = vadd.f32 %v10069_v15, %v9957_v37  ;;  %11953 = vmatprep.mubr.bf16.mxu1 %v20902_v14  ;;  %12254 = vmatprep.subr.bf16.mxu0 %v13872_v59  ;;  %v13863_v59 = vcombine.low %v10254_v53, %v10258_v17  ;;  %v10143_v34 = vmax.f32 %v10068_v32, 0.0  ;;  %v13856_v33 = vcombine.high %v10246_v18, %v10250_v45  ;;  %v10242_v53 = vld [vmem:[%s22272_s18 + $0xb0] sm:$0xff]  ;;  %v20948_v17 = vpop.f32.mrf.mxu0 }
 0x826   : > { %v10071_v54 = vpop.f32.mrf.mxu1  ;;  %11954 = vmatmul.mubr.bf16.gmra.mxu1 %v20908_v28  ;;  %12067 = vmatmul.mubr.bf16.gmra.mxu0 %v20630_v38  ;;  %v13855_v15 = vcombine.low %v10246_v18, %v10250_v45  ;;  %v13848_v61 = vcombine.high %v10238_v43, %v10242_v53  ;;  %v10357_v18 = vld [vmem:[%s22272_s18 + $0x448] sm:$0xff] }
 0x827   : > { %v10072_v63 = vadd.f32 %v10071_v54, %v9959_v62  ;;  %12142 = vmatpush1.bf16.msra.mxu1 %v13997_v5  ;;  %12076 = vmatprep.mubr.bf16.mxu0 %v20656_v31  ;;  %v10146_v30 = vmax.f32 %v10070_v21, 0.0  ;;  %v20940_v5 = vld [vmem:[%s22272_s18 + $0x4a8] sm:$0xff]  ;;  %v9965_v62 = vadd.f32 %v20740_v27, %v20796_v25  ;;  %v9963_v54 = vadd.f32 %v20731_v6, %v20800_v16  ;;  %v20971_v45 = vpop.f32.mrf.mxu0 }
 0x828   : > { %12255 = vmatpush1.bf16.msra.mxu0 %v13871_v40  ;;  %v10075_v42 = vpop.f32.mrf.mxu1  ;;  %12143 = vmatprep.subr.bf16.mxu1 %v13990_v48  ;;  %v10142_v40 = vmax.f32 %v10066_v29, 0.0  ;;  %v13974_v21 = vcombine.high %v20935_v50, %v20940_v5  ;;  %v9969_v27 = vadd.f32 %v20770_v10, %v20796_v25  ;;  %v10361_v6 = vld [vmem:[%s22272_s18 + $0x468] sm:$0xff]  ;;  %v10230_v10 = vld [vmem:[%s22272_s18 + $0x50] sm:$0xff] }
 0x829   : > { %v10147_v37 = vmax.f32 %v10072_v63, 0.0  ;;  %12256 = vmatprep.subr.bf16.mxu0 %v13864_v3  ;;  %v9967_v3 = vadd.f32 %v20761_v0, %v20800_v16 }
 0x82a   : > { %v10077_v48 = vpop.f32.mrf.mxu1  ;;  %v20960_v63 = vpack.c.bf16 %v10146_v30, %v10142_v40  ;;  %v13966_v40 = vcombine.high %v10357_v18, %v10361_v6 }
 0x82b   : > { %v20954_v32 = vpack.c.bf16 %v10147_v37, %v10143_v34  ;;  %12144 = vmatpush1.bf16.msra.mxu1 %v13989_v49  ;;  %v10078_v29 = vadd.f32 %v10077_v48, %v9965_v62  ;;  %v10076_v49 = vadd.f32 %v10075_v42, %v9963_v54  ;;  %v13973_v42 = vcombine.low %v20935_v50, %v20940_v5  ;;  %v20987_v48 = vld [vmem:[%s22272_s18 + $0x408] sm:$0xff]  ;;  %v10222_v5 = vld [vmem:[%s22272_s18 + $0x10] sm:$0xff] }
 0x82c   : > { %12257 = vmatpush1.bf16.msra.mxu0 %v13863_v59  ;;  %v10079_v11 = vpop.f32.mrf.mxu1  ;;  %12145 = vmatprep.subr.bf16.mxu1 %v13982_v2  ;;  %v10234_v59 = vld [vmem:[%s22272_s18 + $0x70] sm:$0xff]  ;;  %v13965_v54 = vcombine.low %v10357_v18, %v10361_v6 }
 0x82d   : > { %v10080_v0 = vadd.f32 %v10079_v11, %v9967_v3  ;;  %11963 = vmatprep.mubr.bf16.mxu1 %v20954_v32  ;;  %12258 = vmatprep.subr.bf16.mxu0 %v13856_v33  ;;  %v13847_v33 = vcombine.low %v10238_v43, %v10242_v53  ;;  %v10151_v62 = vmax.f32 %v10078_v29, 0.0  ;;  %v13840_v50 = vcombine.high %v10230_v10, %v10234_v59  ;;  %v10226_v43 = vld [vmem:[%s22272_s18 + $0x30] sm:$0xff]  ;;  %v21000_v53 = vpop.f32.mrf.mxu0 }
 0x82e   : > { %v10081_v30 = vpop.f32.mrf.mxu1  ;;  %11964 = vmatmul.mubr.bf16.gmra.mxu1 %v20960_v63  ;;  %12077 = vmatmul.mubr.bf16.gmra.mxu0 %v20660_v8  ;;  %v13839_v11 = vcombine.low %v10230_v10, %v10234_v59  ;;  %v13832_v6 = vcombine.high %v10222_v5, %v10226_v43  ;;  %v10469_v10 = vld [vmem:[%s22272_s18 + $0x7c8] sm:$0xff] }
 0x82f   : > { %v10082_v2 = vadd.f32 %v10081_v30, %v9969_v27  ;;  %12146 = vmatpush1.bf16.msra.mxu1 %v13981_v41  ;;  %12086 = vmatprep.mubr.bf16.mxu0 %v20686_v4  ;;  %v10154_v34 = vmax.f32 %v10080_v0, 0.0  ;;  %v20992_v41 = vld [vmem:[%s22272_s18 + $0x428] sm:$0xff]  ;;  %v9975_v27 = vadd.f32 %v20808_v13, %v20796_v25  ;;  %v9973_v30 = vadd.f32 %v20791_v35, %v20800_v16  ;;  %v21023_v59 = vpop.f32.mrf.mxu0 }
 0x830   : > { %12259 = vmatpush1.bf16.msra.mxu0 %v13855_v15  ;;  %v10085_v37 = vpop.f32.mrf.mxu1  ;;  %12147 = vmatprep.subr.bf16.mxu1 %v13974_v21  ;;  %v10150_v15 = vmax.f32 %v10076_v49, 0.0  ;;  %v13958_v0 = vcombine.high %v20987_v48, %v20992_v41  ;;  %v9979_v13 = vadd.f32 %v20839_v24, %v20796_v25  ;;  %v10473_v35 = vld [vmem:[%s22272_s18 + $0x7e8] sm:$0xff]  ;;  %v10342_v24 = vld [vmem:[%s22272_s18 + $0x3d0] sm:$0xff] }
 0x831   : > { %v10155_v3 = vmax.f32 %v10082_v2, 0.0  ;;  %12260 = vmatprep.subr.bf16.mxu0 %v13848_v61  ;;  %v9977_v61 = vadd.f32 %v20829_v39, %v20800_v16 }
 0x832   : > { %v10087_v21 = vpop.f32.mrf.mxu1  ;;  %v21012_v2 = vpack.c.bf16 %v10154_v34, %v10150_v15  ;;  %v14078_v15 = vcombine.high %v10469_v10, %v10473_v35 }
 0x833   : > { %v21006_v29 = vpack.c.bf16 %v10155_v3, %v10151_v62  ;;  %12148 = vmatpush1.bf16.msra.mxu1 %v13973_v42  ;;  %v10088_v49 = vadd.f32 %v10087_v21, %v9975_v27  ;;  %v10086_v42 = vadd.f32 %v10085_v37, %v9973_v30  ;;  %v13957_v37 = vcombine.low %v20987_v48, %v20992_v41  ;;  %v21039_v21 = vld [vmem:[%s22272_s18 + $0x788] sm:$0xff]  ;;  %v10334_v41 = vld [vmem:[%s22272_s18 + $0x390] sm:$0xff] }
 0x834   : > { %12261 = vmatpush1.bf16.msra.mxu0 %v13847_v33  ;;  %v10089_v18 = vpop.f32.mrf.mxu1  ;;  %12149 = vmatprep.subr.bf16.mxu1 %v13966_v40  ;;  %v10346_v33 = vld [vmem:[%s22272_s18 + $0x3f0] sm:$0xff]  ;;  %v14077_v30 = vcombine.low %v10469_v10, %v10473_v35 }
 0x835   : > { %v10090_v39 = vadd.f32 %v10089_v18, %v9977_v61  ;;  %11973 = vmatprep.mubr.bf16.mxu1 %v21006_v29  ;;  %12262 = vmatprep.subr.bf16.mxu0 %v13840_v50  ;;  %v13831_v50 = vcombine.low %v10222_v5, %v10226_v43  ;;  %v10159_v27 = vmax.f32 %v10088_v49, 0.0  ;;  %v13952_v48 = vcombine.high %v10342_v24, %v10346_v33  ;;  %v10338_v5 = vld [vmem:[%s22272_s18 + $0x3b0] sm:$0xff]  ;;  %v21052_v43 = vpop.f32.mrf.mxu0 }
 0x836   : > { %v10091_v34 = vpop.f32.mrf.mxu1  ;;  %11974 = vmatmul.mubr.bf16.gmra.mxu1 %v21012_v2  ;;  %12087 = vmatmul.mubr.bf16.gmra.mxu0 %v20690_v46  ;;  %v13951_v18 = vcombine.low %v10342_v24, %v10346_v33  ;;  %v13944_v35 = vcombine.high %v10334_v41, %v10338_v5  ;;  %v10453_v24 = vld [vmem:[%s22272_s18 + $0x748] sm:$0xff] }
 0x837   : > { %v10092_v40 = vadd.f32 %v10091_v34, %v9979_v13  ;;  %12150 = vmatpush1.bf16.msra.mxu1 %v13965_v54  ;;  %12096 = vmatprep.mubr.bf16.mxu0 %v20716_v20  ;;  %v10162_v62 = vmax.f32 %v10090_v39, 0.0  ;;  %v21044_v54 = vld [vmem:[%s22272_s18 + $0x7a8] sm:$0xff]  ;;  %v9985_v13 = vadd.f32 %v20896_v12, %v20796_v25  ;;  %v9983_v34 = vadd.f32 %v20866_v58, %v20800_v16  ;;  %v21075_v33 = vpop.f32.mrf.mxu0 }
 0x838   : > { %12263 = vmatpush1.bf16.msra.mxu0 %v13839_v11  ;;  %v10095_v3 = vpop.f32.mrf.mxu1  ;;  %12151 = vmatprep.subr.bf16.mxu1 %v13958_v0  ;;  %v10158_v11 = vmax.f32 %v10086_v42, 0.0  ;;  %v14070_v39 = vcombine.high %v21039_v21, %v21044_v54  ;;  %v9989_v12 = vadd.f32 %v20948_v17, %v20796_v25  ;;  %v10457_v58 = vld [vmem:[%s22272_s18 + $0x768] sm:$0xff]  ;;  %v10326_v17 = vld [vmem:[%s22272_s18 + $0x350] sm:$0xff] }
 0x839   : > { %v10163_v61 = vmax.f32 %v10092_v40, 0.0  ;;  %12264 = vmatprep.subr.bf16.mxu0 %v13832_v6  ;;  %v9987_v6 = vadd.f32 %v20919_v1, %v20800_v16 }
 0x83a   : > { %v10097_v0 = vpop.f32.mrf.mxu1  ;;  %v21064_v40 = vpack.c.bf16 %v10162_v62, %v10158_v11  ;;  %v14062_v11 = vcombine.high %v10453_v24, %v10457_v58 }
 0x83b   : > { %v21058_v49 = vpack.c.bf16 %v10163_v61, %v10159_v27  ;;  %12152 = vmatpush1.bf16.msra.mxu1 %v13957_v37  ;;  %v10098_v42 = vadd.f32 %v10097_v0, %v9985_v13  ;;  %v10096_v37 = vadd.f32 %v10095_v3, %v9983_v34  ;;  %v14069_v3 = vcombine.low %v21039_v21, %v21044_v54  ;;  %v21091_v0 = vld [vmem:[%s22272_s18 + $0x708] sm:$0xff]  ;;  %v10318_v54 = vld [vmem:[%s22272_s18 + $0x310] sm:$0xff] }
 0x83c   : > { %12265 = vmatpush1.bf16.msra.mxu0 %v13831_v50  ;;  %v10099_v10 = vpop.f32.mrf.mxu1  ;;  %12153 = vmatprep.subr.bf16.mxu1 %v14078_v15  ;;  %v10330_v50 = vld [vmem:[%s22272_s18 + $0x370] sm:$0xff]  ;;  %v14061_v34 = vcombine.low %v10453_v24, %v10457_v58 }
 0x83d   : > { %v10100_v1 = vadd.f32 %v10099_v10, %v9987_v6  ;;  %11983 = vmatprep.mubr.bf16.mxu1 %v21058_v49  ;;  %12266 = vmatprep.subr.bf16.mxu0 %v13952_v48  ;;  %v13943_v48 = vcombine.low %v10334_v41, %v10338_v5  ;;  %v10167_v13 = vmax.f32 %v10098_v42, 0.0  ;;  %v13936_v21 = vcombine.high %v10326_v17, %v10330_v50  ;;  %v10322_v41 = vld [vmem:[%s22272_s18 + $0x330] sm:$0xff]  ;;  %v10004_v5 = vpop.f32.mrf.mxu0 }
 0x83e   : > { %v10101_v62 = vpop.f32.mrf.mxu1  ;;  %11984 = vmatmul.mubr.bf16.gmra.mxu1 %v21064_v40  ;;  %12097 = vmatmul.mubr.bf16.gmra.mxu0 %v20720_v56  ;;  %v13935_v10 = vcombine.low %v10326_v17, %v10330_v50  ;;  %v13928_v58 = vcombine.high %v10318_v54, %v10322_v41  ;;  %v10437_v17 = vld [vmem:[%s22272_s18 + $0x6c8] sm:$0xff] }
 0x83f   : > { %v10102_v15 = vadd.f32 %v10101_v62, %v9989_v12  ;;  %12154 = vmatpush2.bf16.msra.mxu1 %v14077_v30  ;;  %12106 = vmatprep.mubr.bf16.mxu0 %v20746_v19  ;;  %v10170_v27 = vmax.f32 %v10100_v1, 0.0  ;;  %v21096_v30 = vld [vmem:[%s22272_s18 + $0x728] sm:$0xff]  ;;  %v9995_v12 = vadd.f32 %v21000_v53, %v20796_v25  ;;  %v9993_v62 = vadd.f32 %v20971_v45, %v20800_v16  ;;  %v10006_v50 = vpop.f32.mrf.mxu0 }
 0x840   : > { %12267 = vmatpush2.bf16.msra.mxu0 %v13951_v18  ;;  %v10105_v61 = vpop.f32.mrf.mxu1  ;;  %12155 = vmatprep.subr.bf16.mxu1 %v14070_v39  ;;  %v10166_v18 = vmax.f32 %v10096_v37, 0.0  ;;  %v14054_v1 = vcombine.high %v21091_v0, %v21096_v30  ;;  %v9999_v53 = vadd.f32 %v21052_v43, %v20796_v25  ;;  %v10441_v45 = vld [vmem:[%s22272_s18 + $0x6e8] sm:$0xff]  ;;  %v10310_v43 = vld [vmem:[%s22272_s18 + $0x2d0] sm:$0xff] }
 0x841   : > { %v10171_v6 = vmax.f32 %v10102_v15, 0.0  ;;  %12268 = vmatprep.subr.bf16.mxu0 %v13944_v35  ;;  %v9997_v35 = vadd.f32 %v21023_v59, %v20800_v16 }
 0x842   : > { %v10107_v39 = vpop.f32.mrf.mxu1  ;;  %v21114_v15 = vpack.c.bf16 %v10170_v27, %v10166_v18  ;;  %v14046_v18 = vcombine.high %v10437_v17, %v10441_v45 }
 0x843   : > { %v21108_v42 = vpack.c.bf16 %v10171_v6, %v10167_v13  ;;  %12156 = vmatpush2.bf16.msra.mxu1 %v14069_v3  ;;  %v10108_v37 = vadd.f32 %v10107_v39, %v9995_v12  ;;  %v10106_v3 = vadd.f32 %v10105_v61, %v9993_v62  ;;  %v14053_v61 = vcombine.low %v21091_v0, %v21096_v30  ;;  %v10429_v39 = vld [vmem:[%s22272_s18 + $0x688] sm:$0xff]  ;;  %v10302_v0 = vld [vmem:[%s22272_s18 + $0x290] sm:$0xff] }
 0x844   : > { %12269 = vmatpush2.bf16.msra.mxu0 %v13943_v48  ;;  %v10109_v24 = vpop.f32.mrf.mxu1  ;;  %12157 = vmatprep.subr.bf16.mxu1 %v14062_v11  ;;  %v10314_v48 = vld [vmem:[%s22272_s18 + $0x2f0] sm:$0xff]  ;;  %v10433_v12 = vld [vmem:[%s22272_s18 + $0x6a8] sm:$0xff] }
 0x845   : > { %v10110_v59 = vadd.f32 %v10109_v24, %v9997_v35  ;;  %11993 = vmatprep.mubr.bf16.mxu1 %v21108_v42  ;;  %12270 = vmatprep.subr.bf16.mxu0 %v13936_v21  ;;  %v13927_v21 = vcombine.low %v10318_v54, %v10322_v41  ;;  %v13920_v62 = vcombine.high %v10310_v43, %v10314_v48  ;;  %v10306_v30 = vld [vmem:[%s22272_s18 + $0x2b0] sm:$0xff]  ;;  %v10008_v54 = vpop.f32.mrf.mxu0  ;;  %v10174_v41 = vmax.f32 %v10106_v3, 0.0 }
 0x846   : > { %v10111_v27 = vpop.f32.mrf.mxu1  ;;  %11994 = vmatmul.mubr.bf16.gmra.mxu1 %v21114_v15  ;;  %12107 = vmatmul.mubr.bf16.gmra.mxu0 %v20750_v51  ;;  %v13919_v24 = vcombine.low %v10310_v43, %v10314_v48  ;;  %v13912_v3 = vcombine.high %v10302_v0, %v10306_v30 }
 0x847   : > { %v10112_v11 = vadd.f32 %v10111_v27, %v9999_v53  ;;  %12158 = vmatpush2.bf16.msra.mxu1 %v14061_v34  ;;  %12116 = vmatprep.mubr.bf16.mxu0 %v20776_v26  ;;  %v10178_v13 = vmax.f32 %v10110_v59, 0.0  ;;  %v10175_v34 = vmax.f32 %v10108_v37, 0.0  ;;  %v10005_v53 = vadd.f32 %v10004_v5, %v20796_v25  ;;  %v10421_v5 = vld [vmem:[%s22272_s18 + $0x648] sm:$0xff] }
 0x848   : > { %12271 = vmatpush2.bf16.msra.mxu0 %v13935_v10  ;;  %v10115_v6 = vpop.f32.mrf.mxu1  ;;  %12159 = vmatprep.subr.bf16.mxu1 %v14054_v1  ;;  %v14045_v1 = vcombine.low %v10437_v17, %v10441_v45  ;;  %v10007_v37 = vadd.f32 %v10006_v50, %v20800_v16  ;;  %v10003_v27 = vadd.f32 %v21075_v33, %v20800_v16  ;;  %v10425_v16 = vld [vmem:[%s22272_s18 + $0x668] sm:$0xff] }
 0x849   : > { %v10179_v35 = vmax.f32 %v10112_v11, 0.0  ;;  %12272 = vmatprep.subr.bf16.mxu0 %v13928_v58  ;;  %v14038_v58 = vcombine.high %v10429_v39, %v10433_v12  ;;  %v21154_v11 = vpack.c.bf16 %v10178_v13, %v10174_v41  ;;  %v10009_v17 = vadd.f32 %v10008_v54, %v20796_v25  ;;  %v10298_v25 = vld [vmem:[%s22272_s18 + $0x270] sm:$0xff]  ;;  %v10417_v41 = vld [vmem:[%s22272_s18 + $0x628] sm:$0xff] }
 0x84a   : > { %v10117_v10 = vpop.f32.mrf.mxu1  ;;  %v10116_v33 = vadd.f32 %v10115_v6, %v10003_v27  ;;  %v13911_v6 = vcombine.low %v10302_v0, %v10306_v30  ;;  %v14029_v30 = vcombine.low %v10421_v5, %v10425_v16  ;;  %v10279_v27 = vld [vmem:[%s22272_s18 + $0x1d8] sm:$0xff] }
 0x84b   : > { %v21150_v59 = vpack.c.bf16 %v10179_v35, %v10175_v34  ;;  %12160 = vmatpush2.bf16.msra.mxu1 %v14053_v61  ;;  %v10118_v45 = vadd.f32 %v10117_v10, %v10005_v53  ;;  %v14037_v61 = vcombine.low %v10429_v39, %v10433_v12  ;;  %v10286_v39 = vld [vmem:[%s22272_s18 + $0x210] sm:$0xff] }
 0x84c   : > { %12273 = vmatpush2.bf16.msra.mxu0 %v13927_v21  ;;  %v10119_v52 = vpop.f32.mrf.mxu1  ;;  %12161 = vmatprep.subr.bf16.mxu1 %v14046_v18  ;;  %v14030_v21 = vcombine.high %v10421_v5, %v10425_v16  ;;  %v10182_v54 = vmax.f32 %v10116_v33, 0.0  ;;  %v10290_v12 = vld [vmem:[%s22272_s18 + $0x230] sm:$0xff] }
 0x84d   : > { %v10120_v43 = vadd.f32 %v10119_v52, %v10007_v37  ;;  %12003 = vmatprep.mubr.bf16.mxu1 %v21150_v59  ;;  %12274 = vmatprep.subr.bf16.mxu0 %v13920_v62  ;;  %v10294_v52 = vld [vmem:[%s22272_s18 + $0x250] sm:$0xff]  ;;  %v10183_v18 = vmax.f32 %v10118_v45, 0.0  ;;  %v10413_v62 = vld [vmem:[%s22272_s18 + $0x608] sm:$0xff]  ;;  %v13896_v53 = vcombine.high %v10286_v39, %v10290_v12  ;;  %v13895_v45 = vcombine.low %v10286_v39, %v10290_v12 }
 0x84e   : > { %v10121_v50 = vpop.f32.mrf.mxu1  ;;  %12004 = vmatmul.mubr.bf16.gmra.mxu1 %v21154_v11  ;;  %12117 = vmatmul.mubr.bf16.gmra.mxu0 %v20780_v47  ;;  %v13904_v35 = vcombine.high %v10294_v52, %v10298_v25  ;;  %v10406_v37 = vld [vmem:[%s22272_s18 + $0x5d0] sm:$0xff] }
 0x84f   : > { %v10122_v48 = vadd.f32 %v10121_v50, %v10009_v17  ;;  %12162 = vmatpush2.bf16.msra.mxu1 %v14045_v1  ;;  %12126 = vmatprep.mubr.bf16.mxu0 %v20814_v55  ;;  %v10186_v13 = vmax.f32 %v10120_v43, 0.0  ;;  %v13903_v1 = vcombine.low %v10294_v52, %v10298_v25  ;;  %v14021_v17 = vcombine.low %v10413_v62, %v10417_v41  ;;  %v10398_v16 = vld [vmem:[%s22272_s18 + $0x590] sm:$0xff]  ;;  %v10271_v52 = vld [vmem:[%s22272_s18 + $0x198] sm:$0xff] }
 0x850   : > { %12275 = vmatpush2.bf16.msra.mxu0 %v13919_v24  ;;  %12163 = vmatprep.subr.bf16.mxu1 %v14038_v58  ;;  %v14022_v24 = vcombine.high %v10413_v62, %v10417_v41  ;;  %v10410_v58 = vld [vmem:[%s22272_s18 + $0x5f0] sm:$0xff]  ;;  %v10275_v25 = vld [vmem:[%s22272_s18 + $0x1b8] sm:$0xff] }
 0x851   : > { %v10187_v34 = vmax.f32 %v10122_v48, 0.0  ;;  %12276 = vmatprep.subr.bf16.mxu0 %v13912_v3  ;;  %v21187_v10 = vpack.c.bf16 %v10186_v13, %v10182_v54  ;;  %v10283_v3 = vld [vmem:[%s22272_s18 + $0x1f8] sm:$0xff]  ;;  %v14016_v43 = vcombine.high %v10406_v37, %v10410_v58  ;;  %v10402_v33 = vld [vmem:[%s22272_s18 + $0x5b0] sm:$0xff]  ;;  %v14015_v50 = vcombine.low %v10406_v37, %v10410_v58 }
 0x852   : > { %v13890_v5 = vcombine.high %v10279_v27, %v10283_v3  ;;  %v13889_v48 = vcombine.low %v10279_v27, %v10283_v3  ;;  %v10390_v13 = vld [vmem:[%s22272_s18 + $0x550] sm:$0xff]  ;;  %v13881_v54 = vcombine.low %v10271_v52, %v10275_v25 }
 0x853   : > { %v21185_v0 = vpack.c.bf16 %v10187_v34, %v10183_v18  ;;  %12164 = vmatpush2.bf16.msra.mxu1 %v14037_v61  ;;  %v14008_v61 = vcombine.high %v10398_v16, %v10402_v33  ;;  %v14007_v18 = vcombine.low %v10398_v16, %v10402_v33  ;;  %v10263_v34 = vld [vmem:[%s22272_s18 + $0x158] sm:$0xff]  ;;  %v10382_v39 = vld [vmem:[%s22272_s18 + $0x510] sm:$0xff] }
 0x854   : > { %12277 = vmatpush2.bf16.msra.mxu0 %v13911_v6  ;;  %12165 = vmatprep.subr.bf16.mxu1 %v14030_v21  ;;  %v10394_v6 = vld [vmem:[%s22272_s18 + $0x570] sm:$0xff]  ;;  %v13882_v21 = vcombine.high %v10271_v52, %v10275_v25 }
 0x855   : > { %12013 = vmatprep.mubr.bf16.mxu1 %v21185_v0  ;;  %12278 = vmatprep.subr.bf16.mxu0 %v13904_v35  ;;  %v10267_v35 = vld [vmem:[%s22272_s18 + $0x178] sm:$0xff]  ;;  %v14000_v62 = vcombine.high %v10390_v13, %v10394_v6  ;;  %v10386_v12 = vld [vmem:[%s22272_s18 + $0x530] sm:$0xff] }
 0x856   : > { %12014 = vmatmul.mubr.bf16.gmra.mxu1 %v21187_v10  ;;  %12127 = vmatmul.mubr.bf16.gmra.mxu0 %v20818_v22  ;;  %v13874_v41 = vcombine.high %v10263_v34, %v10267_v35  ;;  %v13992_v37 = vcombine.high %v10382_v39, %v10386_v12  ;;  %v10374_v58 = vld [vmem:[%s22272_s18 + $0x4d0] sm:$0xff] }
 0x857   : > { %12166 = vmatpush2.bf16.msra.mxu1 %v14029_v30  ;;  %12169 = vmatprep.mubr.bf16.mxu1 %v20851_v60  ;;  %v13999_v30 = vcombine.low %v10390_v13, %v10394_v6  ;;  %v10378_v27 = vld [vmem:[%s22272_s18 + $0x4f0] sm:$0xff] }
 0x858   : > { %12279 = vmatpush2.bf16.msra.mxu0 %v13903_v1  ;;  %12282 = vmatprep.mubr.bf16.mxu0 %v20594_v7  ;;  %v10255_v1 = vld [vmem:[%s22272_s18 + $0x118] sm:$0xff]  ;;  %v10370_v52 = vld [vmem:[%s22272_s18 + $0x4b0] sm:$0xff]  ;;  %v13983_v25 = vcombine.low %v10374_v58, %v10378_v27 }
 0x859   : > { %12167 = vmatprep.subr.bf16.mxu1 %v14022_v24  ;;  %12280 = vmatprep.subr.bf16.mxu0 %v13896_v53  ;;  %v10259_v24 = vld [vmem:[%s22272_s18 + $0x138] sm:$0xff]  ;;  %v13873_v53 = vcombine.low %v10263_v34, %v10267_v35 }
 0x85a   : > { %v13866_v3 = vcombine.high %v10255_v1, %v10259_v24  ;;  %v13865_v16 = vcombine.low %v10255_v1, %v10259_v24  ;;  %v10354_v1 = vld [vmem:[%s22272_s18 + $0x430] sm:$0xff] }
 0x85b   : > { %12168 = vmatpush2.bf16.msra.mxu1 %v14021_v17  ;;  %v13991_v17 = vcombine.low %v10382_v39, %v10386_v12 }
 0x85c   : > { %12281 = vmatpush2.bf16.msra.mxu0 %v13895_v45  ;;  %12363 = vmatprep.subr.bf16.mxu1 %v14016_v43  ;;  %v10247_v45 = vld [vmem:[%s22272_s18 + $0xd8] sm:$0xff] }
 0x85d   : > { %12476 = vmatprep.subr.bf16.mxu0 %v13890_v5  ;;  %v10251_v43 = vld [vmem:[%s22272_s18 + $0xf8] sm:$0xff]  ;;  %v13984_v5 = vcombine.high %v10374_v58, %v10378_v27 }
 0x85e   : > { %12170 = vmatmul.mubr.bf16.vlgmr.msra.gmra.mxu1 %v20855_v36  ;;  %v13858_v33 = vcombine.high %v10247_v45, %v10251_v43  ;;  %v13857_v13 = vcombine.low %v10247_v45, %v10251_v43 }
 0x85f   : > { %12283 = vmatmul.mubr.bf16.vlgmr.msra.gmra.mxu0 %v20598_v9  ;;  %12364 = vmatpush1.bf16.msra.mxu1 %v14015_v50  ;;  %v10366_v50 = vld [vmem:[%s22272_s18 + $0x490] sm:$0xff] }
 0x860   : > { %12179 = vmatprep.mubr.bf16.mxu1 %v20902_v14  ;;  %12292 = vmatprep.mubr.bf16.mxu0 %v20626_v57  ;;  %v13976_v6 = vcombine.high %v10366_v50, %v10370_v52  ;;  %v13975_v35 = vcombine.low %v10366_v50, %v10370_v52 }
 0x861   : > { %12477 = vmatpush1.bf16.msra.mxu0 %v13889_v48  ;;  %12365 = vmatprep.subr.bf16.mxu1 %v14008_v61  ;;  %v10239_v48 = vld [vmem:[%s22272_s18 + $0x98] sm:$0xff] }
 0x862   : > { %12478 = vmatprep.subr.bf16.mxu0 %v13882_v21  ;;  %v10243_v61 = vld [vmem:[%s22272_s18 + $0xb8] sm:$0xff]  ;;  %v10358_v21 = vld [vmem:[%s22272_s18 + $0x450] sm:$0xff] }
 0x863   : > { %12366 = vmatpush1.bf16.msra.mxu1 %v14007_v18  ;;  %v10362_v18 = vld [vmem:[%s22272_s18 + $0x470] sm:$0xff]  ;;  %v13850_v34 = vcombine.high %v10239_v48, %v10243_v61  ;;  %v13849_v39 = vcombine.low %v10239_v48, %v10243_v61 }
 0x864   : > { %12367 = vmatprep.subr.bf16.mxu1 %v14000_v62  ;;  %v10231_v62 = vld [vmem:[%s22272_s18 + $0x58] sm:$0xff]  ;;  %v13967_v24 = vcombine.low %v10358_v21, %v10362_v18  ;;  %v10466_v48 = vld [vmem:[%s22272_s18 + $0x7b0] sm:$0xff] }
 0x865   : > { %12479 = vmatpush1.bf16.msra.mxu0 %v13881_v54  ;;  %v10235_v54 = vld [vmem:[%s22272_s18 + $0x78] sm:$0xff] }
 0x866   : > { %12180 = vmatmul.mubr.bf16.gmra.mxu1 %v20908_v28  ;;  %12480 = vmatprep.subr.bf16.mxu0 %v13874_v41  ;;  %v13968_v41 = vcombine.high %v10358_v21, %v10362_v18  ;;  %v13842_v12 = vcombine.high %v10231_v62, %v10235_v54  ;;  %v13841_v58 = vcombine.low %v10231_v62, %v10235_v54 }
 0x867   : > { %12293 = vmatmul.mubr.bf16.gmra.mxu0 %v20630_v38  ;;  %12368 = vmatpush1.bf16.msra.mxu1 %v13999_v30  ;;  %v10350_v30 = vld [vmem:[%s22272_s18 + $0x410] sm:$0xff] }
 0x868   : > { %12189 = vmatprep.mubr.bf16.mxu1 %v20954_v32  ;;  %12302 = vmatprep.mubr.bf16.mxu0 %v20656_v31  ;;  %v13960_v27 = vcombine.high %v10350_v30, %v10354_v1  ;;  %v13959_v43 = vcombine.low %v10350_v30, %v10354_v1 }
 0x869   : > { %12481 = vmatpush1.bf16.msra.mxu0 %v13873_v53  ;;  %12369 = vmatprep.subr.bf16.mxu1 %v13992_v37  ;;  %v10223_v53 = vld [vmem:[%s22272_s18 + $0x18] sm:$0xff] }
 0x86a   : > { %12482 = vmatprep.subr.bf16.mxu0 %v13866_v3  ;;  %v10227_v37 = vld [vmem:[%s22272_s18 + $0x38] sm:$0xff]  ;;  %v10470_v3 = vld [vmem:[%s22272_s18 + $0x7d0] sm:$0xff] }
 0x86b   : > { %12370 = vmatpush1.bf16.msra.mxu1 %v13991_v17  ;;  %v10474_v17 = vld [vmem:[%s22272_s18 + $0x7f0] sm:$0xff]  ;;  %v13834_v45 = vcombine.high %v10223_v53, %v10227_v37  ;;  %v13833_v50 = vcombine.low %v10223_v53, %v10227_v37 }
 0x86c   : > { %12371 = vmatprep.subr.bf16.mxu1 %v13984_v5  ;;  %v10343_v5 = vld [vmem:[%s22272_s18 + $0x3d8] sm:$0xff]  ;;  %v14079_v61 = vcombine.low %v10470_v3, %v10474_v17  ;;  %v10450_v53 = vld [vmem:[%s22272_s18 + $0x730] sm:$0xff] }
 0x86d   : > { %12483 = vmatpush1.bf16.msra.mxu0 %v13865_v16  ;;  %v10347_v16 = vld [vmem:[%s22272_s18 + $0x3f8] sm:$0xff] }
 0x86e   : > { %12190 = vmatmul.mubr.bf16.gmra.mxu1 %v20960_v63  ;;  %12484 = vmatprep.subr.bf16.mxu0 %v13858_v33  ;;  %v14080_v33 = vcombine.high %v10470_v3, %v10474_v17  ;;  %v13954_v52 = vcombine.high %v10343_v5, %v10347_v16  ;;  %v13953_v21 = vcombine.low %v10343_v5, %v10347_v16 }
 0x86f   : > { %12303 = vmatmul.mubr.bf16.gmra.mxu0 %v20660_v8  ;;  %12372 = vmatpush1.bf16.msra.mxu1 %v13983_v25  ;;  %v10462_v25 = vld [vmem:[%s22272_s18 + $0x790] sm:$0xff] }
 0x870   : > { %12199 = vmatprep.mubr.bf16.mxu1 %v21006_v29  ;;  %12312 = vmatprep.mubr.bf16.mxu0 %v20686_v4  ;;  %v14072_v18 = vcombine.high %v10462_v25, %v10466_v48  ;;  %v14071_v54 = vcombine.low %v10462_v25, %v10466_v48 }
 0x871   : > { %12485 = vmatpush1.bf16.msra.mxu0 %v13857_v13  ;;  %12373 = vmatprep.subr.bf16.mxu1 %v13976_v6  ;;  %v10335_v13 = vld [vmem:[%s22272_s18 + $0x398] sm:$0xff] }
 0x872   : > { %12486 = vmatprep.subr.bf16.mxu0 %v13850_v34  ;;  %v10339_v6 = vld [vmem:[%s22272_s18 + $0x3b8] sm:$0xff]  ;;  %v10454_v34 = vld [vmem:[%s22272_s18 + $0x750] sm:$0xff] }
 0x873   : > { %12374 = vmatpush1.bf16.msra.mxu1 %v13975_v35  ;;  %v10458_v35 = vld [vmem:[%s22272_s18 + $0x770] sm:$0xff]  ;;  %v13946_v62 = vcombine.high %v10335_v13, %v10339_v6  ;;  %v13945_v30 = vcombine.low %v10335_v13, %v10339_v6 }
 0x874   : > { %12375 = vmatprep.subr.bf16.mxu1 %v13968_v41  ;;  %v10327_v41 = vld [vmem:[%s22272_s18 + $0x358] sm:$0xff]  ;;  %v14063_v37 = vcombine.low %v10454_v34, %v10458_v35  ;;  %v10434_v13 = vld [vmem:[%s22272_s18 + $0x6b0] sm:$0xff] }
 0x875   : > { %12487 = vmatpush1.bf16.msra.mxu0 %v13849_v39  ;;  %v10331_v39 = vld [vmem:[%s22272_s18 + $0x378] sm:$0xff] }
 0x876   : > { %12200 = vmatmul.mubr.bf16.gmra.mxu1 %v21012_v2  ;;  %12488 = vmatprep.subr.bf16.mxu0 %v13842_v12  ;;  %v14064_v12 = vcombine.high %v10454_v34, %v10458_v35  ;;  %v13938_v1 = vcombine.high %v10327_v41, %v10331_v39  ;;  %v13937_v3 = vcombine.low %v10327_v41, %v10331_v39 }
 0x877   : > { %12313 = vmatmul.mubr.bf16.gmra.mxu0 %v20690_v46  ;;  %12376 = vmatpush1.bf16.msra.mxu1 %v13967_v24  ;;  %v10446_v24 = vld [vmem:[%s22272_s18 + $0x710] sm:$0xff] }
 0x878   : > { %12209 = vmatprep.mubr.bf16.mxu1 %v21058_v49  ;;  %12322 = vmatprep.mubr.bf16.mxu0 %v20716_v20  ;;  %v14056_v17 = vcombine.high %v10446_v24, %v10450_v53  ;;  %v14055_v16 = vcombine.low %v10446_v24, %v10450_v53 }
 0x879   : > { %12489 = vmatpush1.bf16.msra.mxu0 %v13841_v58  ;;  %12377 = vmatprep.subr.bf16.mxu1 %v13960_v27  ;;  %v10319_v58 = vld [vmem:[%s22272_s18 + $0x318] sm:$0xff] }
 0x87a   : > { %12490 = vmatprep.subr.bf16.mxu0 %v13834_v45  ;;  %v10323_v27 = vld [vmem:[%s22272_s18 + $0x338] sm:$0xff]  ;;  %v10438_v45 = vld [vmem:[%s22272_s18 + $0x6d0] sm:$0xff] }
 0x87b   : > { %12378 = vmatpush1.bf16.msra.mxu1 %v13959_v43  ;;  %v10442_v43 = vld [vmem:[%s22272_s18 + $0x6f0] sm:$0xff]  ;;  %v13930_v5 = vcombine.high %v10319_v58, %v10323_v27  ;;  %v13929_v25 = vcombine.low %v10319_v58, %v10323_v27 }
 0x87c   : > { %12379 = vmatprep.subr.bf16.mxu1 %v14080_v33  ;;  %v10311_v33 = vld [vmem:[%s22272_s18 + $0x2d8] sm:$0xff]  ;;  %v14047_v6 = vcombine.low %v10438_v45, %v10442_v43  ;;  %v10418_v58 = vld [vmem:[%s22272_s18 + $0x630] sm:$0xff] }
 0x87d   : > { %12491 = vmatpush1.bf16.msra.mxu0 %v13833_v50  ;;  %v10315_v50 = vld [vmem:[%s22272_s18 + $0x2f8] sm:$0xff] }
 0x87e   : > { %12210 = vmatmul.mubr.bf16.gmra.mxu1 %v21064_v40  ;;  %12492 = vmatprep.subr.bf16.mxu0 %v13954_v52  ;;  %v14048_v52 = vcombine.high %v10438_v45, %v10442_v43  ;;  %v13922_v48 = vcombine.high %v10311_v33, %v10315_v50  ;;  %v13921_v34 = vcombine.low %v10311_v33, %v10315_v50 }
 0x87f   : > { %12323 = vmatmul.mubr.bf16.gmra.mxu0 %v20720_v56  ;;  %12380 = vmatpush2.bf16.msra.mxu1 %v14079_v61  ;;  %v10430_v61 = vld [vmem:[%s22272_s18 + $0x690] sm:$0xff] }
 0x880   : > { %12219 = vmatprep.mubr.bf16.mxu1 %v21108_v42  ;;  %12332 = vmatprep.mubr.bf16.mxu0 %v20746_v19  ;;  %v14040_v35 = vcombine.high %v10430_v61, %v10434_v13  ;;  %v14039_v39 = vcombine.low %v10430_v61, %v10434_v13  ;;  %v10403_v61 = vld [vmem:[%s22272_s18 + $0x5b8] sm:$0xff] }
 0x881   : > { %12493 = vmatpush2.bf16.msra.mxu0 %v13953_v21  ;;  %12381 = vmatprep.subr.bf16.mxu1 %v14072_v18  ;;  %v10303_v21 = vld [vmem:[%s22272_s18 + $0x298] sm:$0xff] }
 0x882   : > { %12494 = vmatprep.subr.bf16.mxu0 %v13946_v62  ;;  %v10307_v18 = vld [vmem:[%s22272_s18 + $0x2b8] sm:$0xff]  ;;  %v10422_v62 = vld [vmem:[%s22272_s18 + $0x650] sm:$0xff] }
 0x883   : > { %12382 = vmatpush2.bf16.msra.mxu1 %v14071_v54  ;;  %v10426_v54 = vld [vmem:[%s22272_s18 + $0x670] sm:$0xff]  ;;  %v13914_v41 = vcombine.high %v10303_v21, %v10307_v18  ;;  %v13913_v24 = vcombine.low %v10303_v21, %v10307_v18  ;;  %v10395_v21 = vld [vmem:[%s22272_s18 + $0x578] sm:$0xff] }
 0x884   : > { %12383 = vmatprep.subr.bf16.mxu1 %v14064_v12  ;;  %v10295_v12 = vld [vmem:[%s22272_s18 + $0x258] sm:$0xff]  ;;  %v14031_v27 = vcombine.low %v10422_v62, %v10426_v54 }
 0x885   : > { %12495 = vmatpush2.bf16.msra.mxu0 %v13945_v30  ;;  %v10299_v30 = vld [vmem:[%s22272_s18 + $0x278] sm:$0xff] }
 0x886   : > { %12220 = vmatmul.mubr.bf16.gmra.mxu1 %v21114_v15  ;;  %12496 = vmatprep.subr.bf16.mxu0 %v13938_v1  ;;  %v14032_v1 = vcombine.high %v10422_v62, %v10426_v54  ;;  %v13906_v53 = vcombine.high %v10295_v12, %v10299_v30  ;;  %v13905_v45 = vcombine.low %v10295_v12, %v10299_v30  ;;  %v10383_v54 = vld [vmem:[%s22272_s18 + $0x518] sm:$0xff] }
 0x887   : > { %12333 = vmatmul.mubr.bf16.gmra.mxu0 %v20750_v51  ;;  %12384 = vmatpush2.bf16.msra.mxu1 %v14063_v37  ;;  %v10414_v37 = vld [vmem:[%s22272_s18 + $0x610] sm:$0xff] }
 0x888   : > { %12229 = vmatprep.mubr.bf16.mxu1 %v21150_v59  ;;  %12342 = vmatprep.mubr.bf16.mxu0 %v20776_v26  ;;  %v14024_v43 = vcombine.high %v10414_v37, %v10418_v58  ;;  %v14023_v50 = vcombine.low %v10414_v37, %v10418_v58 }
 0x889   : > { %12497 = vmatpush2.bf16.msra.mxu0 %v13937_v3  ;;  %12385 = vmatprep.subr.bf16.mxu1 %v14056_v17  ;;  %v10287_v3 = vld [vmem:[%s22272_s18 + $0x218] sm:$0xff] }
 0x88a   : > { %12498 = vmatprep.subr.bf16.mxu0 %v13930_v5  ;;  %v10291_v17 = vld [vmem:[%s22272_s18 + $0x238] sm:$0xff] }
 0x88b   : > { %12386 = vmatpush2.bf16.msra.mxu1 %v14055_v16  ;;  %v10407_v5 = vld [vmem:[%s22272_s18 + $0x5d8] sm:$0xff]  ;;  %v13898_v33 = vcombine.high %v10287_v3, %v10291_v17 }
 0x88c   : > { %12387 = vmatprep.subr.bf16.mxu1 %v14048_v52  ;;  %v10411_v16 = vld [vmem:[%s22272_s18 + $0x5f8] sm:$0xff] }
 0x88d   : > { %12499 = vmatpush2.bf16.msra.mxu0 %v13929_v25  ;;  %v14018_v52 = vcombine.high %v10407_v5, %v10411_v16  ;;  %v13897_v25 = vcombine.low %v10287_v3, %v10291_v17  ;;  %v14017_v13 = vcombine.low %v10407_v5, %v10411_v16  ;;  %v10371_v3 = vld [vmem:[%s22272_s18 + $0x4b8] sm:$0xff] }
 0x88e   : > { %12230 = vmatmul.mubr.bf16.gmra.mxu1 %v21154_v11  ;;  %12500 = vmatprep.subr.bf16.mxu0 %v13922_v48  ;;  %v10399_v48 = vld [vmem:[%s22272_s18 + $0x598] sm:$0xff] }
 0x88f   : > { %12343 = vmatmul.mubr.bf16.gmra.mxu0 %v20780_v47  ;;  %12388 = vmatpush2.bf16.msra.mxu1 %v14047_v6  ;;  %v14010_v6 = vcombine.high %v10399_v48, %v10403_v61  ;;  %v10363_v5 = vld [vmem:[%s22272_s18 + $0x478] sm:$0xff] }
 0x890   : > { %12239 = vmatprep.mubr.bf16.mxu1 %v21185_v0  ;;  %12352 = vmatprep.mubr.bf16.mxu0 %v20814_v55 }
 0x891   : > { %12501 = vmatpush2.bf16.msra.mxu0 %v13921_v34  ;;  %12389 = vmatprep.subr.bf16.mxu1 %v14040_v35  ;;  %v14009_v34 = vcombine.low %v10399_v48, %v10403_v61  ;;  %v10355_v48 = vld [vmem:[%s22272_s18 + $0x438] sm:$0xff] }
 0x892   : > { %12502 = vmatprep.subr.bf16.mxu0 %v13914_v41  ;;  %v10387_v41 = vld [vmem:[%s22272_s18 + $0x538] sm:$0xff] }
 0x893   : > { %12390 = vmatpush2.bf16.msra.mxu1 %v14039_v39 }
 0x894   : > { %12391 = vmatprep.subr.bf16.mxu1 %v14032_v1  ;;  %v10379_v1 = vld [vmem:[%s22272_s18 + $0x4f8] sm:$0xff] }
 0x895   : > { %12503 = vmatpush2.bf16.msra.mxu0 %v13913_v24 }
 0x896   : > { %12240 = vmatmul.mubr.bf16.gmra.mxu1 %v21187_v10  ;;  %12504 = vmatprep.subr.bf16.mxu0 %v13906_v53  ;;  %v13993_v53 = vcombine.low %v10383_v54, %v10387_v41 }
 0x897   : > { %12353 = vmatmul.mubr.bf16.gmra.mxu0 %v20818_v22  ;;  %12392 = vmatpush2.bf16.msra.mxu1 %v14031_v27  ;;  %v10367_v27 = vld [vmem:[%s22272_s18 + $0x498] sm:$0xff] }
 0x898   : > { %12395 = vmatprep.mubr.bf16.mxu1 %v20851_v60  ;;  %12508 = vmatprep.mubr.bf16.mxu0 %v20594_v7  ;;  %v10391_v7 = vld [vmem:[%s22272_s18 + $0x558] sm:$0xff] }
 0x899   : > { %12505 = vmatpush2.bf16.msra.mxu0 %v13905_v45  ;;  %12393 = vmatprep.subr.bf16.mxu1 %v14024_v43  ;;  %v14002_v62 = vcombine.high %v10391_v7, %v10395_v21  ;;  %v14001_v12 = vcombine.low %v10391_v7, %v10395_v21  ;;  %v10475_v7 = vld [vmem:[%s22272_s18 + $0x7f8] sm:$0xff] }
 0x89a   : > { %12506 = vmatprep.subr.bf16.mxu0 %v13898_v33  ;;  %v13977_v33 = vcombine.low %v10367_v27, %v10371_v3 }
 0x89b   : > { %12394 = vmatpush2.bf16.msra.mxu1 %v14023_v50 }
 0x89c   : > { %12589 = vmatprep.subr.bf16.mxu1 %v14018_v52 }
 0x89d   : > { %12507 = vmatpush2.bf16.msra.mxu0 %v13897_v25  ;;  %v10351_v25 = vld [vmem:[%s22272_s18 + $0x418] sm:$0xff] }
 0x89e   : > { %v21436_v18 = vpop.f32.mrf.mxu0  ;;  %12396 = vmatmul.mubr.bf16.vlgmr.msra.gmra.mxu1 %v20855_v36 }
 0x89f   : > { %12590 = vmatpush1.bf16.msra.mxu1 %v14017_v13  ;;  %12405 = vmatprep.mubr.bf16.mxu1 %v20902_v14 }
 0x8a0   : > { %12509 = vmatmul.mubr.bf16.vlgmr.msra.gmra.mxu0 %v20598_v9  ;;  %v21441_v35 = vpop.f32.mrf.mxu0  ;;  %12591 = vmatprep.subr.bf16.mxu1 %v14010_v6  ;;  %v13994_v9 = vcombine.high %v10383_v54, %v10387_v41  ;;  %v10463_v41 = vld [vmem:[%s22272_s18 + $0x798] sm:$0xff] }
 0x8a1   : > { %12518 = vmatprep.mubr.bf16.mxu0 %v20626_v57  ;;  %v10375_v57 = vld [vmem:[%s22272_s18 + $0x4d8] sm:$0xff] }
 0x8a2   : > { %v21450_v39 = vpop.f32.mrf.mxu0  ;;  %v13986_v58 = vcombine.high %v10375_v57, %v10379_v1  ;;  %v13985_v45 = vcombine.low %v10375_v57, %v10379_v1 }
 0x8a3   : > { %12592 = vmatpush1.bf16.msra.mxu1 %v14009_v34  ;;  %v13961_v34 = vcombine.low %v10351_v25, %v10355_v48 }
 0x8a4   : > { %v21452_v30 = vpop.f32.mrf.mxu0  ;;  %12593 = vmatprep.subr.bf16.mxu1 %v14002_v62 }
 0x8a6   : > { %v21460_v24 = vpop.f32.mrf.mxu0  ;;  %12406 = vmatmul.mubr.bf16.gmra.mxu1 %v20908_v28 }
 0x8a7   : > { %12594 = vmatpush1.bf16.msra.mxu1 %v14001_v12  ;;  %12415 = vmatprep.mubr.bf16.mxu1 %v20954_v32  ;;  %v10467_v12 = vld [vmem:[%s22272_s18 + $0x7b8] sm:$0xff] }
 0x8a8   : > { %12519 = vmatmul.mubr.bf16.gmra.mxu0 %v20630_v38  ;;  %v21465_v37 = vpop.f32.mrf.mxu0  ;;  %12595 = vmatprep.subr.bf16.mxu1 %v13994_v9  ;;  %v13978_v38 = vcombine.high %v10367_v27, %v10371_v3  ;;  %v14073_v27 = vcombine.low %v10463_v41, %v10467_v12 }
 0x8a9   : > { %12528 = vmatprep.mubr.bf16.mxu0 %v20656_v31  ;;  %v10359_v31 = vld [vmem:[%s22272_s18 + $0x458] sm:$0xff] }
 0x8aa   : > { %v21474_v17 = vpop.f32.mrf.mxu0  ;;  %v13970_v52 = vcombine.high %v10359_v31, %v10363_v5  ;;  %v13969_v13 = vcombine.low %v10359_v31, %v10363_v5  ;;  %v10451_v31 = vld [vmem:[%s22272_s18 + $0x738] sm:$0xff] }
 0x8ab   : > { %12596 = vmatpush1.bf16.msra.mxu1 %v13993_v53  ;;  %v10459_v53 = vld [vmem:[%s22272_s18 + $0x778] sm:$0xff] }
 0x8ac   : > { %v21476_v43 = vpop.f32.mrf.mxu0  ;;  %12597 = vmatprep.subr.bf16.mxu1 %v13986_v58 }
 0x8ae   : > { %v21484_v16 = vpop.f32.mrf.mxu0  ;;  %12416 = vmatmul.mubr.bf16.gmra.mxu1 %v20960_v63 }
 0x8af   : > { %12598 = vmatpush1.bf16.msra.mxu1 %v13985_v45  ;;  %12425 = vmatprep.mubr.bf16.mxu1 %v21006_v29 }
 0x8b0   : > { %12529 = vmatmul.mubr.bf16.gmra.mxu0 %v20660_v8  ;;  %v21489_v50 = vpop.f32.mrf.mxu0  ;;  %12599 = vmatprep.subr.bf16.mxu1 %v13978_v38  ;;  %v13962_v8 = vcombine.high %v10351_v25, %v10355_v48  ;;  %v10447_v38 = vld [vmem:[%s22272_s18 + $0x718] sm:$0xff] }
 0x8b1   : > { %12538 = vmatprep.mubr.bf16.mxu0 %v20686_v4  ;;  %v10471_v4 = vld [vmem:[%s22272_s18 + $0x7d8] sm:$0xff] }
 0x8b2   : > { %v21498_v61 = vpop.f32.mrf.mxu0  ;;  %v14082_v54 = vcombine.high %v10471_v4, %v10475_v7  ;;  %v14081_v57 = vcombine.low %v10471_v4, %v10475_v7  ;;  %v10443_v25 = vld [vmem:[%s22272_s18 + $0x6f8] sm:$0xff] }
 0x8b3   : > { %12600 = vmatpush1.bf16.msra.mxu1 %v13977_v33  ;;  %v10431_v7 = vld [vmem:[%s22272_s18 + $0x698] sm:$0xff] }
 0x8b4   : > { %v21500_v6 = vpop.f32.mrf.mxu0  ;;  %12601 = vmatprep.subr.bf16.mxu1 %v13970_v52 }
 0x8b6   : > { %v21508_v21 = vpop.f32.mrf.mxu0  ;;  %12426 = vmatmul.mubr.bf16.gmra.mxu1 %v21012_v2 }
 0x8b7   : > { %12602 = vmatpush1.bf16.msra.mxu1 %v13969_v13  ;;  %12435 = vmatprep.mubr.bf16.mxu1 %v21058_v49  ;;  %v14057_v13 = vcombine.low %v10447_v38, %v10451_v31 }
 0x8b8   : > { %12539 = vmatmul.mubr.bf16.gmra.mxu0 %v20690_v46  ;;  %v21513_v62 = vpop.f32.mrf.mxu0  ;;  %12603 = vmatprep.subr.bf16.mxu1 %v13962_v8  ;;  %v14074_v46 = vcombine.high %v10463_v41, %v10467_v12 }
 0x8b9   : > { %12548 = vmatprep.mubr.bf16.mxu0 %v20716_v20  ;;  %v10455_v20 = vld [vmem:[%s22272_s18 + $0x758] sm:$0xff] }
 0x8ba   : > { %v21522_v9 = vpop.f32.mrf.mxu0  ;;  %v14066_v45 = vcombine.high %v10455_v20, %v10459_v53  ;;  %v14065_v33 = vcombine.low %v10455_v20, %v10459_v53 }
 0x8bb   : > { %12604 = vmatpush1.bf16.msra.mxu1 %v13961_v34  ;;  %v10435_v34 = vld [vmem:[%s22272_s18 + $0x6b8] sm:$0xff] }
 0x8bc   : > { %v21524_v1 = vpop.f32.mrf.mxu0  ;;  %12605 = vmatprep.subr.bf16.mxu1 %v14082_v54  ;;  %v14041_v20 = vcombine.low %v10431_v7, %v10435_v34 }
 0x8be   : > { %v21532_v58 = vpop.f32.mrf.mxu0  ;;  %12436 = vmatmul.mubr.bf16.gmra.mxu1 %v21064_v40 }
 0x8bf   : > { %12606 = vmatpush2.bf16.msra.mxu1 %v14081_v57  ;;  %12445 = vmatprep.mubr.bf16.mxu1 %v21108_v42  ;;  %v10427_v57 = vld [vmem:[%s22272_s18 + $0x678] sm:$0xff] }
 0x8c0   : > { %12549 = vmatmul.mubr.bf16.gmra.mxu0 %v20720_v56  ;;  %v21537_v3 = vpop.f32.mrf.mxu0  ;;  %12607 = vmatprep.subr.bf16.mxu1 %v14074_v46  ;;  %v14058_v56 = vcombine.high %v10447_v38, %v10451_v31  ;;  %v10419_v38 = vld [vmem:[%s22272_s18 + $0x638] sm:$0xff] }
 0x8c1   : > { %12558 = vmatprep.mubr.bf16.mxu0 %v20746_v19  ;;  %v10439_v19 = vld [vmem:[%s22272_s18 + $0x6d8] sm:$0xff] }
 0x8c2   : > { %v21546_v5 = vpop.f32.mrf.mxu0  ;;  %v14050_v4 = vcombine.high %v10439_v19, %v10443_v25  ;;  %v14049_v41 = vcombine.low %v10439_v19, %v10443_v25 }
 0x8c3   : > { %12608 = vmatpush2.bf16.msra.mxu1 %v14073_v27 }
 0x8c4   : > { %v21548_v52 = vpop.f32.mrf.mxu0  ;;  %12609 = vmatprep.subr.bf16.mxu1 %v14066_v45  ;;  %v10415_v45 = vld [vmem:[%s22272_s18 + $0x618] sm:$0xff] }
 0x8c5   : > { %v14025_v25 = vcombine.low %v10415_v45, %v10419_v38 }
 0x8c6   : > { %v21556_v48 = vpop.f32.mrf.mxu0  ;;  %12446 = vmatmul.mubr.bf16.gmra.mxu1 %v21114_v15 }
 0x8c7   : > { %12610 = vmatpush2.bf16.msra.mxu1 %v14065_v33  ;;  %12455 = vmatprep.mubr.bf16.mxu1 %v21150_v59 }
 0x8c8   : > { %12559 = vmatmul.mubr.bf16.gmra.mxu0 %v20750_v51  ;;  %v21561_v8 = vpop.f32.mrf.mxu0  ;;  %12611 = vmatprep.subr.bf16.mxu1 %v14058_v56  ;;  %v14042_v51 = vcombine.high %v10431_v7, %v10435_v34  ;;  %v14026_v56 = vcombine.high %v10415_v45, %v10419_v38 }
 0x8c9   : > { %12568 = vmatprep.mubr.bf16.mxu0 %v20776_v26  ;;  %v10423_v26 = vld [vmem:[%s22272_s18 + $0x658] sm:$0xff] }
 0x8ca   : > { %v21570_v54 = vpop.f32.mrf.mxu0  ;;  %v14034_v27 = vcombine.high %v10423_v26, %v10427_v57  ;;  %v14033_v33 = vcombine.low %v10423_v26, %v10427_v57 }
 0x8cb   : > { %12612 = vmatpush2.bf16.msra.mxu1 %v14057_v13 }
 0x8cc   : > { %v21572_v12 = vpop.f32.mrf.mxu0  ;;  %12613 = vmatprep.subr.bf16.mxu1 %v14050_v4 }
 0x8ce   : > { %v21580_v46 = vpop.f32.mrf.mxu0  ;;  %12456 = vmatmul.mubr.bf16.gmra.mxu1 %v21154_v11 }
 0x8cf   : > { %12614 = vmatpush2.bf16.msra.mxu1 %v14049_v41  ;;  %12465 = vmatprep.mubr.bf16.mxu1 %v21185_v0 }
 0x8d0   : > { %12569 = vmatmul.mubr.bf16.gmra.mxu0 %v20780_v47  ;;  %v21585_v53 = vpop.f32.mrf.mxu0  ;;  %12615 = vmatprep.subr.bf16.mxu1 %v14042_v51 }
 0x8d1   : > { %12578 = vmatprep.mubr.bf16.mxu0 %v20814_v55  ;;  %v21601_v55 = vld [vmem:[%s22273_s19] sm:$0xff] }
 0x8d2   : > { %v21594_v31 = vpop.f32.mrf.mxu0  ;;  %v21613_v4 = vrot.slane %v21601_v55, %v22369_v23  ;;  %v21619_v34 = vrot.slane %v21601_v55, %v22368_v44 }
 0x8d3   : > { %12616 = vmatpush2.bf16.msra.mxu1 %v14041_v20 }
 0x8d4   : > { %v21596_v47 = vpop.f32.mrf.mxu0  ;;  %12617 = vmatprep.subr.bf16.mxu1 %v14034_v27  ;;  %v11835_v23 = vadd.f32 %v21441_v35, %v21619_v34  ;;  %v11837_v20 = vadd.f32 %v21450_v39, %v21613_v4  ;;  %v11843_v39 = vadd.f32 %v21460_v24, %v21613_v4  ;;  %v11847_v24 = vadd.f32 %v21474_v17, %v21613_v4 }
 0x8d6   : > { %v21603_v19 = vpop.f32.mrf.mxu0  ;;  %12466 = vmatmul.mubr.bf16.gmra.mxu1 %v21187_v10 }
 0x8d7   : > { %12618 = vmatpush2.bf16.msra.mxu1 %v14033_v33  ;;  %12621 = vmatprep.mubr.bf16.mxu1 %v20851_v60 }
 0x8d8   : > { %12579 = vmatmul.mubr.bf16.gmra.mxu0 %v20818_v22  ;;  %v21608_v13 = vpop.f32.mrf.mxu0  ;;  %12619 = vmatprep.subr.bf16.mxu1 %v14026_v56  ;;  %v11833_v22 = vadd.f32 %v21436_v18, %v21613_v4 }
 0x8da   : > { %v21615_v7 = vpop.f32.mrf.mxu0 }
 0x8db   : > { %12620 = vmatpush2.bf16.msra.mxu1 %v14025_v25 }
 0x8dc   : > { %v21623_v60 = vpop.f32.mrf.mxu0 }
 0x8de   : > { %v11945_v41 = vpop.f32.mrf.mxu1  ;;  %v21627_v51 = vpop.f32.mrf.mxu0  ;;  %12622 = vmatmul.mubr.bf16.vlgmr.msra.gmra.mxu1 %v20855_v36 }
 0x8df   : > { %v11946_v26 = vadd.f32 %v11945_v41, %v11833_v22  ;;  %12631 = vmatprep.mubr.bf16.mxu1 %v20902_v14  ;;  %v11839_v14 = vadd.f32 %v21452_v30, %v21619_v34  ;;  %v11845_v30 = vadd.f32 %v21465_v37, %v21619_v34 }
 0x8e0   : > { %v11947_v44 = vpop.f32.mrf.mxu1  ;;  %v21633_v57 = vpop.f32.mrf.mxu0 }
 0x8e1   : > { %12702 = vst [vmem:[%s21637_s29] sm:$0xff] %v11946_v26  ;;  %v11948_v36 = vadd.f32 %v11947_v44, %v11835_v23 }
 0x8e2   : > { %v11949_v18 = vpop.f32.mrf.mxu1  ;;  %v21640_v27 = vpop.f32.mrf.mxu0 }
 0x8e3   : > { %12703 = vst [vmem:[%s21637_s29 + $0x8] sm:$0xff] %v11948_v36  ;;  %v11950_v35 = vadd.f32 %v11949_v18, %v11837_v20  ;;  %v11853_v18 = vadd.f32 %v21484_v16, %v21613_v4  ;;  %v11857_v16 = vadd.f32 %v21498_v61, %v21613_v4 }
 0x8e4   : > { %v11951_v45 = vpop.f32.mrf.mxu1  ;;  %v21645_v38 = vpop.f32.mrf.mxu0 }
 0x8e5   : > { %12710 = vst [vmem:[%s21637_s29 + $0x40] sm:$0xff] %v11950_v35  ;;  %v11952_v33 = vadd.f32 %v11951_v45, %v11839_v14 }
 0x8e6   : > { %v11955_v56 = vpop.f32.mrf.mxu1  ;;  %v21650_v25 = vpop.f32.mrf.mxu0  ;;  %12632 = vmatmul.mubr.bf16.gmra.mxu1 %v20908_v28  ;;  %v11849_v28 = vadd.f32 %v21476_v43, %v21619_v34  ;;  %v11855_v43 = vadd.f32 %v21489_v50, %v21619_v34 }
 0x8e7   : > { %12711 = vst [vmem:[%s21637_s29 + $0x48] sm:$0xff] %v11952_v33  ;;  %v11956_v22 = vadd.f32 %v11955_v56, %v11843_v39  ;;  %12641 = vmatprep.mubr.bf16.mxu1 %v20954_v32 }
 0x8e8   : > { %v11957_v41 = vpop.f32.mrf.mxu1  ;;  %v21657_v23 = vpop.f32.mrf.mxu0 }
 0x8e9   : > { %12718 = vst [vmem:[%s21637_s29 + $0x80] sm:$0xff] %v11956_v22  ;;  %v11958_v26 = vadd.f32 %v11957_v41, %v11845_v30 }
 0x8ea   : > { %v11959_v44 = vpop.f32.mrf.mxu1  ;;  %v21662_v20 = vpop.f32.mrf.mxu0 }
 0x8eb   : > { %12719 = vst [vmem:[%s21637_s29 + $0x88] sm:$0xff] %v11958_v26  ;;  %v11960_v37 = vadd.f32 %v11959_v44, %v11847_v24  ;;  %v11863_v24 = vadd.f32 %v21508_v21, %v21613_v4  ;;  %v11867_v21 = vadd.f32 %v21522_v9, %v21613_v4 }
 0x8ec   : > { %v11961_v36 = vpop.f32.mrf.mxu1  ;;  %v21667_v32 = vpop.f32.mrf.mxu0 }
 0x8ed   : > { %12726 = vst [vmem:[%s21637_s29 + $0xc0] sm:$0xff] %v11960_v37  ;;  %v11962_v17 = vadd.f32 %v11961_v36, %v11849_v28 }
 0x8ee   : > { %v11965_v14 = vpop.f32.mrf.mxu1  ;;  %v21672_v35 = vpop.f32.mrf.mxu0  ;;  %12642 = vmatmul.mubr.bf16.gmra.mxu1 %v20960_v63  ;;  %v11859_v63 = vadd.f32 %v21500_v6, %v21619_v34  ;;  %v11865_v6 = vadd.f32 %v21513_v62, %v21619_v34 }
 0x8ef   : > { %12727 = vst [vmem:[%s21637_s29 + $0xc8] sm:$0xff] %v11962_v17  ;;  %v11966_v45 = vadd.f32 %v11965_v14, %v11853_v18  ;;  %12651 = vmatprep.mubr.bf16.mxu1 %v21006_v29 }
 0x8f0   : > { %v11967_v39 = vpop.f32.mrf.mxu1  ;;  %v21679_v33 = vpop.f32.mrf.mxu0 }
 0x8f1   : > { %12734 = vst [vmem:[%s21637_s29 + $0x100] sm:$0xff] %v11966_v45  ;;  %v11968_v56 = vadd.f32 %v11967_v39, %v11855_v43  ;;  %v11873_v45 = vadd.f32 %v21532_v58, %v21613_v4  ;;  %v11877_v58 = vadd.f32 %v21546_v5, %v21613_v4 }
 0x8f2   : > { %v11969_v30 = vpop.f32.mrf.mxu1  ;;  %v21684_v22 = vpop.f32.mrf.mxu0 }
 0x8f3   : > { %12735 = vst [vmem:[%s21637_s29 + $0x108] sm:$0xff] %v11968_v56  ;;  %v11970_v50 = vadd.f32 %v11969_v30, %v11857_v16 }
 0x8f4   : > { %v11971_v41 = vpop.f32.mrf.mxu1  ;;  %v21689_v29 = vpop.f32.mrf.mxu0 }
 0x8f5   : > { %12742 = vst [vmem:[%s21637_s29 + $0x140] sm:$0xff] %v11970_v50  ;;  %v11972_v61 = vadd.f32 %v11971_v41, %v11859_v63 }
 0x8f6   : > { %v11975_v26 = vpop.f32.mrf.mxu1  ;;  %v21694_v44 = vpop.f32.mrf.mxu0  ;;  %12652 = vmatmul.mubr.bf16.gmra.mxu1 %v21012_v2  ;;  %v11869_v2 = vadd.f32 %v21524_v1, %v21619_v34  ;;  %v11875_v1 = vadd.f32 %v21537_v3, %v21619_v34 }
 0x8f7   : > { %12743 = vst [vmem:[%s21637_s29 + $0x148] sm:$0xff] %v11972_v61  ;;  %v11976_v28 = vadd.f32 %v11975_v26, %v11863_v24  ;;  %12661 = vmatprep.mubr.bf16.mxu1 %v21058_v49  ;;  %v11883_v26 = vadd.f32 %v21556_v48, %v21613_v4  ;;  %v11887_v48 = vadd.f32 %v21570_v54, %v21613_v4 }
 0x8f8   : > { %v11977_v37 = vpop.f32.mrf.mxu1  ;;  %v21701_v36 = vpop.f32.mrf.mxu0 }
 0x8f9   : > { %12750 = vst [vmem:[%s21637_s29 + $0x180] sm:$0xff] %v11976_v28  ;;  %v11978_v18 = vadd.f32 %v11977_v37, %v11865_v6 }
 0x8fa   : > { %v11979_v17 = vpop.f32.mrf.mxu1  ;;  %v21706_v14 = vpop.f32.mrf.mxu0 }
 0x8fb   : > { %12751 = vst [vmem:[%s21637_s29 + $0x188] sm:$0xff] %v11978_v18  ;;  %v11980_v62 = vadd.f32 %v11979_v17, %v11867_v21 }
 0x8fc   : > { %v11981_v43 = vpop.f32.mrf.mxu1  ;;  %v21711_v49 = vpop.f32.mrf.mxu0 }
 0x8fd   : > { %12758 = vst [vmem:[%s21637_s29 + $0x1c0] sm:$0xff] %v11980_v62  ;;  %v11982_v9 = vadd.f32 %v11981_v43, %v11869_v2 }
 0x8fe   : > { %v11985_v39 = vpop.f32.mrf.mxu1  ;;  %v21716_v16 = vpop.f32.mrf.mxu0  ;;  %12662 = vmatmul.mubr.bf16.gmra.mxu1 %v21064_v40  ;;  %v11879_v40 = vadd.f32 %v21548_v52, %v21619_v34  ;;  %v11885_v52 = vadd.f32 %v21561_v8, %v21619_v34 }
 0x8ff   : > { %12759 = vst [vmem:[%s21637_s29 + $0x1c8] sm:$0xff] %v11982_v9  ;;  %v11986_v56 = vadd.f32 %v11985_v39, %v11873_v45  ;;  %12671 = vmatprep.mubr.bf16.mxu1 %v21108_v42  ;;  %v11893_v45 = vadd.f32 %v21580_v46, %v21613_v4  ;;  %v11897_v46 = vadd.f32 %v21594_v31, %v21613_v4 }
 0x900   : > { %v11987_v30 = vpop.f32.mrf.mxu1  ;;  %v21723_v63 = vpop.f32.mrf.mxu0 }
 0x901   : > { %12766 = vst [vmem:[%s21637_s29 + $0x200] sm:$0xff] %v11986_v56  ;;  %v11988_v50 = vadd.f32 %v11987_v30, %v11875_v1 }
 0x902   : > { %v11989_v41 = vpop.f32.mrf.mxu1  ;;  %v21728_v24 = vpop.f32.mrf.mxu0 }
 0x903   : > { %12767 = vst [vmem:[%s21637_s29 + $0x208] sm:$0xff] %v11988_v50  ;;  %v11990_v3 = vadd.f32 %v11989_v41, %v11877_v58 }
 0x904   : > { %v11991_v61 = vpop.f32.mrf.mxu1  ;;  %v21733_v42 = vpop.f32.mrf.mxu0 }
 0x905   : > { %12774 = vst [vmem:[%s21637_s29 + $0x240] sm:$0xff] %v11990_v3  ;;  %v11992_v5 = vadd.f32 %v11991_v61, %v11879_v40  ;;  %v11903_v3 = vadd.f32 %v21603_v19, %v21613_v4  ;;  %v11907_v19 = vadd.f32 %v21615_v7, %v21613_v4 }
 0x906   : > { %v11995_v6 = vpop.f32.mrf.mxu1  ;;  %v21738_v28 = vpop.f32.mrf.mxu0  ;;  %12672 = vmatmul.mubr.bf16.gmra.mxu1 %v21114_v15  ;;  %v11889_v15 = vadd.f32 %v21572_v12, %v21619_v34  ;;  %v11895_v12 = vadd.f32 %v21585_v53, %v21619_v34 }
 0x907   : > { %12775 = vst [vmem:[%s21637_s29 + $0x248] sm:$0xff] %v11992_v5  ;;  %v11996_v37 = vadd.f32 %v11995_v6, %v11883_v26  ;;  %12681 = vmatprep.mubr.bf16.mxu1 %v21150_v59 }
 0x908   : > { %v11997_v21 = vpop.f32.mrf.mxu1  ;;  %v21745_v18 = vpop.f32.mrf.mxu0 }
 0x909   : > { %12782 = vst [vmem:[%s21637_s29 + $0x280] sm:$0xff] %v11996_v37  ;;  %v11998_v17 = vadd.f32 %v11997_v21, %v11885_v52  ;;  %v22373_v37 = vld [vmem:[#allocation16_spill] sm:$0xff] }
 0x90a   : > { %v11999_v2 = vpop.f32.mrf.mxu1  ;;  %v21750_v62 = vpop.f32.mrf.mxu0  ;;  %v21794_v21 = vrot.slane %v21601_v55, %v22373_v37 }
 0x90b   : > { %12783 = vst [vmem:[%s21637_s29 + $0x288] sm:$0xff] %v11998_v17  ;;  %v12000_v8 = vadd.f32 %v11999_v2, %v11887_v48  ;;  %v22374_v2 = vld [vmem:[#allocation14_spill] sm:$0xff] }
 0x90c   : > { %v12001_v43 = vpop.f32.mrf.mxu1  ;;  %v21755_v59 = vpop.f32.mrf.mxu0 }
 0x90d   : > { %12790 = vst [vmem:[%s21637_s29 + $0x2c0] sm:$0xff] %v12000_v8  ;;  %v12002_v54 = vadd.f32 %v12001_v43, %v11889_v15  ;;  %v21803_v15 = vrot.slane %v21601_v55, %v22374_v2  ;;  %v12059_v43 = vadd.f32 %v21627_v51, %v21794_v21 }
 0x90e   : > { %v12005_v9 = vpop.f32.mrf.mxu1  ;;  %v21760_v39 = vpop.f32.mrf.mxu0  ;;  %12682 = vmatmul.mubr.bf16.gmra.mxu1 %v21154_v11  ;;  %v11899_v11 = vadd.f32 %v21596_v47, %v21619_v34  ;;  %v11905_v47 = vadd.f32 %v21608_v13, %v21619_v34  ;;  %v11909_v13 = vadd.f32 %v21623_v60, %v21619_v34 }
 0x90f   : > { %12791 = vst [vmem:[%s21637_s29 + $0x2c8] sm:$0xff] %v12002_v54  ;;  %v12006_v1 = vadd.f32 %v12005_v9, %v11893_v45  ;;  %12691 = vmatprep.mubr.bf16.mxu1 %v21185_v0  ;;  %v12061_v34 = vadd.f32 %v21633_v57, %v21803_v15  ;;  %v12075_v37 = vadd.f32 %v21667_v32, %v21803_v15 }
 0x910   : > { %v12007_v56 = vpop.f32.mrf.mxu1  ;;  %v21767_v30 = vpop.f32.mrf.mxu0 }
 0x911   : > { %12798 = vst [vmem:[%s21637_s29 + $0x300] sm:$0xff] %v12006_v1  ;;  %v12008_v58 = vadd.f32 %v12007_v56, %v11895_v12  ;;  %v12063_v1 = vadd.f32 %v21640_v27, %v21794_v21 }
 0x912   : > { %v12009_v50 = vpop.f32.mrf.mxu1  ;;  %v21772_v41 = vpop.f32.mrf.mxu0 }
 0x913   : > { %12799 = vst [vmem:[%s21637_s29 + $0x308] sm:$0xff] %v12008_v58  ;;  %v12010_v53 = vadd.f32 %v12009_v50, %v11897_v46  ;;  %v12065_v58 = vadd.f32 %v21645_v38, %v21803_v15 }
 0x914   : > { %v12011_v40 = vpop.f32.mrf.mxu1  ;;  %v21777_v0 = vpop.f32.mrf.mxu0 }
 0x915   : > { %12806 = vst [vmem:[%s21637_s29 + $0x340] sm:$0xff] %v12010_v53  ;;  %v12012_v31 = vadd.f32 %v12011_v40, %v11899_v11  ;;  %v12069_v53 = vadd.f32 %v21650_v25, %v21794_v21 }
 0x916   : > { %v12015_v61 = vpop.f32.mrf.mxu1  ;;  %v21782_v26 = vpop.f32.mrf.mxu0  ;;  %12692 = vmatmul.mubr.bf16.gmra.mxu1 %v21187_v10 }
 0x917   : > { %12807 = vst [vmem:[%s21637_s29 + $0x348] sm:$0xff] %v12012_v31  ;;  %v12016_v5 = vadd.f32 %v12015_v61, %v11903_v3  ;;  %v12071_v31 = vadd.f32 %v21657_v23, %v21803_v15 }
 0x918   : > { %v12017_v6 = vpop.f32.mrf.mxu1  ;;  %v21788_v52 = vpop.f32.mrf.mxu0 }
 0x919   : > { %12814 = vst [vmem:[%s21637_s29 + $0x380] sm:$0xff] %v12016_v5  ;;  %v12018_v48 = vadd.f32 %v12017_v6, %v11905_v47  ;;  %v12073_v5 = vadd.f32 %v21662_v20, %v21794_v21 }
 0x91a   : > { %v12019_v10 = vpop.f32.mrf.mxu1  ;;  %v21797_v17 = vpop.f32.mrf.mxu0 }
 0x91b   : > { %12815 = vst [vmem:[%s21637_s29 + $0x388] sm:$0xff] %v12018_v48  ;;  %v12020_v4 = vadd.f32 %v12019_v10, %v11907_v19 }
 0x91c   : > { %v12021_v7 = vpop.f32.mrf.mxu1  ;;  %v21806_v8 = vpop.f32.mrf.mxu0 }
 0x91d   : > { %12822 = vst [vmem:[%s21637_s29 + $0x3c0] sm:$0xff] %v12020_v4  ;;  %v12022_v45 = vadd.f32 %v12021_v7, %v11909_v13  ;;  %v12079_v13 = vadd.f32 %v21672_v35, %v21794_v21  ;;  %v12081_v7 = vadd.f32 %v21679_v33, %v21803_v15 }
 0x91e   : > { %v12171_v54 = vpop.f32.mrf.mxu1 }
 0x91f   : > { %12823 = vst [vmem:[%s21637_s29 + $0x3c8] sm:$0xff] %v12022_v45  ;;  %v12172_v60 = vadd.f32 %v12171_v54, %v12059_v43  ;;  %v21814_v9 = vpop.f32.mrf.mxu0  ;;  %v12083_v54 = vadd.f32 %v21684_v22, %v21794_v21 }
 0x920   : > { %v12173_v12 = vpop.f32.mrf.mxu1 }
 0x921   : > { %12704 = vst [vmem:[%s21637_s29 + $0x10] sm:$0xff] %v12172_v60  ;;  %v12174_v56 = vadd.f32 %v12173_v12, %v12061_v34  ;;  %v21819_v46 = vpop.f32.mrf.mxu0  ;;  %v12085_v12 = vadd.f32 %v21689_v29, %v21803_v15 }
 0x922   : > { %v12175_v51 = vpop.f32.mrf.mxu1 }
 0x923   : > { %12705 = vst [vmem:[%s21637_s29 + $0x18] sm:$0xff] %v12174_v56  ;;  %v12176_v57 = vadd.f32 %v12175_v51, %v12063_v1  ;;  %v21824_v50 = vpop.f32.mrf.mxu0  ;;  %v12089_v51 = vadd.f32 %v21694_v44, %v21794_v21 }
 0x924   : > { %v12177_v11 = vpop.f32.mrf.mxu1 }
 0x925   : > { %12712 = vst [vmem:[%s21637_s29 + $0x50] sm:$0xff] %v12176_v57  ;;  %v12178_v27 = vadd.f32 %v12177_v11, %v12065_v58  ;;  %v21829_v40 = vpop.f32.mrf.mxu0  ;;  %v12091_v11 = vadd.f32 %v21701_v36, %v21803_v15 }
 0x926   : > { %v12181_v3 = vpop.f32.mrf.mxu1 }
 0x927   : > { %12713 = vst [vmem:[%s21637_s29 + $0x58] sm:$0xff] %v12178_v27  ;;  %v12182_v38 = vadd.f32 %v12181_v3, %v12069_v53  ;;  %v21834_v61 = vpop.f32.mrf.mxu0  ;;  %v12093_v3 = vadd.f32 %v21706_v14, %v21794_v21 }
 0x928   : > { %v12183_v47 = vpop.f32.mrf.mxu1 }
 0x929   : > { %12720 = vst [vmem:[%s21637_s29 + $0x90] sm:$0xff] %v12182_v38  ;;  %v12184_v25 = vadd.f32 %v12183_v47, %v12071_v31  ;;  %v21839_v6 = vpop.f32.mrf.mxu0  ;;  %v12095_v47 = vadd.f32 %v21711_v49, %v21803_v15 }
 0x92a   : > { %v12185_v19 = vpop.f32.mrf.mxu1 }
 0x92b   : > { %12721 = vst [vmem:[%s21637_s29 + $0x98] sm:$0xff] %v12184_v25  ;;  %v12186_v23 = vadd.f32 %v12185_v19, %v12073_v5  ;;  %v21844_v48 = vpop.f32.mrf.mxu0  ;;  %v12099_v19 = vadd.f32 %v21716_v16, %v21794_v21 }
 0x92c   : > { %v12187_v10 = vpop.f32.mrf.mxu1 }
 0x92d   : > { %12728 = vst [vmem:[%s21637_s29 + $0xd0] sm:$0xff] %v12186_v23  ;;  %v12188_v20 = vadd.f32 %v12187_v10, %v12075_v37  ;;  %v21849_v2 = vpop.f32.mrf.mxu0  ;;  %v12101_v10 = vadd.f32 %v21723_v63, %v21803_v15 }
 0x92e   : > { %v12191_v4 = vpop.f32.mrf.mxu1 }
 0x92f   : > { %12729 = vst [vmem:[%s21637_s29 + $0xd8] sm:$0xff] %v12188_v20  ;;  %v12192_v32 = vadd.f32 %v12191_v4, %v12079_v13  ;;  %v21854_v43 = vpop.f32.mrf.mxu0  ;;  %v12103_v4 = vadd.f32 %v21728_v24, %v21794_v21 }
 0x930   : > { %v12193_v45 = vpop.f32.mrf.mxu1 }
 0x931   : > { %12736 = vst [vmem:[%s21637_s29 + $0x110] sm:$0xff] %v12192_v32  ;;  %v12194_v35 = vadd.f32 %v12193_v45, %v12081_v7  ;;  %v21859_v34 = vpop.f32.mrf.mxu0  ;;  %v12105_v45 = vadd.f32 %v21733_v42, %v21803_v15 }
 0x932   : > { %v12195_v60 = vpop.f32.mrf.mxu1 }
 0x933   : > { %12737 = vst [vmem:[%s21637_s29 + $0x118] sm:$0xff] %v12194_v35  ;;  %v12196_v33 = vadd.f32 %v12195_v60, %v12083_v54  ;;  %v21864_v1 = vpop.f32.mrf.mxu0  ;;  %v12109_v60 = vadd.f32 %v21738_v28, %v21794_v21 }
 0x934   : > { %v12197_v56 = vpop.f32.mrf.mxu1 }
 0x935   : > { %12744 = vst [vmem:[%s21637_s29 + $0x150] sm:$0xff] %v12196_v33  ;;  %v12198_v22 = vadd.f32 %v12197_v56, %v12085_v12  ;;  %v21869_v58 = vpop.f32.mrf.mxu0  ;;  %v12111_v56 = vadd.f32 %v21745_v18, %v21803_v15 }
 0x936   : > { %v12201_v57 = vpop.f32.mrf.mxu1 }
 0x937   : > { %12745 = vst [vmem:[%s21637_s29 + $0x158] sm:$0xff] %v12198_v22  ;;  %v12202_v29 = vadd.f32 %v12201_v57, %v12089_v51  ;;  %v21874_v53 = vpop.f32.mrf.mxu0  ;;  %v12113_v57 = vadd.f32 %v21750_v62, %v21794_v21 }
 0x938   : > { %v12203_v27 = vpop.f32.mrf.mxu1 }
 0x939   : > { %12752 = vst [vmem:[%s21637_s29 + $0x190] sm:$0xff] %v12202_v29  ;;  %v12204_v44 = vadd.f32 %v12203_v27, %v12091_v11  ;;  %v21879_v31 = vpop.f32.mrf.mxu0  ;;  %v12115_v27 = vadd.f32 %v21755_v59, %v21803_v15 }
 0x93a   : > { %v12205_v38 = vpop.f32.mrf.mxu1 }
 0x93b   : > { %12753 = vst [vmem:[%s21637_s29 + $0x198] sm:$0xff] %v12204_v44  ;;  %v12206_v36 = vadd.f32 %v12205_v38, %v12093_v3  ;;  %v21884_v5 = vpop.f32.mrf.mxu0  ;;  %v12119_v38 = vadd.f32 %v21760_v39, %v21794_v21 }
 0x93c   : > { %v12207_v25 = vpop.f32.mrf.mxu1 }
 0x93d   : > { %12760 = vst [vmem:[%s21637_s29 + $0x1d0] sm:$0xff] %v12206_v36  ;;  %v12208_v14 = vadd.f32 %v12207_v25, %v12095_v47  ;;  %v21889_v37 = vpop.f32.mrf.mxu0  ;;  %v12121_v25 = vadd.f32 %v21767_v30, %v21803_v15 }
 0x93e   : > { %v12211_v23 = vpop.f32.mrf.mxu1 }
 0x93f   : > { %12761 = vst [vmem:[%s21637_s29 + $0x1d8] sm:$0xff] %v12208_v14  ;;  %v12212_v49 = vadd.f32 %v12211_v23, %v12099_v19  ;;  %v21894_v13 = vpop.f32.mrf.mxu0  ;;  %v12123_v23 = vadd.f32 %v21772_v41, %v21794_v21 }
 0x940   : > { %v12213_v20 = vpop.f32.mrf.mxu1 }
 0x941   : > { %12768 = vst [vmem:[%s21637_s29 + $0x210] sm:$0xff] %v12212_v49  ;;  %v12214_v16 = vadd.f32 %v12213_v20, %v12101_v10  ;;  %v21899_v7 = vpop.f32.mrf.mxu0  ;;  %v12125_v20 = vadd.f32 %v21777_v0, %v21803_v15  ;;  %v12131_v0 = vadd.f32 %v21788_v52, %v21803_v15 }
 0x942   : > { %v12215_v32 = vpop.f32.mrf.mxu1 }
 0x943   : > { %12769 = vst [vmem:[%s21637_s29 + $0x218] sm:$0xff] %v12214_v16  ;;  %v12216_v63 = vadd.f32 %v12215_v32, %v12103_v4  ;;  %v21904_v54 = vpop.f32.mrf.mxu0  ;;  %v12129_v32 = vadd.f32 %v21782_v26, %v21794_v21  ;;  %v12133_v26 = vadd.f32 %v21797_v17, %v21794_v21 }
 0x944   : > { %v12217_v35 = vpop.f32.mrf.mxu1 }
 0x945   : > { %12776 = vst [vmem:[%s21637_s29 + $0x250] sm:$0xff] %v12216_v63  ;;  %v12218_v24 = vadd.f32 %v12217_v35, %v12105_v45  ;;  %v21909_v12 = vpop.f32.mrf.mxu0  ;;  %v22375_v45 = vld [vmem:[#allocation12_spill] sm:$0xff] }
 0x946   : > { %v12221_v33 = vpop.f32.mrf.mxu1  ;;  %v10496_v41 = vsub.s32 4, %v22375_v45 }
 0x947   : > { %12777 = vst [vmem:[%s21637_s29 + $0x258] sm:$0xff] %v12218_v24  ;;  %v12222_v42 = vadd.f32 %v12221_v33, %v12109_v60  ;;  %v21914_v51 = vpop.f32.mrf.mxu0  ;;  %v10500_v24 = vsub.s32 5, %v22375_v45 }
 0x948   : > { %v12223_v22 = vpop.f32.mrf.mxu1 }
 0x949   : > { %12784 = vst [vmem:[%s21637_s29 + $0x290] sm:$0xff] %v12222_v42  ;;  %v12224_v28 = vadd.f32 %v12223_v22, %v12111_v56  ;;  %v21919_v11 = vpop.f32.mrf.mxu0  ;;  %v21961_v22 = vrot.slane %v21601_v55, %v10496_v41 }
 0x94a   : > { %v12225_v29 = vpop.f32.mrf.mxu1 }
 0x94b   : > { %12785 = vst [vmem:[%s21637_s29 + $0x298] sm:$0xff] %v12224_v28  ;;  %v12226_v18 = vadd.f32 %v12225_v29, %v12113_v57  ;;  %v21924_v3 = vpop.f32.mrf.mxu0  ;;  %v12135_v29 = vadd.f32 %v21806_v8, %v21803_v15  ;;  %v12285_v17 = vadd.f32 %v21814_v9, %v21961_v22 }
 0x94c   : > { %v12227_v44 = vpop.f32.mrf.mxu1 }
 0x94d   : > { %12792 = vst [vmem:[%s21637_s29 + $0x2d0] sm:$0xff] %v12226_v18  ;;  %v12228_v62 = vadd.f32 %v12227_v44, %v12115_v27  ;;  %v21929_v47 = vpop.f32.mrf.mxu0  ;;  %v21969_v27 = vrot.slane %v21601_v55, %v10500_v24 }
 0x94e   : > { %v12231_v36 = vpop.f32.mrf.mxu1 }
 0x94f   : > { %12793 = vst [vmem:[%s21637_s29 + $0x2d8] sm:$0xff] %v12228_v62  ;;  %v12232_v59 = vadd.f32 %v12231_v36, %v12119_v38  ;;  %v21934_v19 = vpop.f32.mrf.mxu0  ;;  %v12287_v15 = vadd.f32 %v21819_v46, %v21969_v27  ;;  %v12297_v41 = vadd.f32 %v21839_v6, %v21969_v27 }
 0x950   : > { %v12233_v14 = vpop.f32.mrf.mxu1 }
 0x951   : > { %12800 = vst [vmem:[%s21637_s29 + $0x310] sm:$0xff] %v12232_v59  ;;  %v12234_v39 = vadd.f32 %v12233_v14, %v12121_v25  ;;  %v21939_v10 = vpop.f32.mrf.mxu0  ;;  %v12289_v14 = vadd.f32 %v21824_v50, %v21961_v22 }
 0x952   : > { %v12235_v49 = vpop.f32.mrf.mxu1 }
 0x953   : > { %12801 = vst [vmem:[%s21637_s29 + $0x318] sm:$0xff] %v12234_v39  ;;  %v12236_v30 = vadd.f32 %v12235_v49, %v12123_v23  ;;  %v21944_v4 = vpop.f32.mrf.mxu0  ;;  %v12291_v49 = vadd.f32 %v21829_v40, %v21969_v27 }
 0x954   : > { %v12237_v16 = vpop.f32.mrf.mxu1 }
 0x955   : > { %12808 = vst [vmem:[%s21637_s29 + $0x350] sm:$0xff] %v12236_v30  ;;  %v12238_v63 = vadd.f32 %v12237_v16, %v12125_v20  ;;  %v21950_v35 = vpop.f32.mrf.mxu0  ;;  %v12295_v16 = vadd.f32 %v21834_v61, %v21961_v22  ;;  %v12301_v61 = vadd.f32 %v21849_v2, %v21969_v27 }
 0x956   : > { %v12241_v60 = vpop.f32.mrf.mxu1 }
 0x957   : > { %12809 = vst [vmem:[%s21637_s29 + $0x358] sm:$0xff] %v12238_v63  ;;  %v12242_v33 = vadd.f32 %v12241_v60, %v12129_v32  ;;  %v21956_v56 = vpop.f32.mrf.mxu0 }
 0x958   : > { %v12243_v42 = vpop.f32.mrf.mxu1 }
 0x959   : > { %12816 = vst [vmem:[%s21637_s29 + $0x390] sm:$0xff] %v12242_v33  ;;  %v12244_v57 = vadd.f32 %v12243_v42, %v12131_v0  ;;  %v21964_v28 = vpop.f32.mrf.mxu0  ;;  %v12299_v0 = vadd.f32 %v21844_v48, %v21961_v22  ;;  %v12307_v48 = vadd.f32 %v21859_v34, %v21969_v27 }
 0x95a   : > { %v12245_v52 = vpop.f32.mrf.mxu1 }
 0x95b   : > { %12817 = vst [vmem:[%s21637_s29 + $0x398] sm:$0xff] %v12244_v57  ;;  %v12246_v18 = vadd.f32 %v12245_v52, %v12133_v26  ;;  %v21972_v44 = vpop.f32.mrf.mxu0  ;;  %v12305_v57 = vadd.f32 %v21854_v43, %v21961_v22  ;;  %v12311_v43 = vadd.f32 %v21869_v58, %v21969_v27 }
 0x95c   : > { %v12247_v21 = vpop.f32.mrf.mxu1 }
 0x95d   : > { %12824 = vst [vmem:[%s21637_s29 + $0x3d0] sm:$0xff] %v12246_v18  ;;  %v12248_v38 = vadd.f32 %v12247_v21, %v12135_v29  ;;  %v21977_v62 = vpop.f32.mrf.mxu0 }
 0x95e   : > { %v12397_v36 = vpop.f32.mrf.mxu1 }
 0x95f   : > { %12825 = vst [vmem:[%s21637_s29 + $0x3d8] sm:$0xff] %v12248_v38  ;;  %v12398_v8 = vadd.f32 %v12397_v36, %v12285_v17  ;;  %v12309_v17 = vadd.f32 %v21864_v1, %v21961_v22  ;;  %v12317_v1 = vadd.f32 %v21879_v31, %v21969_v27 }
 0x960   : > { %v21982_v25 = vpop.f32.mrf.mxu0  ;;  %v12399_v59 = vpop.f32.mrf.mxu1 }
 0x961   : > { %12706 = vst [vmem:[%s21637_s29 + $0x20] sm:$0xff] %v12398_v8  ;;  %v12400_v9 = vadd.f32 %v12399_v59, %v12287_v15  ;;  %v12315_v59 = vadd.f32 %v21874_v53, %v21961_v22  ;;  %v12321_v53 = vadd.f32 %v21889_v37, %v21969_v27 }
 0x962   : > { %v21987_v23 = vpop.f32.mrf.mxu0  ;;  %v12401_v39 = vpop.f32.mrf.mxu1 }
 0x963   : > { %12707 = vst [vmem:[%s21637_s29 + $0x28] sm:$0xff] %v12400_v9  ;;  %v12402_v46 = vadd.f32 %v12401_v39, %v12289_v14 }
 0x964   : > { %v21992_v20 = vpop.f32.mrf.mxu0  ;;  %v12403_v30 = vpop.f32.mrf.mxu1 }
 0x965   : > { %12714 = vst [vmem:[%s21637_s29 + $0x60] sm:$0xff] %v12402_v46  ;;  %v12404_v50 = vadd.f32 %v12403_v30, %v12291_v49  ;;  %v12319_v46 = vadd.f32 %v21884_v5, %v21961_v22  ;;  %v12327_v5 = vadd.f32 %v21899_v7, %v21969_v27 }
 0x966   : > { %v12407_v32 = vpop.f32.mrf.mxu1  ;;  %v22000_v60 = vpop.f32.mrf.mxu0 }
 0x967   : > { %12715 = vst [vmem:[%s21637_s29 + $0x68] sm:$0xff] %v12404_v50  ;;  %v12408_v63 = vadd.f32 %v12407_v32, %v12295_v16 }
 0x968   : > { %v12409_v40 = vpop.f32.mrf.mxu1  ;;  %v22008_v26 = vpop.f32.mrf.mxu0 }
 0x969   : > { %12722 = vst [vmem:[%s21637_s29 + $0xa0] sm:$0xff] %v12408_v63  ;;  %v12410_v24 = vadd.f32 %v12409_v40, %v12297_v41  ;;  %v12325_v41 = vadd.f32 %v21894_v13, %v21961_v22  ;;  %v12331_v13 = vadd.f32 %v21909_v12, %v21969_v27 }
 0x96a   : > { %v12411_v33 = vpop.f32.mrf.mxu1  ;;  %v22016_v21 = vpop.f32.mrf.mxu0 }
 0x96b   : > { %12723 = vst [vmem:[%s21637_s29 + $0xa8] sm:$0xff] %v12410_v24  ;;  %v12412_v42 = vadd.f32 %v12411_v33, %v12299_v0  ;;  %v12329_v33 = vadd.f32 %v21904_v54, %v21961_v22  ;;  %v12337_v54 = vadd.f32 %v21919_v11, %v21969_v27 }
 0x96c   : > { %v12413_v6 = vpop.f32.mrf.mxu1  ;;  %v22024_v8 = vpop.f32.mrf.mxu0 }
 0x96d   : > { %12730 = vst [vmem:[%s21637_s29 + $0xe0] sm:$0xff] %v12412_v42  ;;  %v12414_v52 = vadd.f32 %v12413_v6, %v12301_v61 }
 0x96e   : > { %v12417_v29 = vpop.f32.mrf.mxu1  ;;  %v22032_v49 = vpop.f32.mrf.mxu0 }
 0x96f   : > { %12731 = vst [vmem:[%s21637_s29 + $0xe8] sm:$0xff] %v12414_v52  ;;  %v12418_v18 = vadd.f32 %v12417_v29, %v12305_v57  ;;  %v12335_v52 = vadd.f32 %v21914_v51, %v21961_v22  ;;  %v12341_v51 = vadd.f32 %v21929_v47, %v21969_v27 }
 0x970   : > { %v12419_v2 = vpop.f32.mrf.mxu1  ;;  %v22040_v32 = vpop.f32.mrf.mxu0 }
 0x971   : > { %12738 = vst [vmem:[%s21637_s29 + $0x120] sm:$0xff] %v12418_v18  ;;  %v12420_v38 = vadd.f32 %v12419_v2, %v12307_v48 }
 0x972   : > { %v12421_v36 = vpop.f32.mrf.mxu1  ;;  %v22048_v24 = vpop.f32.mrf.mxu0 }
 0x973   : > { %12739 = vst [vmem:[%s21637_s29 + $0x128] sm:$0xff] %v12420_v38  ;;  %v12422_v15 = vadd.f32 %v12421_v36, %v12309_v17  ;;  %v12339_v17 = vadd.f32 %v21924_v3, %v21961_v22  ;;  %v12347_v3 = vadd.f32 %v21939_v10, %v21969_v27 }
 0x974   : > { %v12423_v34 = vpop.f32.mrf.mxu1  ;;  %v22056_v57 = vpop.f32.mrf.mxu0 }
 0x975   : > { %12746 = vst [vmem:[%s21637_s29 + $0x160] sm:$0xff] %v12422_v15  ;;  %v12424_v14 = vadd.f32 %v12423_v34, %v12311_v43  ;;  %v12345_v34 = vadd.f32 %v21934_v19, %v21961_v22  ;;  %v12351_v19 = vadd.f32 %v21950_v35, %v21969_v27  ;;  %v10508_v35 = vsub.s32 7, %v22375_v45 }
 0x976   : > { %v12427_v9 = vpop.f32.mrf.mxu1  ;;  %v22064_v2 = vpop.f32.mrf.mxu0 }
 0x977   : > { %12747 = vst [vmem:[%s21637_s29 + $0x168] sm:$0xff] %v12424_v14  ;;  %v12428_v39 = vadd.f32 %v12427_v9, %v12315_v59 }
 0x978   : > { %v12429_v58 = vpop.f32.mrf.mxu1  ;;  %v22072_v15 = vpop.f32.mrf.mxu0 }
 0x979   : > { %12754 = vst [vmem:[%s21637_s29 + $0x1a0] sm:$0xff] %v12428_v39  ;;  %v12430_v30 = vadd.f32 %v12429_v58, %v12317_v1  ;;  %v12349_v39 = vadd.f32 %v21944_v4, %v21961_v22 }
 0x97a   : > { %v12431_v16 = vpop.f32.mrf.mxu1  ;;  %v22080_v1 = vpop.f32.mrf.mxu0 }
 0x97b   : > { %12755 = vst [vmem:[%s21637_s29 + $0x1a8] sm:$0xff] %v12430_v30  ;;  %v12432_v50 = vadd.f32 %v12431_v16, %v12319_v46 }
 0x97c   : > { %v12433_v31 = vpop.f32.mrf.mxu1  ;;  %v22088_v10 = vpop.f32.mrf.mxu0 }
 0x97d   : > { %12762 = vst [vmem:[%s21637_s29 + $0x1e0] sm:$0xff] %v12432_v50  ;;  %v12434_v63 = vadd.f32 %v12433_v31, %v12321_v53  ;;  %v12355_v53 = vadd.f32 %v21956_v56, %v21961_v22  ;;  %v10504_v50 = vsub.s32 6, %v22375_v45  ;;  %v12359_v56 = vadd.f32 %v21972_v44, %v21961_v22 }
 0x97e   : > { %v12437_v40 = vpop.f32.mrf.mxu1  ;;  %v22109_v45 = vrot.slane %v21601_v55, %v10508_v35 }
 0x97f   : > { %12763 = vst [vmem:[%s21637_s29 + $0x1e8] sm:$0xff] %v12434_v63  ;;  %v12438_v0 = vadd.f32 %v12437_v40, %v12325_v41  ;;  %v12357_v41 = vadd.f32 %v21964_v28, %v21969_v27  ;;  %v22098_v40 = vpop.f32.mrf.mxu0  ;;  %v12361_v28 = vadd.f32 %v21977_v62, %v21969_v27 }
 0x980   : > { %v12439_v37 = vpop.f32.mrf.mxu1  ;;  %v12513_v27 = vadd.f32 %v21987_v23, %v22109_v45 }
 0x981   : > { %12770 = vst [vmem:[%s21637_s29 + $0x220] sm:$0xff] %v12438_v0  ;;  %v12440_v61 = vadd.f32 %v12439_v37, %v12327_v5  ;;  %v22103_v0 = vrot.slane %v21601_v55, %v10504_v50 }
 0x982   : > { %v12441_v42 = vpop.f32.mrf.mxu1 }
 0x983   : > { %12771 = vst [vmem:[%s21637_s29 + $0x228] sm:$0xff] %v12440_v61  ;;  %v12442_v6 = vadd.f32 %v12441_v42, %v12329_v33  ;;  %v22112_v42 = vpop.f32.mrf.mxu0  ;;  %v12511_v44 = vadd.f32 %v21982_v25, %v22103_v0  ;;  %v12517_v25 = vadd.f32 %v22000_v60, %v22109_v45  ;;  %v12541_v50 = vadd.f32 %v22072_v15, %v22103_v0 }
 0x984   : > { %v12443_v7 = vpop.f32.mrf.mxu1  ;;  %v12547_v15 = vadd.f32 %v22098_v40, %v22109_v45 }
 0x985   : > { %12778 = vst [vmem:[%s21637_s29 + $0x260] sm:$0xff] %v12442_v6  ;;  %v12444_v29 = vadd.f32 %v12443_v7, %v12331_v13  ;;  %v22120_v55 = vpop.f32.mrf.mxu0 }
 0x986   : > { %v12447_v48 = vpop.f32.mrf.mxu1 }
 0x987   : > { %12779 = vst [vmem:[%s21637_s29 + $0x268] sm:$0xff] %v12444_v29  ;;  %v12448_v18 = vadd.f32 %v12447_v48, %v12335_v52  ;;  %v12515_v52 = vadd.f32 %v21992_v20, %v22103_v0  ;;  %v12523_v20 = vadd.f32 %v22016_v21, %v22109_v45 }
 0x988   : > { %v12449_v12 = vpop.f32.mrf.mxu1 }
 0x989   : > { %12786 = vst [vmem:[%s21637_s29 + $0x2a0] sm:$0xff] %v12448_v18  ;;  %v12450_v38 = vadd.f32 %v12449_v12, %v12337_v54  ;;  %v22128_v18 = vpop.f32.mrf.mxu0  ;;  %v12521_v12 = vadd.f32 %v22008_v26, %v22103_v0  ;;  %v12527_v26 = vadd.f32 %v22032_v49, %v22109_v45 }
 0x98a   : > { %v12451_v36 = vpop.f32.mrf.mxu1 }
 0x98b   : > { %12787 = vst [vmem:[%s21637_s29 + $0x2a8] sm:$0xff] %v12450_v38  ;;  %v12452_v43 = vadd.f32 %v12451_v36, %v12339_v17 }
 0x98c   : > { %v12453_v11 = vpop.f32.mrf.mxu1 }
 0x98d   : > { %12794 = vst [vmem:[%s21637_s29 + $0x2e0] sm:$0xff] %v12452_v43  ;;  %v12454_v59 = vadd.f32 %v12453_v11, %v12341_v51  ;;  %v12556_v51 = vpop.f32.mrf.mxu0  ;;  %v12525_v43 = vadd.f32 %v22024_v8, %v22103_v0  ;;  %v12533_v8 = vadd.f32 %v22048_v24, %v22109_v45 }
 0x98e   : > { %v12457_v14 = vpop.f32.mrf.mxu1 }
 0x98f   : > { %12795 = vst [vmem:[%s21637_s29 + $0x2e8] sm:$0xff] %v12454_v59  ;;  %v12458_v9 = vadd.f32 %v12457_v14, %v12345_v34  ;;  %v12560_v14 = vpop.f32.mrf.mxu0 }
 0x990   : > { %v12459_v47 = vpop.f32.mrf.mxu1 }
 0x991   : > { %12802 = vst [vmem:[%s21637_s29 + $0x320] sm:$0xff] %v12458_v9  ;;  %v12460_v58 = vadd.f32 %v12459_v47, %v12347_v3  ;;  %v12531_v3 = vadd.f32 %v22040_v32, %v22103_v0  ;;  %v12537_v32 = vadd.f32 %v22064_v2, %v22109_v45 }
 0x992   : > { %v12461_v46 = vpop.f32.mrf.mxu1 }
 0x993   : > { %12803 = vst [vmem:[%s21637_s29 + $0x328] sm:$0xff] %v12460_v58  ;;  %v12462_v30 = vadd.f32 %v12461_v46, %v12349_v39  ;;  %v12562_v58 = vpop.f32.mrf.mxu0  ;;  %v12535_v46 = vadd.f32 %v22056_v57, %v22103_v0  ;;  %v12543_v57 = vadd.f32 %v22080_v1, %v22109_v45 }
 0x994   : > { %v12463_v16 = vpop.f32.mrf.mxu1 }
 0x995   : > { %12810 = vst [vmem:[%s21637_s29 + $0x360] sm:$0xff] %v12462_v30  ;;  %v12464_v4 = vadd.f32 %v12463_v16, %v12351_v19 }
 0x996   : > { %v12467_v31 = vpop.f32.mrf.mxu1 }
 0x997   : > { %12811 = vst [vmem:[%s21637_s29 + $0x368] sm:$0xff] %v12464_v4  ;;  %v12468_v63 = vadd.f32 %v12467_v31, %v12355_v53  ;;  %v12564_v53 = vpop.f32.mrf.mxu0 }
 0x998   : > { %v12469_v5 = vpop.f32.mrf.mxu1 }
 0x999   : > { %12818 = vst [vmem:[%s21637_s29 + $0x3a0] sm:$0xff] %v12468_v63  ;;  %v12470_v37 = vadd.f32 %v12469_v5, %v12357_v41  ;;  %v12566_v35 = vpop.f32.mrf.mxu0  ;;  %v12545_v63 = vadd.f32 %v22088_v10, %v22103_v0  ;;  %v12553_v10 = vadd.f32 %v22120_v55, %v22109_v45  ;;  %v12561_v55 = vadd.f32 %v12560_v14, %v22103_v0 }
 0x99a   : > { %v12471_v33 = vpop.f32.mrf.mxu1 }
 0x99b   : > { %12819 = vst [vmem:[%s21637_s29 + $0x3a8] sm:$0xff] %v12470_v37  ;;  %v12472_v61 = vadd.f32 %v12471_v33, %v12359_v56  ;;  %v12570_v33 = vpop.f32.mrf.mxu0 }
 0x99c   : > { %v12473_v22 = vpop.f32.mrf.mxu1 }
 0x99d   : > { %12826 = vst [vmem:[%s21637_s29 + $0x3e0] sm:$0xff] %v12472_v61  ;;  %v12474_v13 = vadd.f32 %v12473_v22, %v12361_v28  ;;  %v12551_v28 = vadd.f32 %v22112_v42, %v22103_v0  ;;  %v12557_v42 = vadd.f32 %v12556_v51, %v22109_v45 }
 0x99e   : > { %v12623_v6 = vpop.f32.mrf.mxu1 }
 0x99f   : > { %12827 = vst [vmem:[%s21637_s29 + $0x3e8] sm:$0xff] %v12474_v13  ;;  %v12624_v62 = vadd.f32 %v12623_v6, %v12511_v44  ;;  %v12572_v13 = vpop.f32.mrf.mxu0  ;;  %v12555_v6 = vadd.f32 %v22128_v18, %v22103_v0 }
 0x9a0   : > { %v12625_v7 = vpop.f32.mrf.mxu1 }
 0x9a1   : > { %12708 = vst [vmem:[%s21637_s29 + $0x30] sm:$0xff] %v12624_v62  ;;  %v12626_v29 = vadd.f32 %v12625_v7, %v12513_v27 }
 0x9a2   : > { %v12627_v48 = vpop.f32.mrf.mxu1 }
 0x9a3   : > { %12709 = vst [vmem:[%s21637_s29 + $0x38] sm:$0xff] %v12626_v29  ;;  %v12628_v54 = vadd.f32 %v12627_v48, %v12515_v52  ;;  %v12574_v52 = vpop.f32.mrf.mxu0 }
 0x9a4   : > { %v12629_v23 = vpop.f32.mrf.mxu1 }
 0x9a5   : > { %12716 = vst [vmem:[%s21637_s29 + $0x70] sm:$0xff] %v12628_v54  ;;  %v12630_v17 = vadd.f32 %v12629_v23, %v12517_v25  ;;  %v12563_v54 = vadd.f32 %v12562_v58, %v22109_v45  ;;  %v12576_v23 = vpop.f32.mrf.mxu0 }
 0x9a6   : > { %v12633_v38 = vpop.f32.mrf.mxu1 }
 0x9a7   : > { %12717 = vst [vmem:[%s21637_s29 + $0x78] sm:$0xff] %v12630_v17  ;;  %v12634_v36 = vadd.f32 %v12633_v38, %v12521_v12  ;;  %v12565_v17 = vadd.f32 %v12564_v53, %v22103_v0 }
 0x9a8   : > { %v12635_v60 = vpop.f32.mrf.mxu1 }
 0x9a9   : > { %12724 = vst [vmem:[%s21637_s29 + $0xb0] sm:$0xff] %v12634_v36  ;;  %v12636_v11 = vadd.f32 %v12635_v60, %v12523_v20  ;;  %v12567_v36 = vadd.f32 %v12566_v35, %v22109_v45  ;;  %v12580_v60 = vpop.f32.mrf.mxu0 }
 0x9aa   : > { %v12637_v34 = vpop.f32.mrf.mxu1 }
 0x9ab   : > { %12725 = vst [vmem:[%s21637_s29 + $0xb8] sm:$0xff] %v12636_v11  ;;  %v12638_v59 = vadd.f32 %v12637_v34, %v12525_v43  ;;  %v12571_v11 = vadd.f32 %v12570_v33, %v22103_v0 }
 0x9ac   : > { %v12639_v21 = vpop.f32.mrf.mxu1 }
 0x9ad   : > { %12732 = vst [vmem:[%s21637_s29 + $0xf0] sm:$0xff] %v12638_v59  ;;  %v12640_v9 = vadd.f32 %v12639_v21, %v12527_v26  ;;  %v12573_v59 = vadd.f32 %v12572_v13, %v22109_v45  ;;  %v12582_v21 = vpop.f32.mrf.mxu0 }
 0x9ae   : > { %v12643_v47 = vpop.f32.mrf.mxu1 }
 0x9af   : > { %12733 = vst [vmem:[%s21637_s29 + $0xf8] sm:$0xff] %v12640_v9  ;;  %v12644_v39 = vadd.f32 %v12643_v47, %v12531_v3  ;;  %v12575_v9 = vadd.f32 %v12574_v52, %v22103_v0 }
 0x9b0   : > { %v12645_v49 = vpop.f32.mrf.mxu1 }
 0x9b1   : > { %12740 = vst [vmem:[%s21637_s29 + $0x130] sm:$0xff] %v12644_v39  ;;  %v12646_v19 = vadd.f32 %v12645_v49, %v12533_v8  ;;  %v12577_v39 = vadd.f32 %v12576_v23, %v22109_v45  ;;  %v12584_v49 = vpop.f32.mrf.mxu0 }
 0x9b2   : > { %v12647_v30 = vpop.f32.mrf.mxu1 }
 0x9b3   : > { %12741 = vst [vmem:[%s21637_s29 + $0x138] sm:$0xff] %v12646_v19  ;;  %v12648_v16 = vadd.f32 %v12647_v30, %v12535_v46  ;;  %v12581_v19 = vadd.f32 %v12580_v60, %v22103_v0 }
 0x9b4   : > { %v12649_v24 = vpop.f32.mrf.mxu1 }
 0x9b5   : > { %12748 = vst [vmem:[%s21637_s29 + $0x170] sm:$0xff] %v12648_v16  ;;  %v12650_v4 = vadd.f32 %v12649_v24, %v12537_v32  ;;  %v12583_v16 = vadd.f32 %v12582_v21, %v22109_v45  ;;  %v12586_v24 = vpop.f32.mrf.mxu0 }
 0x9b6   : > { %v12653_v31 = vpop.f32.mrf.mxu1 }
 0x9b7   : > { %12749 = vst [vmem:[%s21637_s29 + $0x178] sm:$0xff] %v12650_v4  ;;  %v12654_v41 = vadd.f32 %v12653_v31, %v12541_v50  ;;  %v12585_v4 = vadd.f32 %v12584_v49, %v22103_v0 }
 0x9b8   : > { %v12655_v2 = vpop.f32.mrf.mxu1 }
 0x9b9   : > { %12756 = vst [vmem:[%s21637_s29 + $0x1b0] sm:$0xff] %v12654_v41  ;;  %v12656_v5 = vadd.f32 %v12655_v2, %v12543_v57  ;;  %v12587_v41 = vadd.f32 %v12586_v24, %v22109_v45 }
 0x9ba   : > { %v12657_v56 = vpop.f32.mrf.mxu1 }
 0x9bb   : > { %12757 = vst [vmem:[%s21637_s29 + $0x1b8] sm:$0xff] %v12656_v5  ;;  %v12658_v37 = vadd.f32 %v12657_v56, %v12545_v63 }
 0x9bc   : > { %v12659_v1 = vpop.f32.mrf.mxu1 }
 0x9bd   : > { %12764 = vst [vmem:[%s21637_s29 + $0x1f0] sm:$0xff] %v12658_v37  ;;  %v12660_v61 = vadd.f32 %v12659_v1, %v12547_v15 }
 0x9be   : > { %v12663_v22 = vpop.f32.mrf.mxu1 }
 0x9bf   : > { %12765 = vst [vmem:[%s21637_s29 + $0x1f8] sm:$0xff] %v12660_v61  ;;  %v12664_v44 = vadd.f32 %v12663_v22, %v12551_v28 }
 0x9c0   : > { %v12665_v40 = vpop.f32.mrf.mxu1 }
 0x9c1   : > { %12772 = vst [vmem:[%s21637_s29 + $0x230] sm:$0xff] %v12664_v44  ;;  %v12666_v27 = vadd.f32 %v12665_v40, %v12553_v10 }
 0x9c2   : > { %v12667_v62 = vpop.f32.mrf.mxu1 }
 0x9c3   : > { %12773 = vst [vmem:[%s21637_s29 + $0x238] sm:$0xff] %v12666_v27  ;;  %v12668_v7 = vadd.f32 %v12667_v62, %v12555_v6 }
 0x9c4   : > { %v12669_v29 = vpop.f32.mrf.mxu1 }
 0x9c5   : > { %12780 = vst [vmem:[%s21637_s29 + $0x270] sm:$0xff] %v12668_v7  ;;  %v12670_v48 = vadd.f32 %v12669_v29, %v12557_v42 }
 0x9c6   : > { %v12673_v25 = vpop.f32.mrf.mxu1 }
 0x9c7   : > { %12781 = vst [vmem:[%s21637_s29 + $0x278] sm:$0xff] %v12670_v48  ;;  %v12674_v18 = vadd.f32 %v12673_v25, %v12561_v55 }
 0x9c8   : > { %v12675_v12 = vpop.f32.mrf.mxu1 }
 0x9c9   : > { %12788 = vst [vmem:[%s21637_s29 + $0x2b0] sm:$0xff] %v12674_v18  ;;  %v12676_v38 = vadd.f32 %v12675_v12, %v12563_v54 }
 0x9ca   : > { %v12677_v20 = vpop.f32.mrf.mxu1 }
 0x9cb   : > { %12789 = vst [vmem:[%s21637_s29 + $0x2b8] sm:$0xff] %v12676_v38  ;;  %v12678_v51 = vadd.f32 %v12677_v20, %v12565_v17 }
 0x9cc   : > { %v12679_v43 = vpop.f32.mrf.mxu1 }
 0x9cd   : > { %12796 = vst [vmem:[%s21637_s29 + $0x2f0] sm:$0xff] %v12678_v51  ;;  %v12680_v34 = vadd.f32 %v12679_v43, %v12567_v36 }
 0x9ce   : > { %v12683_v26 = vpop.f32.mrf.mxu1 }
 0x9cf   : > { %12797 = vst [vmem:[%s21637_s29 + $0x2f8] sm:$0xff] %v12680_v34  ;;  %v12684_v14 = vadd.f32 %v12683_v26, %v12571_v11 }
 0x9d0   : > { %v12685_v3 = vpop.f32.mrf.mxu1 }
 0x9d1   : > { %12804 = vst [vmem:[%s21637_s29 + $0x330] sm:$0xff] %v12684_v14  ;;  %v12686_v47 = vadd.f32 %v12685_v3, %v12573_v59 }
 0x9d2   : > { %v12687_v8 = vpop.f32.mrf.mxu1 }
 0x9d3   : > { %12805 = vst [vmem:[%s21637_s29 + $0x338] sm:$0xff] %v12686_v47  ;;  %v12688_v58 = vadd.f32 %v12687_v8, %v12575_v9 }
 0x9d4   : > { %v12689_v46 = vpop.f32.mrf.mxu1 }
 0x9d5   : > { %12812 = vst [vmem:[%s21637_s29 + $0x370] sm:$0xff] %v12688_v58  ;;  %v12690_v30 = vadd.f32 %v12689_v46, %v12577_v39 }
 0x9d6   : > { %v12693_v32 = vpop.f32.mrf.mxu1 }
 0x9d7   : > { %12813 = vst [vmem:[%s21637_s29 + $0x378] sm:$0xff] %v12690_v30  ;;  %v12694_v53 = vadd.f32 %v12693_v32, %v12581_v19 }
 0x9d8   : > { %v12695_v50 = vpop.f32.mrf.mxu1 }
 0x9d9   : > { %12820 = vst [vmem:[%s21637_s29 + $0x3b0] sm:$0xff] %v12694_v53  ;;  %v12696_v31 = vadd.f32 %v12695_v50, %v12583_v16 }
 0x9da   : > { %v12697_v57 = vpop.f32.mrf.mxu1 }
 0x9db   : > { %12821 = vst [vmem:[%s21637_s29 + $0x3b8] sm:$0xff] %v12696_v31  ;;  %v12698_v35 = vadd.f32 %v12697_v57, %v12585_v4 }
 0x9dc   : > { %v12699_v2 = vpop.f32.mrf.mxu1 }
 0x9dd   : > { %12828 = vst [vmem:[%s21637_s29 + $0x3f0] sm:$0xff] %v12698_v35  ;;  %v12700_v0 = vadd.f32 %v12699_v2, %v12587_v41 }
 0x9df   : > { %12829 = vst [vmem:[%s21637_s29 + $0x3f8] sm:$0xff] %v12700_v0 }
 0x9e0   : > { %15530 = shalt.err (!%p15527_p3)
}
 0x9e1   : > { %s15531_s26 = scalar_lea.hbm %s22206_s23, 16384  ;;  %s15535_s28 = scalar_lea.hbm %s22377_s20, 32768 }
 0x9e2   : > { %p15532_p4 = scmp.ne.s32.totalorder %s22206_s23, %s15531_s26  ;;  %p15536_p9 = scmp.lt.s32.totalorder %s22206_s23, %s22377_s20 }
 0x9e3   : > { %p15537_p10 = scmp.lt.s32.totalorder %s15535_s28, %s15531_s26 }
 0x9e4   : > { %p15533_p7 = pnand %p15532_p4, %p15725_p5 }
 0x9e5   : > { %p15538_p11 = por %p15537_p10, %p15536_p9 }
 0x9e6   : > { %p15534_p8 = pneg %p15533_p7 }
 0x9e8   : > { %p15539_p12 = pnand %p15538_p11, %p15534_p8 }
 0x9ea   : > { %15542 = shalt.err (!%p15539_p12)
}
 0x9eb   : > { %s15580_s1 = smov 1024   ;;  %s15581_s24 = smov 64  }
 0x9ec   : > { %14092 = dma.vmem_to_hbm [thread:$0]  (%p15725_p5), %s22208_s27, 16384, %s22206_s23, %s22214_s2, %s15580_s1, %s15580_s1, %s15581_s24  }
 0x9ed PF: > { %s22378_s25 = sld [smem:[#allocation7_spill]] }
 0x9ee   : > { %s22379_s29 = sld [smem:[#allocation5_spill]] }
 0x9f3   : > { %p14098_p13 = scmp.ge.s32.totalorder %s22378_s25, 2 }
 0x9f4   : > { %s12860_s5 = sand.u32 1, %s22379_s29  }
 0x9f5   : > { %p14095_p0 = pnand %p14098_p13, %p15729_p6  ;;  %s12861_s3 = scalar_lea.sflag [#allocation3], %s12860_s5 }
 0x9f7   : > { %p14096_p1 = pneg %p14095_p0 }
 0x9f9   : > { %15560 = dma.done.wait (%p14096_p1), %s12861_s3, 16384  }
 0x9fa   : > { %15562 = vsyncadd (%p14096_p1), %s12861_s3, 4294950912  ;;  %s22381_s24 = sld [smem:[#allocation8_spill]]  ;;  %s22384_s1 = smov %s15569_s22 }
 0x9fb   : > { %s22382_s26 = sld [smem:[#allocation6_spill]] }
 0x9fc   : > { %s22383_s23 = sld [smem:[#allocation9_spill]] }
 0xa00   : > { %p30_p2 = scmp.ge.s32.totalorder %s22381_s24, 4  }
 0xa01   : > { %s22385_s22 = smov %s22382_s26 }
 0xa02   :  { %32 = sbr.rel (!%p30_p2) target bundleno = 11 (0xb), region = 135 }
 0xa07   :  { %12866 = vsyncpa [#allocation3], 1 }
 0xa08   :  { %12868 = vsyncpa [#allocation3 + $0x1], 1 }

</bundles_post_ra>
